<compile_context>
chip_gen: v5e
topology: v5e:2x2
jax: 0.10.0
libtpu: 0.0.40
codegen_flags: <defaults>
</compile_context>

<pallas_src>
import functools

import jax
import jax.numpy as jnp
from jax.experimental import pallas as pl
from jax.experimental.pallas import tpu as pltpu

PAR = {'nodes': [450, 450],
       'filters': [16, 8, 8, 16, 16, 16],
       'kernels': [2, 4, 8, 8, 4, 2],
       'strides': [2, 2, 4, 4, 2, 2]}

LEAKY_SLOPE = 0.01   # nn.LeakyReLU() default
BN_EPS = 1e-5        # nn.BatchNorm default


# ----------------------------------------------------------------------------
# Pallas kernels
# ----------------------------------------------------------------------------
def _lrelu(y):
    return jnp.where(y >= 0.0, y, LEAKY_SLOPE * y)


def _linear_stack_kernel(z_ref, w1_ref, b1_ref, g1_ref, be1_ref,
                         w2_ref, b2_ref, g2_ref, be2_ref, o_ref):
    """Two fused (Linear -> LeakyReLU -> train-mode BatchNorm1d) blocks."""
    def block(x, w, b, g, be):
        y = _lrelu(jnp.dot(x, w, preferred_element_type=jnp.float32) + b)
        mean = jnp.mean(y, axis=0, keepdims=True)
        var = jnp.maximum(jnp.mean(y * y, axis=0, keepdims=True) - mean * mean, 0.0)
        return (y - mean) * jax.lax.rsqrt(var + BN_EPS) * g + be

    h = block(z_ref[...], w1_ref[...], b1_ref[...], g1_ref[...], be1_ref[...])
    o_ref[...] = block(h, w2_ref[...], b2_ref[...], g2_ref[...], be2_ref[...])


def _grouped_bn_coeffs(y, g, be, n_phase, n_ch):
    """Train-mode BatchNorm2d scale/shift.  y: (n_phase*n_ch, M) with rows
    ordered (phase, channel); per-channel stats over all phases x lanes, which
    is exactly the (N, H, W) reduction of BatchNorm2d."""
    inv = 1.0 / float(n_phase * y.shape[1])
    row_sum = jnp.sum(y, axis=1, keepdims=True)        # (P*C, 1)
    row_sq = jnp.sum(y * y, axis=1, keepdims=True)     # (P*C, 1)
    s1 = row_sum[0:n_ch, :]
    s2 = row_sq[0:n_ch, :]
    for p in range(1, n_phase):
        s1 = s1 + row_sum[p * n_ch:(p + 1) * n_ch, :]
        s2 = s2 + row_sq[p * n_ch:(p + 1) * n_ch, :]
    mean = s1 * inv
    var = jnp.maximum(s2 * inv - mean * mean, 0.0)     # biased (train mode)
    scale = g * jax.lax.rsqrt(var + BN_EPS)            # (C, 1)
    shift = be - mean * scale                          # (C, 1)
    return scale, shift


def _convt_lrelu_bn_kernel(pt_ref, w_ref, b_ref, g_ref, be_ref, o_ref, *,
                           n_phase, n_ch):
    """Phase-decomposed ConvTranspose2d + LeakyReLU + BatchNorm2d (train).

    pt_ref : (K, M)            transposed im2col patches, K = Cin*(k/s)^2,
                               M = B*Q*Q  (pixel axis on lanes)
    w_ref  : (n_phase*n_ch, K) dense per-phase weights, rows (phase, cout)
    o_ref  : (n_phase, n_ch, M)
    """
    y = _lrelu(jnp.dot(w_ref[...], pt_ref[...],
                       preferred_element_type=jnp.float32) + b_ref[...])
    scale, shift = _grouped_bn_coeffs(y, g_ref[...], be_ref[...], n_phase, n_ch)
    for p in range(n_phase):
        o_ref[p] = y[p * n_ch:(p + 1) * n_ch, :] * scale + shift


def _convt_bn_convt_sig_kernel(pt_ref, w2_ref, b2_ref, g2_ref, be2_ref,
                               w3_ref, b3_ref, o_ref, *, n_phase, n_ch):
    """Fused (ConvT2 + LeakyReLU + BN2d) + (ConvT3, Cout=1, as a per-phase
    channel contraction) + sigmoid.   o_ref: (n_phase2, n_phase3, M)."""
    y = _lrelu(jnp.dot(w2_ref[...], pt_ref[...],
                       preferred_element_type=jnp.float32) + b2_ref[...])
    scale, shift = _grouped_bn_coeffs(y, g2_ref[...], be2_ref[...], n_phase, n_ch)
    w3 = w3_ref[...]                                    # (P3, C)
    b3 = b3_ref[...]                                    # (1, 1)
    for p in range(n_phase):
        blk = y[p * n_ch:(p + 1) * n_ch, :] * scale + shift            # (C, M)
        y3 = jnp.dot(w3, blk, preferred_element_type=jnp.float32) + b3  # (P3, M)
        o_ref[p] = jax.nn.sigmoid(y3)


def _full_spec(shape):
    # whole-array block (grid of size 1); full dims always satisfy (8,128) rule.
    return pl.BlockSpec(shape, lambda i, _n=len(shape): (0,) * _n)


def _call(kernel, args, out_shape):
    return pl.pallas_call(
        kernel,
        out_shape=jax.ShapeDtypeStruct(out_shape, jnp.float32),
        grid=(1,),
        in_specs=[_full_spec(a.shape) for a in args],
        out_specs=_full_spec(out_shape),
        compiler_params=pltpu.CompilerParams(dimension_semantics=("arbitrary",)),
    )(*args)


# ----------------------------------------------------------------------------
# XLA-side glue: sub-pixel weight / patch preparation (all tensors <= 320 KB)
# ----------------------------------------------------------------------------
def _phase_weights(w, s):
    """ConvTranspose2d weight (Cin,Cout,k,k), k = kk*s  ->  dense per-phase
    weights (s*s, Cout, Cin*kk*kk); phase p = rh*s + rw and
    W[p, co, (ci,u,v)] = w[ci, co, (kk-1-u)*s + rh, (kk-1-v)*s + rw]."""
    cin, cout, k, _ = w.shape
    kk = k // s
    wr = w.reshape(cin, cout, kk, s, kk, s)       # [ci, co, a, rh, b, rw]
    wr = wr[:, :, ::-1, :, ::-1, :]               # a -> kk-1-u (spatial flip)
    wr = wr.transpose(3, 5, 1, 0, 2, 4)           # (rh, rw, co, ci, u, v)
    return wr.reshape(s * s, cout, cin * kk * kk)


def _patches_t(x, kk):
    """NCHW input -> transposed im2col patches (Cin*kk*kk, B*Q*Q), Q = H+kk-1.
    Row order (ci, u, v); column (lane) order (b, qh, qw)."""
    b, cin, h, _ = x.shape
    q = h + kk - 1
    xp = jnp.pad(x, ((0, 0), (0, 0), (kk - 1, kk - 1), (kk - 1, kk - 1)))
    cols = jnp.stack([xp[:, :, u:u + q, v:v + q]
                      for u in range(kk) for v in range(kk)], axis=2)
    return cols.transpose(1, 2, 0, 3, 4).reshape(cin * kk * kk, b * q * q)


# ----------------------------------------------------------------------------
# Forward pass
# ----------------------------------------------------------------------------
def decoder_forward(params, z, dim=5):
    f, ker, st = PAR['filters'], PAR['kernels'], PAR['strides']
    B = z.shape[0]

    # --- Linear+LReLU+BN1d  x2, fused into one kernel ------------------------
    h = _call(_linear_stack_kernel,
              (z,
               params['w_lin1'], params['b_lin1'], params['g_lin1'], params['be_lin1'],
               params['w_lin2'], params['b_lin2'], params['g_lin2'], params['be_lin2']),
              (B, f[3] * dim * dim))
    x = h.reshape(B, f[3], dim, dim)                               # (B,16,5,5)

    # --- ConvT2d(16,16,k=8,s=4) + LReLU + BN2d (phase-decomposed) ------------
    s1 = st[3]
    kk1 = ker[3] // s1
    p1, c1 = s1 * s1, f[4]
    q1 = dim + kk1 - 1
    pt1 = _patches_t(x, kk1)                                       # (64, B*36)
    w1 = _phase_weights(params['w_cnn1'], s1).reshape(p1 * c1, -1)  # (256, 64)
    y1 = _call(functools.partial(_convt_lrelu_bn_kernel, n_phase=p1, n_ch=c1),
               (pt1, w1,
                jnp.tile(params['b_cnn1'], p1).reshape(-1, 1),
                params['g_cnn1'].reshape(-1, 1),
                params['be_cnn1'].reshape(-1, 1)),
               (p1, c1, B * q1 * q1))                              # (16,16,72)
    # de-interleave phases back to NCHW: (rh,rw,co,b,qh,qw) -> (b,co,qh*s+rh,..)
    x = (y1.reshape(s1, s1, c1, B, q1, q1)
           .transpose(3, 2, 4, 0, 5, 1)
           .reshape(B, c1, q1 * s1, q1 * s1))                      # (B,16,24,24)

    # --- ConvT2d(16,16,k=4,s=2)+LReLU+BN2d  +  ConvT2d(16,1,k=2,s=2)+sigmoid -
    s2 = st[4]
    kk2 = ker[4] // s2
    p2, c2 = s2 * s2, f[5]
    q2 = q1 * s1 + kk2 - 1
    s3 = st[5]
    p3 = s3 * s3
    pt2 = _patches_t(x, kk2)                                       # (64, B*625)
    w2 = _phase_weights(params['w_cnn2'], s2).reshape(p2 * c2, -1)  # (64, 64)
    w3 = _phase_weights(params['w_cnn3'], s3).reshape(p3, c2)       # (4, 16)
    y = _call(functools.partial(_convt_bn_convt_sig_kernel, n_phase=p2, n_ch=c2),
              (pt2, w2,
               jnp.tile(params['b_cnn2'], p2).reshape(-1, 1),
               params['g_cnn2'].reshape(-1, 1),
               params['be_cnn2'].reshape(-1, 1),
               w3,
               params['b_cnn3'].reshape(1, 1)),
              (p2, p3, B * q2 * q2))                               # (4,4,B*625)
    # (r2h,r2w,r3h,r3w,b,qh,qw) -> (b, 1, qh*4+r2h*2+r3h, qw*4+r2w*2+r3w)
    out = (y.reshape(s2, s2, s3, s3, B, q2, q2)
            .transpose(4, 5, 0, 2, 6, 1, 3)
            .reshape(B, 1, q2 * s2 * s3, q2 * s2 * s3))            # (B,1,100,100)
    return out


# ----------------------------------------------------------------------------
# Dense reference (lax.conv) for in-script validation of the Pallas path
# ----------------------------------------------------------------------------
def _ref_convt(x, w, b, s):
    k = w.shape[2]
    y = jax.lax.conv_general_dilated(
        x, jnp.flip(w, (2, 3)).transpose(1, 0, 2, 3),
        window_strides=(1, 1),
        padding=[(k - 1, k - 1), (k - 1, k - 1)],
        lhs_dilation=(s, s),
        dimension_numbers=('NCHW', 'OIHW', 'NCHW'))
    return y + b.reshape(1, -1, 1, 1)


def reference_forward(params, z, dim=5):
    def lrelu(v):
        return jnp.where(v >= 0, v, LEAKY_SLOPE * v)

    def bn(y, g, be, axes):
        m = y.mean(axes, keepdims=True)
        v = ((y - m) ** 2).mean(axes, keepdims=True)
        return (y - m) / jnp.sqrt(v + BN_EPS) * g + be

    f = PAR['filters']
    h = bn(lrelu(z @ params['w_lin1'] + params['b_lin1']),
           params['g_lin1'], params['be_lin1'], (0,))
    h = bn(lrelu(h @ params['w_lin2'] + params['b_lin2']),
           params['g_lin2'], params['be_lin2'], (0,))
    x = h.reshape(h.shape[0], f[3], dim, dim)
    x = bn(lrelu(_ref_convt(x, params['w_cnn1'], params['b_cnn1'], 4)),
           params['g_cnn1'].reshape(1, -1, 1, 1),
           params['be_cnn1'].reshape(1, -1, 1, 1), (0, 2, 3))
    x = bn(lrelu(_ref_convt(x, params['w_cnn2'], params['b_cnn2'], 2)),
           params['g_cnn2'].reshape(1, -1, 1, 1),
           params['be_cnn2'].reshape(1, -1, 1, 1), (0, 2, 3))
    x = _ref_convt(x, params['w_cnn3'], params['b_cnn3'], 2)
    return jax.nn.sigmoid(x)


# ----------------------------------------------------------------------------
# Parameters (deterministic synthetic init)
# ----------------------------------------------------------------------------
def init_params(key, latent, dim=5):
    f, ker = PAR['filters'], PAR['kernels']
    n1 = PAR['nodes'][1]
    n2 = f[3] * dim * dim
    shapes = {
        'w_lin1': (latent, n1), 'b_lin1': (1, n1), 'g_lin1': (1, n1), 'be_lin1': (1, n1),
        'w_lin2': (n1, n2),     'b_lin2': (1, n2), 'g_lin2': (1, n2), 'be_lin2': (1, n2),
        'w_cnn1': (f[3], f[4], ker[3], ker[3]), 'b_cnn1': (f[4],),
        'g_cnn1': (f[4],), 'be_cnn1': (f[4],),
        'w_cnn2': (f[4], f[5], ker[4], ker[4]), 'b_cnn2': (f[5],),
        'g_cnn2': (f[5],), 'be_cnn2': (f[5],),
        'w_cnn3': (f[5], 1, ker[5], ker[5]),    'b_cnn3': (1,),
    }
    params = {}
    keys = jax.random.split(key, len(shapes))
    for sub, (name, shape) in zip(keys, sorted(shapes.items())):
        if name.startswith('g_'):
            params[name] = 1.0 + 0.1 * jax.random.normal(sub, shape, jnp.float32)
        else:
            params[name] = 0.05 * jax.random.normal(sub, shape, jnp.float32)
    return params


if __name__ == "__main__":
    B, LATENT = 2, 8
    key = jax.random.PRNGKey(0)
    kz, kp = jax.random.split(key)
    z = jax.random.normal(kz, (B, LATENT), jnp.float32)
    params = init_params(kp, LATENT)

    out = jax.block_until_ready(jax.jit(decoder_forward)(params, z))

    assert out.shape == (B, 1, 100, 100), out.shape
    assert out.dtype == jnp.float32
    assert bool(jnp.all(jnp.isfinite(out)))
    assert bool(jnp.all((out >= 0.0) & (out <= 1.0)))

    # validate the phase-decomposed Pallas path against a dense lax.conv reference
    ref = jax.block_until_ready(jax.jit(reference_forward)(params, z))
    assert float(jnp.max(jnp.abs(out - ref))) < 2e-2

    print("KERNEL_OK")
</pallas_src>

<mosaic_0001>
module attributes {stable_mosaic.version = 11 : i64} {
  func.func @_linear_stack_kernel(%arg0: i32, %arg1: memref<2x8xf32, #tpu.memory_space<vmem>>, %arg2: memref<8x450xf32, #tpu.memory_space<vmem>>, %arg3: memref<1x450xf32, #tpu.memory_space<vmem>>, %arg4: memref<1x450xf32, #tpu.memory_space<vmem>>, %arg5: memref<1x450xf32, #tpu.memory_space<vmem>>, %arg6: memref<450x400xf32, #tpu.memory_space<vmem>>, %arg7: memref<1x400xf32, #tpu.memory_space<vmem>>, %arg8: memref<1x400xf32, #tpu.memory_space<vmem>>, %arg9: memref<1x400xf32, #tpu.memory_space<vmem>>, %arg10: memref<2x400xf32, #tpu.memory_space<vmem>>) attributes {dimension_semantics = [#tpu.dimension_semantics<arbitrary>], iteration_bounds = array<i64: 1>, scalar_prefetch = 0 : i64, scratch_operands = 0 : i64, tpu.core_type = #tpu.core_type<tc>, window_params = [{pipeline_mode = #tpu.pipeline_mode<synchronous>, transform_indices = @transform_0, window_bounds = array<i64: 2, 8>}, {pipeline_mode = #tpu.pipeline_mode<synchronous>, transform_indices = @transform_1, window_bounds = array<i64: 8, 450>}, {pipeline_mode = #tpu.pipeline_mode<synchronous>, transform_indices = @transform_2, window_bounds = array<i64: 1, 450>}, {pipeline_mode = #tpu.pipeline_mode<synchronous>, transform_indices = @transform_3, window_bounds = array<i64: 1, 450>}, {pipeline_mode = #tpu.pipeline_mode<synchronous>, transform_indices = @transform_4, window_bounds = array<i64: 1, 450>}, {pipeline_mode = #tpu.pipeline_mode<synchronous>, transform_indices = @transform_5, window_bounds = array<i64: 450, 400>}, {pipeline_mode = #tpu.pipeline_mode<synchronous>, transform_indices = @transform_6, window_bounds = array<i64: 1, 400>}, {pipeline_mode = #tpu.pipeline_mode<synchronous>, transform_indices = @transform_7, window_bounds = array<i64: 1, 400>}, {pipeline_mode = #tpu.pipeline_mode<synchronous>, transform_indices = @transform_8, window_bounds = array<i64: 1, 400>}, {pipeline_mode = #tpu.pipeline_mode<synchronous>, transform_indices = @transform_9, window_bounds = array<i64: 2, 400>}]} {
    %c0 = arith.constant 0 : index
    %c0_0 = arith.constant 0 : index
    %0 = vector.load %arg1[%c0, %c0_0] : memref<2x8xf32, #tpu.memory_space<vmem>>, vector<2x8xf32>
    %c0_1 = arith.constant 0 : index
    %c0_2 = arith.constant 0 : index
    %1 = vector.load %arg2[%c0_1, %c0_2] : memref<8x450xf32, #tpu.memory_space<vmem>>, vector<8x450xf32>
    %c0_3 = arith.constant 0 : index
    %c0_4 = arith.constant 0 : index
    %2 = vector.load %arg3[%c0_3, %c0_4] : memref<1x450xf32, #tpu.memory_space<vmem>>, vector<1x450xf32>
    %c0_5 = arith.constant 0 : index
    %c0_6 = arith.constant 0 : index
    %3 = vector.load %arg4[%c0_5, %c0_6] : memref<1x450xf32, #tpu.memory_space<vmem>>, vector<1x450xf32>
    %c0_7 = arith.constant 0 : index
    %c0_8 = arith.constant 0 : index
    %4 = vector.load %arg5[%c0_7, %c0_8] : memref<1x450xf32, #tpu.memory_space<vmem>>, vector<1x450xf32>
    %cst = arith.constant dense<0.000000e+00> : vector<2x450xf32>
    %5 = tpu.matmul %0, %1, %cst {dimension_numbers = #tpu.dot_dimension_numbers<[1], [0], [0], [1], [0, 0, 1, 1], [], []>} : vector<2x8xf32>, vector<8x450xf32>, vector<2x450xf32> -> vector<2x450xf32>
    %6 = vector.broadcast %2 : vector<1x450xf32> to vector<2x450xf32>
    %7 = arith.addf %5, %6 : vector<2x450xf32>
    %cst_9 = arith.constant 0.000000e+00 : f32
    %8 = vector.broadcast %cst_9 : f32 to vector<2x450xf32>
    %9 = arith.cmpf oge, %7, %8 : vector<2x450xf32>
    %cst_10 = arith.constant 0.00999999977 : f32
    %10 = vector.broadcast %cst_10 : f32 to vector<2x450xf32>
    %11 = arith.mulf %10, %7 : vector<2x450xf32>
    %12 = arith.select %9, %7, %11 : vector<2x450xi1>, vector<2x450xf32>
    %cst_11 = arith.constant dense<0.000000e+00> : vector<450xf32>
    %13 = vector.multi_reduction <add>, %12, %cst_11 [0] : vector<2x450xf32> to vector<450xf32>
    %14 = vector.shape_cast %13 : vector<450xf32> to vector<1x450xf32>
    %cst_12 = arith.constant 2.000000e+00 : f32
    %15 = vector.broadcast %cst_12 : f32 to vector<1x450xf32>
    %16 = arith.divf %14, %15 : vector<1x450xf32>
    %17 = arith.mulf %12, %12 : vector<2x450xf32>
    %cst_13 = arith.constant dense<0.000000e+00> : vector<450xf32>
    %18 = vector.multi_reduction <add>, %17, %cst_13 [0] : vector<2x450xf32> to vector<450xf32>
    %19 = vector.shape_cast %18 : vector<450xf32> to vector<1x450xf32>
    %cst_14 = arith.constant 2.000000e+00 : f32
    %20 = vector.broadcast %cst_14 : f32 to vector<1x450xf32>
    %21 = arith.divf %19, %20 : vector<1x450xf32>
    %22 = arith.mulf %16, %16 : vector<1x450xf32>
    %23 = arith.subf %21, %22 : vector<1x450xf32>
    %cst_15 = arith.constant 0.000000e+00 : f32
    %24 = vector.broadcast %cst_15 : f32 to vector<1x450xf32>
    %25 = arith.maximumf %23, %24 : vector<1x450xf32>
    %26 = vector.broadcast %16 : vector<1x450xf32> to vector<2x450xf32>
    %27 = arith.subf %12, %26 : vector<2x450xf32>
    %cst_16 = arith.constant 9.99999974E-6 : f32
    %28 = vector.broadcast %cst_16 : f32 to vector<1x450xf32>
    %29 = arith.addf %25, %28 : vector<1x450xf32>
    %30 = math.rsqrt %29 : vector<1x450xf32>
    %31 = vector.broadcast %30 : vector<1x450xf32> to vector<2x450xf32>
    %32 = arith.mulf %27, %31 : vector<2x450xf32>
    %33 = vector.broadcast %3 : vector<1x450xf32> to vector<2x450xf32>
    %34 = arith.mulf %32, %33 : vector<2x450xf32>
    %35 = vector.broadcast %4 : vector<1x450xf32> to vector<2x450xf32>
    %36 = arith.addf %34, %35 : vector<2x450xf32>
    %c0_17 = arith.constant 0 : index
    %c0_18 = arith.constant 0 : index
    %37 = vector.load %arg6[%c0_17, %c0_18] : memref<450x400xf32, #tpu.memory_space<vmem>>, vector<450x400xf32>
    %c0_19 = arith.constant 0 : index
    %c0_20 = arith.constant 0 : index
    %38 = vector.load %arg7[%c0_19, %c0_20] : memref<1x400xf32, #tpu.memory_space<vmem>>, vector<1x400xf32>
    %c0_21 = arith.constant 0 : index
    %c0_22 = arith.constant 0 : index
    %39 = vector.load %arg8[%c0_21, %c0_22] : memref<1x400xf32, #tpu.memory_space<vmem>>, vector<1x400xf32>
    %c0_23 = arith.constant 0 : index
    %c0_24 = arith.constant 0 : index
    %40 = vector.load %arg9[%c0_23, %c0_24] : memref<1x400xf32, #tpu.memory_space<vmem>>, vector<1x400xf32>
    %cst_25 = arith.constant dense<0.000000e+00> : vector<2x400xf32>
    %41 = tpu.matmul %36, %37, %cst_25 {dimension_numbers = #tpu.dot_dimension_numbers<[1], [0], [0], [1], [0, 0, 1, 1], [], []>} : vector<2x450xf32>, vector<450x400xf32>, vector<2x400xf32> -> vector<2x400xf32>
    %42 = vector.broadcast %38 : vector<1x400xf32> to vector<2x400xf32>
    %43 = arith.addf %41, %42 : vector<2x400xf32>
    %cst_26 = arith.constant 0.000000e+00 : f32
    %44 = vector.broadcast %cst_26 : f32 to vector<2x400xf32>
    %45 = arith.cmpf oge, %43, %44 : vector<2x400xf32>
    %cst_27 = arith.constant 0.00999999977 : f32
    %46 = vector.broadcast %cst_27 : f32 to vector<2x400xf32>
    %47 = arith.mulf %46, %43 : vector<2x400xf32>
    %48 = arith.select %45, %43, %47 : vector<2x400xi1>, vector<2x400xf32>
    %cst_28 = arith.constant dense<0.000000e+00> : vector<400xf32>
    %49 = vector.multi_reduction <add>, %48, %cst_28 [0] : vector<2x400xf32> to vector<400xf32>
    %50 = vector.shape_cast %49 : vector<400xf32> to vector<1x400xf32>
    %cst_29 = arith.constant 2.000000e+00 : f32
    %51 = vector.broadcast %cst_29 : f32 to vector<1x400xf32>
    %52 = arith.divf %50, %51 : vector<1x400xf32>
    %53 = arith.mulf %48, %48 : vector<2x400xf32>
    %cst_30 = arith.constant dense<0.000000e+00> : vector<400xf32>
    %54 = vector.multi_reduction <add>, %53, %cst_30 [0] : vector<2x400xf32> to vector<400xf32>
    %55 = vector.shape_cast %54 : vector<400xf32> to vector<1x400xf32>
    %cst_31 = arith.constant 2.000000e+00 : f32
    %56 = vector.broadcast %cst_31 : f32 to vector<1x400xf32>
    %57 = arith.divf %55, %56 : vector<1x400xf32>
    %58 = arith.mulf %52, %52 : vector<1x400xf32>
    %59 = arith.subf %57, %58 : vector<1x400xf32>
    %cst_32 = arith.constant 0.000000e+00 : f32
    %60 = vector.broadcast %cst_32 : f32 to vector<1x400xf32>
    %61 = arith.maximumf %59, %60 : vector<1x400xf32>
    %62 = vector.broadcast %52 : vector<1x400xf32> to vector<2x400xf32>
    %63 = arith.subf %48, %62 : vector<2x400xf32>
    %cst_33 = arith.constant 9.99999974E-6 : f32
    %64 = vector.broadcast %cst_33 : f32 to vector<1x400xf32>
    %65 = arith.addf %61, %64 : vector<1x400xf32>
    %66 = math.rsqrt %65 : vector<1x400xf32>
    %67 = vector.broadcast %66 : vector<1x400xf32> to vector<2x400xf32>
    %68 = arith.mulf %63, %67 : vector<2x400xf32>
    %69 = vector.broadcast %39 : vector<1x400xf32> to vector<2x400xf32>
    %70 = arith.mulf %68, %69 : vector<2x400xf32>
    %71 = vector.broadcast %40 : vector<1x400xf32> to vector<2x400xf32>
    %72 = arith.addf %70, %71 : vector<2x400xf32>
    %c0_34 = arith.constant 0 : index
    %c0_35 = arith.constant 0 : index
    %73 = vector.load %arg10[%c0_34, %c0_35] : memref<2x400xf32, #tpu.memory_space<vmem>>, vector<2x400xf32>
    tpu.vector_store %arg10[%c0_34, %c0_35], %72 {strides = array<i32>} : memref<2x400xf32, #tpu.memory_space<vmem>>, vector<2x400xf32>,
    return
  }
  func.func @transform_0(%arg0: i32) -> (i32, i32) {
    %c0_i32 = arith.constant 0 : i32
    %c0_i32_0 = arith.constant 0 : i32
    %c0_i32_1 = arith.constant 0 : i32
    return %c0_i32, %c0_i32_0 : i32, i32
  }
  func.func @transform_1(%arg0: i32) -> (i32, i32) {
    %c0_i32 = arith.constant 0 : i32
    %c0_i32_0 = arith.constant 0 : i32
    %c0_i32_1 = arith.constant 0 : i32
    return %c0_i32, %c0_i32_0 : i32, i32
  }
  func.func @transform_2(%arg0: i32) -> (i32, i32) {
    %c0_i32 = arith.constant 0 : i32
    %c0_i32_0 = arith.constant 0 : i32
    %c0_i32_1 = arith.constant 0 : i32
    return %c0_i32, %c0_i32_0 : i32, i32
  }
  func.func @transform_3(%arg0: i32) -> (i32, i32) {
    %c0_i32 = arith.constant 0 : i32
    %c0_i32_0 = arith.constant 0 : i32
    %c0_i32_1 = arith.constant 0 : i32
    return %c0_i32, %c0_i32_0 : i32, i32
  }
  func.func @transform_4(%arg0: i32) -> (i32, i32) {
    %c0_i32 = arith.constant 0 : i32
    %c0_i32_0 = arith.constant 0 : i32
    %c0_i32_1 = arith.constant 0 : i32
    return %c0_i32, %c0_i32_0 : i32, i32
  }
  func.func @transform_5(%arg0: i32) -> (i32, i32) {
    %c0_i32 = arith.constant 0 : i32
    %c0_i32_0 = arith.constant 0 : i32
    %c0_i32_1 = arith.constant 0 : i32
    return %c0_i32, %c0_i32_0 : i32, i32
  }
  func.func @transform_6(%arg0: i32) -> (i32, i32) {
    %c0_i32 = arith.constant 0 : i32
    %c0_i32_0 = arith.constant 0 : i32
    %c0_i32_1 = arith.constant 0 : i32
    return %c0_i32, %c0_i32_0 : i32, i32
  }
  func.func @transform_7(%arg0: i32) -> (i32, i32) {
    %c0_i32 = arith.constant 0 : i32
    %c0_i32_0 = arith.constant 0 : i32
    %c0_i32_1 = arith.constant 0 : i32
    return %c0_i32, %c0_i32_0 : i32, i32
  }
  func.func @transform_8(%arg0: i32) -> (i32, i32) {
    %c0_i32 = arith.constant 0 : i32
    %c0_i32_0 = arith.constant 0 : i32
    %c0_i32_1 = arith.constant 0 : i32
    return %c0_i32, %c0_i32_0 : i32, i32
  }
  func.func @transform_9(%arg0: i32) -> (i32, i32) {
    %c0_i32 = arith.constant 0 : i32
    %c0_i32_0 = arith.constant 0 : i32
    %c0_i32_1 = arith.constant 0 : i32
    return %c0_i32, %c0_i32_0 : i32, i32
  }
}

module attributes {stable_mosaic.version = 11 : i64} {
  func.func @_convt_lrelu_bn_kernel(%arg0: i32, %arg1: memref<64x72xf32, #tpu.memory_space<vmem>>, %arg2: memref<256x64xf32, #tpu.memory_space<vmem>>, %arg3: memref<256x1xf32, #tpu.memory_space<vmem>>, %arg4: memref<16x1xf32, #tpu.memory_space<vmem>>, %arg5: memref<16x1xf32, #tpu.memory_space<vmem>>, %arg6: memref<16x16x72xf32, #tpu.memory_space<vmem>>) attributes {dimension_semantics = [#tpu.dimension_semantics<arbitrary>], iteration_bounds = array<i64: 1>, scalar_prefetch = 0 : i64, scratch_operands = 0 : i64, tpu.core_type = #tpu.core_type<tc>, window_params = [{pipeline_mode = #tpu.pipeline_mode<synchronous>, transform_indices = @transform_0, window_bounds = array<i64: 64, 72>}, {pipeline_mode = #tpu.pipeline_mode<synchronous>, transform_indices = @transform_1, window_bounds = array<i64: 256, 64>}, {pipeline_mode = #tpu.pipeline_mode<synchronous>, transform_indices = @transform_2, window_bounds = array<i64: 256, 1>}, {pipeline_mode = #tpu.pipeline_mode<synchronous>, transform_indices = @transform_3, window_bounds = array<i64: 16, 1>}, {pipeline_mode = #tpu.pipeline_mode<synchronous>, transform_indices = @transform_4, window_bounds = array<i64: 16, 1>}, {pipeline_mode = #tpu.pipeline_mode<synchronous>, transform_indices = @transform_5, window_bounds = array<i64: 16, 16, 72>}]} {
    %c0 = arith.constant 0 : index
    %c0_0 = arith.constant 0 : index
    %0 = vector.load %arg2[%c0, %c0_0] : memref<256x64xf32, #tpu.memory_space<vmem>>, vector<256x64xf32>
    %c0_1 = arith.constant 0 : index
    %c0_2 = arith.constant 0 : index
    %1 = vector.load %arg1[%c0_1, %c0_2] : memref<64x72xf32, #tpu.memory_space<vmem>>, vector<64x72xf32>
    %cst = arith.constant dense<0.000000e+00> : vector<256x72xf32>
    %2 = tpu.matmul %0, %1, %cst {dimension_numbers = #tpu.dot_dimension_numbers<[1], [0], [0], [1], [0, 0, 1, 1], [], []>} : vector<256x64xf32>, vector<64x72xf32>, vector<256x72xf32> -> vector<256x72xf32>
    %c0_3 = arith.constant 0 : index
    %c0_4 = arith.constant 0 : index
    %3 = vector.load %arg3[%c0_3, %c0_4] : memref<256x1xf32, #tpu.memory_space<vmem>>, vector<256x1xf32>
    %4 = vector.broadcast %3 : vector<256x1xf32> to vector<256x72xf32>
    %5 = arith.addf %2, %4 : vector<256x72xf32>
    %cst_5 = arith.constant 0.000000e+00 : f32
    %6 = vector.broadcast %cst_5 : f32 to vector<256x72xf32>
    %7 = arith.cmpf oge, %5, %6 : vector<256x72xf32>
    %cst_6 = arith.constant 0.00999999977 : f32
    %8 = vector.broadcast %cst_6 : f32 to vector<256x72xf32>
    %9 = arith.mulf %8, %5 : vector<256x72xf32>
    %10 = arith.select %7, %5, %9 : vector<256x72xi1>, vector<256x72xf32>
    %c0_7 = arith.constant 0 : index
    %c0_8 = arith.constant 0 : index
    %11 = vector.load %arg4[%c0_7, %c0_8] : memref<16x1xf32, #tpu.memory_space<vmem>>, vector<16x1xf32>
    %c0_9 = arith.constant 0 : index
    %c0_10 = arith.constant 0 : index
    %12 = vector.load %arg5[%c0_9, %c0_10] : memref<16x1xf32, #tpu.memory_space<vmem>>, vector<16x1xf32>
    %cst_11 = arith.constant dense<0.000000e+00> : vector<256xf32>
    %13 = vector.multi_reduction <add>, %10, %cst_11 [1] : vector<256x72xf32> to vector<256xf32>
    %14 = vector.shape_cast %13 : vector<256xf32> to vector<256x1xf32>
    %15 = arith.mulf %10, %10 : vector<256x72xf32>
    %cst_12 = arith.constant dense<0.000000e+00> : vector<256xf32>
    %16 = vector.multi_reduction <add>, %15, %cst_12 [1] : vector<256x72xf32> to vector<256xf32>
    %17 = vector.shape_cast %16 : vector<256xf32> to vector<256x1xf32>
    %18 = vector.extract_strided_slice %14 {offsets = [0, 0], sizes = [16, 1], strides = [1, 1]} : vector<256x1xf32> to vector<16x1xf32>
    %19 = vector.extract_strided_slice %17 {offsets = [0, 0], sizes = [16, 1], strides = [1, 1]} : vector<256x1xf32> to vector<16x1xf32>
    %20 = vector.extract_strided_slice %14 {offsets = [16, 0], sizes = [16, 1], strides = [1, 1]} : vector<256x1xf32> to vector<16x1xf32>
    %21 = arith.addf %18, %20 : vector<16x1xf32>
    %22 = vector.extract_strided_slice %17 {offsets = [16, 0], sizes = [16, 1], strides = [1, 1]} : vector<256x1xf32> to vector<16x1xf32>
    %23 = arith.addf %19, %22 : vector<16x1xf32>
    %24 = vector.extract_strided_slice %14 {offsets = [32, 0], sizes = [16, 1], strides = [1, 1]} : vector<256x1xf32> to vector<16x1xf32>
    %25 = arith.addf %21, %24 : vector<16x1xf32>
    %26 = vector.extract_strided_slice %17 {offsets = [32, 0], sizes = [16, 1], strides = [1, 1]} : vector<256x1xf32> to vector<16x1xf32>
    %27 = arith.addf %23, %26 : vector<16x1xf32>
    %28 = vector.extract_strided_slice %14 {offsets = [48, 0], sizes = [16, 1], strides = [1, 1]} : vector<256x1xf32> to vector<16x1xf32>
    %29 = arith.addf %25, %28 : vector<16x1xf32>
    %30 = vector.extract_strided_slice %17 {offsets = [48, 0], sizes = [16, 1], strides = [1, 1]} : vector<256x1xf32> to vector<16x1xf32>
    %31 = arith.addf %27, %30 : vector<16x1xf32>
    %32 = vector.extract_strided_slice %14 {offsets = [64, 0], sizes = [16, 1], strides = [1, 1]} : vector<256x1xf32> to vector<16x1xf32>
    %33 = arith.addf %29, %32 : vector<16x1xf32>
    %34 = vector.extract_strided_slice %17 {offsets = [64, 0], sizes = [16, 1], strides = [1, 1]} : vector<256x1xf32> to vector<16x1xf32>
    %35 = arith.addf %31, %34 : vector<16x1xf32>
    %36 = vector.extract_strided_slice %14 {offsets = [80, 0], sizes = [16, 1], strides = [1, 1]} : vector<256x1xf32> to vector<16x1xf32>
    %37 = arith.addf %33, %36 : vector<16x1xf32>
    %38 = vector.extract_strided_slice %17 {offsets = [80, 0], sizes = [16, 1], strides = [1, 1]} : vector<256x1xf32> to vector<16x1xf32>
    %39 = arith.addf %35, %38 : vector<16x1xf32>
    %40 = vector.extract_strided_slice %14 {offsets = [96, 0], sizes = [16, 1], strides = [1, 1]} : vector<256x1xf32> to vector<16x1xf32>
    %41 = arith.addf %37, %40 : vector<16x1xf32>
    %42 = vector.extract_strided_slice %17 {offsets = [96, 0], sizes = [16, 1], strides = [1, 1]} : vector<256x1xf32> to vector<16x1xf32>
    %43 = arith.addf %39, %42 : vector<16x1xf32>
    %44 = vector.extract_strided_slice %14 {offsets = [112, 0], sizes = [16, 1], strides = [1, 1]} : vector<256x1xf32> to vector<16x1xf32>
    %45 = arith.addf %41, %44 : vector<16x1xf32>
    %46 = vector.extract_strided_slice %17 {offsets = [112, 0], sizes = [16, 1], strides = [1, 1]} : vector<256x1xf32> to vector<16x1xf32>
    %47 = arith.addf %43, %46 : vector<16x1xf32>
    %48 = vector.extract_strided_slice %14 {offsets = [128, 0], sizes = [16, 1], strides = [1, 1]} : vector<256x1xf32> to vector<16x1xf32>
    %49 = arith.addf %45, %48 : vector<16x1xf32>
    %50 = vector.extract_strided_slice %17 {offsets = [128, 0], sizes = [16, 1], strides = [1, 1]} : vector<256x1xf32> to vector<16x1xf32>
    %51 = arith.addf %47, %50 : vector<16x1xf32>
    %52 = vector.extract_strided_slice %14 {offsets = [144, 0], sizes = [16, 1], strides = [1, 1]} : vector<256x1xf32> to vector<16x1xf32>
    %53 = arith.addf %49, %52 : vector<16x1xf32>
    %54 = vector.extract_strided_slice %17 {offsets = [144, 0], sizes = [16, 1], strides = [1, 1]} : vector<256x1xf32> to vector<16x1xf32>
    %55 = arith.addf %51, %54 : vector<16x1xf32>
    %56 = vector.extract_strided_slice %14 {offsets = [160, 0], sizes = [16, 1], strides = [1, 1]} : vector<256x1xf32> to vector<16x1xf32>
    %57 = arith.addf %53, %56 : vector<16x1xf32>
    %58 = vector.extract_strided_slice %17 {offsets = [160, 0], sizes = [16, 1], strides = [1, 1]} : vector<256x1xf32> to vector<16x1xf32>
    %59 = arith.addf %55, %58 : vector<16x1xf32>
    %60 = vector.extract_strided_slice %14 {offsets = [176, 0], sizes = [16, 1], strides = [1, 1]} : vector<256x1xf32> to vector<16x1xf32>
    %61 = arith.addf %57, %60 : vector<16x1xf32>
    %62 = vector.extract_strided_slice %17 {offsets = [176, 0], sizes = [16, 1], strides = [1, 1]} : vector<256x1xf32> to vector<16x1xf32>
    %63 = arith.addf %59, %62 : vector<16x1xf32>
    %64 = vector.extract_strided_slice %14 {offsets = [192, 0], sizes = [16, 1], strides = [1, 1]} : vector<256x1xf32> to vector<16x1xf32>
    %65 = arith.addf %61, %64 : vector<16x1xf32>
    %66 = vector.extract_strided_slice %17 {offsets = [192, 0], sizes = [16, 1], strides = [1, 1]} : vector<256x1xf32> to vector<16x1xf32>
    %67 = arith.addf %63, %66 : vector<16x1xf32>
    %68 = vector.extract_strided_slice %14 {offsets = [208, 0], sizes = [16, 1], strides = [1, 1]} : vector<256x1xf32> to vector<16x1xf32>
    %69 = arith.addf %65, %68 : vector<16x1xf32>
    %70 = vector.extract_strided_slice %17 {offsets = [208, 0], sizes = [16, 1], strides = [1, 1]} : vector<256x1xf32> to vector<16x1xf32>
    %71 = arith.addf %67, %70 : vector<16x1xf32>
    %72 = vector.extract_strided_slice %14 {offsets = [224, 0], sizes = [16, 1], strides = [1, 1]} : vector<256x1xf32> to vector<16x1xf32>
    %73 = arith.addf %69, %72 : vector<16x1xf32>
    %74 = vector.extract_strided_slice %17 {offsets = [224, 0], sizes = [16, 1], strides = [1, 1]} : vector<256x1xf32> to vector<16x1xf32>
    %75 = arith.addf %71, %74 : vector<16x1xf32>
    %76 = vector.extract_strided_slice %14 {offsets = [240, 0], sizes = [16, 1], strides = [1, 1]} : vector<256x1xf32> to vector<16x1xf32>
    %77 = arith.addf %73, %76 : vector<16x1xf32>
    %78 = vector.extract_strided_slice %17 {offsets = [240, 0], sizes = [16, 1], strides = [1, 1]} : vector<256x1xf32> to vector<16x1xf32>
    %79 = arith.addf %75, %78 : vector<16x1xf32>
    %cst_13 = arith.constant 8.68055562E-4 : f32
    %80 = vector.broadcast %cst_13 : f32 to vector<16x1xf32>
    %81 = arith.mulf %77, %80 : vector<16x1xf32>
    %cst_14 = arith.constant 8.68055562E-4 : f32
    %82 = vector.broadcast %cst_14 : f32 to vector<16x1xf32>
    %83 = arith.mulf %79, %82 : vector<16x1xf32>
    %84 = arith.mulf %81, %81 : vector<16x1xf32>
    %85 = arith.subf %83, %84 : vector<16x1xf32>
    %cst_15 = arith.constant 0.000000e+00 : f32
    %86 = vector.broadcast %cst_15 : f32 to vector<16x1xf32>
    %87 = arith.maximumf %85, %86 : vector<16x1xf32>
    %cst_16 = arith.constant 9.99999974E-6 : f32
    %88 = vector.broadcast %cst_16 : f32 to vector<16x1xf32>
    %89 = arith.addf %87, %88 : vector<16x1xf32>
    %90 = math.rsqrt %89 : vector<16x1xf32>
    %91 = arith.mulf %11, %90 : vector<16x1xf32>
    %92 = arith.mulf %81, %91 : vector<16x1xf32>
    %93 = arith.subf %12, %92 : vector<16x1xf32>
    %94 = vector.extract_strided_slice %10 {offsets = [0, 0], sizes = [16, 72], strides = [1, 1]} : vector<256x72xf32> to vector<16x72xf32>
    %95 = vector.broadcast %91 : vector<16x1xf32> to vector<16x72xf32>
    %96 = arith.mulf %94, %95 : vector<16x72xf32>
    %97 = vector.broadcast %93 : vector<16x1xf32> to vector<16x72xf32>
    %98 = arith.addf %96, %97 : vector<16x72xf32>
    %c0_17 = arith.constant 0 : index
    %c0_18 = arith.constant 0 : index
    %c0_19 = arith.constant 0 : index
    %99 = vector.load %arg6[%c0_17, %c0_18, %c0_19] : memref<16x16x72xf32, #tpu.memory_space<vmem>>, vector<1x16x72xf32>
    %100 = vector.shape_cast %99 : vector<1x16x72xf32> to vector<16x72xf32>
    %101 = vector.shape_cast %98 : vector<16x72xf32> to vector<1x16x72xf32>
    tpu.vector_store %arg6[%c0_17, %c0_18, %c0_19], %101 {strides = array<i32>} : memref<16x16x72xf32, #tpu.memory_space<vmem>>, vector<1x16x72xf32>,
    %102 = vector.extract_strided_slice %10 {offsets = [16, 0], sizes = [16, 72], strides = [1, 1]} : vector<256x72xf32> to vector<16x72xf32>
    %103 = vector.broadcast %91 : vector<16x1xf32> to vector<16x72xf32>
    %104 = arith.mulf %102, %103 : vector<16x72xf32>
    %105 = vector.broadcast %93 : vector<16x1xf32> to vector<16x72xf32>
    %106 = arith.addf %104, %105 : vector<16x72xf32>
    %c1 = arith.constant 1 : index
    %c0_20 = arith.constant 0 : index
    %c0_21 = arith.constant 0 : index
    %107 = vector.load %arg6[%c1, %c0_20, %c0_21] : memref<16x16x72xf32, #tpu.memory_space<vmem>>, vector<1x16x72xf32>
    %108 = vector.shape_cast %107 : vector<1x16x72xf32> to vector<16x72xf32>
    %109 = vector.shape_cast %106 : vector<16x72xf32> to vector<1x16x72xf32>
    tpu.vector_store %arg6[%c1, %c0_20, %c0_21], %109 {strides = array<i32>} : memref<16x16x72xf32, #tpu.memory_space<vmem>>, vector<1x16x72xf32>,
    %110 = vector.extract_strided_slice %10 {offsets = [32, 0], sizes = [16, 72], strides = [1, 1]} : vector<256x72xf32> to vector<16x72xf32>
    %111 = vector.broadcast %91 : vector<16x1xf32> to vector<16x72xf32>
    %112 = arith.mulf %110, %111 : vector<16x72xf32>
    %113 = vector.broadcast %93 : vector<16x1xf32> to vector<16x72xf32>
    %114 = arith.addf %112, %113 : vector<16x72xf32>
    %c2 = arith.constant 2 : index
    %c0_22 = arith.constant 0 : index
    %c0_23 = arith.constant 0 : index
    %115 = vector.load %arg6[%c2, %c0_22, %c0_23] : memref<16x16x72xf32, #tpu.memory_space<vmem>>, vector<1x16x72xf32>
    %116 = vector.shape_cast %115 : vector<1x16x72xf32> to vector<16x72xf32>
    %117 = vector.shape_cast %114 : vector<16x72xf32> to vector<1x16x72xf32>
    tpu.vector_store %arg6[%c2, %c0_22, %c0_23], %117 {strides = array<i32>} : memref<16x16x72xf32, #tpu.memory_space<vmem>>, vector<1x16x72xf32>,
    %118 = vector.extract_strided_slice %10 {offsets = [48, 0], sizes = [16, 72], strides = [1, 1]} : vector<256x72xf32> to vector<16x72xf32>
    %119 = vector.broadcast %91 : vector<16x1xf32> to vector<16x72xf32>
    %120 = arith.mulf %118, %119 : vector<16x72xf32>
    %121 = vector.broadcast %93 : vector<16x1xf32> to vector<16x72xf32>
    %122 = arith.addf %120, %121 : vector<16x72xf32>
    %c3 = arith.constant 3 : index
    %c0_24 = arith.constant 0 : index
    %c0_25 = arith.constant 0 : index
    %123 = vector.load %arg6[%c3, %c0_24, %c0_25] : memref<16x16x72xf32, #tpu.memory_space<vmem>>, vector<1x16x72xf32>
    %124 = vector.shape_cast %123 : vector<1x16x72xf32> to vector<16x72xf32>
    %125 = vector.shape_cast %122 : vector<16x72xf32> to vector<1x16x72xf32>
    tpu.vector_store %arg6[%c3, %c0_24, %c0_25], %125 {strides = array<i32>} : memref<16x16x72xf32, #tpu.memory_space<vmem>>, vector<1x16x72xf32>,
    %126 = vector.extract_strided_slice %10 {offsets = [64, 0], sizes = [16, 72], strides = [1, 1]} : vector<256x72xf32> to vector<16x72xf32>
    %127 = vector.broadcast %91 : vector<16x1xf32> to vector<16x72xf32>
    %128 = arith.mulf %126, %127 : vector<16x72xf32>
    %129 = vector.broadcast %93 : vector<16x1xf32> to vector<16x72xf32>
    %130 = arith.addf %128, %129 : vector<16x72xf32>
    %c4 = arith.constant 4 : index
    %c0_26 = arith.constant 0 : index
    %c0_27 = arith.constant 0 : index
    %131 = vector.load %arg6[%c4, %c0_26, %c0_27] : memref<16x16x72xf32, #tpu.memory_space<vmem>>, vector<1x16x72xf32>
    %132 = vector.shape_cast %131 : vector<1x16x72xf32> to vector<16x72xf32>
    %133 = vector.shape_cast %130 : vector<16x72xf32> to vector<1x16x72xf32>
    tpu.vector_store %arg6[%c4, %c0_26, %c0_27], %133 {strides = array<i32>} : memref<16x16x72xf32, #tpu.memory_space<vmem>>, vector<1x16x72xf32>,
    %134 = vector.extract_strided_slice %10 {offsets = [80, 0], sizes = [16, 72], strides = [1, 1]} : vector<256x72xf32> to vector<16x72xf32>
    %135 = vector.broadcast %91 : vector<16x1xf32> to vector<16x72xf32>
    %136 = arith.mulf %134, %135 : vector<16x72xf32>
    %137 = vector.broadcast %93 : vector<16x1xf32> to vector<16x72xf32>
    %138 = arith.addf %136, %137 : vector<16x72xf32>
    %c5 = arith.constant 5 : index
    %c0_28 = arith.constant 0 : index
    %c0_29 = arith.constant 0 : index
    %139 = vector.load %arg6[%c5, %c0_28, %c0_29] : memref<16x16x72xf32, #tpu.memory_space<vmem>>, vector<1x16x72xf32>
    %140 = vector.shape_cast %139 : vector<1x16x72xf32> to vector<16x72xf32>
    %141 = vector.shape_cast %138 : vector<16x72xf32> to vector<1x16x72xf32>
    tpu.vector_store %arg6[%c5, %c0_28, %c0_29], %141 {strides = array<i32>} : memref<16x16x72xf32, #tpu.memory_space<vmem>>, vector<1x16x72xf32>,
    %142 = vector.extract_strided_slice %10 {offsets = [96, 0], sizes = [16, 72], strides = [1, 1]} : vector<256x72xf32> to vector<16x72xf32>
    %143 = vector.broadcast %91 : vector<16x1xf32> to vector<16x72xf32>
    %144 = arith.mulf %142, %143 : vector<16x72xf32>
    %145 = vector.broadcast %93 : vector<16x1xf32> to vector<16x72xf32>
    %146 = arith.addf %144, %145 : vector<16x72xf32>
    %c6 = arith.constant 6 : index
    %c0_30 = arith.constant 0 : index
    %c0_31 = arith.constant 0 : index
    %147 = vector.load %arg6[%c6, %c0_30, %c0_31] : memref<16x16x72xf32, #tpu.memory_space<vmem>>, vector<1x16x72xf32>
    %148 = vector.shape_cast %147 : vector<1x16x72xf32> to vector<16x72xf32>
    %149 = vector.shape_cast %146 : vector<16x72xf32> to vector<1x16x72xf32>
    tpu.vector_store %arg6[%c6, %c0_30, %c0_31], %149 {strides = array<i32>} : memref<16x16x72xf32, #tpu.memory_space<vmem>>, vector<1x16x72xf32>,
    %150 = vector.extract_strided_slice %10 {offsets = [112, 0], sizes = [16, 72], strides = [1, 1]} : vector<256x72xf32> to vector<16x72xf32>
    %151 = vector.broadcast %91 : vector<16x1xf32> to vector<16x72xf32>
    %152 = arith.mulf %150, %151 : vector<16x72xf32>
    %153 = vector.broadcast %93 : vector<16x1xf32> to vector<16x72xf32>
    %154 = arith.addf %152, %153 : vector<16x72xf32>
    %c7 = arith.constant 7 : index
    %c0_32 = arith.constant 0 : index
    %c0_33 = arith.constant 0 : index
    %155 = vector.load %arg6[%c7, %c0_32, %c0_33] : memref<16x16x72xf32, #tpu.memory_space<vmem>>, vector<1x16x72xf32>
    %156 = vector.shape_cast %155 : vector<1x16x72xf32> to vector<16x72xf32>
    %157 = vector.shape_cast %154 : vector<16x72xf32> to vector<1x16x72xf32>
    tpu.vector_store %arg6[%c7, %c0_32, %c0_33], %157 {strides = array<i32>} : memref<16x16x72xf32, #tpu.memory_space<vmem>>, vector<1x16x72xf32>,
    %158 = vector.extract_strided_slice %10 {offsets = [128, 0], sizes = [16, 72], strides = [1, 1]} : vector<256x72xf32> to vector<16x72xf32>
    %159 = vector.broadcast %91 : vector<16x1xf32> to vector<16x72xf32>
    %160 = arith.mulf %158, %159 : vector<16x72xf32>
    %161 = vector.broadcast %93 : vector<16x1xf32> to vector<16x72xf32>
    %162 = arith.addf %160, %161 : vector<16x72xf32>
    %c8 = arith.constant 8 : index
    %c0_34 = arith.constant 0 : index
    %c0_35 = arith.constant 0 : index
    %163 = vector.load %arg6[%c8, %c0_34, %c0_35] : memref<16x16x72xf32, #tpu.memory_space<vmem>>, vector<1x16x72xf32>
    %164 = vector.shape_cast %163 : vector<1x16x72xf32> to vector<16x72xf32>
    %165 = vector.shape_cast %162 : vector<16x72xf32> to vector<1x16x72xf32>
    tpu.vector_store %arg6[%c8, %c0_34, %c0_35], %165 {strides = array<i32>} : memref<16x16x72xf32, #tpu.memory_space<vmem>>, vector<1x16x72xf32>,
    %166 = vector.extract_strided_slice %10 {offsets = [144, 0], sizes = [16, 72], strides = [1, 1]} : vector<256x72xf32> to vector<16x72xf32>
    %167 = vector.broadcast %91 : vector<16x1xf32> to vector<16x72xf32>
    %168 = arith.mulf %166, %167 : vector<16x72xf32>
    %169 = vector.broadcast %93 : vector<16x1xf32> to vector<16x72xf32>
    %170 = arith.addf %168, %169 : vector<16x72xf32>
    %c9 = arith.constant 9 : index
    %c0_36 = arith.constant 0 : index
    %c0_37 = arith.constant 0 : index
    %171 = vector.load %arg6[%c9, %c0_36, %c0_37] : memref<16x16x72xf32, #tpu.memory_space<vmem>>, vector<1x16x72xf32>
    %172 = vector.shape_cast %171 : vector<1x16x72xf32> to vector<16x72xf32>
    %173 = vector.shape_cast %170 : vector<16x72xf32> to vector<1x16x72xf32>
    tpu.vector_store %arg6[%c9, %c0_36, %c0_37], %173 {strides = array<i32>} : memref<16x16x72xf32, #tpu.memory_space<vmem>>, vector<1x16x72xf32>,
    %174 = vector.extract_strided_slice %10 {offsets = [160, 0], sizes = [16, 72], strides = [1, 1]} : vector<256x72xf32> to vector<16x72xf32>
    %175 = vector.broadcast %91 : vector<16x1xf32> to vector<16x72xf32>
    %176 = arith.mulf %174, %175 : vector<16x72xf32>
    %177 = vector.broadcast %93 : vector<16x1xf32> to vector<16x72xf32>
    %178 = arith.addf %176, %177 : vector<16x72xf32>
    %c10 = arith.constant 10 : index
    %c0_38 = arith.constant 0 : index
    %c0_39 = arith.constant 0 : index
    %179 = vector.load %arg6[%c10, %c0_38, %c0_39] : memref<16x16x72xf32, #tpu.memory_space<vmem>>, vector<1x16x72xf32>
    %180 = vector.shape_cast %179 : vector<1x16x72xf32> to vector<16x72xf32>
    %181 = vector.shape_cast %178 : vector<16x72xf32> to vector<1x16x72xf32>
    tpu.vector_store %arg6[%c10, %c0_38, %c0_39], %181 {strides = array<i32>} : memref<16x16x72xf32, #tpu.memory_space<vmem>>, vector<1x16x72xf32>,
    %182 = vector.extract_strided_slice %10 {offsets = [176, 0], sizes = [16, 72], strides = [1, 1]} : vector<256x72xf32> to vector<16x72xf32>
    %183 = vector.broadcast %91 : vector<16x1xf32> to vector<16x72xf32>
    %184 = arith.mulf %182, %183 : vector<16x72xf32>
    %185 = vector.broadcast %93 : vector<16x1xf32> to vector<16x72xf32>
    %186 = arith.addf %184, %185 : vector<16x72xf32>
    %c11 = arith.constant 11 : index
    %c0_40 = arith.constant 0 : index
    %c0_41 = arith.constant 0 : index
    %187 = vector.load %arg6[%c11, %c0_40, %c0_41] : memref<16x16x72xf32, #tpu.memory_space<vmem>>, vector<1x16x72xf32>
    %188 = vector.shape_cast %187 : vector<1x16x72xf32> to vector<16x72xf32>
    %189 = vector.shape_cast %186 : vector<16x72xf32> to vector<1x16x72xf32>
    tpu.vector_store %arg6[%c11, %c0_40, %c0_41], %189 {strides = array<i32>} : memref<16x16x72xf32, #tpu.memory_space<vmem>>, vector<1x16x72xf32>,
    %190 = vector.extract_strided_slice %10 {offsets = [192, 0], sizes = [16, 72], strides = [1, 1]} : vector<256x72xf32> to vector<16x72xf32>
    %191 = vector.broadcast %91 : vector<16x1xf32> to vector<16x72xf32>
    %192 = arith.mulf %190, %191 : vector<16x72xf32>
    %193 = vector.broadcast %93 : vector<16x1xf32> to vector<16x72xf32>
    %194 = arith.addf %192, %193 : vector<16x72xf32>
    %c12 = arith.constant 12 : index
    %c0_42 = arith.constant 0 : index
    %c0_43 = arith.constant 0 : index
    %195 = vector.load %arg6[%c12, %c0_42, %c0_43] : memref<16x16x72xf32, #tpu.memory_space<vmem>>, vector<1x16x72xf32>
    %196 = vector.shape_cast %195 : vector<1x16x72xf32> to vector<16x72xf32>
    %197 = vector.shape_cast %194 : vector<16x72xf32> to vector<1x16x72xf32>
    tpu.vector_store %arg6[%c12, %c0_42, %c0_43], %197 {strides = array<i32>} : memref<16x16x72xf32, #tpu.memory_space<vmem>>, vector<1x16x72xf32>,
    %198 = vector.extract_strided_slice %10 {offsets = [208, 0], sizes = [16, 72], strides = [1, 1]} : vector<256x72xf32> to vector<16x72xf32>
    %199 = vector.broadcast %91 : vector<16x1xf32> to vector<16x72xf32>
    %200 = arith.mulf %198, %199 : vector<16x72xf32>
    %201 = vector.broadcast %93 : vector<16x1xf32> to vector<16x72xf32>
    %202 = arith.addf %200, %201 : vector<16x72xf32>
    %c13 = arith.constant 13 : index
    %c0_44 = arith.constant 0 : index
    %c0_45 = arith.constant 0 : index
    %203 = vector.load %arg6[%c13, %c0_44, %c0_45] : memref<16x16x72xf32, #tpu.memory_space<vmem>>, vector<1x16x72xf32>
    %204 = vector.shape_cast %203 : vector<1x16x72xf32> to vector<16x72xf32>
    %205 = vector.shape_cast %202 : vector<16x72xf32> to vector<1x16x72xf32>
    tpu.vector_store %arg6[%c13, %c0_44, %c0_45], %205 {strides = array<i32>} : memref<16x16x72xf32, #tpu.memory_space<vmem>>, vector<1x16x72xf32>,
    %206 = vector.extract_strided_slice %10 {offsets = [224, 0], sizes = [16, 72], strides = [1, 1]} : vector<256x72xf32> to vector<16x72xf32>
    %207 = vector.broadcast %91 : vector<16x1xf32> to vector<16x72xf32>
    %208 = arith.mulf %206, %207 : vector<16x72xf32>
    %209 = vector.broadcast %93 : vector<16x1xf32> to vector<16x72xf32>
    %210 = arith.addf %208, %209 : vector<16x72xf32>
    %c14 = arith.constant 14 : index
    %c0_46 = arith.constant 0 : index
    %c0_47 = arith.constant 0 : index
    %211 = vector.load %arg6[%c14, %c0_46, %c0_47] : memref<16x16x72xf32, #tpu.memory_space<vmem>>, vector<1x16x72xf32>
    %212 = vector.shape_cast %211 : vector<1x16x72xf32> to vector<16x72xf32>
    %213 = vector.shape_cast %210 : vector<16x72xf32> to vector<1x16x72xf32>
    tpu.vector_store %arg6[%c14, %c0_46, %c0_47], %213 {strides = array<i32>} : memref<16x16x72xf32, #tpu.memory_space<vmem>>, vector<1x16x72xf32>,
    %214 = vector.extract_strided_slice %10 {offsets = [240, 0], sizes = [16, 72], strides = [1, 1]} : vector<256x72xf32> to vector<16x72xf32>
    %215 = vector.broadcast %91 : vector<16x1xf32> to vector<16x72xf32>
    %216 = arith.mulf %214, %215 : vector<16x72xf32>
    %217 = vector.broadcast %93 : vector<16x1xf32> to vector<16x72xf32>
    %218 = arith.addf %216, %217 : vector<16x72xf32>
    %c15 = arith.constant 15 : index
    %c0_48 = arith.constant 0 : index
    %c0_49 = arith.constant 0 : index
    %219 = vector.load %arg6[%c15, %c0_48, %c0_49] : memref<16x16x72xf32, #tpu.memory_space<vmem>>, vector<1x16x72xf32>
    %220 = vector.shape_cast %219 : vector<1x16x72xf32> to vector<16x72xf32>
    %221 = vector.shape_cast %218 : vector<16x72xf32> to vector<1x16x72xf32>
    tpu.vector_store %arg6[%c15, %c0_48, %c0_49], %221 {strides = array<i32>} : memref<16x16x72xf32, #tpu.memory_space<vmem>>, vector<1x16x72xf32>,
    return
  }
  func.func @transform_0(%arg0: i32) -> (i32, i32) {
    %c0_i32 = arith.constant 0 : i32
    %c0_i32_0 = arith.constant 0 : i32
    %c0_i32_1 = arith.constant 0 : i32
    return %c0_i32, %c0_i32_0 : i32, i32
  }
  func.func @transform_1(%arg0: i32) -> (i32, i32) {
    %c0_i32 = arith.constant 0 : i32
    %c0_i32_0 = arith.constant 0 : i32
    %c0_i32_1 = arith.constant 0 : i32
    return %c0_i32, %c0_i32_0 : i32, i32
  }
  func.func @transform_2(%arg0: i32) -> (i32, i32) {
    %c0_i32 = arith.constant 0 : i32
    %c0_i32_0 = arith.constant 0 : i32
    %c0_i32_1 = arith.constant 0 : i32
    return %c0_i32, %c0_i32_0 : i32, i32
  }
  func.func @transform_3(%arg0: i32) -> (i32, i32) {
    %c0_i32 = arith.constant 0 : i32
    %c0_i32_0 = arith.constant 0 : i32
    %c0_i32_1 = arith.constant 0 : i32
    return %c0_i32, %c0_i32_0 : i32, i32
  }
  func.func @transform_4(%arg0: i32) -> (i32, i32) {
    %c0_i32 = arith.constant 0 : i32
    %c0_i32_0 = arith.constant 0 : i32
    %c0_i32_1 = arith.constant 0 : i32
    return %c0_i32, %c0_i32_0 : i32, i32
  }
  func.func @transform_5(%arg0: i32) -> (i32, i32, i32) {
    %c0_i32 = arith.constant 0 : i32
    %c0_i32_0 = arith.constant 0 : i32
    %c0_i32_1 = arith.constant 0 : i32
    %c0_i32_2 = arith.constant 0 : i32
    return %c0_i32, %c0_i32_0, %c0_i32_1 : i32, i32, i32
  }
}

module attributes {stable_mosaic.version = 11 : i64} {
  func.func @_convt_bn_convt_sig_kernel(%arg0: i32, %arg1: memref<64x1250xf32, #tpu.memory_space<vmem>>, %arg2: memref<64x64xf32, #tpu.memory_space<vmem>>, %arg3: memref<64x1xf32, #tpu.memory_space<vmem>>, %arg4: memref<16x1xf32, #tpu.memory_space<vmem>>, %arg5: memref<16x1xf32, #tpu.memory_space<vmem>>, %arg6: memref<4x16xf32, #tpu.memory_space<vmem>>, %arg7: memref<1x1xf32, #tpu.memory_space<vmem>>, %arg8: memref<4x4x1250xf32, #tpu.memory_space<vmem>>) attributes {dimension_semantics = [#tpu.dimension_semantics<arbitrary>], iteration_bounds = array<i64: 1>, scalar_prefetch = 0 : i64, scratch_operands = 0 : i64, tpu.core_type = #tpu.core_type<tc>, window_params = [{pipeline_mode = #tpu.pipeline_mode<synchronous>, transform_indices = @transform_0, window_bounds = array<i64: 64, 1250>}, {pipeline_mode = #tpu.pipeline_mode<synchronous>, transform_indices = @transform_1, window_bounds = array<i64: 64, 64>}, {pipeline_mode = #tpu.pipeline_mode<synchronous>, transform_indices = @transform_2, window_bounds = array<i64: 64, 1>}, {pipeline_mode = #tpu.pipeline_mode<synchronous>, transform_indices = @transform_3, window_bounds = array<i64: 16, 1>}, {pipeline_mode = #tpu.pipeline_mode<synchronous>, transform_indices = @transform_4, window_bounds = array<i64: 16, 1>}, {pipeline_mode = #tpu.pipeline_mode<synchronous>, transform_indices = @transform_5, window_bounds = array<i64: 4, 16>}, {pipeline_mode = #tpu.pipeline_mode<synchronous>, transform_indices = @transform_6, window_bounds = array<i64: 1, 1>}, {pipeline_mode = #tpu.pipeline_mode<synchronous>, transform_indices = @transform_7, window_bounds = array<i64: 4, 4, 1250>}]} {
    %c0 = arith.constant 0 : index
    %c0_0 = arith.constant 0 : index
    %0 = vector.load %arg2[%c0, %c0_0] : memref<64x64xf32, #tpu.memory_space<vmem>>, vector<64x64xf32>
    %c0_1 = arith.constant 0 : index
    %c0_2 = arith.constant 0 : index
    %1 = vector.load %arg1[%c0_1, %c0_2] : memref<64x1250xf32, #tpu.memory_space<vmem>>, vector<64x1250xf32>
    %cst = arith.constant dense<0.000000e+00> : vector<64x1250xf32>
    %2 = tpu.matmul %0, %1, %cst {dimension_numbers = #tpu.dot_dimension_numbers<[1], [0], [0], [1], [0, 0, 1, 1], [], []>} : vector<64x64xf32>, vector<64x1250xf32>, vector<64x1250xf32> -> vector<64x1250xf32>
    %c0_3 = arith.constant 0 : index
    %c0_4 = arith.constant 0 : index
    %3 = vector.load %arg3[%c0_3, %c0_4] : memref<64x1xf32, #tpu.memory_space<vmem>>, vector<64x1xf32>
    %4 = vector.broadcast %3 : vector<64x1xf32> to vector<64x1250xf32>
    %5 = arith.addf %2, %4 : vector<64x1250xf32>
    %cst_5 = arith.constant 0.000000e+00 : f32
    %6 = vector.broadcast %cst_5 : f32 to vector<64x1250xf32>
    %7 = arith.cmpf oge, %5, %6 : vector<64x1250xf32>
    %cst_6 = arith.constant 0.00999999977 : f32
    %8 = vector.broadcast %cst_6 : f32 to vector<64x1250xf32>
    %9 = arith.mulf %8, %5 : vector<64x1250xf32>
    %10 = arith.select %7, %5, %9 : vector<64x1250xi1>, vector<64x1250xf32>
    %c0_7 = arith.constant 0 : index
    %c0_8 = arith.constant 0 : index
    %11 = vector.load %arg4[%c0_7, %c0_8] : memref<16x1xf32, #tpu.memory_space<vmem>>, vector<16x1xf32>
    %c0_9 = arith.constant 0 : index
    %c0_10 = arith.constant 0 : index
    %12 = vector.load %arg5[%c0_9, %c0_10] : memref<16x1xf32, #tpu.memory_space<vmem>>, vector<16x1xf32>
    %cst_11 = arith.constant dense<0.000000e+00> : vector<64xf32>
    %13 = vector.multi_reduction <add>, %10, %cst_11 [1] : vector<64x1250xf32> to vector<64xf32>
    %14 = vector.shape_cast %13 : vector<64xf32> to vector<64x1xf32>
    %15 = arith.mulf %10, %10 : vector<64x1250xf32>
    %cst_12 = arith.constant dense<0.000000e+00> : vector<64xf32>
    %16 = vector.multi_reduction <add>, %15, %cst_12 [1] : vector<64x1250xf32> to vector<64xf32>
    %17 = vector.shape_cast %16 : vector<64xf32> to vector<64x1xf32>
    %18 = vector.extract_strided_slice %14 {offsets = [0, 0], sizes = [16, 1], strides = [1, 1]} : vector<64x1xf32> to vector<16x1xf32>
    %19 = vector.extract_strided_slice %17 {offsets = [0, 0], sizes = [16, 1], strides = [1, 1]} : vector<64x1xf32> to vector<16x1xf32>
    %20 = vector.extract_strided_slice %14 {offsets = [16, 0], sizes = [16, 1], strides = [1, 1]} : vector<64x1xf32> to vector<16x1xf32>
    %21 = arith.addf %18, %20 : vector<16x1xf32>
    %22 = vector.extract_strided_slice %17 {offsets = [16, 0], sizes = [16, 1], strides = [1, 1]} : vector<64x1xf32> to vector<16x1xf32>
    %23 = arith.addf %19, %22 : vector<16x1xf32>
    %24 = vector.extract_strided_slice %14 {offsets = [32, 0], sizes = [16, 1], strides = [1, 1]} : vector<64x1xf32> to vector<16x1xf32>
    %25 = arith.addf %21, %24 : vector<16x1xf32>
    %26 = vector.extract_strided_slice %17 {offsets = [32, 0], sizes = [16, 1], strides = [1, 1]} : vector<64x1xf32> to vector<16x1xf32>
    %27 = arith.addf %23, %26 : vector<16x1xf32>
    %28 = vector.extract_strided_slice %14 {offsets = [48, 0], sizes = [16, 1], strides = [1, 1]} : vector<64x1xf32> to vector<16x1xf32>
    %29 = arith.addf %25, %28 : vector<16x1xf32>
    %30 = vector.extract_strided_slice %17 {offsets = [48, 0], sizes = [16, 1], strides = [1, 1]} : vector<64x1xf32> to vector<16x1xf32>
    %31 = arith.addf %27, %30 : vector<16x1xf32>
    %cst_13 = arith.constant 2.000000e-04 : f32
    %32 = vector.broadcast %cst_13 : f32 to vector<16x1xf32>
    %33 = arith.mulf %29, %32 : vector<16x1xf32>
    %cst_14 = arith.constant 2.000000e-04 : f32
    %34 = vector.broadcast %cst_14 : f32 to vector<16x1xf32>
    %35 = arith.mulf %31, %34 : vector<16x1xf32>
    %36 = arith.mulf %33, %33 : vector<16x1xf32>
    %37 = arith.subf %35, %36 : vector<16x1xf32>
    %cst_15 = arith.constant 0.000000e+00 : f32
    %38 = vector.broadcast %cst_15 : f32 to vector<16x1xf32>
    %39 = arith.maximumf %37, %38 : vector<16x1xf32>
    %cst_16 = arith.constant 9.99999974E-6 : f32
    %40 = vector.broadcast %cst_16 : f32 to vector<16x1xf32>
    %41 = arith.addf %39, %40 : vector<16x1xf32>
    %42 = math.rsqrt %41 : vector<16x1xf32>
    %43 = arith.mulf %11, %42 : vector<16x1xf32>
    %44 = arith.mulf %33, %43 : vector<16x1xf32>
    %45 = arith.subf %12, %44 : vector<16x1xf32>
    %c0_17 = arith.constant 0 : index
    %c0_18 = arith.constant 0 : index
    %46 = vector.load %arg6[%c0_17, %c0_18] : memref<4x16xf32, #tpu.memory_space<vmem>>, vector<4x16xf32>
    %c0_19 = arith.constant 0 : index
    %c0_20 = arith.constant 0 : index
    %47 = vector.load %arg7[%c0_19, %c0_20] : memref<1x1xf32, #tpu.memory_space<vmem>>, vector<1x1xf32>
    %48 = vector.extract_strided_slice %10 {offsets = [0, 0], sizes = [16, 1250], strides = [1, 1]} : vector<64x1250xf32> to vector<16x1250xf32>
    %49 = vector.broadcast %43 : vector<16x1xf32> to vector<16x1250xf32>
    %50 = arith.mulf %48, %49 : vector<16x1250xf32>
    %51 = vector.broadcast %45 : vector<16x1xf32> to vector<16x1250xf32>
    %52 = arith.addf %50, %51 : vector<16x1250xf32>
    %cst_21 = arith.constant dense<0.000000e+00> : vector<4x1250xf32>
    %53 = tpu.matmul %46, %52, %cst_21 {dimension_numbers = #tpu.dot_dimension_numbers<[1], [0], [0], [1], [0, 0, 1, 1], [], []>} : vector<4x16xf32>, vector<16x1250xf32>, vector<4x1250xf32> -> vector<4x1250xf32>
    %54 = vector.broadcast %47 : vector<1x1xf32> to vector<4x1250xf32>
    %55 = arith.addf %53, %54 : vector<4x1250xf32>
    %56 = arith.negf %55 : vector<4x1250xf32>
    %57 = math.exp %56 : vector<4x1250xf32>
    %cst_22 = arith.constant 1.000000e+00 : f32
    %58 = vector.broadcast %cst_22 : f32 to vector<4x1250xf32>
    %59 = arith.addf %58, %57 : vector<4x1250xf32>
    %60 = arith.divf %58, %59 : vector<4x1250xf32>
    %c0_23 = arith.constant 0 : index
    %c0_24 = arith.constant 0 : index
    %c0_25 = arith.constant 0 : index
    %61 = vector.load %arg8[%c0_23, %c0_24, %c0_25] : memref<4x4x1250xf32, #tpu.memory_space<vmem>>, vector<1x4x1250xf32>
    %62 = vector.shape_cast %61 : vector<1x4x1250xf32> to vector<4x1250xf32>
    %63 = vector.shape_cast %60 : vector<4x1250xf32> to vector<1x4x1250xf32>
    tpu.vector_store %arg8[%c0_23, %c0_24, %c0_25], %63 {strides = array<i32>} : memref<4x4x1250xf32, #tpu.memory_space<vmem>>, vector<1x4x1250xf32>,
    %64 = vector.extract_strided_slice %10 {offsets = [16, 0], sizes = [16, 1250], strides = [1, 1]} : vector<64x1250xf32> to vector<16x1250xf32>
    %65 = vector.broadcast %43 : vector<16x1xf32> to vector<16x1250xf32>
    %66 = arith.mulf %64, %65 : vector<16x1250xf32>
    %67 = vector.broadcast %45 : vector<16x1xf32> to vector<16x1250xf32>
    %68 = arith.addf %66, %67 : vector<16x1250xf32>
    %cst_26 = arith.constant dense<0.000000e+00> : vector<4x1250xf32>
    %69 = tpu.matmul %46, %68, %cst_26 {dimension_numbers = #tpu.dot_dimension_numbers<[1], [0], [0], [1], [0, 0, 1, 1], [], []>} : vector<4x16xf32>, vector<16x1250xf32>, vector<4x1250xf32> -> vector<4x1250xf32>
    %70 = vector.broadcast %47 : vector<1x1xf32> to vector<4x1250xf32>
    %71 = arith.addf %69, %70 : vector<4x1250xf32>
    %72 = arith.negf %71 : vector<4x1250xf32>
    %73 = math.exp %72 : vector<4x1250xf32>
    %cst_27 = arith.constant 1.000000e+00 : f32
    %74 = vector.broadcast %cst_27 : f32 to vector<4x1250xf32>
    %75 = arith.addf %74, %73 : vector<4x1250xf32>
    %76 = arith.divf %74, %75 : vector<4x1250xf32>
    %c1 = arith.constant 1 : index
    %c0_28 = arith.constant 0 : index
    %c0_29 = arith.constant 0 : index
    %77 = vector.load %arg8[%c1, %c0_28, %c0_29] : memref<4x4x1250xf32, #tpu.memory_space<vmem>>, vector<1x4x1250xf32>
    %78 = vector.shape_cast %77 : vector<1x4x1250xf32> to vector<4x1250xf32>
    %79 = vector.shape_cast %76 : vector<4x1250xf32> to vector<1x4x1250xf32>
    tpu.vector_store %arg8[%c1, %c0_28, %c0_29], %79 {strides = array<i32>} : memref<4x4x1250xf32, #tpu.memory_space<vmem>>, vector<1x4x1250xf32>,
    %80 = vector.extract_strided_slice %10 {offsets = [32, 0], sizes = [16, 1250], strides = [1, 1]} : vector<64x1250xf32> to vector<16x1250xf32>
    %81 = vector.broadcast %43 : vector<16x1xf32> to vector<16x1250xf32>
    %82 = arith.mulf %80, %81 : vector<16x1250xf32>
    %83 = vector.broadcast %45 : vector<16x1xf32> to vector<16x1250xf32>
    %84 = arith.addf %82, %83 : vector<16x1250xf32>
    %cst_30 = arith.constant dense<0.000000e+00> : vector<4x1250xf32>
    %85 = tpu.matmul %46, %84, %cst_30 {dimension_numbers = #tpu.dot_dimension_numbers<[1], [0], [0], [1], [0, 0, 1, 1], [], []>} : vector<4x16xf32>, vector<16x1250xf32>, vector<4x1250xf32> -> vector<4x1250xf32>
    %86 = vector.broadcast %47 : vector<1x1xf32> to vector<4x1250xf32>
    %87 = arith.addf %85, %86 : vector<4x1250xf32>
    %88 = arith.negf %87 : vector<4x1250xf32>
    %89 = math.exp %88 : vector<4x1250xf32>
    %cst_31 = arith.constant 1.000000e+00 : f32
    %90 = vector.broadcast %cst_31 : f32 to vector<4x1250xf32>
    %91 = arith.addf %90, %89 : vector<4x1250xf32>
    %92 = arith.divf %90, %91 : vector<4x1250xf32>
    %c2 = arith.constant 2 : index
    %c0_32 = arith.constant 0 : index
    %c0_33 = arith.constant 0 : index
    %93 = vector.load %arg8[%c2, %c0_32, %c0_33] : memref<4x4x1250xf32, #tpu.memory_space<vmem>>, vector<1x4x1250xf32>
    %94 = vector.shape_cast %93 : vector<1x4x1250xf32> to vector<4x1250xf32>
    %95 = vector.shape_cast %92 : vector<4x1250xf32> to vector<1x4x1250xf32>
    tpu.vector_store %arg8[%c2, %c0_32, %c0_33], %95 {strides = array<i32>} : memref<4x4x1250xf32, #tpu.memory_space<vmem>>, vector<1x4x1250xf32>,
    %96 = vector.extract_strided_slice %10 {offsets = [48, 0], sizes = [16, 1250], strides = [1, 1]} : vector<64x1250xf32> to vector<16x1250xf32>
    %97 = vector.broadcast %43 : vector<16x1xf32> to vector<16x1250xf32>
    %98 = arith.mulf %96, %97 : vector<16x1250xf32>
    %99 = vector.broadcast %45 : vector<16x1xf32> to vector<16x1250xf32>
    %100 = arith.addf %98, %99 : vector<16x1250xf32>
    %cst_34 = arith.constant dense<0.000000e+00> : vector<4x1250xf32>
    %101 = tpu.matmul %46, %100, %cst_34 {dimension_numbers = #tpu.dot_dimension_numbers<[1], [0], [0], [1], [0, 0, 1, 1], [], []>} : vector<4x16xf32>, vector<16x1250xf32>, vector<4x1250xf32> -> vector<4x1250xf32>
    %102 = vector.broadcast %47 : vector<1x1xf32> to vector<4x1250xf32>
    %103 = arith.addf %101, %102 : vector<4x1250xf32>
    %104 = arith.negf %103 : vector<4x1250xf32>
    %105 = math.exp %104 : vector<4x1250xf32>
    %cst_35 = arith.constant 1.000000e+00 : f32
    %106 = vector.broadcast %cst_35 : f32 to vector<4x1250xf32>
    %107 = arith.addf %106, %105 : vector<4x1250xf32>
    %108 = arith.divf %106, %107 : vector<4x1250xf32>
    %c3 = arith.constant 3 : index
    %c0_36 = arith.constant 0 : index
    %c0_37 = arith.constant 0 : index
    %109 = vector.load %arg8[%c3, %c0_36, %c0_37] : memref<4x4x1250xf32, #tpu.memory_space<vmem>>, vector<1x4x1250xf32>
    %110 = vector.shape_cast %109 : vector<1x4x1250xf32> to vector<4x1250xf32>
    %111 = vector.shape_cast %108 : vector<4x1250xf32> to vector<1x4x1250xf32>
    tpu.vector_store %arg8[%c3, %c0_36, %c0_37], %111 {strides = array<i32>} : memref<4x4x1250xf32, #tpu.memory_space<vmem>>, vector<1x4x1250xf32>,
    return
  }
  func.func @transform_0(%arg0: i32) -> (i32, i32) {
    %c0_i32 = arith.constant 0 : i32
    %c0_i32_0 = arith.constant 0 : i32
    %c0_i32_1 = arith.constant 0 : i32
    return %c0_i32, %c0_i32_0 : i32, i32
  }
  func.func @transform_1(%arg0: i32) -> (i32, i32) {
    %c0_i32 = arith.constant 0 : i32
    %c0_i32_0 = arith.constant 0 : i32
    %c0_i32_1 = arith.constant 0 : i32
    return %c0_i32, %c0_i32_0 : i32, i32
  }
  func.func @transform_2(%arg0: i32) -> (i32, i32) {
    %c0_i32 = arith.constant 0 : i32
    %c0_i32_0 = arith.constant 0 : i32
    %c0_i32_1 = arith.constant 0 : i32
    return %c0_i32, %c0_i32_0 : i32, i32
  }
  func.func @transform_3(%arg0: i32) -> (i32, i32) {
    %c0_i32 = arith.constant 0 : i32
    %c0_i32_0 = arith.constant 0 : i32
    %c0_i32_1 = arith.constant 0 : i32
    return %c0_i32, %c0_i32_0 : i32, i32
  }
  func.func @transform_4(%arg0: i32) -> (i32, i32) {
    %c0_i32 = arith.constant 0 : i32
    %c0_i32_0 = arith.constant 0 : i32
    %c0_i32_1 = arith.constant 0 : i32
    return %c0_i32, %c0_i32_0 : i32, i32
  }
  func.func @transform_5(%arg0: i32) -> (i32, i32) {
    %c0_i32 = arith.constant 0 : i32
    %c0_i32_0 = arith.constant 0 : i32
    %c0_i32_1 = arith.constant 0 : i32
    return %c0_i32, %c0_i32_0 : i32, i32
  }
  func.func @transform_6(%arg0: i32) -> (i32, i32) {
    %c0_i32 = arith.constant 0 : i32
    %c0_i32_0 = arith.constant 0 : i32
    %c0_i32_1 = arith.constant 0 : i32
    return %c0_i32, %c0_i32_0 : i32, i32
  }
  func.func @transform_7(%arg0: i32) -> (i32, i32, i32) {
    %c0_i32 = arith.constant 0 : i32
    %c0_i32_0 = arith.constant 0 : i32
    %c0_i32_1 = arith.constant 0 : i32
    %c0_i32_2 = arith.constant 0 : i32
    return %c0_i32, %c0_i32_0, %c0_i32_1 : i32, i32, i32
  }
}

</mosaic_0001>

<bundles_post_ra>
// kernel: decoder_forward.3
= control target key start
LH: loop header
LB: loop body
LE: loop exit
PB: predicated region body
PF: predicated region fallthrough
CT: control target
= control target key end

     0   :  { %14 = vsyncpa [#allocation3], 0  ;;  %s2398_s0 = inlined_call_operand.hbm [shape: f32[2,8], index: 0, kind: input, shape index: {}]   ;;  %s2399_s1 = inlined_call_operand.hbm [shape: f32[8,450], index: 1, kind: input, shape index: {}]   ;;  %s2400_s2 = inlined_call_operand.hbm [shape: f32[1,450], index: 2, kind: input, shape index: {}]   ;;  %s2401_s3 = inlined_call_operand.hbm [shape: f32[1,450], index: 3, kind: input, shape index: {}]   ;;  %s2402_s4 = inlined_call_operand.hbm [shape: f32[1,450], index: 4, kind: input, shape index: {}]   ;;  %s2403_s5 = inlined_call_operand.vmem [shape: f32[450,400], index: 5, kind: input, shape index: {}]   ;;  %s2404_s6 = inlined_call_operand.hbm [shape: f32[1,400], index: 6, kind: input, shape index: {}]   ;;  %s2405_s7 = inlined_call_operand.hbm [shape: f32[1,400], index: 7, kind: input, shape index: {}]   ;;  %s2406_s8 = inlined_call_operand.hbm [shape: f32[1,400], index: 8, kind: input, shape index: {}]   ;;  %s2407_s9 = inlined_call_operand.vmem [shape: f32[2,400], index: 9, kind: output, shape index: {}]  }
   0x1   :  { %15 = vsyncpa [#allocation5], 0 }
   0x2   :  { %16 = vsyncpa [#allocation8], 0 }
   0x3   :  { %17 = vsyncpa [#allocation11], 0  ;;  %s35_s11 = sshll.u32 %s2399_s1, 4  ;;  %s36_s11 = int_to_ptr.hbm [resolvable:$true] %s35_s11 }
   0x4   :  { %18 = vsyncpa [#allocation14], 0  ;;  %s1437_s12 = smov [#allocation4]   ;;  %s57_s16 = sshll.u32 %s2401_s3, 4  ;;  %s58_s16 = int_to_ptr.hbm [resolvable:$true] %s57_s16 }
   0x5   :  { %s37_s13 = sshll.u32 %s1437_s12, 4  ;;  %s1438_s17 = smov [#allocation7]   ;;  %s38_s13 = int_to_ptr.vmem [resolvable:$true] %s37_s13 }
   0x6   :  { %40 = dma.hbm_to_vmem [thread:$0]  %s36_s11, 512, %s38_s13, [#allocation5]  }
   0x7   :  { %s59_s18 = sshll.u32 %s1438_s17, 4  ;;  %s81_s21 = sshll.u32 %s2404_s6, 4  ;;  %s60_s18 = int_to_ptr.vmem [resolvable:$true] %s59_s18  ;;  %s82_s21 = int_to_ptr.hbm [resolvable:$true] %s81_s21 }
   0x8   :  { %62 = dma.hbm_to_vmem [thread:$0]  %s58_s16, 64, %s60_s18, [#allocation8]  }
   0x9   :  { %s24_s23 = sshll.u32 %s2398_s0, 4  ;;  %s1439_s24 = smov [#allocation10]   ;;  %s25_s23 = int_to_ptr.hbm [resolvable:$true] %s24_s23 }
   0xa   :  { %s83_s25 = sshll.u32 %s1439_s24, 4  ;;  %s1440_s3 = smov [#allocation2]   ;;  %s84_s25 = int_to_ptr.vmem [resolvable:$true] %s83_s25 }
   0xb   :  { %86 = dma.hbm_to_vmem [thread:$0]  %s82_s21, 64, %s84_s25, [#allocation11]  }
   0xc   :  { %s26_s26 = sshll.u32 %s1440_s3, 4  ;;  %s46_s29 = sshll.u32 %s2400_s2, 4  ;;  %s27_s26 = int_to_ptr.vmem [resolvable:$true] %s26_s26  ;;  %s47_s29 = int_to_ptr.hbm [resolvable:$true] %s46_s29 }
   0xd   :  { %29 = dma.hbm_to_vmem [thread:$0]  %s25_s23, 32, %s27_s26, [#allocation3]  }
   0xe   :  { %s68_s10 = sshll.u32 %s2402_s4, 4  ;;  %s1441_s11 = smov [#allocation6]   ;;  %s69_s10 = int_to_ptr.hbm [resolvable:$true] %s68_s10 }
   0xf   :  { %s48_s0 = sshll.u32 %s1441_s11, 4  ;;  %s1442_s12 = smov [#allocation9]   ;;  %s49_s0 = int_to_ptr.vmem [resolvable:$true] %s48_s0 }
  0x10   :  { %51 = dma.hbm_to_vmem [thread:$0]  %s47_s29, 64, %s49_s0, [#allocation5]  }
  0x11   :  { %s70_s13 = sshll.u32 %s1442_s12, 4  ;;  %s92_s16 = sshll.u32 %s2405_s7, 4  ;;  %s71_s13 = int_to_ptr.vmem [resolvable:$true] %s70_s13  ;;  %s93_s16 = int_to_ptr.hbm [resolvable:$true] %s92_s16 }
  0x12   :  { %73 = dma.hbm_to_vmem [thread:$0]  %s69_s10, 64, %s71_s13, [#allocation8]  }
  0x13   :  { %s103_s18 = sshll.u32 %s2406_s8, 4  ;;  %s1443_s19 = smov [#allocation12]   ;;  %s104_s18 = int_to_ptr.hbm [resolvable:$true] %s103_s18 }
  0x14   :  { %s94_s4 = sshll.u32 %s1443_s19, 4  ;;  %s1444_s20 = smov [#allocation13]   ;;  %s95_s4 = int_to_ptr.vmem [resolvable:$true] %s94_s4 }
  0x15   :  { %97 = dma.hbm_to_vmem [thread:$0]  %s93_s16, 64, %s95_s4, [#allocation11]  }
  0x16   :  { %s105_s21 = sshll.u32 %s1444_s20, 4  ;;  %s106_s21 = int_to_ptr.vmem [resolvable:$true] %s105_s21 }
  0x17   :  { %108 = dma.hbm_to_vmem [thread:$0]  %s104_s18, 64, %s106_s21, [#allocation14]  }
  0x18   :  { %1427 = dma.done.wait [#allocation3], 32  }
  0x19   :  { %1428 = vsyncadd [#allocation3], 4294967264 }
  0x1a   :  { %1429 = dma.done.wait [#allocation5], 576  }
  0x1b   :  { %1430 = vsyncadd [#allocation5], 4294966720 }
  0x1c   :  { %1431 = dma.done.wait [#allocation8], 128  }
  0x1d   :  { %1432 = vsyncadd [#allocation8], 4294967168 }
  0x1e   :  { %1433 = dma.done.wait [#allocation11], 128  }
  0x1f   :  { %1434 = vsyncadd [#allocation11], 4294967168 }
  0x20   :  { %1435 = dma.done.wait [#allocation14], 64  }
  0x21   :  { %1436 = vsyncadd [#allocation14], 4294967232  ;;  %v142_v0 = vld [vmem:[#allocation4] sm:$0xff]  ;;  %v143_v1 = vld [vmem:[#allocation4 + $0x8] sm:$0xff]  ;;  %vm158_vm0 = vcmask 64512   ;;  %vm254_vm1 = vcmask 1041408  }
  0x22   :  { %v144_v2 = vld [vmem:[#allocation4 + $0x10] sm:$0xff]  ;;  %177 = vmatpush.msra.mxu0 %v142_v0  ;;  %197 = vmatpush.msra.mxu1 %v143_v1  ;;  %v145_v3 = vld [vmem:[#allocation4 + $0x18] sm:$0xff]  ;;  %v1445_v32 = vmov 2.0   ;;  %v546_v51 = vld [vmem:[%s2403_s5 + $0x3e8] sm:$0xff]  ;;  %vm276_vm4 = vcmask 533504  }
  0x23   :  { %v141_v4 = vld [vmem:[#allocation2] sm:$0x3]  ;;  %217 = vmatpush.msra.mxu2 %v144_v2  ;;  %237 = vmatpush.msra.mxu3 %v145_v3  ;;  %1217 = vrcp.f32 %v1445_v32  ;;  %v610_v52 = vld [vmem:[%s2403_s5 + $0x5e8] sm:$0xff]  ;;  %v1661_v53 = vld [vmem:[#allocation6] sm:$0xf] }
  0x24   :  { %v481_v5 = vld [vmem:[%s2403_s5 + $0x1e0] sm:$0xff]  ;;  %1196 = vmatmul.msk.f32.vlgmr.msra.gmra.mxu0 %vm158_vm0, %v141_v4  ;;  %1197 = vmatmul.msk.f32.vlgmr.msra.gmra.mxu1 %vm158_vm0, %v141_v4  ;;  %v542_v57 = vld [vmem:[%s2403_s5 + $0x3c8] sm:$0xff]  ;;  %v150_v61 = vperm.slane %v1661_v53, 0  ;;  %v151_v62 = vperm.slane %v1661_v53, 1 }
  0x25   :  { %v545_v6 = vld [vmem:[%s2403_s5 + $0x3e0] sm:$0xff]  ;;  %1198 = vmatmul.msk.f32.vlgmr.msra.gmra.mxu2 %vm158_vm0, %v141_v4  ;;  %1199 = vmatmul.msk.f32.vlgmr.msra.gmra.mxu3 %vm158_vm0, %v141_v4  ;;  %v606_v58 = vld [vmem:[%s2403_s5 + $0x5c8] sm:$0xff] }
  0x26   :  { %v477_v7 = vld [vmem:[%s2403_s5 + $0x1c0] sm:$0xff]  ;;  %677 = vmatpush.msrb.mxu0 %v481_v5  ;;  %697 = vmatpush.msrb.mxu1 %v545_v6  ;;  %v538_v63 = vld [vmem:[%s2403_s5 + $0x3a8] sm:$0xff] }
  0x27   :  { %v541_v8 = vld [vmem:[%s2403_s5 + $0x3c0] sm:$0xff]  ;;  %v602_v0 = vld [vmem:[%s2403_s5 + $0x5a8] sm:$0xff] }
  0x28   :  { %v473_v9 = vld [vmem:[%s2403_s5 + $0x1a0] sm:$0xff]  ;;  %678 = vmatpush.msrb.mxu0 %v477_v7  ;;  %698 = vmatpush.msrb.mxu1 %v541_v8  ;;  %v482_v4 = vld [vmem:[%s2403_s5 + $0x1e8] sm:$0xff] }
  0x29   :  { %v537_v10 = vld [vmem:[%s2403_s5 + $0x3a0] sm:$0xff]  ;;  %v1638_v45 = vpop.eup %1217  ;;  %v534_v5 = vld [vmem:[%s2403_s5 + $0x388] sm:$0xff] }
  0x2a   :  { %v469_v11 = vld [vmem:[%s2403_s5 + $0x180] sm:$0xff]  ;;  %679 = vmatpush.msrb.mxu0 %v473_v9  ;;  %699 = vmatpush.msrb.mxu1 %v537_v10  ;;  %v285_v54 = vmul.f32 2.0, %v1638_v45  ;;  %v598_v6 = vld [vmem:[%s2403_s5 + $0x588] sm:$0xff]  ;;  %vm289_vm5 = vweird.f32 %v1638_v45 }
  0x2b   :  { %v533_v12 = vld [vmem:[%s2403_s5 + $0x380] sm:$0xff] }
  0x2c   :  { %v465_v13 = vld [vmem:[%s2403_s5 + $0x160] sm:$0xff]  ;;  %680 = vmatpush.msrb.mxu0 %v469_v11  ;;  %700 = vmatpush.msrb.mxu1 %v533_v12  ;;  %v286_v1 = vsub.f32 1.0, %v285_v54  ;;  %v478_v12 = vld [vmem:[%s2403_s5 + $0x1c8] sm:$0xff] }
  0x2d   :  { %v529_v14 = vld [vmem:[%s2403_s5 + $0x360] sm:$0xff]  ;;  %v514_v54 = vld [vmem:[%s2403_s5 + $0x2e8] sm:$0xff] }
  0x2e   :  { %681 = vmatpush.msrb.mxu0 %v465_v13  ;;  %701 = vmatpush.msrb.mxu1 %v529_v14  ;;  %v461_v15 = vld [vmem:[%s2403_s5 + $0x140] sm:$0xff]  ;;  %v530_v13 = vld [vmem:[%s2403_s5 + $0x368] sm:$0xff] }
  0x2f   :  { %v525_v16 = vld [vmem:[%s2403_s5 + $0x340] sm:$0xff]  ;;  %v594_v14 = vld [vmem:[%s2403_s5 + $0x568] sm:$0xff] }
  0x30   :  { %682 = vmatpush.msrb.mxu0 %v461_v15  ;;  %702 = vmatpush.msrb.mxu1 %v525_v16  ;;  %v457_v17 = vld [vmem:[%s2403_s5 + $0x120] sm:$0xff]  ;;  %v287_v15 = vmul.f32 %v1638_v45, %v286_v1 }
  0x31   :  { %v521_v18 = vld [vmem:[%s2403_s5 + $0x320] sm:$0xff] }
  0x32   :  { %683 = vmatpush.msrb.mxu0 %v457_v17  ;;  %703 = vmatpush.msrb.mxu1 %v521_v18  ;;  %v453_v19 = vld [vmem:[%s2403_s5 + $0x100] sm:$0xff] }
  0x33   :  { %v517_v20 = vld [vmem:[%s2403_s5 + $0x300] sm:$0xff] }
  0x34   :  { %684 = vmatpush.msrb.mxu0 %v453_v19  ;;  %704 = vmatpush.msrb.mxu1 %v517_v20  ;;  %v449_v21 = vld [vmem:[%s2403_s5 + $0xe0] sm:$0xff]  ;;  %v152_v19 = vperm.slane %v1661_v53, 2  ;;  %v153_v20 = vperm.slane %v1661_v53, 3  ;;  %v462_v53 = vld [vmem:[%s2403_s5 + $0x148] sm:$0xff] }
  0x35   :  { %v513_v22 = vld [vmem:[%s2403_s5 + $0x2e0] sm:$0xff] }
  0x36   :  { %685 = vmatpush.msrb.mxu0 %v449_v21  ;;  %705 = vmatpush.msrb.mxu1 %v513_v22  ;;  %v445_v23 = vld [vmem:[%s2403_s5 + $0xc0] sm:$0xff]  ;;  %v474_v21 = vld [vmem:[%s2403_s5 + $0x1a8] sm:$0xff] }
  0x37   :  { %v509_v24 = vld [vmem:[%s2403_s5 + $0x2c0] sm:$0xff]  ;;  %v526_v22 = vld [vmem:[%s2403_s5 + $0x348] sm:$0xff] }
  0x38   :  { %686 = vmatpush.msrb.mxu0 %v445_v23  ;;  %706 = vmatpush.msrb.mxu1 %v509_v24  ;;  %v441_v25 = vld [vmem:[%s2403_s5 + $0xa0] sm:$0xff]  ;;  %v590_v23 = vld [vmem:[%s2403_s5 + $0x548] sm:$0xff] }
  0x39   :  { %v505_v26 = vld [vmem:[%s2403_s5 + $0x2a0] sm:$0xff] }
  0x3a   :  { %v609_v27 = vld [vmem:[%s2403_s5 + $0x5e0] sm:$0xff]  ;;  %687 = vmatpush.msrb.mxu0 %v441_v25  ;;  %707 = vmatpush.msrb.mxu1 %v505_v26 }
  0x3b   :  { %v645_v28 = vld [vmem:[%s2403_s5 + $0x700] sm:$0x3]  ;;  %717 = vmatpush.msrb.mxu2 %v609_v27  ;;  %v470_v27 = vld [vmem:[%s2403_s5 + $0x188] sm:$0xff] }
  0x3c   :  { %1200 = vmatpush.msk.msrb.mxu3 %vm254_vm1, %v645_v28  ;;  %v437_v29 = vld [vmem:[%s2403_s5 + $0x80] sm:$0xff]  ;;  %v522_v28 = vld [vmem:[%s2403_s5 + $0x328] sm:$0xff] }
  0x3d   :  { %v501_v30 = vld [vmem:[%s2403_s5 + $0x280] sm:$0xff]  ;;  %688 = vmatpush.msrb.mxu0 %v437_v29 }
  0x3e   :  { %v605_v31 = vld [vmem:[%s2403_s5 + $0x5c0] sm:$0xff]  ;;  %708 = vmatpush.msrb.mxu1 %v501_v30 }
  0x3f   :  { %v641_v33 = vld [vmem:[%s2403_s5 + $0x6e0] sm:$0xff]  ;;  %718 = vmatpush.msrb.mxu2 %v605_v31 }
  0x40   :  { %745 = vmatpush.msrb.mxu3 %v641_v33  ;;  %v433_v34 = vld [vmem:[%s2403_s5 + $0x60] sm:$0xff]  ;;  %v586_v33 = vld [vmem:[%s2403_s5 + $0x528] sm:$0xff] }
  0x41   :  { %v497_v35 = vld [vmem:[%s2403_s5 + $0x260] sm:$0xff]  ;;  %689 = vmatpush.msrb.mxu0 %v433_v34 }
  0x42   :  { %v601_v36 = vld [vmem:[%s2403_s5 + $0x5a0] sm:$0xff]  ;;  %709 = vmatpush.msrb.mxu1 %v497_v35 }
  0x43   :  { %v637_v37 = vld [vmem:[%s2403_s5 + $0x6c0] sm:$0xff]  ;;  %719 = vmatpush.msrb.mxu2 %v601_v36  ;;  %v288_v36 = vadd.f32 %v1638_v45, %v287_v15 }
  0x44   :  { %746 = vmatpush.msrb.mxu3 %v637_v37  ;;  %v429_v38 = vld [vmem:[%s2403_s5 + $0x40] sm:$0xff] }
  0x45   :  { %v493_v39 = vld [vmem:[%s2403_s5 + $0x240] sm:$0xff]  ;;  %690 = vmatpush.msrb.mxu0 %v429_v38  ;;  %v1796_v1 = vsel %vm289_vm5, %v1638_v45, %v288_v36  ;;  %v498_v36 = vld [vmem:[%s2403_s5 + $0x268] sm:$0xff]  ;;  %vm661_vm5 = vcmask 539648  }
  0x46   :  { %v597_v40 = vld [vmem:[%s2403_s5 + $0x580] sm:$0xff]  ;;  %710 = vmatpush.msrb.mxu1 %v493_v39 }
  0x47   :  { %v633_v41 = vld [vmem:[%s2403_s5 + $0x6a0] sm:$0xff]  ;;  %720 = vmatpush.msrb.mxu2 %v597_v40  ;;  %v466_v40 = vld [vmem:[%s2403_s5 + $0x168] sm:$0xff] }
  0x48   :  { %747 = vmatpush.msrb.mxu3 %v633_v41  ;;  %v425_v42 = vld [vmem:[%s2403_s5 + $0x20] sm:$0xff]  ;;  %v518_v41 = vld [vmem:[%s2403_s5 + $0x308] sm:$0xff] }
  0x49   :  { %v489_v43 = vld [vmem:[%s2403_s5 + $0x220] sm:$0xff]  ;;  %691 = vmatpush.msrb.mxu0 %v425_v42  ;;  %v582_v42 = vld [vmem:[%s2403_s5 + $0x508] sm:$0xff] }
  0x4a   :  { %v593_v44 = vld [vmem:[%s2403_s5 + $0x560] sm:$0xff]  ;;  %711 = vmatpush.msrb.mxu1 %v489_v43 }
  0x4b   :  { %v629_v46 = vld [vmem:[%s2403_s5 + $0x680] sm:$0xff]  ;;  %721 = vmatpush.msrb.mxu2 %v593_v44 }
  0x4c   :  { %748 = vmatpush.msrb.mxu3 %v629_v46  ;;  %v421_v47 = vld [vmem:[%s2403_s5] sm:$0xff] }
  0x4d   :  { %v485_v48 = vld [vmem:[%s2403_s5 + $0x200] sm:$0xff]  ;;  %692 = vmatpush.msrb.mxu0 %v421_v47 }
  0x4e   :  { %v589_v49 = vld [vmem:[%s2403_s5 + $0x540] sm:$0xff]  ;;  %712 = vmatpush.msrb.mxu1 %v485_v48 }
  0x4f   :  { %v625_v50 = vld [vmem:[%s2403_s5 + $0x660] sm:$0xff]  ;;  %722 = vmatpush.msrb.mxu2 %v589_v49  ;;  %777 = vmatpush.msra.mxu0 %v546_v51 }
  0x50   :  { %749 = vmatpush.msrb.mxu3 %v625_v50  ;;  %v585_v55 = vld [vmem:[%s2403_s5 + $0x520] sm:$0xff]  ;;  %797 = vmatpush.msra.mxu1 %v610_v52 }
  0x51   :  { %v621_v56 = vld [vmem:[%s2403_s5 + $0x640] sm:$0xff]  ;;  %723 = vmatpush.msrb.mxu2 %v585_v55  ;;  %778 = vmatpush.msra.mxu0 %v542_v57  ;;  %v578_v55 = vld [vmem:[%s2403_s5 + $0x4e8] sm:$0xff] }
  0x52   :  { %750 = vmatpush.msrb.mxu3 %v621_v56  ;;  %v581_v59 = vld [vmem:[%s2403_s5 + $0x500] sm:$0xff]  ;;  %798 = vmatpush.msra.mxu1 %v606_v58 }
  0x53   :  { %v617_v60 = vld [vmem:[%s2403_s5 + $0x620] sm:$0xff]  ;;  %724 = vmatpush.msrb.mxu2 %v581_v59  ;;  %779 = vmatpush.msra.mxu0 %v538_v63  ;;  %v458_v63 = vld [vmem:[%s2403_s5 + $0x128] sm:$0xff] }
  0x54   :  { %751 = vmatpush.msrb.mxu3 %v617_v60  ;;  %v577_v2 = vld [vmem:[%s2403_s5 + $0x4e0] sm:$0xff]  ;;  %799 = vmatpush.msra.mxu1 %v602_v0  ;;  %v510_v0 = vld [vmem:[%s2403_s5 + $0x2c8] sm:$0xff] }
  0x55   :  { %v613_v3 = vld [vmem:[%s2403_s5 + $0x600] sm:$0xff]  ;;  %725 = vmatpush.msrb.mxu2 %v577_v2  ;;  %780 = vmatpush.msra.mxu0 %v534_v5 }
  0x56   :  { %752 = vmatpush.msrb.mxu3 %v613_v3  ;;  %v573_v9 = vld [vmem:[%s2403_s5 + $0x4c0] sm:$0xff]  ;;  %800 = vmatpush.msra.mxu1 %v598_v6 }
  0x57   :  { %726 = vmatpush.msrb.mxu2 %v573_v9  ;;  %v569_v16 = vld [vmem:[%s2403_s5 + $0x4a0] sm:$0xff]  ;;  %781 = vmatpush.msra.mxu0 %v530_v13  ;;  %v454_v9 = vld [vmem:[%s2403_s5 + $0x108] sm:$0xff] }
  0x58   :  { %757 = vmatpush.msra.mxu3 %v482_v4  ;;  %801 = vmatpush.msra.mxu1 %v594_v14  ;;  %v565_v26 = vld [vmem:[%s2403_s5 + $0x480] sm:$0xff]  ;;  %v574_v4 = vld [vmem:[%s2403_s5 + $0x4c8] sm:$0xff] }
  0x59   :  { %727 = vmatpush.msrb.mxu2 %v569_v16  ;;  %782 = vmatpush.msra.mxu0 %v526_v22  ;;  %v561_v34 = vld [vmem:[%s2403_s5 + $0x460] sm:$0xff]  ;;  %v646_v16 = vld [vmem:[%s2403_s5 + $0x708] sm:$0x3] }
  0x5a   :  { %758 = vmatpush.msra.mxu3 %v478_v12  ;;  %802 = vmatpush.msra.mxu1 %v590_v23  ;;  %v557_v48 = vld [vmem:[%s2403_s5 + $0x440] sm:$0xff]  ;;  %v502_v22 = vld [vmem:[%s2403_s5 + $0x288] sm:$0xff] }
  0x5b   :  { %728 = vmatpush.msrb.mxu2 %v565_v26  ;;  %783 = vmatpush.msra.mxu0 %v522_v28  ;;  %v549_v5 = vld [vmem:[%s2403_s5 + $0x400] sm:$0xff]  ;;  %v566_v23 = vld [vmem:[%s2403_s5 + $0x488] sm:$0xff] }
  0x5c   :  { %759 = vmatpush.msra.mxu3 %v474_v21  ;;  %803 = vmatpush.msra.mxu1 %v586_v33  ;;  %v450_v21 = vld [vmem:[%s2403_s5 + $0xe8] sm:$0xff] }
  0x5d   :  { %729 = vmatpush.msrb.mxu2 %v561_v34  ;;  %784 = vmatpush.msra.mxu0 %v518_v41 }
  0x5e   :  { %760 = vmatpush.msra.mxu3 %v470_v27  ;;  %804 = vmatpush.msra.mxu1 %v582_v42  ;;  %v638_v42 = vld [vmem:[%s2403_s5 + $0x6c8] sm:$0xff] }
  0x5f   :  { %730 = vmatpush.msrb.mxu2 %v557_v48  ;;  %785 = vmatpush.msra.mxu0 %v514_v54  ;;  %v442_v48 = vld [vmem:[%s2403_s5 + $0xa8] sm:$0xff] }
  0x60   :  { %761 = vmatpush.msra.mxu3 %v466_v40  ;;  %805 = vmatpush.msra.mxu1 %v578_v55  ;;  %v558_v54 = vld [vmem:[%s2403_s5 + $0x448] sm:$0xff] }
  0x61   :  { %786 = vmatpush.msra.mxu0 %v510_v0  ;;  %v634_v55 = vld [vmem:[%s2403_s5 + $0x6a8] sm:$0xff] }
  0x62   :  { %762 = vmatpush.msra.mxu3 %v462_v53  ;;  %806 = vmatpush.msra.mxu1 %v574_v4  ;;  %v554_v0 = vld [vmem:[%s2403_s5 + $0x428] sm:$0xff] }
  0x63   :  { %v630_v4 = vld [vmem:[%s2403_s5 + $0x688] sm:$0xff] }
  0x64   :  { %763 = vmatpush.msra.mxu3 %v458_v63 }
  0x66   :  { %764 = vmatpush.msra.mxu3 %v454_v9 }
  0x68   :  { %765 = vmatpush.msra.mxu3 %v450_v21  ;;  %v622_v21 = vld [vmem:[%s2403_s5 + $0x648] sm:$0xff] }
  0xa1   :  { %v179_v7 = vpop.f32.mrf.mxu0  ;;  %v199_v8 = vpop.f32.mrf.mxu1 }
  0xa2   :  { %v180_v10 = vadd.f32 %v179_v7, %v150_v61  ;;  %v200_v11 = vadd.f32 %v199_v8, %v151_v62  ;;  %v553_v62 = vld [vmem:[%s2403_s5 + $0x420] sm:$0xff] }
  0xa3   :  { %731 = vmatpush.msrb.mxu2 %v553_v62 }
  0xa4   :  { %vm242_vm2 = vcmp.ge.f32.partialorder %v180_v10, 0.0  ;;  %v246_v17 = vmul.f32 0.01, %v180_v10  ;;  %vm243_vm3 = vcmp.ge.f32.partialorder %v200_v11, 0.0  ;;  %v247_v18 = vmul.f32 0.01, %v200_v11 }
  0xa5   :  { %732 = vmatpush.msrb.mxu2 %v549_v5 }
  0xa6   :  { %v1732_v24 = vsel %vm242_vm2, %v180_v10, %v246_v17  ;;  %v1734_v25 = vsel %vm243_vm3, %v200_v11, %v247_v18  ;;  %v506_v10 = vld [vmem:[%s2403_s5 + $0x2a8] sm:$0xff] }
  0xa7   :  { %v255_v29 = vsel %vm254_vm1, %v1732_v24, 0.0  ;;  %v295_v30 = vmul.f32 %v1732_v24, %v1732_v24  ;;  %v262_v31 = vsel %vm254_vm1, %v1734_v25, 0.0  ;;  %v296_v32 = vmul.f32 %v1734_v25, %v1734_v25  ;;  %v570_v11 = vld [vmem:[%s2403_s5 + $0x4a8] sm:$0xff]  ;;  %787 = vmatpush.msra.mxu0 %v506_v10  ;;  %1202 = vmatpush.msk.msra.mxu2 %vm254_vm1, %v646_v16 }
  0xa8   :  { %v256_v35 = vrot.slane %v255_v29, 4  ;;  %v263_v37 = vrot.slane %v262_v31, 4  ;;  %v219_v38 = vpop.f32.mrf.mxu2  ;;  %v239_v39 = vpop.f32.mrf.mxu3  ;;  %807 = vmatpush.msra.mxu1 %v570_v11 }
  0xa9   :  { %v299_v43 = vsel %vm254_vm1, %v295_v30, 0.0  ;;  %v306_v44 = vsel %vm254_vm1, %v296_v32, 0.0  ;;  %v220_v46 = vadd.f32 %v219_v38, %v152_v19  ;;  %v240_v47 = vadd.f32 %v239_v39, %v153_v20  ;;  %v642_v30 = vld [vmem:[%s2403_s5 + $0x6e8] sm:$0xff]  ;;  %788 = vmatpush.msra.mxu0 %v502_v22 }
  0xaa   :  { %v257_v49 = vadd.f32 %v256_v35, %v255_v29  ;;  %v300_v50 = vrot.slane %v299_v43, 4  ;;  %v264_v51 = vadd.f32 %v263_v37, %v262_v31  ;;  %v307_v52 = vrot.slane %v306_v44, 4  ;;  %v446_v35 = vld [vmem:[%s2403_s5 + $0xc8] sm:$0xff]  ;;  %808 = vmatpush.msra.mxu1 %v566_v23  ;;  %825 = vmatpush.msra.mxu2 %v642_v30 }
  0xab   :  { %vm244_vm6 = vcmp.ge.f32.partialorder %v220_v46, 0.0  ;;  %v248_v56 = vmul.f32 0.01, %v220_v46  ;;  %vm245_vm7 = vcmp.ge.f32.partialorder %v240_v47, 0.0  ;;  %v249_v57 = vmul.f32 0.01, %v240_v47  ;;  %766 = vmatpush.msra.mxu3 %v446_v35  ;;  %789 = vmatpush.msra.mxu0 %v498_v36 }
  0xac   :  { %v258_v58 = vrot.slane %v257_v49, 2  ;;  %v301_v59 = vadd.f32 %v300_v50, %v299_v43  ;;  %v265_v60 = vrot.slane %v264_v51, 2  ;;  %v308_v61 = vadd.f32 %v307_v52, %v306_v44  ;;  %v562_v37 = vld [vmem:[%s2403_s5 + $0x468] sm:$0xff]  ;;  %826 = vmatpush.msra.mxu2 %v638_v42 }
  0xad   :  { %v1799_v2 = vsel %vm244_vm6, %v220_v46, %v248_v56  ;;  %v1801_v3 = vsel %vm245_vm7, %v240_v47, %v249_v57  ;;  %809 = vmatpush.msra.mxu1 %v562_v37  ;;  %767 = vmatpush.msra.mxu3 %v442_v48  ;;  %v614_v37 = vld [vmem:[%s2403_s5 + $0x608] sm:$0xff] }
  0xae   :  { %v259_v6 = vadd.f32 %v258_v58, %v257_v49  ;;  %v302_v7 = vrot.slane %v301_v59, 2  ;;  %v266_v8 = vadd.f32 %v265_v60, %v264_v51  ;;  %v309_v45 = vrot.slane %v308_v61, 2  ;;  %v494_v49 = vld [vmem:[%s2403_s5 + $0x248] sm:$0xff]  ;;  %827 = vmatpush.msra.mxu2 %v634_v55 }
  0xaf   :  { %v269_v12 = vsel %vm254_vm1, %v1799_v2, 0.0  ;;  %v297_v13 = vmul.f32 %v1799_v2, %v1799_v2  ;;  %v277_v14 = vsel %vm276_vm4, %v1801_v3, 0.0  ;;  %v298_v15 = vmul.f32 %v1801_v3, %v1801_v3  ;;  %v490_v60 = vld [vmem:[%s2403_s5 + $0x228] sm:$0xff]  ;;  %790 = vmatpush.msra.mxu0 %v494_v49  ;;  %810 = vmatpush.msra.mxu1 %v558_v54 }
  0xb0   :  { %v260_v17 = vrot.slane %v259_v6, 1  ;;  %v303_v18 = vadd.f32 %v302_v7, %v301_v59  ;;  %v267_v19 = vrot.slane %v266_v8, 1  ;;  %v310_v20 = vadd.f32 %v309_v45, %v308_v61  ;;  %v438_v59 = vld [vmem:[%s2403_s5 + $0x88] sm:$0xff]  ;;  %828 = vmatpush.msra.mxu2 %v630_v4 }
  0xb1   :  { %v270_v26 = vrot.slane %v269_v12, 4  ;;  %v313_v27 = vsel %vm254_vm1, %v297_v13, 0.0  ;;  %v278_v28 = vrot.slane %v277_v14, 4  ;;  %v320_v29 = vsel %vm276_vm4, %v298_v15, 0.0  ;;  %v486_v45 = vld [vmem:[%s2403_s5 + $0x208] sm:$0xff]  ;;  %768 = vmatpush.msra.mxu3 %v438_v59  ;;  %791 = vmatpush.msra.mxu0 %v490_v60 }
  0xb2   :  { %v261_v31 = vadd.f32 %v260_v17, %v259_v6  ;;  %v304_v32 = vrot.slane %v303_v18, 1  ;;  %v268_v33 = vadd.f32 %v267_v19, %v266_v8  ;;  %v311_v34 = vrot.slane %v310_v20, 1  ;;  %v434_v8 = vld [vmem:[%s2403_s5 + $0x68] sm:$0xff]  ;;  %811 = vmatpush.msra.mxu1 %v554_v0 }
  0xb3   :  { %v271_v38 = vadd.f32 %v270_v26, %v269_v12  ;;  %v314_v39 = vrot.slane %v313_v27, 4  ;;  %v279_v40 = vadd.f32 %v278_v28, %v277_v14  ;;  %v321_v41 = vrot.slane %v320_v29, 4  ;;  %v550_v12 = vld [vmem:[%s2403_s5 + $0x408] sm:$0xff]  ;;  %769 = vmatpush.msra.mxu3 %v434_v8  ;;  %792 = vmatpush.msra.mxu0 %v486_v45 }
  0xb4   :  { %v1857_v43 = vmul.f32 %v1796_v1, %v261_v31  ;;  %v305_v44 = vadd.f32 %v304_v32, %v303_v18  ;;  %v1860_v46 = vmul.f32 %v1796_v1, %v268_v33  ;;  %v312_v47 = vadd.f32 %v311_v34, %v310_v20  ;;  %v626_v13 = vld [vmem:[%s2403_s5 + $0x668] sm:$0xff]  ;;  %812 = vmatpush.msra.mxu1 %v550_v12 }
  0xb5   :  { %v272_v50 = vrot.slane %v271_v38, 2  ;;  %v315_v51 = vadd.f32 %v314_v39, %v313_v27  ;;  %v280_v52 = vrot.slane %v279_v40, 2  ;;  %v322_v53 = vadd.f32 %v321_v41, %v320_v29  ;;  %v430_v17 = vld [vmem:[%s2403_s5 + $0x48] sm:$0xff]  ;;  %829 = vmatpush.msra.mxu2 %v626_v13 }
  0xb6   :  { %v327_v56 = vmul.f32 %v305_v44, %v1796_v1  ;;  %v331_v57 = vmul.f32 %v1857_v43, %v1857_v43  ;;  %v328_v58 = vmul.f32 %v312_v47, %v1796_v1  ;;  %v332_v61 = vmul.f32 %v1860_v46, %v1860_v46  ;;  %v426_v27 = vld [vmem:[%s2403_s5 + $0x28] sm:$0xff]  ;;  %770 = vmatpush.msra.mxu3 %v430_v17 }
  0xb7   :  { %v273_v62 = vadd.f32 %v272_v50, %v271_v38  ;;  %v316_v63 = vrot.slane %v315_v51, 2  ;;  %v281_v6 = vadd.f32 %v280_v52, %v279_v40  ;;  %v323_v7 = vrot.slane %v322_v53, 2  ;;  %v618_v31 = vld [vmem:[%s2403_s5 + $0x628] sm:$0xff]  ;;  %830 = vmatpush.msra.mxu2 %v622_v21 }
  0xb8   :  { %v335_v5 = vsub.f32 %v327_v56, %v331_v57  ;;  %v336_v9 = vsub.f32 %v328_v58, %v332_v61  ;;  %v422_v34 = vld [vmem:[%s2403_s5 + $0x8] sm:$0xff]  ;;  %771 = vmatpush.msra.mxu3 %v426_v27  ;;  %v343_v0 = vsub.f32 %v1732_v24, %v1857_v43  ;;  %v344_v8 = vsub.f32 %v1734_v25, %v1860_v46  ;;  %v611_v25 = vld [vmem:[%s2403_s5 + $0x5f0] sm:$0xff] }
  0xb9   :  { %v274_v10 = vrot.slane %v273_v62, 1  ;;  %v317_v11 = vadd.f32 %v316_v63, %v315_v51  ;;  %v282_v15 = vrot.slane %v281_v6, 1  ;;  %v324_v16 = vadd.f32 %v323_v7, %v322_v53  ;;  %831 = vmatpush.msra.mxu2 %v618_v31  ;;  %v1934_v58 = vld [vmem:[#allocation7] sm:$0xf] }
  0xba   :  { %v339_v14 = vmax.f32 %v335_v5, 0.0  ;;  %v340_v18 = vmax.f32 %v336_v9, 0.0  ;;  %772 = vmatpush.msra.mxu3 %v422_v34  ;;  %v397_v9 = vperm.slane %v1934_v58, 1  ;;  %v398_v31 = vperm.slane %v1934_v58, 2 }
  0xbb   :  { %v275_v19 = vadd.f32 %v274_v10, %v273_v62  ;;  %v318_v20 = vrot.slane %v317_v11, 1  ;;  %v283_v23 = vadd.f32 %v282_v15, %v281_v6  ;;  %v325_v26 = vrot.slane %v324_v16, 1  ;;  %832 = vmatpush.msra.mxu2 %v614_v37  ;;  %v1936_v62 = vld [vmem:[#allocation9] sm:$0xf]  ;;  %v639_v37 = vld [vmem:[%s2403_s5 + $0x6d0] sm:$0xff] }
  0xbc   :  { %v347_v22 = vadd.f32 1e-05, %v339_v14  ;;  %v348_v28 = vadd.f32 1e-05, %v340_v18  ;;  %v396_v6 = vperm.slane %v1934_v58, 0  ;;  %v409_v13 = vperm.slane %v1936_v62, 0 }
  0xbd   :  { %v1914_v29 = vmul.f32 %v1796_v1, %v275_v19  ;;  %v319_v30 = vadd.f32 %v318_v20, %v317_v11  ;;  %v1920_v32 = vmul.f32 %v1796_v1, %v283_v23  ;;  %v326_v33 = vadd.f32 %v325_v26, %v324_v16  ;;  %v607_v26 = vld [vmem:[%s2403_s5 + $0x5d0] sm:$0xff] }
  0xbe   :  { %1219 = vrsqrt.f32 %v347_v22  ;;  %vm357_vm8 = vweird.f32 %v347_v22  ;;  %vm367_vm10 = vweird.f32 %v348_v28  ;;  %v410_v24 = vperm.slane %v1936_v62, 1 }
  0xbf   :  { %1221 = vrsqrt.f32 %v348_v28  ;;  %v329_v35 = vmul.f32 %v319_v30, %v1796_v1  ;;  %v333_v36 = vmul.f32 %v1914_v29, %v1914_v29  ;;  %v330_v38 = vmul.f32 %v326_v33, %v1796_v1  ;;  %v643_v30 = vld [vmem:[%s2403_s5 + $0x6f0] sm:$0xff] }
  0xc0   :  { %v334_v39 = vmul.f32 %v1920_v32, %v1920_v32  ;;  %v345_v27 = vsub.f32 %v1799_v2, %v1914_v29  ;;  %v346_v34 = vsub.f32 %v1801_v3, %v1920_v32  ;;  %v603_v2 = vld [vmem:[%s2403_s5 + $0x5b0] sm:$0xff]  ;;  %v399_v29 = vperm.slane %v1934_v58, 3 }
  0xc1   :  { %v337_v40 = vsub.f32 %v329_v35, %v333_v36  ;;  %v412_v32 = vperm.slane %v1936_v62, 3  ;;  %v587_v58 = vld [vmem:[%s2403_s5 + $0x530] sm:$0xff] }
  0xc2   :  { %v338_v41 = vsub.f32 %v330_v38, %v334_v39  ;;  %v411_v38 = vperm.slane %v1936_v62, 2  ;;  %v599_v39 = vld [vmem:[%s2403_s5 + $0x590] sm:$0xff] }
  0xc3   :  { %v341_v42 = vmax.f32 %v337_v40, 0.0  ;;  %v467_v62 = vld [vmem:[%s2403_s5 + $0x170] sm:$0xff] }
  0xc4   :  { %v1220_v44 = vpop.eup %1219  ;;  %v342_v47 = vmax.f32 %v338_v41, 0.0  ;;  %v635_v41 = vld [vmem:[%s2403_s5 + $0x6b0] sm:$0xff] }
  0xc5   :  { %v1222_v48 = vpop.eup %1221  ;;  %v352_v49 = vmul.f32 %v1220_v44, %v347_v22  ;;  %v349_v50 = vadd.f32 1e-05, %v341_v42  ;;  %vm358_vm9 = vweird.f32 %v1220_v44  ;;  %v647_v22 = vld [vmem:[%s2403_s5 + $0x710] sm:$0x3] }
  0xc6   :  { %v362_v51 = vmul.f32 %v1222_v48, %v348_v28  ;;  %v350_v52 = vadd.f32 1e-05, %v342_v47  ;;  %vm368_vm11 = vweird.f32 %v1222_v48  ;;  %vm359_vm12 = vmor %vm357_vm8, %vm358_vm9  ;;  %v483_v47 = vld [vmem:[%s2403_s5 + $0x1f0] sm:$0xff] }
  0xc7   :  { %v353_v53 = vmul.f32 %v1220_v44, %v352_v49  ;;  %1223 = vrsqrt.f32 %v349_v50  ;;  %vm369_vm13 = vmor %vm367_vm10, %vm368_vm11  ;;  %vm377_vm0 = vweird.f32 %v349_v50  ;;  %v547_v49 = vld [vmem:[%s2403_s5 + $0x3f0] sm:$0xff]  ;;  %vm1030_vm10 = vcmask 123904  }
  0xc8   :  { %v363_v54 = vmul.f32 %v1222_v48, %v362_v51  ;;  %1225 = vrsqrt.f32 %v350_v52  ;;  %vm387_vm3 = vweird.f32 %v350_v52  ;;  %v479_v51 = vld [vmem:[%s2403_s5 + $0x1d0] sm:$0xff] }
  0xc9   :  { %v354_v55 = vmul.f32 0.5, %v353_v53  ;;  %v543_v53 = vld [vmem:[%s2403_s5 + $0x3d0] sm:$0xff] }
  0xca   :  { %v364_v56 = vmul.f32 0.5, %v363_v54  ;;  %v591_v54 = vld [vmem:[%s2403_s5 + $0x550] sm:$0xff] }
  0xcb   :  { %v355_v57 = vsub.f32 1.5, %v354_v55  ;;  %v475_v55 = vld [vmem:[%s2403_s5 + $0x1b0] sm:$0xff] }
  0xcc   :  { %v365_v59 = vsub.f32 1.5, %v364_v56  ;;  %v627_v56 = vld [vmem:[%s2403_s5 + $0x670] sm:$0xff] }
  0xcd   :  { %v1224_v60 = vpop.eup %1223  ;;  %v356_v61 = vmul.f32 %v1220_v44, %v355_v57  ;;  %v539_v57 = vld [vmem:[%s2403_s5 + $0x3b0] sm:$0xff] }
  0xce   :  { %v1226_v63 = vpop.eup %1225  ;;  %v366_v4 = vmul.f32 %v1222_v48, %v365_v59  ;;  %v372_v5 = vmul.f32 %v1224_v60, %v349_v50  ;;  %vm378_vm14 = vweird.f32 %v1224_v60  ;;  %v595_v50 = vld [vmem:[%s2403_s5 + $0x570] sm:$0xff] }
  0xcf   :  { %v360_v7 = vsel %vm359_vm12, %v1220_v44, %v356_v61  ;;  %v382_v45 = vmul.f32 %v1226_v63, %v350_v52  ;;  %vm388_vm15 = vweird.f32 %v1226_v63  ;;  %vm379_vm2 = vmor %vm377_vm0, %vm378_vm14  ;;  %v631_v52 = vld [vmem:[%s2403_s5 + $0x690] sm:$0xff] }
  0xd0   :  { %v391_v10 = vmul.f32 %v360_v7, %v343_v0  ;;  %v370_v11 = vsel %vm369_vm13, %v1222_v48, %v366_v4  ;;  %v373_v12 = vmul.f32 %v1224_v60, %v372_v5  ;;  %vm389_vm4 = vmor %vm387_vm3, %vm388_vm15  ;;  %v471_v59 = vld [vmem:[%s2403_s5 + $0x190] sm:$0xff] }
  0xd1   :  { %v392_v14 = vmul.f32 %v370_v11, %v344_v8  ;;  %v383_v15 = vmul.f32 %v1226_v63, %v382_v45  ;;  %v535_v61 = vld [vmem:[%s2403_s5 + $0x390] sm:$0xff] }
  0xd2   :  { %v374_v43 = vmul.f32 0.5, %v373_v12  ;;  %v404_v16 = vmul.f32 %v396_v6, %v391_v10  ;;  %v583_v0 = vld [vmem:[%s2403_s5 + $0x510] sm:$0xff]  ;;  %v484_v10 = vld [vmem:[%s2403_s5 + $0x1f8] sm:$0xff] }
  0xd3   :  { %v384_v17 = vmul.f32 0.5, %v383_v15  ;;  %v405_v18 = vmul.f32 %v397_v9, %v392_v14  ;;  %v619_v4 = vld [vmem:[%s2403_s5 + $0x630] sm:$0xff]  ;;  %v480_v14 = vld [vmem:[%s2403_s5 + $0x1d8] sm:$0xff] }
  0xd4   :  { %v375_v19 = vsub.f32 1.5, %v374_v43  ;;  %v1946_v20 = vadd.f32 %v409_v13, %v404_v16  ;;  %v463_v5 = vld [vmem:[%s2403_s5 + $0x150] sm:$0xff]  ;;  %v476_v16 = vld [vmem:[%s2403_s5 + $0x1b8] sm:$0xff] }
  0xd5   :  { %v385_v46 = vsub.f32 1.5, %v384_v17  ;;  %v1951_v21 = vadd.f32 %v410_v24, %v405_v18  ;;  %v527_v6 = vld [vmem:[%s2403_s5 + $0x350] sm:$0xff] }
  0xd6   :  { %v376_v23 = vmul.f32 %v1224_v60, %v375_v19  ;;  %693 = vmatmul.f32.vlgmr.msrb.gmra.mxu0 %v1946_v20  ;;  %v579_v7 = vld [vmem:[%s2403_s5 + $0x4f0] sm:$0xff] }
  0xd7   :  { %v386_v28 = vmul.f32 %v1226_v63, %v385_v46  ;;  %713 = vmatmul.f32.vlgmr.msrb.gmra.mxu1 %v1951_v21  ;;  %877 = vmatpush.msrb.mxu0 %v611_v25  ;;  %v615_v8 = vld [vmem:[%s2403_s5 + $0x610] sm:$0xff]  ;;  %v472_v25 = vld [vmem:[%s2403_s5 + $0x198] sm:$0xff] }
  0xd8   :  { %v380_v33 = vsel %vm379_vm2, %v1224_v60, %v376_v23  ;;  %1204 = vmatpush.msk.msrb.mxu1 %vm254_vm1, %v647_v22  ;;  %v623_v60 = vld [vmem:[%s2403_s5 + $0x650] sm:$0xff] }
  0xd9   :  { %v393_v35 = vmul.f32 %v380_v33, %v345_v27  ;;  %v390_v36 = vsel %vm389_vm4, %v1226_v63, %v386_v28  ;;  %878 = vmatpush.msrb.mxu0 %v607_v26  ;;  %v531_v63 = vld [vmem:[%s2403_s5 + $0x370] sm:$0xff]  ;;  %v468_v26 = vld [vmem:[%s2403_s5 + $0x178] sm:$0xff] }
  0xda   :  { %v394_v3 = vmul.f32 %v390_v36, %v346_v34  ;;  %905 = vmatpush.msrb.mxu1 %v643_v30  ;;  %v459_v45 = vld [vmem:[%s2403_s5 + $0x130] sm:$0xff] }
  0xdb   :  { %879 = vmatpush.msrb.mxu0 %v603_v2  ;;  %v406_v40 = vmul.f32 %v398_v31, %v393_v35  ;;  %v523_v9 = vld [vmem:[%s2403_s5 + $0x330] sm:$0xff]  ;;  %v464_v31 = vld [vmem:[%s2403_s5 + $0x158] sm:$0xff] }
  0xdc   :  { %906 = vmatpush.msrb.mxu1 %v639_v37  ;;  %v407_v42 = vmul.f32 %v399_v29, %v394_v3  ;;  %v575_v11 = vld [vmem:[%s2403_s5 + $0x4d0] sm:$0xff]  ;;  %v460_v29 = vld [vmem:[%s2403_s5 + $0x138] sm:$0xff] }
  0xdd   :  { %v1986_v44 = vadd.f32 %v411_v38, %v406_v40  ;;  %880 = vmatpush.msrb.mxu0 %v599_v39  ;;  %v455_v12 = vld [vmem:[%s2403_s5 + $0x110] sm:$0xff]  ;;  %v456_v37 = vld [vmem:[%s2403_s5 + $0x118] sm:$0xff] }
  0xde   :  { %v1991_v48 = vadd.f32 %v412_v32, %v407_v42  ;;  %907 = vmatpush.msrb.mxu1 %v635_v41  ;;  %793 = vmatmul.f32.vlgmr.msra.gmra.mxu0 %v1951_v21  ;;  %v519_v13 = vld [vmem:[%s2403_s5 + $0x310] sm:$0xff]  ;;  %v648_v38 = vld [vmem:[%s2403_s5 + $0x718] sm:$0x3] }
  0xdf   :  { %733 = vmatmul.f32.vlgmr.msrb.gmra.mxu2 %v1986_v44  ;;  %813 = vmatmul.f32.vlgmr.msra.gmra.mxu1 %v1986_v44  ;;  %v571_v15 = vld [vmem:[%s2403_s5 + $0x4b0] sm:$0xff]  ;;  %v452_v39 = vld [vmem:[%s2403_s5 + $0xf8] sm:$0xff] }
  0xe0   :  { %1201 = vmatmul.msk.f32.vlgmr.msrb.gmra.mxu3 %vm661_vm5, %v1991_v48  ;;  %837 = vmatpush.msrb.mxu2 %v483_v47  ;;  %v451_v24 = vld [vmem:[%s2403_s5 + $0xf0] sm:$0xff]  ;;  %v644_v40 = vld [vmem:[%s2403_s5 + $0x6f8] sm:$0xff] }
  0xe1   :  { %857 = vmatpush.msrb.mxu3 %v547_v49  ;;  %881 = vmatpush.msrb.mxu0 %v595_v50  ;;  %v515_v43 = vld [vmem:[%s2403_s5 + $0x2f0] sm:$0xff]  ;;  %v448_v47 = vld [vmem:[%s2403_s5 + $0xd8] sm:$0xff] }
  0xe2   :  { %838 = vmatpush.msrb.mxu2 %v479_v51  ;;  %908 = vmatpush.msrb.mxu1 %v631_v52  ;;  %v567_v17 = vld [vmem:[%s2403_s5 + $0x490] sm:$0xff]  ;;  %v640_v49 = vld [vmem:[%s2403_s5 + $0x6d8] sm:$0xff] }
  0xe3   :  { %858 = vmatpush.msrb.mxu3 %v543_v53  ;;  %882 = vmatpush.msrb.mxu0 %v591_v54  ;;  %v447_v18 = vld [vmem:[%s2403_s5 + $0xd0] sm:$0xff]  ;;  %v444_v51 = vld [vmem:[%s2403_s5 + $0xb8] sm:$0xff] }
  0xe4   :  { %839 = vmatpush.msrb.mxu2 %v475_v55  ;;  %909 = vmatpush.msrb.mxu1 %v627_v56  ;;  %v511_v19 = vld [vmem:[%s2403_s5 + $0x2d0] sm:$0xff]  ;;  %v548_v52 = vld [vmem:[%s2403_s5 + $0x3f8] sm:$0xff] }
  0xe5   :  { %859 = vmatpush.msrb.mxu3 %v539_v57  ;;  %883 = vmatpush.msrb.mxu0 %v587_v58  ;;  %v563_v46 = vld [vmem:[%s2403_s5 + $0x470] sm:$0xff]  ;;  %v612_v53 = vld [vmem:[%s2403_s5 + $0x5f8] sm:$0xff] }
  0xe6   :  { %840 = vmatpush.msrb.mxu2 %v471_v59  ;;  %910 = vmatpush.msrb.mxu1 %v623_v60  ;;  %v443_v22 = vld [vmem:[%s2403_s5 + $0xb0] sm:$0xff]  ;;  %v636_v54 = vld [vmem:[%s2403_s5 + $0x6b8] sm:$0xff] }
  0xe7   :  { %860 = vmatpush.msrb.mxu3 %v535_v61  ;;  %1203 = vmatmul.msk.f32.vlgmr.msra.gmra.mxu2 %vm661_vm5, %v1991_v48  ;;  %v507_v23 = vld [vmem:[%s2403_s5 + $0x2b0] sm:$0xff]  ;;  %v440_v55 = vld [vmem:[%s2403_s5 + $0x98] sm:$0xff] }
  0xe8   :  { %773 = vmatmul.f32.vlgmr.msra.gmra.mxu3 %v1946_v20  ;;  %841 = vmatpush.msrb.mxu2 %v467_v62  ;;  %v559_v27 = vld [vmem:[%s2403_s5 + $0x450] sm:$0xff]  ;;  %v544_v56 = vld [vmem:[%s2403_s5 + $0x3d8] sm:$0xff] }
  0xe9   :  { %861 = vmatpush.msrb.mxu3 %v531_v63  ;;  %884 = vmatpush.msrb.mxu0 %v583_v0  ;;  %v439_v28 = vld [vmem:[%s2403_s5 + $0x90] sm:$0xff]  ;;  %v608_v57 = vld [vmem:[%s2403_s5 + $0x5d8] sm:$0xff] }
  0xea   :  { %911 = vmatpush.msrb.mxu1 %v619_v4  ;;  %842 = vmatpush.msrb.mxu2 %v463_v5  ;;  %v503_v30 = vld [vmem:[%s2403_s5 + $0x290] sm:$0xff]  ;;  %v632_v58 = vld [vmem:[%s2403_s5 + $0x698] sm:$0xff] }
  0xeb   :  { %862 = vmatpush.msrb.mxu3 %v527_v6  ;;  %885 = vmatpush.msrb.mxu0 %v579_v7  ;;  %v555_v33 = vld [vmem:[%s2403_s5 + $0x430] sm:$0xff]  ;;  %v436_v59 = vld [vmem:[%s2403_s5 + $0x78] sm:$0xff] }
  0xec   :  { %912 = vmatpush.msrb.mxu1 %v615_v8  ;;  %843 = vmatpush.msrb.mxu2 %v459_v45  ;;  %v435_v34 = vld [vmem:[%s2403_s5 + $0x70] sm:$0xff]  ;;  %v540_v60 = vld [vmem:[%s2403_s5 + $0x3b8] sm:$0xff] }
  0xed   :  { %1205 = vmatmul.msk.f32.vlgmr.msrb.gmra.mxu1 %vm661_vm5, %v1991_v48  ;;  %863 = vmatpush.msrb.mxu3 %v523_v9  ;;  %v499_v2 = vld [vmem:[%s2403_s5 + $0x270] sm:$0xff]  ;;  %v604_v61 = vld [vmem:[%s2403_s5 + $0x5b8] sm:$0xff] }
  0xee   :  { %917 = vmatpush.msra.mxu1 %v484_v10  ;;  %886 = vmatpush.msrb.mxu0 %v575_v11  ;;  %v551_v35 = vld [vmem:[%s2403_s5 + $0x410] sm:$0xff]  ;;  %v628_v62 = vld [vmem:[%s2403_s5 + $0x678] sm:$0xff] }
  0xef   :  { %844 = vmatpush.msrb.mxu2 %v455_v12  ;;  %864 = vmatpush.msrb.mxu3 %v519_v13  ;;  %v431_v36 = vld [vmem:[%s2403_s5 + $0x50] sm:$0xff]  ;;  %v432_v63 = vld [vmem:[%s2403_s5 + $0x58] sm:$0xff] }
  0xf0   :  { %918 = vmatpush.msra.mxu1 %v480_v14  ;;  %887 = vmatpush.msrb.mxu0 %v571_v15  ;;  %v495_v3 = vld [vmem:[%s2403_s5 + $0x250] sm:$0xff]  ;;  %v536_v0 = vld [vmem:[%s2403_s5 + $0x398] sm:$0xff] }
  0xf1   :  { %845 = vmatpush.msrb.mxu2 %v451_v24  ;;  %865 = vmatpush.msrb.mxu3 %v515_v43  ;;  %v427_v32 = vld [vmem:[%s2403_s5 + $0x30] sm:$0xff]  ;;  %v600_v4 = vld [vmem:[%s2403_s5 + $0x598] sm:$0xff] }
  0xf2   :  { %919 = vmatpush.msra.mxu1 %v476_v16  ;;  %888 = vmatpush.msrb.mxu0 %v567_v17  ;;  %v491_v41 = vld [vmem:[%s2403_s5 + $0x230] sm:$0xff]  ;;  %v624_v5 = vld [vmem:[%s2403_s5 + $0x658] sm:$0xff] }
  0xf3   :  { %846 = vmatpush.msrb.mxu2 %v447_v18  ;;  %866 = vmatpush.msrb.mxu3 %v511_v19  ;;  %v423_v42 = vld [vmem:[%s2403_s5 + $0x10] sm:$0xff]  ;;  %v428_v6 = vld [vmem:[%s2403_s5 + $0x38] sm:$0xff] }
  0xf4   :  { %920 = vmatpush.msra.mxu1 %v472_v25  ;;  %889 = vmatpush.msrb.mxu0 %v563_v46  ;;  %v487_v50 = vld [vmem:[%s2403_s5 + $0x210] sm:$0xff]  ;;  %v532_v7 = vld [vmem:[%s2403_s5 + $0x378] sm:$0xff] }
  0xf5   :  { %847 = vmatpush.msrb.mxu2 %v443_v22  ;;  %867 = vmatpush.msrb.mxu3 %v507_v23  ;;  %v596_v8 = vld [vmem:[%s2403_s5 + $0x578] sm:$0xff] }
  0xf6   :  { %921 = vmatpush.msra.mxu1 %v468_v26  ;;  %890 = vmatpush.msrb.mxu0 %v559_v27  ;;  %v620_v45 = vld [vmem:[%s2403_s5 + $0x638] sm:$0xff] }
  0xf7   :  { %848 = vmatpush.msrb.mxu2 %v439_v28  ;;  %868 = vmatpush.msrb.mxu3 %v503_v30  ;;  %v424_v9 = vld [vmem:[%s2403_s5 + $0x18] sm:$0xff] }
  0xf8   :  { %922 = vmatpush.msra.mxu1 %v464_v31  ;;  %891 = vmatpush.msrb.mxu0 %v555_v33  ;;  %v528_v10 = vld [vmem:[%s2403_s5 + $0x358] sm:$0xff] }
  0xf9   :  { %849 = vmatpush.msrb.mxu2 %v435_v34  ;;  %869 = vmatpush.msrb.mxu3 %v499_v2  ;;  %v592_v11 = vld [vmem:[%s2403_s5 + $0x558] sm:$0xff]  ;;  %v2327_v2 = vld [vmem:[#allocation10] sm:$0xf] }
  0xfa   :  { %923 = vmatpush.msra.mxu1 %v460_v29  ;;  %892 = vmatpush.msrb.mxu0 %v551_v35  ;;  %v616_v12 = vld [vmem:[%s2403_s5 + $0x618] sm:$0xff]  ;;  %v654_v35 = vperm.slane %v2327_v2, 1 }
  0xfb   :  { %893 = vmatmul.f32.vlgmr.msrb.gmra.mxu0 %v1986_v44  ;;  %850 = vmatpush.msrb.mxu2 %v431_v36  ;;  %v524_v13 = vld [vmem:[%s2403_s5 + $0x338] sm:$0xff] }
  0xfc   :  { %924 = vmatpush.msra.mxu1 %v456_v37  ;;  %1206 = vmatpush.msk.msra.mxu0 %vm254_vm1, %v648_v38  ;;  %v588_v14 = vld [vmem:[%s2403_s5 + $0x538] sm:$0xff] }
  0xfd   :  { %870 = vmatpush.msrb.mxu3 %v495_v3  ;;  %851 = vmatpush.msrb.mxu2 %v427_v32  ;;  %v520_v15 = vld [vmem:[%s2403_s5 + $0x318] sm:$0xff]  ;;  %v653_v3 = vperm.slane %v2327_v2, 0 }
  0xfe   :  { %925 = vmatpush.msra.mxu1 %v452_v39  ;;  %985 = vmatpush.msra.mxu0 %v644_v40  ;;  %v584_v24 = vld [vmem:[%s2403_s5 + $0x518] sm:$0xff] }
  0xff   :  { %871 = vmatpush.msrb.mxu3 %v491_v41  ;;  %852 = vmatpush.msrb.mxu2 %v423_v42  ;;  %v516_v43 = vld [vmem:[%s2403_s5 + $0x2f8] sm:$0xff] }
 0x100   :  { %926 = vmatpush.msra.mxu1 %v448_v47  ;;  %986 = vmatpush.msra.mxu0 %v640_v49  ;;  %v576_v16 = vld [vmem:[%s2403_s5 + $0x4d8] sm:$0xff] }
 0x101   :  { %872 = vmatpush.msrb.mxu3 %v487_v50  ;;  %853 = vmatmul.f32.vlgmr.msrb.gmra.mxu2 %v1946_v20  ;;  %v508_v17 = vld [vmem:[%s2403_s5 + $0x2b8] sm:$0xff] }
 0x102   :  { %873 = vmatmul.f32.vlgmr.msrb.gmra.mxu3 %v1951_v21  ;;  %927 = vmatpush.msra.mxu1 %v444_v51  ;;  %v572_v18 = vld [vmem:[%s2403_s5 + $0x4b8] sm:$0xff] }
 0x103   :  { %937 = vmatpush.msra.mxu2 %v548_v52  ;;  %957 = vmatpush.msra.mxu3 %v612_v53  ;;  %v504_v19 = vld [vmem:[%s2403_s5 + $0x298] sm:$0xff] }
 0x104   :  { %987 = vmatpush.msra.mxu0 %v636_v54  ;;  %928 = vmatpush.msra.mxu1 %v440_v55  ;;  %v568_v25 = vld [vmem:[%s2403_s5 + $0x498] sm:$0xff] }
 0x105   :  { %938 = vmatpush.msra.mxu2 %v544_v56  ;;  %958 = vmatpush.msra.mxu3 %v608_v57  ;;  %v500_v46 = vld [vmem:[%s2403_s5 + $0x278] sm:$0xff]  ;;  %v655_v56 = vperm.slane %v2327_v2, 2 }
 0x106   :  { %988 = vmatpush.msra.mxu0 %v632_v58  ;;  %929 = vmatpush.msra.mxu1 %v436_v59  ;;  %v564_v22 = vld [vmem:[%s2403_s5 + $0x478] sm:$0xff] }
 0x107   :  { %939 = vmatpush.msra.mxu2 %v540_v60  ;;  %959 = vmatpush.msra.mxu3 %v604_v61  ;;  %v496_v23 = vld [vmem:[%s2403_s5 + $0x258] sm:$0xff] }
 0x108   :  { %989 = vmatpush.msra.mxu0 %v628_v62  ;;  %930 = vmatpush.msra.mxu1 %v432_v63  ;;  %v560_v26 = vld [vmem:[%s2403_s5 + $0x458] sm:$0xff] }
 0x109   :  { %940 = vmatpush.msra.mxu2 %v536_v0  ;;  %960 = vmatpush.msra.mxu3 %v600_v4  ;;  %v492_v27 = vld [vmem:[%s2403_s5 + $0x238] sm:$0xff] }
 0x10a   :  { %990 = vmatpush.msra.mxu0 %v624_v5  ;;  %931 = vmatpush.msra.mxu1 %v428_v6  ;;  %v556_v28 = vld [vmem:[%s2403_s5 + $0x438] sm:$0xff] }
 0x10b   :  { %941 = vmatpush.msra.mxu2 %v532_v7  ;;  %961 = vmatpush.msra.mxu3 %v596_v8  ;;  %v488_v30 = vld [vmem:[%s2403_s5 + $0x218] sm:$0xff] }
 0x10c   :  { %991 = vmatpush.msra.mxu0 %v620_v45  ;;  %932 = vmatpush.msra.mxu1 %v424_v9  ;;  %v552_v31 = vld [vmem:[%s2403_s5 + $0x418] sm:$0xff] }
 0x10d   :  { %942 = vmatpush.msra.mxu2 %v528_v10  ;;  %962 = vmatpush.msra.mxu3 %v592_v11 }
 0x10e   :  { %992 = vmatpush.msra.mxu0 %v616_v12  ;;  %933 = vmatmul.f32.vlgmr.msra.gmra.mxu1 %v1946_v20  ;;  %v580_v20 = vld [vmem:[%s2403_s5 + $0x4f8] sm:$0xff] }
 0x10f   :  { %1207 = vmatmul.msk.f32.vlgmr.msra.gmra.mxu0 %vm661_vm5, %v1991_v48  ;;  %943 = vmatpush.msra.mxu2 %v524_v13  ;;  %v512_v48 = vld [vmem:[%s2403_s5 + $0x2d8] sm:$0xff] }
 0x110   :  { %963 = vmatpush.msra.mxu3 %v588_v14 }
 0x111   :  { %944 = vmatpush.msra.mxu2 %v520_v15 }
 0x112   :  { %964 = vmatpush.msra.mxu3 %v584_v24 }
 0x113   :  { %945 = vmatpush.msra.mxu2 %v516_v43 }
 0x114   :  { %965 = vmatpush.msra.mxu3 %v580_v20 }
 0x115   :  { %946 = vmatpush.msra.mxu2 %v512_v48 }
 0x116   :  { %966 = vmatpush.msra.mxu3 %v576_v16 }
 0x117   :  { %947 = vmatpush.msra.mxu2 %v508_v17 }
 0x118   :  { %967 = vmatpush.msra.mxu3 %v572_v18 }
 0x119   :  { %948 = vmatpush.msra.mxu2 %v504_v19 }
 0x11a   :  { %968 = vmatpush.msra.mxu3 %v568_v25 }
 0x11b   :  { %949 = vmatpush.msra.mxu2 %v500_v46 }
 0x11c   :  { %969 = vmatpush.msra.mxu3 %v564_v22 }
 0x11d   :  { %950 = vmatpush.msra.mxu2 %v496_v23 }
 0x11e   :  { %970 = vmatpush.msra.mxu3 %v560_v26 }
 0x11f   :  { %951 = vmatpush.msra.mxu2 %v492_v27 }
 0x120   :  { %971 = vmatpush.msra.mxu3 %v556_v28 }
 0x121   :  { %952 = vmatpush.msra.mxu2 %v488_v30 }
 0x122   :  { %972 = vmatpush.msra.mxu3 %v552_v31  ;;  %953 = vmatmul.f32.vlgmr.msra.gmra.mxu2 %v1951_v21 }
 0x123   :  { %973 = vmatmul.f32.vlgmr.msra.gmra.mxu3 %v1986_v44 }
 0x153   :  { %v694_v33 = vpop.f32.mrf.mxu0 }
 0x154   :  { %v714_v29 = vpop.f32.mrf.mxu1  ;;  %v695_v40 = vadd.f32 %v694_v33, %v653_v3 }
 0x156   :  { %v715_v21 = vadd.f32 %v714_v29, %v695_v40 }
 0x15b   :  { %v794_v32 = vpop.f32.mrf.mxu0 }
 0x15c   :  { %v814_v41 = vpop.f32.mrf.mxu1 }
 0x162   :  { %v734_v36 = vpop.f32.mrf.mxu2 }
 0x163   :  { %v754_v34 = vpop.f32.mrf.mxu3  ;;  %v735_v49 = vadd.f32 %v734_v36, %v715_v21 }
 0x165   :  { %v755_v51 = vadd.f32 %v754_v34, %v735_v49 }
 0x167   :  { %v1001_v53 = vmul.f32 0.01, %v755_v51  ;;  %vm997_vm7 = vcmp.ge.f32.partialorder %v755_v51, 0.0 }
 0x169   :  { %v2338_v57 = vsel %vm997_vm7, %v755_v51, %v1001_v53  ;;  %v656_v53 = vperm.slane %v2327_v2, 3 }
 0x16a   :  { %v834_v47 = vpop.f32.mrf.mxu2  ;;  %v1009_v62 = vsel %vm254_vm1, %v2338_v57, 0.0  ;;  %v1042_v63 = vmul.f32 %v2338_v57, %v2338_v57  ;;  %v914_v10 = vpop.f32.mrf.mxu1 }
 0x16b   :  { %v774_v37 = vpop.f32.mrf.mxu3  ;;  %v1010_v8 = vrot.slane %v1009_v62, 4 }
 0x16c   :  { %v775_v38 = vadd.f32 %v774_v37, %v654_v35  ;;  %v1046_v9 = vsel %vm254_vm1, %v1042_v63, 0.0 }
 0x16d   :  { %v1011_v14 = vadd.f32 %v1010_v8, %v1009_v62  ;;  %v1047_v15 = vrot.slane %v1046_v9, 4 }
 0x16e   :  { %v795_v39 = vadd.f32 %v794_v32, %v775_v38 }
 0x16f   :  { %v1012_v18 = vrot.slane %v1011_v14, 2  ;;  %v1048_v19 = vadd.f32 %v1047_v15, %v1046_v9 }
 0x170   :  { %v815_v42 = vadd.f32 %v814_v41, %v795_v39 }
 0x171   :  { %v1013_v28 = vadd.f32 %v1012_v18, %v1011_v14  ;;  %v1049_v30 = vrot.slane %v1048_v19, 2 }
 0x172   :  { %v835_v44 = vadd.f32 %v834_v47, %v815_v42 }
 0x173   :  { %v1014_v37 = vrot.slane %v1013_v28, 1  ;;  %v1050_v38 = vadd.f32 %v1049_v30, %v1048_v19 }
 0x174   :  { %v1002_v50 = vmul.f32 0.01, %v835_v44  ;;  %vm998_vm6 = vcmp.ge.f32.partialorder %v835_v44, 0.0 }
 0x175   :  { %v1015_v21 = vadd.f32 %v1014_v37, %v1013_v28  ;;  %v1051_v47 = vrot.slane %v1050_v38, 1 }
 0x176   :  { %v2331_v52 = vsel %vm998_vm6, %v835_v44, %v1002_v50 }
 0x177   :  { %v1016_v54 = vsel %vm254_vm1, %v2331_v52, 0.0  ;;  %v1043_v55 = vmul.f32 %v2331_v52, %v2331_v52 }
 0x178   :  { %v1017_v58 = vrot.slane %v1016_v54, 4  ;;  %v894_v7 = vpop.f32.mrf.mxu0 }
 0x179   :  { %v1053_v60 = vsel %vm254_vm1, %v1043_v55, 0.0  ;;  %v1052_v55 = vadd.f32 %v1051_v47, %v1050_v38 }
 0x17a   :  { %v1018_v5 = vadd.f32 %v1017_v58, %v1016_v54  ;;  %v1054_v6 = vrot.slane %v1053_v60, 4  ;;  %v2364_v54 = vmul.f32 %v1015_v21, %v1796_v1 }
 0x17b   :  { %v1074_v62 = vmul.f32 %v1052_v55, %v1796_v1 }
 0x17c   :  { %v1019_v12 = vrot.slane %v1018_v5, 2  ;;  %v1055_v13 = vadd.f32 %v1054_v6, %v1053_v60  ;;  %v1078_v63 = vmul.f32 %v2364_v54, %v2364_v54 }
 0x17e   :  { %v1020_v20 = vadd.f32 %v1019_v12, %v1018_v5  ;;  %v1056_v48 = vrot.slane %v1055_v13, 2  ;;  %v1082_v8 = vsub.f32 %v1074_v62, %v1078_v63 }
 0x180   :  { %v1021_v26 = vrot.slane %v1020_v20, 1  ;;  %v1057_v27 = vadd.f32 %v1056_v48, %v1055_v13  ;;  %v1086_v13 = vmax.f32 %v1082_v8, 0.0 }
 0x182   :  { %v1022_v29 = vadd.f32 %v1021_v26, %v1020_v20  ;;  %v1058_v35 = vrot.slane %v1057_v27, 1 }
 0x184   :  { %v854_v59 = vpop.f32.mrf.mxu2  ;;  %v2354_v40 = vmul.f32 %v1022_v29, %v1796_v1  ;;  %v1059_v41 = vadd.f32 %v1058_v35, %v1057_v27 }
 0x185   :  { %v855_v61 = vadd.f32 %v854_v59, %v655_v56  ;;  %v874_v0 = vpop.f32.mrf.mxu3 }
 0x186   :  { %v1075_v50 = vmul.f32 %v1059_v41, %v1796_v1  ;;  %v1079_v51 = vmul.f32 %v2354_v40, %v2354_v40 }
 0x187   :  { %v875_v4 = vadd.f32 %v874_v0, %v855_v61 }
 0x188   :  { %v1083_v60 = vsub.f32 %v1075_v50, %v1079_v51 }
 0x189   :  { %v895_v45 = vadd.f32 %v894_v7, %v875_v4 }
 0x18a   :  { %v1087_v6 = vmax.f32 %v1083_v60, 0.0 }
 0x18b   :  { %v915_v11 = vadd.f32 %v914_v10, %v895_v45  ;;  %v934_v56 = vpop.f32.mrf.mxu1 }
 0x18c   :  { %v935_v61 = vadd.f32 %v934_v56, %v656_v53  ;;  %v994_v45 = vpop.f32.mrf.mxu0 }
 0x18d   :  { %vm999_vm8 = vcmp.ge.f32.partialorder %v915_v11, 0.0  ;;  %v1003_v24 = vmul.f32 0.01, %v915_v11 }
 0x18f   :  { %v2346_v43 = vsel %vm999_vm8, %v915_v11, %v1003_v24  ;;  %v1095_v11 = vadd.f32 1e-05, %v1087_v6  ;;  %vm1181_vm8 = vcmask 1043458  }
 0x190   :  { %v1023_v16 = vsel %vm254_vm1, %v2346_v43, 0.0  ;;  %v1044_v17 = vmul.f32 %v2346_v43, %v2346_v43 }
 0x191   :  { %v1024_v25 = vrot.slane %v1023_v16, 4  ;;  %1227 = vrsqrt.f32 %v1095_v11  ;;  %vm1114_vm12 = vweird.f32 %v1095_v11 }
 0x192   :  { %v1060_v46 = vsel %vm254_vm1, %v1044_v17, 0.0 }
 0x193   :  { %v1025_v22 = vadd.f32 %v1024_v25, %v1023_v16  ;;  %v1061_v23 = vrot.slane %v1060_v46, 4  ;;  %v1094_v16 = vadd.f32 1e-05, %v1086_v13  ;;  %v1090_v13 = vsub.f32 %v2338_v57, %v2364_v54 }
 0x195   :  { %v1026_v31 = vrot.slane %v1025_v22, 2  ;;  %v1062_v33 = vadd.f32 %v1061_v23, %v1060_v46  ;;  %vm1104_vm3 = vweird.f32 %v1094_v16 }
 0x197   :  { %v1027_v34 = vadd.f32 %v1026_v31, %v1025_v22  ;;  %v1063_v36 = vrot.slane %v1062_v33, 2  ;;  %v1228_v22 = vpop.eup %1227 }
 0x198   :  { %v1109_v31 = vmul.f32 %v1228_v22, %v1095_v11  ;;  %vm1115_vm11 = vweird.f32 %v1228_v22 }
 0x199   :  { %v1028_v3 = vrot.slane %v1027_v34, 1  ;;  %v1064_v32 = vadd.f32 %v1063_v36, %v1062_v33  ;;  %vm1116_vm14 = vmor %vm1114_vm12, %vm1115_vm11  ;;  %vm1184_vm12 = vcmask 130054  }
 0x19a   :  { %v1110_v38 = vmul.f32 %v1228_v22, %v1109_v31 }
 0x19b   :  { %v1029_v39 = vadd.f32 %v1028_v3, %v1027_v34  ;;  %v1065_v42 = vrot.slane %v1064_v32, 1 }
 0x19c   :  { %v1111_v21 = vmul.f32 0.5, %v1110_v38 }
 0x19d   :  { %v2357_v44 = vmul.f32 %v1029_v39, %v1796_v1  ;;  %v1066_v49 = vadd.f32 %v1065_v42, %v1064_v32 }
 0x19e   :  { %v1112_v53 = vsub.f32 1.5, %v1111_v21 }
 0x19f   :  { %v1076_v58 = vmul.f32 %v1066_v49, %v1796_v1  ;;  %v1080_v59 = vmul.f32 %v2357_v44, %v2357_v44  ;;  %v1092_v8 = vsub.f32 %v2346_v43, %v2357_v44 }
 0x1a1   :  { %v1084_v4 = vsub.f32 %v1076_v58, %v1080_v59  ;;  %v1113_v58 = vmul.f32 %v1228_v22, %v1112_v53 }
 0x1a3   :  { %v1088_v9 = vmax.f32 %v1084_v4, 0.0  ;;  %v650_v4 = vld [vmem:[#allocation12] sm:$0xf] }
 0x1a4   :  { %v1145_v11 = vperm.slane %v650_v4, 2  ;;  %v1146_v44 = vperm.slane %v650_v4, 3 }
 0x1a5   :  { %v954_v0 = vpop.f32.mrf.mxu2  ;;  %v1096_v14 = vadd.f32 1e-05, %v1088_v9 }
 0x1a6   :  { %v955_v2 = vadd.f32 %v954_v0, %v935_v61  ;;  %v974_v5 = vpop.f32.mrf.mxu3  ;;  %v1117_v61 = vsel %vm1116_vm14, %v1228_v22, %v1113_v58  ;;  %v1091_v0 = vsub.f32 %v2331_v52, %v2354_v40  ;;  %v1143_v40 = vperm.slane %v650_v4, 0 }
 0x1a7   :  { %1229 = vrsqrt.f32 %v1096_v14  ;;  %vm1124_vm15 = vweird.f32 %v1096_v14 }
 0x1a8   :  { %v975_v7 = vadd.f32 %v974_v5, %v955_v2  ;;  %1231 = vrsqrt.f32 %v1094_v16  ;;  %v1139_v6 = vmul.f32 %v1117_v61, %v1091_v0 }
 0x1aa   :  { %v995_v10 = vadd.f32 %v994_v45, %v975_v7  ;;  %v1144_v7 = vperm.slane %v650_v4, 1 }
 0x1ac   :  { %vm1000_vm9 = vcmp.ge.f32.partialorder %v995_v10, 0.0  ;;  %v1004_v12 = vmul.f32 0.01, %v995_v10 }
 0x1ad   :  { %v1230_v27 = vpop.eup %1229 }
 0x1ae   :  { %v2372_v15 = vsel %vm1000_vm9, %v995_v10, %v1004_v12  ;;  %v1232_v29 = vpop.eup %1231  ;;  %v1119_v35 = vmul.f32 %v1230_v27, %v1096_v14  ;;  %vm1125_vm13 = vweird.f32 %v1230_v27  ;;  %v651_v12 = vld [vmem:[#allocation13] sm:$0xf]  ;;  %v1152_v14 = vmul.f32 %v1144_v7, %v1139_v6 }
 0x1af   :  { %v1031_v24 = vsel %vm1030_vm10, %v2372_v15, 0.0  ;;  %v1045_v20 = vmul.f32 %v2372_v15, %v2372_v15  ;;  %v1099_v3 = vmul.f32 %v1232_v29, %v1094_v16  ;;  %vm1105_vm0 = vweird.f32 %v1232_v29  ;;  %vm1126_vm2 = vmor %vm1124_vm15, %vm1125_vm13 }
 0x1b0   :  { %v1032_v48 = vrot.slane %v1031_v24, 4  ;;  %v1120_v41 = vmul.f32 %v1230_v27, %v1119_v35  ;;  %vm1106_vm4 = vmor %vm1104_vm3, %vm1105_vm0  ;;  %v1159_v57 = vperm.slane %v651_v12, 3  ;;  %vm1176_vm9 = vcmask 1045508  }
 0x1b1   :  { %v1067_v17 = vsel %vm1030_vm10, %v1045_v20, 0.0  ;;  %v1100_v47 = vmul.f32 %v1232_v29, %v1099_v3  ;;  %vm1182_vm10 = vmor %vm1181_vm8, %vm254_vm1  ;;  %vm1178_vm13 = vcmask 1043456  }
 0x1b2   :  { %v1033_v18 = vadd.f32 %v1032_v48, %v1031_v24  ;;  %v1068_v19 = vrot.slane %v1067_v17, 4  ;;  %v1121_v50 = vmul.f32 0.5, %v1120_v41  ;;  %v1157_v24 = vperm.slane %v651_v12, 1  ;;  %vm1183_vm11 = vmor %vm1176_vm9, %vm1182_vm10 }
 0x1b3   :  { %v1101_v55 = vmul.f32 0.5, %v1100_v47  ;;  %v1158_v48 = vperm.slane %v651_v12, 2  ;;  %vm1185_vm14 = vmor %vm1184_vm12, %vm1183_vm11 }
 0x1b4   :  { %v1034_v25 = vrot.slane %v1033_v18, 2  ;;  %v1069_v46 = vadd.f32 %v1068_v19, %v1067_v17  ;;  %v1122_v56 = vsub.f32 1.5, %v1121_v50  ;;  %v1165_v19 = vadd.f32 %v1157_v24, %v1152_v14 }
 0x1b5   :  { %v1102_v59 = vsub.f32 1.5, %v1101_v55 }
 0x1b6   :  { %v1035_v23 = vadd.f32 %v1034_v25, %v1033_v18  ;;  %v1070_v26 = vrot.slane %v1069_v46, 2  ;;  %v1123_v60 = vmul.f32 %v1230_v27, %v1122_v56 }
 0x1b7   :  { %v1103_v63 = vmul.f32 %v1232_v29, %v1102_v59 }
 0x1b8   :  { %v1036_v28 = vrot.slane %v1035_v23, 1  ;;  %v1071_v30 = vadd.f32 %v1070_v26, %v1069_v46  ;;  %v1127_v2 = vsel %vm1126_vm2, %v1230_v27, %v1123_v60  ;;  %v1156_v46 = vperm.slane %v651_v12, 0 }
 0x1b9   :  { %v1107_v9 = vsel %vm1106_vm4, %v1232_v29, %v1103_v63  ;;  %v1140_v10 = vmul.f32 %v1127_v2, %v1092_v8  ;;  %v1172_v26 = vrot.slane %v1165_v19, 6 }
 0x1ba   :  { %v1037_v33 = vadd.f32 %v1036_v28, %v1035_v23  ;;  %v1072_v34 = vrot.slane %v1071_v30, 1  ;;  %v1138_v20 = vmul.f32 %v1107_v9, %v1090_v13 }
 0x1bb   :  { %v1153_v17 = vmul.f32 %v1145_v11, %v1140_v10 }
 0x1bc   :  { %v2378_v36 = vmul.f32 %v1037_v33, %v1796_v1  ;;  %v1073_v37 = vadd.f32 %v1072_v34, %v1071_v30  ;;  %v1151_v54 = vmul.f32 %v1143_v40, %v1138_v20 }
 0x1bd   :  { %v1166_v22 = vadd.f32 %v1158_v48, %v1153_v17 }
 0x1be   :  { %v1077_v32 = vmul.f32 %v1073_v37, %v1796_v1  ;;  %v1081_v39 = vmul.f32 %v2378_v36, %v2378_v36  ;;  %v1093_v43 = vsub.f32 %v2372_v15, %v2378_v36  ;;  %v1164_v15 = vadd.f32 %v1156_v46, %v1151_v54 }
 0x1bf   :  { %v1173_v28 = vrot.slane %v1166_v22, 4 }
 0x1c0   :  { %v1085_v42 = vsub.f32 %v1077_v32, %v1081_v39  ;;  %v1175_v31 = vsel %vm254_vm1, %v1164_v15, %v1172_v26 }
 0x1c2   :  { %v1089_v49 = vmax.f32 %v1085_v42, 0.0 }
 0x1c4   :  { %v1097_v51 = vadd.f32 1e-05, %v1089_v49 }
 0x1c6   :  { %1233 = vrsqrt.f32 %v1097_v51  ;;  %vm1134_vm6 = vweird.f32 %v1097_v51 }
 0x1cc   :  { %v1234_v1 = vpop.eup %1233 }
 0x1cd   :  { %v1129_v62 = vmul.f32 %v1234_v1, %v1097_v51  ;;  %vm1135_vm5 = vweird.f32 %v1234_v1 }
 0x1ce   :  { %vm1136_vm7 = vmor %vm1134_vm6, %vm1135_vm5 }
 0x1cf   :  { %v1130_v5 = vmul.f32 %v1234_v1, %v1129_v62 }
 0x1d1   :  { %v1131_v45 = vmul.f32 0.5, %v1130_v5 }
 0x1d3   :  { %v1132_v52 = vsub.f32 1.5, %v1131_v45 }
 0x1d5   :  { %v1133_v16 = vmul.f32 %v1234_v1, %v1132_v52 }
 0x1d7   :  { %v1137_v18 = vsel %vm1136_vm7, %v1234_v1, %v1133_v16 }
 0x1d8   :  { %v1141_v25 = vmul.f32 %v1137_v18, %v1093_v43 }
 0x1da   :  { %v1154_v23 = vmul.f32 %v1146_v44, %v1141_v25 }
 0x1dc   :  { %v1167_v27 = vadd.f32 %v1159_v57, %v1154_v23 }
 0x1de   :  { %v1174_v30 = vrot.slane %v1167_v27, 2 }
 0x1e0   :  { %v1177_v33 = vsel %vm1176_vm9, %v1173_v28, %v1174_v30 }
 0x1e1   :  { %v1179_v34 = vsel %vm1178_vm13, %v1175_v31, %v1177_v33 }
 0x1e2   :  { %1186 = vst.msk [vmem:[%s2407_s9] sm:$0xff] %vm1185_vm14, %v1179_v34 }
 0x1e3   :  { %1191 = vsyncpa [#allocation3], 1 }
 0x1e4   :  { %1192 = vsyncpa [#allocation5], 1 }
 0x1e5   :  { %1193 = vsyncpa [#allocation8], 1 }
 0x1e6   :  { %1194 = vsyncpa [#allocation11], 1 }
 0x1e7   :  { %1195 = vsyncpa [#allocation14], 1 }

// kernel: tile.13
= control target key start
LH: loop header
LB: loop body
LE: loop exit
PB: predicated region body
PF: predicated region fallthrough
CT: control target
= control target key end

     0   :  { %s28_s0 = inlined_call_operand.vmem [shape: f32[16], index: 0, kind: input, shape index: {}]   ;;  %s29_s1 = inlined_call_operand.vmem [shape: f32[16,16], index: 1, kind: output, shape index: {}]  }
   0x1   :  { %v4_v0 = vld [vmem:[%s28_s0] ss:$0 sm:$0xff] }
   0x2   :  { %5 = vst [vmem:[%s29_s1] sm:$0xff] %v4_v0 }
   0x3   :  { %8 = vst [vmem:[%s29_s1 + $0x8] sm:$0xff] %v4_v0 }

// kernel: tile.0
= control target key start
LH: loop header
LB: loop body
LE: loop exit
PB: predicated region body
PF: predicated region fallthrough
CT: control target
= control target key end

     0   :  { %s549_s8 = smov 126   ;;  %s550_s9 = smov 127   ;;  %vm3_vm0 = vcmask 7168   ;;  %s1092_s0 = inlined_call_operand.vmem [shape: f32[16,16], index: 0, kind: input, shape index: {}]   ;;  %s1093_s1 = inlined_call_operand.vmem [shape: f32[256,1], index: 1, kind: output, shape index: {}]  }
   0x1   :  { %v44_v0 = vld [vmem:[%s1092_s0] sm:$0xff]   ;;  %s551_s10 = smov 125   ;;  %v412_v1 = vld [vmem:[%s1092_s0 + $0x8] sm:$0xff]   ;;  %s552_s0 = smov 124  }
   0x2   :  { %45 = vrot.lane.b32.xlu1 %v44_v0, %s549_s8  ;;  %20 = vrot.lane.b32.xlu0 %v44_v0, %s550_s9  ;;  %s553_s13 = smov 123   ;;  %s554_s14 = smov 122   ;;  %4 = vst.msk [vmem:[%s1093_s1] ss:$16 sm:$0x3] %vm3_vm0, %v44_v0  }
   0x3   :  { %70 = vrot.lane.b32.xlu2 %v44_v0, %s551_s10  ;;  %s555_s15 = smov 121   ;;  %s556_s16 = smov 120   ;;  %5 = vst.msk [vmem:[%s1093_s1] ss:$16 sm:$0xc] %vm3_vm0, %v44_v0  }
   0x4   :  { %s557_s17 = smov 119   ;;  %6 = vst.msk [vmem:[%s1093_s1] ss:$16 sm:$0x30] %vm3_vm0, %v44_v0   ;;  %s558_s30 = smov 118  }
   0x5   :  { %7 = vst.msk [vmem:[%s1093_s1] ss:$16 sm:$0xc0] %vm3_vm0, %v44_v0   ;;  %s559_s4 = smov 117   ;;  %s560_s7 = smov 116  }
   0x6   :  { %395 = vst.msk [vmem:[%s1093_s1 + $0x80] ss:$16 sm:$0x3] %vm3_vm0, %v412_v1  }
   0x7   :  { %396 = vst.msk [vmem:[%s1093_s1 + $0x80] ss:$16 sm:$0xc] %vm3_vm0, %v412_v1  }
   0x8   :  { %397 = vst.msk [vmem:[%s1093_s1 + $0x80] ss:$16 sm:$0x30] %vm3_vm0, %v412_v1  }
   0x9   :  { %398 = vst.msk [vmem:[%s1093_s1 + $0x80] ss:$16 sm:$0xc0] %vm3_vm0, %v412_v1  }
   0xa   :  { %58 = vrot.lane.b32.xlu1 %v412_v1, %s549_s8  ;;  %33 = vrot.lane.b32.xlu0 %v412_v1, %s550_s9  ;;  %s561_s8 = smov 115   ;;  %s562_s9 = smov 114  }
   0xb   :  { %83 = vrot.lane.b32.xlu2 %v412_v1, %s551_s10  ;;  %s563_s10 = smov 113  }
  0x12   :  { %108 = vrot.lane.b32.xlu1 %v412_v1, %s552_s0  ;;  %95 = vrot.lane.b32.xlu0 %v44_v0, %s552_s0 }
  0x13   :  { %120 = vrot.lane.b32.xlu2 %v44_v0, %s553_s13 }
  0x1a   :  { %145 = vrot.lane.b32.xlu1 %v44_v0, %s554_s14  ;;  %133 = vrot.lane.b32.xlu0 %v412_v1, %s553_s13 }
  0x1b   :  { %158 = vrot.lane.b32.xlu2 %v412_v1, %s554_s14 }
  0x22   :  { %183 = vrot.lane.b32.xlu1 %v412_v1, %s555_s15  ;;  %170 = vrot.lane.b32.xlu0 %v44_v0, %s555_s15 }
  0x23   :  { %195 = vrot.lane.b32.xlu2 %v44_v0, %s556_s16 }
  0x2a   :  { %220 = vrot.lane.b32.xlu1 %v44_v0, %s557_s17  ;;  %208 = vrot.lane.b32.xlu0 %v412_v1, %s556_s16 }
  0x2b   :  { %233 = vrot.lane.b32.xlu2 %v412_v1, %s557_s17 }
  0x32   :  { %258 = vrot.lane.b32.xlu1 %v412_v1, %s558_s30  ;;  %245 = vrot.lane.b32.xlu0 %v44_v0, %s558_s30 }
  0x33   :  { %270 = vrot.lane.b32.xlu2 %v44_v0, %s559_s4 }
  0x3a   :  { %295 = vrot.lane.b32.xlu1 %v44_v0, %s560_s7  ;;  %283 = vrot.lane.b32.xlu0 %v412_v1, %s559_s4 }
  0x3b   :  { %308 = vrot.lane.b32.xlu2 %v412_v1, %s560_s7 }
  0x42   :  { %333 = vrot.lane.b32.xlu1 %v412_v1, %s561_s8  ;;  %320 = vrot.lane.b32.xlu0 %v44_v0, %s561_s8 }
  0x43   :  { %345 = vrot.lane.b32.xlu2 %v44_v0, %s562_s9 }
  0x4a   :  { %370 = vrot.lane.b32.xlu1 %v44_v0, %s563_s10  ;;  %358 = vrot.lane.b32.xlu0 %v412_v1, %s562_s9 }
  0x4b   :  { %383 = vrot.lane.b32.xlu2 %v412_v1, %s563_s10 }
  0x5d   :  { %v71_v2 = vpop.permute.xlu2 %70  }
  0x5e   :  { %417 = vst.msk [vmem:[%s1093_s1 + $0x3] ss:$16 sm:$0x3] %vm3_vm0, %v71_v2  }
  0x5f   :  { %418 = vst.msk [vmem:[%s1093_s1 + $0x3] ss:$16 sm:$0xc] %vm3_vm0, %v71_v2  }
  0x60   :  { %419 = vst.msk [vmem:[%s1093_s1 + $0x3] ss:$16 sm:$0x30] %vm3_vm0, %v71_v2  }
  0x61   :  { %420 = vst.msk [vmem:[%s1093_s1 + $0x3] ss:$16 sm:$0xc0] %vm3_vm0, %v71_v2  }
  0x65   :  { %v84_v3 = vpop.permute.xlu2 %83  }
  0x66   :  { %422 = vst.msk [vmem:[%s1093_s1 + $0x83] ss:$16 sm:$0x3] %vm3_vm0, %v84_v3  }
  0x67   :  { %423 = vst.msk [vmem:[%s1093_s1 + $0x83] ss:$16 sm:$0xc] %vm3_vm0, %v84_v3  }
  0x68   :  { %424 = vst.msk [vmem:[%s1093_s1 + $0x83] ss:$16 sm:$0x30] %vm3_vm0, %v84_v3  }
  0x69   :  { %425 = vst.msk [vmem:[%s1093_s1 + $0x83] ss:$16 sm:$0xc0] %vm3_vm0, %v84_v3  }
  0x6d   :  { %v121_v4 = vpop.permute.xlu2 %120  }
  0x6e   :  { %435 = vst.msk [vmem:[%s1093_s1 + $0x5] ss:$16 sm:$0x3] %vm3_vm0, %v121_v4  }
  0x6f   :  { %436 = vst.msk [vmem:[%s1093_s1 + $0x5] ss:$16 sm:$0xc] %vm3_vm0, %v121_v4  }
  0x70   :  { %437 = vst.msk [vmem:[%s1093_s1 + $0x5] ss:$16 sm:$0x30] %vm3_vm0, %v121_v4  }
  0x71   :  { %438 = vst.msk [vmem:[%s1093_s1 + $0x5] ss:$16 sm:$0xc0] %vm3_vm0, %v121_v4  }
  0x74   :  { %v46_v5 = vpop.permute.xlu1 %45   ;;  %v21_v6 = vpop.permute.xlu0 %20  }
  0x75   :  { %408 = vst.msk [vmem:[%s1093_s1 + $0x2] ss:$16 sm:$0x3] %vm3_vm0, %v46_v5   ;;  %v159_v7 = vpop.permute.xlu2 %158  }
  0x76   :  { %409 = vst.msk [vmem:[%s1093_s1 + $0x2] ss:$16 sm:$0xc] %vm3_vm0, %v46_v5  }
  0x77   :  { %410 = vst.msk [vmem:[%s1093_s1 + $0x2] ss:$16 sm:$0x30] %vm3_vm0, %v46_v5  }
  0x78   :  { %411 = vst.msk [vmem:[%s1093_s1 + $0x2] ss:$16 sm:$0xc0] %vm3_vm0, %v46_v5  }
  0x79   :  { %399 = vst.msk [vmem:[%s1093_s1 + $0x1] ss:$16 sm:$0x3] %vm3_vm0, %v21_v6  }
  0x7a   :  { %400 = vst.msk [vmem:[%s1093_s1 + $0x1] ss:$16 sm:$0xc] %vm3_vm0, %v21_v6  }
  0x7b   :  { %401 = vst.msk [vmem:[%s1093_s1 + $0x1] ss:$16 sm:$0x30] %vm3_vm0, %v21_v6  }
  0x7c   :  { %402 = vst.msk [vmem:[%s1093_s1 + $0x1] ss:$16 sm:$0xc0] %vm3_vm0, %v21_v6   ;;  %v59_v8 = vpop.permute.xlu1 %58   ;;  %v34_v9 = vpop.permute.xlu0 %33  }
  0x7d   :  { %413 = vst.msk [vmem:[%s1093_s1 + $0x82] ss:$16 sm:$0x3] %vm3_vm0, %v59_v8   ;;  %v196_v10 = vpop.permute.xlu2 %195  }
  0x7e   :  { %414 = vst.msk [vmem:[%s1093_s1 + $0x82] ss:$16 sm:$0xc] %vm3_vm0, %v59_v8  }
  0x7f   :  { %415 = vst.msk [vmem:[%s1093_s1 + $0x82] ss:$16 sm:$0x30] %vm3_vm0, %v59_v8  }
  0x80   :  { %416 = vst.msk [vmem:[%s1093_s1 + $0x82] ss:$16 sm:$0xc0] %vm3_vm0, %v59_v8  }
  0x81   :  { %404 = vst.msk [vmem:[%s1093_s1 + $0x81] ss:$16 sm:$0x3] %vm3_vm0, %v34_v9  }
  0x82   :  { %405 = vst.msk [vmem:[%s1093_s1 + $0x81] ss:$16 sm:$0xc] %vm3_vm0, %v34_v9  }
  0x83   :  { %406 = vst.msk [vmem:[%s1093_s1 + $0x81] ss:$16 sm:$0x30] %vm3_vm0, %v34_v9  }
  0x84   :  { %407 = vst.msk [vmem:[%s1093_s1 + $0x81] ss:$16 sm:$0xc0] %vm3_vm0, %v34_v9   ;;  %v109_v11 = vpop.permute.xlu1 %108   ;;  %v96_v12 = vpop.permute.xlu0 %95  }
  0x85   :  { %431 = vst.msk [vmem:[%s1093_s1 + $0x84] ss:$16 sm:$0x3] %vm3_vm0, %v109_v11   ;;  %v234_v13 = vpop.permute.xlu2 %233  }
  0x86   :  { %432 = vst.msk [vmem:[%s1093_s1 + $0x84] ss:$16 sm:$0xc] %vm3_vm0, %v109_v11  }
  0x87   :  { %433 = vst.msk [vmem:[%s1093_s1 + $0x84] ss:$16 sm:$0x30] %vm3_vm0, %v109_v11  }
  0x88   :  { %434 = vst.msk [vmem:[%s1093_s1 + $0x84] ss:$16 sm:$0xc0] %vm3_vm0, %v109_v11  }
  0x89   :  { %426 = vst.msk [vmem:[%s1093_s1 + $0x4] ss:$16 sm:$0x3] %vm3_vm0, %v96_v12  }
  0x8a   :  { %427 = vst.msk [vmem:[%s1093_s1 + $0x4] ss:$16 sm:$0xc] %vm3_vm0, %v96_v12  }
  0x8b   :  { %428 = vst.msk [vmem:[%s1093_s1 + $0x4] ss:$16 sm:$0x30] %vm3_vm0, %v96_v12  }
  0x8c   :  { %429 = vst.msk [vmem:[%s1093_s1 + $0x4] ss:$16 sm:$0xc0] %vm3_vm0, %v96_v12   ;;  %v146_v14 = vpop.permute.xlu1 %145   ;;  %v134_v15 = vpop.permute.xlu0 %133  }
  0x8d   :  { %449 = vst.msk [vmem:[%s1093_s1 + $0x86] ss:$16 sm:$0x3] %vm3_vm0, %v159_v7   ;;  %v271_v16 = vpop.permute.xlu2 %270  }
  0x8e   :  { %450 = vst.msk [vmem:[%s1093_s1 + $0x86] ss:$16 sm:$0xc] %vm3_vm0, %v159_v7  }
  0x8f   :  { %451 = vst.msk [vmem:[%s1093_s1 + $0x86] ss:$16 sm:$0x30] %vm3_vm0, %v159_v7  }
  0x90   :  { %452 = vst.msk [vmem:[%s1093_s1 + $0x86] ss:$16 sm:$0xc0] %vm3_vm0, %v159_v7  }
  0x91   :  { %444 = vst.msk [vmem:[%s1093_s1 + $0x6] ss:$16 sm:$0x3] %vm3_vm0, %v146_v14  }
  0x92   :  { %445 = vst.msk [vmem:[%s1093_s1 + $0x6] ss:$16 sm:$0xc] %vm3_vm0, %v146_v14  }
  0x93   :  { %446 = vst.msk [vmem:[%s1093_s1 + $0x6] ss:$16 sm:$0x30] %vm3_vm0, %v146_v14  }
  0x94   :  { %447 = vst.msk [vmem:[%s1093_s1 + $0x6] ss:$16 sm:$0xc0] %vm3_vm0, %v146_v14   ;;  %v184_v17 = vpop.permute.xlu1 %183   ;;  %v171_v18 = vpop.permute.xlu0 %170  }
  0x95   :  { %440 = vst.msk [vmem:[%s1093_s1 + $0x85] ss:$16 sm:$0x3] %vm3_vm0, %v134_v15   ;;  %v309_v21 = vpop.permute.xlu2 %308  }
  0x96   :  { %441 = vst.msk [vmem:[%s1093_s1 + $0x85] ss:$16 sm:$0xc] %vm3_vm0, %v134_v15  }
  0x97   :  { %442 = vst.msk [vmem:[%s1093_s1 + $0x85] ss:$16 sm:$0x30] %vm3_vm0, %v134_v15  }
  0x98   :  { %443 = vst.msk [vmem:[%s1093_s1 + $0x85] ss:$16 sm:$0xc0] %vm3_vm0, %v134_v15  }
  0x99   :  { %462 = vst.msk [vmem:[%s1093_s1 + $0x8] ss:$16 sm:$0x3] %vm3_vm0, %v196_v10  }
  0x9a   :  { %463 = vst.msk [vmem:[%s1093_s1 + $0x8] ss:$16 sm:$0xc] %vm3_vm0, %v196_v10  }
  0x9b   :  { %464 = vst.msk [vmem:[%s1093_s1 + $0x8] ss:$16 sm:$0x30] %vm3_vm0, %v196_v10  }
  0x9c   :  { %465 = vst.msk [vmem:[%s1093_s1 + $0x8] ss:$16 sm:$0xc0] %vm3_vm0, %v196_v10   ;;  %v221_v19 = vpop.permute.xlu1 %220   ;;  %v209_v20 = vpop.permute.xlu0 %208  }
  0x9d   :  { %458 = vst.msk [vmem:[%s1093_s1 + $0x87] ss:$16 sm:$0x3] %vm3_vm0, %v184_v17   ;;  %v346_v24 = vpop.permute.xlu2 %345  }
  0x9e   :  { %459 = vst.msk [vmem:[%s1093_s1 + $0x87] ss:$16 sm:$0xc] %vm3_vm0, %v184_v17  }
  0x9f   :  { %460 = vst.msk [vmem:[%s1093_s1 + $0x87] ss:$16 sm:$0x30] %vm3_vm0, %v184_v17  }
  0xa0   :  { %461 = vst.msk [vmem:[%s1093_s1 + $0x87] ss:$16 sm:$0xc0] %vm3_vm0, %v184_v17  }
  0xa1   :  { %453 = vst.msk [vmem:[%s1093_s1 + $0x7] ss:$16 sm:$0x3] %vm3_vm0, %v171_v18  }
  0xa2   :  { %454 = vst.msk [vmem:[%s1093_s1 + $0x7] ss:$16 sm:$0xc] %vm3_vm0, %v171_v18  }
  0xa3   :  { %455 = vst.msk [vmem:[%s1093_s1 + $0x7] ss:$16 sm:$0x30] %vm3_vm0, %v171_v18  }
  0xa4   :  { %456 = vst.msk [vmem:[%s1093_s1 + $0x7] ss:$16 sm:$0xc0] %vm3_vm0, %v171_v18   ;;  %v259_v22 = vpop.permute.xlu1 %258   ;;  %v246_v23 = vpop.permute.xlu0 %245  }
  0xa5   :  { %476 = vst.msk [vmem:[%s1093_s1 + $0x89] ss:$16 sm:$0x3] %vm3_vm0, %v234_v13   ;;  %v384_v29 = vpop.permute.xlu2 %383  }
  0xa6   :  { %477 = vst.msk [vmem:[%s1093_s1 + $0x89] ss:$16 sm:$0xc] %vm3_vm0, %v234_v13  }
  0xa7   :  { %478 = vst.msk [vmem:[%s1093_s1 + $0x89] ss:$16 sm:$0x30] %vm3_vm0, %v234_v13  }
  0xa8   :  { %479 = vst.msk [vmem:[%s1093_s1 + $0x89] ss:$16 sm:$0xc0] %vm3_vm0, %v234_v13  }
  0xa9   :  { %471 = vst.msk [vmem:[%s1093_s1 + $0x9] ss:$16 sm:$0x3] %vm3_vm0, %v221_v19  }
  0xaa   :  { %472 = vst.msk [vmem:[%s1093_s1 + $0x9] ss:$16 sm:$0xc] %vm3_vm0, %v221_v19  }
  0xab   :  { %473 = vst.msk [vmem:[%s1093_s1 + $0x9] ss:$16 sm:$0x30] %vm3_vm0, %v221_v19  }
  0xac   :  { %474 = vst.msk [vmem:[%s1093_s1 + $0x9] ss:$16 sm:$0xc0] %vm3_vm0, %v221_v19   ;;  %v296_v25 = vpop.permute.xlu1 %295   ;;  %v284_v26 = vpop.permute.xlu0 %283  }
  0xad   :  { %467 = vst.msk [vmem:[%s1093_s1 + $0x88] ss:$16 sm:$0x3] %vm3_vm0, %v209_v20  }
  0xae   :  { %468 = vst.msk [vmem:[%s1093_s1 + $0x88] ss:$16 sm:$0xc] %vm3_vm0, %v209_v20  }
  0xaf   :  { %469 = vst.msk [vmem:[%s1093_s1 + $0x88] ss:$16 sm:$0x30] %vm3_vm0, %v209_v20  }
  0xb0   :  { %470 = vst.msk [vmem:[%s1093_s1 + $0x88] ss:$16 sm:$0xc0] %vm3_vm0, %v209_v20  }
  0xb1   :  { %489 = vst.msk [vmem:[%s1093_s1 + $0xb] ss:$16 sm:$0x3] %vm3_vm0, %v271_v16  }
  0xb2   :  { %490 = vst.msk [vmem:[%s1093_s1 + $0xb] ss:$16 sm:$0xc] %vm3_vm0, %v271_v16  }
  0xb3   :  { %491 = vst.msk [vmem:[%s1093_s1 + $0xb] ss:$16 sm:$0x30] %vm3_vm0, %v271_v16  }
  0xb4   :  { %492 = vst.msk [vmem:[%s1093_s1 + $0xb] ss:$16 sm:$0xc0] %vm3_vm0, %v271_v16   ;;  %v334_v27 = vpop.permute.xlu1 %333   ;;  %v321_v28 = vpop.permute.xlu0 %320  }
  0xb5   :  { %485 = vst.msk [vmem:[%s1093_s1 + $0x8a] ss:$16 sm:$0x3] %vm3_vm0, %v259_v22  }
  0xb6   :  { %486 = vst.msk [vmem:[%s1093_s1 + $0x8a] ss:$16 sm:$0xc] %vm3_vm0, %v259_v22  }
  0xb7   :  { %487 = vst.msk [vmem:[%s1093_s1 + $0x8a] ss:$16 sm:$0x30] %vm3_vm0, %v259_v22  }
  0xb8   :  { %488 = vst.msk [vmem:[%s1093_s1 + $0x8a] ss:$16 sm:$0xc0] %vm3_vm0, %v259_v22  }
  0xb9   :  { %480 = vst.msk [vmem:[%s1093_s1 + $0xa] ss:$16 sm:$0x3] %vm3_vm0, %v246_v23  }
  0xba   :  { %481 = vst.msk [vmem:[%s1093_s1 + $0xa] ss:$16 sm:$0xc] %vm3_vm0, %v246_v23  }
  0xbb   :  { %482 = vst.msk [vmem:[%s1093_s1 + $0xa] ss:$16 sm:$0x30] %vm3_vm0, %v246_v23  }
  0xbc   :  { %483 = vst.msk [vmem:[%s1093_s1 + $0xa] ss:$16 sm:$0xc0] %vm3_vm0, %v246_v23   ;;  %v371_v30 = vpop.permute.xlu1 %370   ;;  %v359_v31 = vpop.permute.xlu0 %358  }
  0xbd   :  { %503 = vst.msk [vmem:[%s1093_s1 + $0x8c] ss:$16 sm:$0x3] %vm3_vm0, %v309_v21  }
  0xbe   :  { %504 = vst.msk [vmem:[%s1093_s1 + $0x8c] ss:$16 sm:$0xc] %vm3_vm0, %v309_v21  }
  0xbf   :  { %505 = vst.msk [vmem:[%s1093_s1 + $0x8c] ss:$16 sm:$0x30] %vm3_vm0, %v309_v21  }
  0xc0   :  { %506 = vst.msk [vmem:[%s1093_s1 + $0x8c] ss:$16 sm:$0xc0] %vm3_vm0, %v309_v21  }
  0xc1   :  { %498 = vst.msk [vmem:[%s1093_s1 + $0xc] ss:$16 sm:$0x3] %vm3_vm0, %v296_v25  }
  0xc2   :  { %499 = vst.msk [vmem:[%s1093_s1 + $0xc] ss:$16 sm:$0xc] %vm3_vm0, %v296_v25  }
  0xc3   :  { %500 = vst.msk [vmem:[%s1093_s1 + $0xc] ss:$16 sm:$0x30] %vm3_vm0, %v296_v25  }
  0xc4   :  { %501 = vst.msk [vmem:[%s1093_s1 + $0xc] ss:$16 sm:$0xc0] %vm3_vm0, %v296_v25  }
  0xc5   :  { %494 = vst.msk [vmem:[%s1093_s1 + $0x8b] ss:$16 sm:$0x3] %vm3_vm0, %v284_v26  }
  0xc6   :  { %495 = vst.msk [vmem:[%s1093_s1 + $0x8b] ss:$16 sm:$0xc] %vm3_vm0, %v284_v26  }
  0xc7   :  { %496 = vst.msk [vmem:[%s1093_s1 + $0x8b] ss:$16 sm:$0x30] %vm3_vm0, %v284_v26  }
  0xc8   :  { %497 = vst.msk [vmem:[%s1093_s1 + $0x8b] ss:$16 sm:$0xc0] %vm3_vm0, %v284_v26  }
  0xc9   :  { %516 = vst.msk [vmem:[%s1093_s1 + $0xe] ss:$16 sm:$0x3] %vm3_vm0, %v346_v24  }
  0xca   :  { %517 = vst.msk [vmem:[%s1093_s1 + $0xe] ss:$16 sm:$0xc] %vm3_vm0, %v346_v24  }
  0xcb   :  { %518 = vst.msk [vmem:[%s1093_s1 + $0xe] ss:$16 sm:$0x30] %vm3_vm0, %v346_v24  }
  0xcc   :  { %519 = vst.msk [vmem:[%s1093_s1 + $0xe] ss:$16 sm:$0xc0] %vm3_vm0, %v346_v24  }
  0xcd   :  { %512 = vst.msk [vmem:[%s1093_s1 + $0x8d] ss:$16 sm:$0x3] %vm3_vm0, %v334_v27  }
  0xce   :  { %513 = vst.msk [vmem:[%s1093_s1 + $0x8d] ss:$16 sm:$0xc] %vm3_vm0, %v334_v27  }
  0xcf   :  { %514 = vst.msk [vmem:[%s1093_s1 + $0x8d] ss:$16 sm:$0x30] %vm3_vm0, %v334_v27  }
  0xd0   :  { %515 = vst.msk [vmem:[%s1093_s1 + $0x8d] ss:$16 sm:$0xc0] %vm3_vm0, %v334_v27  }
  0xd1   :  { %507 = vst.msk [vmem:[%s1093_s1 + $0xd] ss:$16 sm:$0x3] %vm3_vm0, %v321_v28  }
  0xd2   :  { %508 = vst.msk [vmem:[%s1093_s1 + $0xd] ss:$16 sm:$0xc] %vm3_vm0, %v321_v28  }
  0xd3   :  { %509 = vst.msk [vmem:[%s1093_s1 + $0xd] ss:$16 sm:$0x30] %vm3_vm0, %v321_v28  }
  0xd4   :  { %510 = vst.msk [vmem:[%s1093_s1 + $0xd] ss:$16 sm:$0xc0] %vm3_vm0, %v321_v28  }
  0xd5   :  { %530 = vst.msk [vmem:[%s1093_s1 + $0x8f] ss:$16 sm:$0x3] %vm3_vm0, %v384_v29  }
  0xd6   :  { %531 = vst.msk [vmem:[%s1093_s1 + $0x8f] ss:$16 sm:$0xc] %vm3_vm0, %v384_v29  }
  0xd7   :  { %532 = vst.msk [vmem:[%s1093_s1 + $0x8f] ss:$16 sm:$0x30] %vm3_vm0, %v384_v29  }
  0xd8   :  { %533 = vst.msk [vmem:[%s1093_s1 + $0x8f] ss:$16 sm:$0xc0] %vm3_vm0, %v384_v29  }
  0xd9   :  { %525 = vst.msk [vmem:[%s1093_s1 + $0xf] ss:$16 sm:$0x3] %vm3_vm0, %v371_v30  }
  0xda   :  { %526 = vst.msk [vmem:[%s1093_s1 + $0xf] ss:$16 sm:$0xc] %vm3_vm0, %v371_v30  }
  0xdb   :  { %527 = vst.msk [vmem:[%s1093_s1 + $0xf] ss:$16 sm:$0x30] %vm3_vm0, %v371_v30  }
  0xdc   :  { %528 = vst.msk [vmem:[%s1093_s1 + $0xf] ss:$16 sm:$0xc0] %vm3_vm0, %v371_v30  }
  0xdd   :  { %521 = vst.msk [vmem:[%s1093_s1 + $0x8e] ss:$16 sm:$0x3] %vm3_vm0, %v359_v31  }
  0xde   :  { %522 = vst.msk [vmem:[%s1093_s1 + $0x8e] ss:$16 sm:$0xc] %vm3_vm0, %v359_v31  }
  0xdf   :  { %523 = vst.msk [vmem:[%s1093_s1 + $0x8e] ss:$16 sm:$0x30] %vm3_vm0, %v359_v31  }
  0xe0   :  { %524 = vst.msk [vmem:[%s1093_s1 + $0x8e] ss:$16 sm:$0xc0] %vm3_vm0, %v359_v31  }

// kernel: decoder_forward.4
= control target key start
LH: loop header
LB: loop body
LE: loop exit
PB: predicated region body
PF: predicated region fallthrough
CT: control target
= control target key end

     0   :  { %v1114_v0 = vmov 0   ;;  %vm252_vm0 = vcmask 523264   ;;  %vm562_vm1 = vcmask 588800   ;;  %s1918_s2 = inlined_call_operand.vmem [shape: f32[256,1], index: 2, kind: input, shape index: {}]   ;;  %s1919_s0 = inlined_call_operand.vmem [shape: f32[64,72], index: 0, kind: input, shape index: {}]   ;;  %s1920_s1 = inlined_call_operand.vmem [shape: f32[256,64], index: 1, kind: input, shape index: {}]   ;;  %s1921_s3 = inlined_call_operand.vmem [shape: f32[16,1], index: 3, kind: input, shape index: {}]   ;;  %s1922_s4 = inlined_call_operand.vmem [shape: f32[16,1], index: 4, kind: input, shape index: {}]   ;;  %s1923_s5 = inlined_call_operand.vmem [shape: f32[16,16,72], index: 5, kind: output, shape index: {}]  }
   0x1   :  { %1109 = vset.pattern.permute.xlu2 %v1114_v0  ;;  %1108 = vset.pattern.permute.xlu1 %v1114_v0  ;;  %v64_v1 = vld [vmem:[%s1918_s2 + $0x20] sm:$0xff]  ;;  %v62_v2 = vld [vmem:[%s1918_s2 + $0x10] sm:$0xff]  ;;  %v59_v4 = vld [vmem:[%s1919_s0 + $0x38] sm:$0xff] }
   0x2   :  { %v60_v3 = vld [vmem:[%s1918_s2] sm:$0xff]  ;;  %1107 = vset.pattern.permute.xlu0 %v1114_v0  ;;  %114 = vperm.xlu2 %1109, %v64_v1   ;;  %v58_v5 = vld [vmem:[%s1919_s0 + $0x30] sm:$0xff]  ;;  %v57_v6 = vld [vmem:[%s1919_s0 + $0x28] sm:$0xff] }
   0x3   :  { %104 = vperm.xlu1 %1108, %v62_v2   ;;  %94 = vperm.xlu0 %1107, %v60_v3   ;;  %v56_v7 = vld [vmem:[%s1919_s0 + $0x20] sm:$0xff]  ;;  %v65_v8 = vld [vmem:[%s1918_s2 + $0x28] sm:$0xff]  ;;  %v63_v9 = vld [vmem:[%s1918_s2 + $0x18] sm:$0xff] }
   0x4   :  { %357 = vmatpush.msra.mxu0 %v59_v4  ;;  %1082 = vmatpush.msra.mxu1 %v59_v4  ;;  %v61_v10 = vld [vmem:[%s1918_s2 + $0x8] sm:$0xff]  ;;  %v55_v11 = vld [vmem:[%s1919_s0 + $0x18] sm:$0xff]  ;;  %v54_v12 = vld [vmem:[%s1919_s0 + $0x10] sm:$0xff] }
   0x5   :  { %1083 = vmatpush.msra.mxu2 %v59_v4  ;;  %1084 = vmatpush.msra.mxu3 %v59_v4  ;;  %v53_v13 = vld [vmem:[%s1919_s0 + $0x8] sm:$0xff]  ;;  %v52_v14 = vld [vmem:[%s1919_s0] sm:$0xff]  ;;  %v67_v20 = vld [vmem:[%s1918_s2 + $0x38] sm:$0xff] }
   0x6   :  { %358 = vmatpush.msra.mxu0 %v58_v5  ;;  %1085 = vmatpush.msra.mxu1 %v58_v5  ;;  %v20_v15 = vld [vmem:[%s1920_s1] sm:$0xff]  ;;  %v66_v21 = vld [vmem:[%s1918_s2 + $0x30] sm:$0xff]  ;;  %v21_v22 = vld [vmem:[%s1920_s1 + $0x8] sm:$0xff] }
   0x7   :  { %1086 = vmatpush.msra.mxu2 %v58_v5  ;;  %1087 = vmatpush.msra.mxu3 %v58_v5  ;;  %v28_v16 = vld [vmem:[%s1920_s1 + $0x40] sm:$0xff]  ;;  %v29_v23 = vld [vmem:[%s1920_s1 + $0x48] sm:$0xff]  ;;  %v71_v26 = vld [vmem:[%s1918_s2 + $0x58] sm:$0xff] }
   0x8   :  { %359 = vmatpush.msra.mxu0 %v57_v6  ;;  %1088 = vmatpush.msra.mxu1 %v57_v6  ;;  %v36_v17 = vld [vmem:[%s1920_s1 + $0x80] sm:$0xff]  ;;  %v37_v24 = vld [vmem:[%s1920_s1 + $0x88] sm:$0xff]  ;;  %v70_v27 = vld [vmem:[%s1918_s2 + $0x50] sm:$0xff] }
   0x9   :  { %1089 = vmatpush.msra.mxu2 %v57_v6  ;;  %1090 = vmatpush.msra.mxu3 %v57_v6  ;;  %v44_v18 = vld [vmem:[%s1920_s1 + $0xc0] sm:$0xff]  ;;  %v45_v25 = vld [vmem:[%s1920_s1 + $0xc8] sm:$0xff]  ;;  %v22_v29 = vld [vmem:[%s1920_s1 + $0x10] sm:$0xff] }
   0xa   :  { %360 = vmatpush.msra.mxu0 %v56_v7  ;;  %1091 = vmatpush.msra.mxu1 %v56_v7  ;;  %v68_v19 = vld [vmem:[%s1918_s2 + $0x40] sm:$0xff]  ;;  %v69_v28 = vld [vmem:[%s1918_s2 + $0x48] sm:$0xff]  ;;  %v30_v30 = vld [vmem:[%s1920_s1 + $0x50] sm:$0xff] }
   0xb   :  { %1092 = vmatpush.msra.mxu2 %v56_v7  ;;  %1093 = vmatpush.msra.mxu3 %v56_v7  ;;  %v38_v31 = vld [vmem:[%s1920_s1 + $0x90] sm:$0xff]  ;;  %v73_v34 = vld [vmem:[%s1918_s2 + $0x68] sm:$0xff]  ;;  %v72_v35 = vld [vmem:[%s1918_s2 + $0x60] sm:$0xff] }
   0xc   :  { %119 = vperm.xlu2 %1109, %v65_v8   ;;  %109 = vperm.xlu1 %1108, %v63_v9   ;;  %v46_v32 = vld [vmem:[%s1920_s1 + $0xd0] sm:$0xff]  ;;  %v23_v36 = vld [vmem:[%s1920_s1 + $0x18] sm:$0xff]  ;;  %v77_v40 = vld [vmem:[%s1918_s2 + $0x88] sm:$0xff] }
   0xd   :  { %99 = vperm.xlu0 %1107, %v61_v10   ;;  %361 = vmatpush.msra.mxu0 %v55_v11  ;;  %v74_v33 = vld [vmem:[%s1918_s2 + $0x70] sm:$0xff]  ;;  %v31_v37 = vld [vmem:[%s1920_s1 + $0x58] sm:$0xff]  ;;  %v76_v41 = vld [vmem:[%s1918_s2 + $0x80] sm:$0xff] }
   0xe   :  { %1094 = vmatpush.msra.mxu1 %v55_v11  ;;  %1095 = vmatpush.msra.mxu2 %v55_v11  ;;  %v39_v38 = vld [vmem:[%s1920_s1 + $0x98] sm:$0xff]  ;;  %v24_v43 = vld [vmem:[%s1920_s1 + $0x20] sm:$0xff]  ;;  %v78_v49 = vld [vmem:[%s1918_s2 + $0x90] sm:$0xff] }
   0xf   :  { %1096 = vmatpush.msra.mxu3 %v55_v11  ;;  %362 = vmatpush.msra.mxu0 %v54_v12  ;;  %v47_v39 = vld [vmem:[%s1920_s1 + $0xd8] sm:$0xff]  ;;  %v32_v44 = vld [vmem:[%s1920_s1 + $0x60] sm:$0xff]  ;;  %v25_v50 = vld [vmem:[%s1920_s1 + $0x28] sm:$0xff] }
  0x10   :  { %1097 = vmatpush.msra.mxu1 %v54_v12  ;;  %1098 = vmatpush.msra.mxu2 %v54_v12  ;;  %v75_v42 = vld [vmem:[%s1918_s2 + $0x78] sm:$0xff]  ;;  %v40_v45 = vld [vmem:[%s1920_s1 + $0xa0] sm:$0xff]  ;;  %v33_v51 = vld [vmem:[%s1920_s1 + $0x68] sm:$0xff] }
  0x11   :  { %1099 = vmatpush.msra.mxu3 %v54_v12  ;;  %363 = vmatpush.msra.mxu0 %v53_v13  ;;  %v48_v46 = vld [vmem:[%s1920_s1 + $0xe0] sm:$0xff]  ;;  %v79_v48 = vld [vmem:[%s1918_s2 + $0x98] sm:$0xff]  ;;  %v41_v52 = vld [vmem:[%s1920_s1 + $0xa8] sm:$0xff] }
  0x12   :  { %1100 = vmatpush.msra.mxu1 %v53_v13  ;;  %1101 = vmatpush.msra.mxu2 %v53_v13  ;;  %v80_v47 = vld [vmem:[%s1918_s2 + $0xa0] sm:$0xff]  ;;  %v49_v53 = vld [vmem:[%s1920_s1 + $0xe8] sm:$0xff]  ;;  %v83_v54 = vld [vmem:[%s1918_s2 + $0xb8] sm:$0xff] }
  0x13   :  { %1102 = vmatpush.msra.mxu3 %v53_v13  ;;  %364 = vmatpush.msra.mxu0 %v52_v14  ;;  %v82_v55 = vld [vmem:[%s1918_s2 + $0xb0] sm:$0xff]  ;;  %v81_v56 = vld [vmem:[%s1918_s2 + $0xa8] sm:$0xff]  ;;  %v84_v63 = vld [vmem:[%s1918_s2 + $0xc0] sm:$0xff] }
  0x14   :  { %1103 = vmatpush.msra.mxu1 %v52_v14  ;;  %1104 = vmatpush.msra.mxu2 %v52_v14  ;;  %v26_v57 = vld [vmem:[%s1920_s1 + $0x30] sm:$0xff]  ;;  %v85_v62 = vld [vmem:[%s1918_s2 + $0xc8] sm:$0xff]  ;;  %v27_v0 = vld [vmem:[%s1920_s1 + $0x38] sm:$0xff] }
  0x15   :  { %1105 = vmatpush.msra.mxu3 %v52_v14  ;;  %1020 = vmatmul.msk.f32.vlgmr.msra.gmra.mxu0 %vm252_vm0, %v20_v15  ;;  %v34_v58 = vld [vmem:[%s1920_s1 + $0x70] sm:$0xff]  ;;  %v35_v1 = vld [vmem:[%s1920_s1 + $0x78] sm:$0xff]  ;;  %v89_v4 = vld [vmem:[%s1918_s2 + $0xe8] sm:$0xff] }
  0x16   :  { %1028 = vmatmul.msk.f32.vlgmr.msra.gmra.mxu1 %vm252_vm0, %v28_v16  ;;  %1036 = vmatmul.msk.f32.vlgmr.msra.gmra.mxu2 %vm252_vm0, %v36_v17  ;;  %v42_v59 = vld [vmem:[%s1920_s1 + $0xb0] sm:$0xff]  ;;  %v43_v2 = vld [vmem:[%s1920_s1 + $0xb8] sm:$0xff]  ;;  %v88_v5 = vld [vmem:[%s1918_s2 + $0xe0] sm:$0xff] }
  0x17   :  { %1044 = vmatmul.msk.f32.vlgmr.msra.gmra.mxu3 %vm252_vm0, %v44_v18  ;;  %134 = vperm.xlu2 %1109, %v68_v19   ;;  %v50_v60 = vld [vmem:[%s1920_s1 + $0xf0] sm:$0xff]  ;;  %v51_v3 = vld [vmem:[%s1920_s1 + $0xf8] sm:$0xff] }
  0x18   :  { %129 = vperm.xlu1 %1108, %v67_v20   ;;  %124 = vperm.xlu0 %1107, %v66_v21   ;;  %v86_v61 = vld [vmem:[%s1918_s2 + $0xd0] sm:$0xff]  ;;  %v87_v6 = vld [vmem:[%s1918_s2 + $0xd8] sm:$0xff] }
  0x19   :  { %v91_v7 = vld [vmem:[%s1918_s2 + $0xf8] sm:$0xff]  ;;  %v90_v8 = vld [vmem:[%s1918_s2 + $0xf0] sm:$0xff] }
  0x1d   :  { %1021 = vmatmul.msk.f32.gmra.mxu0 %vm252_vm0, %v21_v22 }
  0x1e   :  { %1029 = vmatmul.msk.f32.gmra.mxu1 %vm252_vm0, %v29_v23  ;;  %1037 = vmatmul.msk.f32.gmra.mxu2 %vm252_vm0, %v37_v24 }
  0x1f   :  { %1045 = vmatmul.msk.f32.gmra.mxu3 %vm252_vm0, %v45_v25  ;;  %149 = vperm.xlu2 %1109, %v71_v26  }
  0x20   :  { %144 = vperm.xlu1 %1108, %v70_v27   ;;  %139 = vperm.xlu0 %1107, %v69_v28  }
  0x25   :  { %1022 = vmatmul.msk.f32.gmra.mxu0 %vm252_vm0, %v22_v29 }
  0x26   :  { %1030 = vmatmul.msk.f32.gmra.mxu1 %vm252_vm0, %v30_v30  ;;  %1038 = vmatmul.msk.f32.gmra.mxu2 %vm252_vm0, %v38_v31 }
  0x27   :  { %1046 = vmatmul.msk.f32.gmra.mxu3 %vm252_vm0, %v46_v32  ;;  %164 = vperm.xlu2 %1109, %v74_v33  }
  0x28   :  { %159 = vperm.xlu1 %1108, %v73_v34   ;;  %154 = vperm.xlu0 %1107, %v72_v35  }
  0x2d   :  { %1023 = vmatmul.msk.f32.gmra.mxu0 %vm252_vm0, %v23_v36 }
  0x2e   :  { %1031 = vmatmul.msk.f32.gmra.mxu1 %vm252_vm0, %v31_v37  ;;  %1039 = vmatmul.msk.f32.gmra.mxu2 %vm252_vm0, %v39_v38 }
  0x2f   :  { %1047 = vmatmul.msk.f32.gmra.mxu3 %vm252_vm0, %v47_v39  ;;  %179 = vperm.xlu2 %1109, %v77_v40  }
  0x30   :  { %174 = vperm.xlu1 %1108, %v76_v41   ;;  %169 = vperm.xlu0 %1107, %v75_v42  }
  0x35   :  { %1024 = vmatmul.msk.f32.gmra.mxu0 %vm252_vm0, %v24_v43 }
  0x36   :  { %1032 = vmatmul.msk.f32.gmra.mxu1 %vm252_vm0, %v32_v44  ;;  %1040 = vmatmul.msk.f32.gmra.mxu2 %vm252_vm0, %v40_v45 }
  0x37   :  { %1048 = vmatmul.msk.f32.gmra.mxu3 %vm252_vm0, %v48_v46  ;;  %194 = vperm.xlu2 %1109, %v80_v47  }
  0x38   :  { %189 = vperm.xlu1 %1108, %v79_v48   ;;  %184 = vperm.xlu0 %1107, %v78_v49  }
  0x3d   :  { %1025 = vmatmul.msk.f32.gmra.mxu0 %vm252_vm0, %v25_v50 }
  0x3e   :  { %1033 = vmatmul.msk.f32.gmra.mxu1 %vm252_vm0, %v33_v51  ;;  %1041 = vmatmul.msk.f32.gmra.mxu2 %vm252_vm0, %v41_v52 }
  0x3f   :  { %1049 = vmatmul.msk.f32.gmra.mxu3 %vm252_vm0, %v49_v53  ;;  %209 = vperm.xlu2 %1109, %v83_v54  }
  0x40   :  { %204 = vperm.xlu1 %1108, %v82_v55   ;;  %199 = vperm.xlu0 %1107, %v81_v56  }
  0x45   :  { %1026 = vmatmul.msk.f32.gmra.mxu0 %vm252_vm0, %v26_v57 }
  0x46   :  { %1034 = vmatmul.msk.f32.gmra.mxu1 %vm252_vm0, %v34_v58  ;;  %1042 = vmatmul.msk.f32.gmra.mxu2 %vm252_vm0, %v42_v59 }
  0x47   :  { %1050 = vmatmul.msk.f32.gmra.mxu3 %vm252_vm0, %v50_v60  ;;  %224 = vperm.xlu2 %1109, %v86_v61  }
  0x48   :  { %219 = vperm.xlu1 %1108, %v85_v62   ;;  %214 = vperm.xlu0 %1107, %v84_v63  }
  0x4d   :  { %1027 = vmatmul.msk.f32.gmra.mxu0 %vm252_vm0, %v27_v0 }
  0x4e   :  { %1035 = vmatmul.msk.f32.gmra.mxu1 %vm252_vm0, %v35_v1  ;;  %1043 = vmatmul.msk.f32.gmra.mxu2 %vm252_vm0, %v43_v2 }
  0x4f   :  { %1051 = vmatmul.msk.f32.gmra.mxu3 %vm252_vm0, %v51_v3  ;;  %239 = vperm.xlu2 %1109, %v89_v4  }
  0x50   :  { %234 = vperm.xlu1 %1108, %v88_v5   ;;  %229 = vperm.xlu0 %1107, %v87_v6  }
  0x58   :  { %249 = vperm.xlu1 %1108, %v91_v7   ;;  %244 = vperm.xlu0 %1107, %v90_v8  }
  0x5c   :  { %v1393_v9 = vpop.permute.xlu2 %114 }
  0x66   :  { %v1395_v10 = vpop.permute.xlu2 %119 }
  0x71   :  { %v135_v11 = vpop.permute.xlu2 %134 }
  0x75   :  { %v105_v12 = vpop.permute.xlu1 %104  ;;  %v95_v13 = vpop.permute.xlu0 %94 }
  0x79   :  { %v1397_v14 = vpop.permute.xlu2 %149 }
  0x7e   :  { %v1399_v15 = vpop.permute.xlu1 %109 }
  0x7f   :  { %v100_v16 = vpop.permute.xlu0 %99 }
  0x81   :  { %v1401_v17 = vpop.permute.xlu2 %164 }
  0x89   :  { %v180_v20 = vpop.permute.xlu2 %179 }
  0x8a   :  { %v1403_v18 = vpop.permute.xlu1 %129  ;;  %v1405_v19 = vpop.permute.xlu0 %124 }
  0x91   :  { %v1411_v29 = vpop.permute.xlu2 %194 }
  0x92   :  { %v1407_v21 = vpop.permute.xlu1 %144  ;;  %v1409_v22 = vpop.permute.xlu0 %139 }
  0x93   :  { %v366_v23 = vpop.f32.mrf.mxu0  ;;  %v390_v24 = vpop.f32.mrf.mxu1 }
  0x94   :  { %v367_v25 = vadd.f32 %v366_v23, %v95_v13  ;;  %v391_v26 = vadd.f32 %v390_v24, %v135_v11 }
  0x96   :  { %v494_v27 = vmul.f32 0.01, %v367_v25  ;;  %v502_v28 = vmul.f32 0.01, %v391_v26  ;;  %vm470_vm2 = vcmp.ge.f32.partialorder %v391_v26, 0.0  ;;  %vm462_vm3 = vcmp.ge.f32.partialorder %v367_v25, 0.0 }
  0x98   :  { %v1413_v30 = vsel %vm470_vm2, %v391_v26, %v502_v28  ;;  %v1415_v31 = vsel %vm462_vm3, %v367_v25, %v494_v27 }
  0x99   :  { %v414_v32 = vpop.f32.mrf.mxu2  ;;  %v587_v33 = vsel %vm562_vm1, %v1413_v30, 0.0  ;;  %v563_v34 = vsel %vm562_vm1, %v1415_v31, 0.0  ;;  %v659_v35 = vmul.f32 %v1415_v31, %v1415_v31  ;;  %v1430_v45 = vpop.permute.xlu2 %209 }
  0x9a   :  { %v1423_v36 = vpop.permute.xlu1 %159  ;;  %v1425_v37 = vpop.permute.xlu0 %154  ;;  %588 = vadd.xlane.f32.xlu0 %v587_v33  ;;  %564 = vadd.xlane.f32.xlu2 %v563_v34 }
  0x9b   :  { %v438_v38 = vpop.f32.mrf.mxu3  ;;  %v369_v39 = vpop.f32.mrf.mxu0  ;;  %v691_v40 = vsel %vm562_vm1, %v659_v35, 0.0 }
  0x9c   :  { %v370_v41 = vadd.f32 %v369_v39, %v100_v16  ;;  %692 = vadd.xlane.f32.xlu1 %v691_v40  ;;  %v393_v43 = vpop.f32.mrf.mxu1 }
  0x9e   :  { %v495_v42 = vmul.f32 0.01, %v370_v41  ;;  %vm463_vm4 = vcmp.ge.f32.partialorder %v370_v41, 0.0 }
  0xa0   :  { %v1428_v44 = vsel %vm463_vm4, %v370_v41, %v495_v42  ;;  %v394_v41 = vadd.f32 %v393_v43, %v1409_v22 }
  0xa1   :  { %v417_v46 = vpop.f32.mrf.mxu2  ;;  %v566_v47 = vsel %vm562_vm1, %v1428_v44, 0.0  ;;  %v660_v4 = vmul.f32 %v1428_v44, %v1428_v44  ;;  %v225_v5 = vpop.permute.xlu2 %224 }
  0xa2   :  { %v175_v48 = vpop.permute.xlu1 %174  ;;  %v1434_v49 = vpop.permute.xlu0 %169  ;;  %v418_v50 = vadd.f32 %v417_v46, %v180_v20  ;;  %567 = vadd.xlane.f32.xlu0 %v566_v47  ;;  %v503_v22 = vmul.f32 0.01, %v394_v41  ;;  %vm471_vm12 = vcmp.ge.f32.partialorder %v394_v41, 0.0 }
  0xa3   :  { %v415_v51 = vadd.f32 %v414_v32, %v175_v48  ;;  %v441_v52 = vpop.f32.mrf.mxu3  ;;  %v372_v53 = vpop.f32.mrf.mxu0  ;;  %v694_v11 = vsel %vm562_vm1, %v660_v4, 0.0 }
  0xa4   :  { %v511_v54 = vmul.f32 0.01, %v418_v50  ;;  %v373_v55 = vadd.f32 %v372_v53, %v105_v12  ;;  %vm479_vm5 = vcmp.ge.f32.partialorder %v418_v50, 0.0  ;;  %v396_v61 = vpop.f32.mrf.mxu1 }
  0xa5   :  { %v510_v56 = vmul.f32 0.01, %v415_v51  ;;  %vm478_vm6 = vcmp.ge.f32.partialorder %v415_v51, 0.0  ;;  %v397_v42 = vadd.f32 %v396_v61, %v1407_v21 }
  0xa6   :  { %v496_v57 = vmul.f32 0.01, %v373_v55  ;;  %v1436_v58 = vsel %vm479_vm5, %v418_v50, %v511_v54  ;;  %vm464_vm7 = vcmp.ge.f32.partialorder %v373_v55, 0.0 }
  0xa7   :  { %1937 = vst [vmem:[#allocation2_spill] sm:$0xff] %v1436_v58  ;;  %v1438_v59 = vsel %vm478_vm6, %v415_v51, %v510_v56  ;;  %v614_v63 = vsel %vm562_vm1, %v1436_v58, 0.0  ;;  %v504_v43 = vmul.f32 0.01, %v397_v42  ;;  %vm472_vm13 = vcmp.ge.f32.partialorder %v397_v42, 0.0 }
  0xa8   :  { %v611_v60 = vsel %vm562_vm1, %v1438_v59, 0.0  ;;  %v1450_v2 = vsel %vm464_vm7, %v373_v55, %v496_v57  ;;  %v1487_v56 = vsel %vm471_vm12, %v394_v41, %v503_v22 }
  0xa9   :  { %612 = vadd.xlane.f32.xlu2 %v611_v60  ;;  %v1442_v62 = vpop.f32.mrf.mxu2  ;;  %v661_v6 = vmul.f32 %v1450_v2, %v1450_v2  ;;  %1940 = vst [vmem:[#allocation5_spill] sm:$0xff] %v1487_v56  ;;  %v1489_v57 = vsel %vm472_vm13, %v397_v42, %v504_v43 }
  0xaa   :  { %v1446_v0 = vpop.permute.xlu1 %189  ;;  %v1448_v1 = vpop.permute.xlu0 %184  ;;  %615 = vadd.xlane.f32.xlu0 %v614_v63  ;;  %v590_v63 = vsel %vm562_vm1, %v1487_v56, 0.0 }
  0xab   :  { %v444_v3 = vpop.f32.mrf.mxu3  ;;  %v375_v8 = vpop.f32.mrf.mxu0  ;;  %v697_v13 = vsel %vm562_vm1, %v661_v6, 0.0 }
  0xac   :  { %v445_v7 = vadd.f32 %v444_v3, %v225_v5  ;;  %v399_v24 = vpop.f32.mrf.mxu1  ;;  %v376_v55 = vadd.f32 %v375_v8, %v1399_v15  ;;  %v593_v3 = vsel %vm562_vm1, %v1489_v57, 0.0 }
  0xad   :  { %v400_v25 = vadd.f32 %v399_v24, %v1397_v14 }
  0xae   :  { %v520_v16 = vmul.f32 0.01, %v445_v7  ;;  %vm488_vm8 = vcmp.ge.f32.partialorder %v445_v7, 0.0  ;;  %v497_v4 = vmul.f32 0.01, %v376_v55  ;;  %vm465_vm15 = vcmp.ge.f32.partialorder %v376_v55, 0.0 }
  0xaf   :  { %v505_v32 = vmul.f32 0.01, %v400_v25  ;;  %vm473_vm9 = vcmp.ge.f32.partialorder %v400_v25, 0.0 }
  0xb0   :  { %v1463_v26 = vsel %vm488_vm8, %v445_v7, %v520_v16  ;;  %v1503_v8 = vsel %vm465_vm15, %v376_v55, %v497_v4  ;;  %v569_v16 = vsel %vm562_vm1, %v1450_v2, 0.0 }
  0xb1   :  { %695 = vadd.xlane.f32.xlu2 %v694_v11  ;;  %v423_v12 = vpop.f32.mrf.mxu2  ;;  %v641_v28 = vsel %vm562_vm1, %v1463_v26, 0.0  ;;  %v1472_v48 = vsel %vm473_vm9, %v400_v25, %v505_v32  ;;  %v572_v24 = vsel %vm562_vm1, %v1503_v8, 0.0  ;;  %v662_v42 = vmul.f32 %v1503_v8, %v1503_v8 }
  0xb2   :  { %v1458_v20 = vpop.permute.xlu1 %204  ;;  %v1460_v23 = vpop.permute.xlu0 %199  ;;  %698 = vadd.xlane.f32.xlu0 %v697_v13  ;;  %1938 = vst [vmem:[#allocation3_spill] sm:$0xff] %v1472_v48  ;;  %v424_v7 = vadd.f32 %v423_v12, %v1446_v0 }
  0xb3   :  { %v1465_v27 = vpop.f32.mrf.mxu0 }
  0xb4   :  { %v1474_v50 = vpop.f32.mrf.mxu1  ;;  %vm481_vm3 = vcmp.ge.f32.partialorder %v424_v7, 0.0 }
  0xb9   :  { %v426_v40 = vpop.f32.mrf.mxu2 }
  0xba   :  { %v220_v33 = vpop.permute.xlu1 %219  ;;  %v215_v34 = vpop.permute.xlu0 %214  ;;  %642 = vadd.xlane.f32.xlu0 %v641_v28  ;;  %v427_v47 = vadd.f32 %v426_v40, %v1411_v29  ;;  %v596_v29 = vsel %vm562_vm1, %v1472_v48, 0.0  ;;  %v513_v28 = vmul.f32 0.01, %v424_v7 }
  0xbb   :  { %v442_v35 = vadd.f32 %v441_v52, %v220_v33  ;;  %v439_v39 = vadd.f32 %v438_v38, %v215_v34  ;;  %v381_v54 = vpop.f32.mrf.mxu0 }
  0xbc   :  { %v514_v53 = vmul.f32 0.01, %v427_v47  ;;  %vm482_vm14 = vcmp.ge.f32.partialorder %v427_v47, 0.0  ;;  %v382_v60 = vadd.f32 %v381_v54, %v1395_v10  ;;  %v405_v5 = vpop.f32.mrf.mxu1  ;;  %v421_v10 = vadd.f32 %v1442_v62, %v1448_v1 }
  0xbd   :  { %v519_v14 = vmul.f32 0.01, %v442_v35  ;;  %v518_v46 = vmul.f32 0.01, %v439_v39  ;;  %vm486_vm10 = vcmp.ge.f32.partialorder %v439_v39, 0.0  ;;  %vm487_vm11 = vcmp.ge.f32.partialorder %v442_v35, 0.0 }
  0xbe   :  { %v1492_v61 = vsel %vm482_vm14, %v427_v47, %v514_v53  ;;  %v499_v6 = vmul.f32 0.01, %v382_v60  ;;  %vm467_vm0 = vcmp.ge.f32.partialorder %v382_v60, 0.0  ;;  %v512_v25 = vmul.f32 0.01, %v421_v10 }
  0xbf   :  { %v1476_v51 = vsel %vm486_vm10, %v439_v39, %v518_v46  ;;  %v1478_v52 = vsel %vm487_vm11, %v442_v35, %v519_v14  ;;  %v623_v15 = vsel %vm562_vm1, %v1492_v61, 0.0  ;;  %vm480_vm2 = vcmp.ge.f32.partialorder %v421_v10, 0.0 }
  0xc0   :  { %1939 = vst [vmem:[#allocation4_spill] sm:$0xff] %v1478_v52  ;;  %v635_v38 = vsel %vm562_vm1, %v1476_v51, 0.0  ;;  %v638_v21 = vsel %vm562_vm1, %v1478_v52, 0.0  ;;  %v1505_v11 = vsel %vm467_vm0, %v382_v60, %v499_v6  ;;  %v379_v1 = vadd.f32 %v1465_v27, %v1393_v9 }
  0xc1   :  { %636 = vadd.xlane.f32.xlu1 %v635_v38  ;;  %639 = vadd.xlane.f32.xlu2 %v638_v21  ;;  %v429_v13 = vpop.f32.mrf.mxu2  ;;  %v578_v62 = vsel %vm562_vm1, %v1505_v11, 0.0  ;;  %v1515_v12 = vsel %vm480_vm2, %v421_v10, %v512_v25  ;;  %v1517_v32 = vsel %vm481_vm3, %v424_v7, %v513_v28  ;;  %v664_v33 = vmul.f32 %v1505_v11, %v1505_v11 }
  0xc2   :  { %597 = vadd.xlane.f32.xlu0 %v596_v29  ;;  %1941 = vst [vmem:[#allocation6_spill] sm:$0xff] %v1517_v32  ;;  %v617_v35 = vsel %vm562_vm1, %v1515_v12, 0.0  ;;  %v620_v39 = vsel %vm562_vm1, %v1517_v32, 0.0  ;;  %v498_v40 = vmul.f32 0.01, %v379_v1  ;;  %vm466_vm4 = vcmp.ge.f32.partialorder %v379_v1, 0.0 }
  0xc3   :  { %v706_v9 = vsel %vm562_vm1, %v664_v33, 0.0  ;;  %v700_v47 = vsel %vm562_vm1, %v662_v42, 0.0  ;;  %v430_v29 = vadd.f32 %v429_v13, %v1460_v23  ;;  %v667_v54 = vmul.f32 %v1413_v30, %v1413_v30  ;;  %v384_v60 = vpop.f32.mrf.mxu0 }
  0xc4   :  { %v408_v0 = vpop.f32.mrf.mxu1  ;;  %v1531_v14 = vsel %vm466_vm4, %v379_v1, %v498_v40  ;;  %v670_v1 = vmul.f32 %v1472_v48, %v1472_v48 }
  0xc5   :  { %v409_v34 = vadd.f32 %v408_v0, %v1401_v17  ;;  %v403_v17 = vadd.f32 %v1474_v50, %v1425_v37  ;;  %v575_v38 = vsel %vm562_vm1, %v1531_v14, 0.0  ;;  %v663_v37 = vmul.f32 %v1531_v14, %v1531_v14 }
  0xc6   :  { %v406_v50 = vadd.f32 %v405_v5, %v1423_v36  ;;  %v715_v36 = vsel %vm562_vm1, %v667_v54, 0.0  ;;  %vm483_vm7 = vcmp.ge.f32.partialorder %v430_v29, 0.0  ;;  %v385_v5 = vadd.f32 %v384_v60, %v1405_v19 }
  0xc7   :  { %v508_v27 = vmul.f32 0.01, %v409_v34  ;;  %vm476_vm5 = vcmp.ge.f32.partialorder %v409_v34, 0.0  ;;  %v506_v21 = vmul.f32 0.01, %v403_v17  ;;  %vm474_vm6 = vcmp.ge.f32.partialorder %v403_v17, 0.0 }
  0xc8   :  { %v507_v4 = vmul.f32 0.01, %v406_v50  ;;  %vm475_vm8 = vcmp.ge.f32.partialorder %v406_v50, 0.0  ;;  %vm468_vm10 = vcmp.ge.f32.partialorder %v385_v5, 0.0 }
  0xc9   :  { %591 = vadd.xlane.f32.xlu1 %v590_v63  ;;  %594 = vadd.xlane.f32.xlu2 %v593_v3  ;;  %v432_v41 = vpop.f32.mrf.mxu2  ;;  %v1533_v46 = vsel %vm476_vm5, %v409_v34, %v508_v27  ;;  %v1544_v53 = vsel %vm474_vm6, %v403_v17, %v506_v21  ;;  %v703_v3 = vsel %vm562_vm1, %v663_v37, 0.0 }
  0xca   :  { %624 = vadd.xlane.f32.xlu0 %v623_v15  ;;  %v605_v22 = vsel %vm562_vm1, %v1533_v46, 0.0  ;;  %v599_v63 = vsel %vm562_vm1, %v1544_v53, 0.0  ;;  %v515_v15 = vmul.f32 0.01, %v430_v29  ;;  %v1557_v10 = vsel %vm475_vm8, %v406_v50, %v507_v4 }
  0xcb   :  { %1943 = vst [vmem:[#allocation8_spill] sm:$0xff] %v1557_v10  ;;  %v673_v17 = vmul.f32 %v1533_v46, %v1533_v46 }
  0xcc   :  { %v1555_v6 = vsel %vm483_vm7, %v430_v29, %v515_v15  ;;  %v411_v40 = vpop.f32.mrf.mxu1  ;;  %v676_v29 = vmul.f32 %v1436_v58, %v1436_v58  ;;  %v679_v15 = vmul.f32 %v1492_v61, %v1492_v61 }
  0xcd   :  { %1942 = vst [vmem:[#allocation7_spill] sm:$0xff] %v1555_v6  ;;  %v626_v13 = vsel %vm562_vm1, %v1555_v6, 0.0  ;;  %v412_v27 = vadd.f32 %v411_v40, %v1434_v49  ;;  %v675_v40 = vmul.f32 %v1438_v59, %v1438_v59 }
  0xce   :  { %v742_v60 = vsel %vm562_vm1, %v676_v29, 0.0  ;;  %v677_v29 = vmul.f32 %v1515_v12, %v1515_v12 }
  0xcf   :  { %v509_v21 = vmul.f32 0.01, %v412_v27  ;;  %vm477_vm13 = vcmp.ge.f32.partialorder %v412_v27, 0.0 }
  0xd1   :  { %570 = vadd.xlane.f32.xlu1 %v569_v16  ;;  %573 = vadd.xlane.f32.xlu2 %v572_v24  ;;  %v435_v43 = vpop.f32.mrf.mxu2  ;;  %v602_v16 = vsel %vm562_vm1, %v1557_v10, 0.0  ;;  %v500_v24 = vmul.f32 0.01, %v385_v5  ;;  %v1598_v50 = vsel %vm477_vm13, %v412_v27, %v509_v21 }
  0xd2   :  { %579 = vadd.xlane.f32.xlu0 %v578_v62  ;;  %v436_v55 = vadd.f32 %v435_v43, %v1430_v45  ;;  %v433_v45 = vadd.f32 %v432_v41, %v1458_v20  ;;  %v387_v20 = vpop.f32.mrf.mxu0  ;;  %v1581_v41 = vpop.permute.xlu0 %229  ;;  %1946 = vst [vmem:[#allocation11_spill] sm:$0xff] %v1598_v50  ;;  %v608_v54 = vsel %vm562_vm1, %v1598_v50, 0.0 }
  0xd3   :  { %v388_v28 = vadd.f32 %v387_v20, %v1403_v18  ;;  %v1568_v62 = vsel %vm468_vm10, %v385_v5, %v500_v24  ;;  %v1579_v18 = vpop.f32.mrf.mxu3  ;;  %v671_v24 = vmul.f32 %v1544_v53, %v1544_v53 }
  0xd4   :  { %v517_v23 = vmul.f32 0.01, %v436_v55  ;;  %vm485_vm9 = vcmp.ge.f32.partialorder %v436_v55, 0.0  ;;  %v516_v25 = vmul.f32 0.01, %v433_v45  ;;  %vm484_vm11 = vcmp.ge.f32.partialorder %v433_v45, 0.0 }
  0xd5   :  { %v581_v33 = vsel %vm562_vm1, %v1568_v62, 0.0  ;;  %vm469_vm12 = vcmp.ge.f32.partialorder %v388_v28, 0.0 }
  0xd6   :  { %v1559_v7 = vsel %vm485_vm9, %v436_v55, %v517_v23  ;;  %v1570_v0 = vsel %vm484_vm11, %v433_v45, %v516_v25  ;;  %v751_v45 = vsel %vm562_vm1, %v679_v15, 0.0  ;;  %v672_v25 = vmul.f32 %v1557_v10, %v1557_v10 }
  0xd7   :  { %1944 = vst [vmem:[#allocation9_spill] sm:$0xff] %v1559_v7  ;;  %v632_v19 = vsel %vm562_vm1, %v1559_v7, 0.0  ;;  %v629_v34 = vsel %vm562_vm1, %v1570_v0, 0.0  ;;  %v682_v20 = vmul.f32 %v1559_v7, %v1559_v7 }
  0xd9   :  { %618 = vadd.xlane.f32.xlu1 %v617_v35  ;;  %621 = vadd.xlane.f32.xlu2 %v620_v39  ;;  %v501_v35 = vmul.f32 0.01, %v388_v28  ;;  %v724_v39 = vsel %vm562_vm1, %v670_v1, 0.0  ;;  %v730_v1 = vsel %vm562_vm1, %v672_v25, 0.0 }
  0xda   :  { %707 = vadd.xlane.f32.xlu0 %v706_v9  ;;  %v665_v9 = vmul.f32 %v1568_v62, %v1568_v62  ;;  %v245_v37 = vpop.permute.xlu0 %244 }
  0xdb   :  { %v1586_v42 = vsel %vm469_vm12, %v388_v28, %v501_v35  ;;  %v1596_v43 = vpop.f32.mrf.mxu3  ;;  %v727_v28 = vsel %vm562_vm1, %v671_v24, 0.0 }
  0xdc   :  { %1945 = vst [vmem:[#allocation10_spill] sm:$0xff] %v1586_v42  ;;  %v666_v49 = vmul.f32 %v1586_v42, %v1586_v42 }
  0xde   :  { %v712_v55 = vsel %vm562_vm1, %v666_v49, 0.0 }
  0xe1   :  { %701 = vadd.xlane.f32.xlu1 %v700_v47  ;;  %576 = vadd.xlane.f32.xlu2 %v575_v38  ;;  %v709_v47 = vsel %vm562_vm1, %v665_v9, 0.0  ;;  %v584_v38 = vsel %vm562_vm1, %v1586_v42, 0.0 }
  0xe2   :  { %606 = vadd.xlane.f32.xlu0 %v605_v22  ;;  %v733_v22 = vsel %vm562_vm1, %v673_v17, 0.0  ;;  %v684_v17 = vmul.f32 %v1478_v52, %v1478_v52 }
  0xe4   :  { %v766_v21 = vsel %vm562_vm1, %v684_v17, 0.0 }
  0xe9   :  { %600 = vadd.xlane.f32.xlu1 %v599_v63  ;;  %704 = vadd.xlane.f32.xlu2 %v703_v3  ;;  %v668_v63 = vmul.f32 %v1487_v56, %v1487_v56  ;;  %v669_v3 = vmul.f32 %v1489_v57, %v1489_v57 }
  0xea   :  { %716 = vadd.xlane.f32.xlu0 %v715_v36  ;;  %v1614_v36 = vpop.f32.mrf.mxu3 }
  0xeb   :  { %v718_v23 = vsel %vm562_vm1, %v668_v63, 0.0  ;;  %v721_v5 = vsel %vm562_vm1, %v669_v3, 0.0  ;;  %v685_v63 = vmul.f32 %v1463_v26, %v1463_v26 }
  0xf1   :  { %627 = vadd.xlane.f32.xlu1 %v626_v13  ;;  %603 = vadd.xlane.f32.xlu2 %v602_v16  ;;  %v1619_v13 = vpop.permute.xlu2 %239  ;;  %v235_v16 = vpop.permute.xlu1 %234 }
  0xf2   :  { %633 = vadd.xlane.f32.xlu0 %v632_v19 }
  0xf9   :  { %582 = vadd.xlane.f32.xlu1 %v581_v33  ;;  %630 = vadd.xlane.f32.xlu2 %v629_v34  ;;  %v456_v33 = vpop.f32.mrf.mxu3  ;;  %v760_v34 = vsel %vm562_vm1, %v682_v20, 0.0  ;;  %v250_v9 = vpop.permute.xlu1 %249 }
  0xfa   :  { %725 = vadd.xlane.f32.xlu0 %v724_v39  ;;  %v674_v39 = vmul.f32 %v1598_v50, %v1598_v50  ;;  %v457_v24 = vadd.f32 %v456_v33, %v245_v37 }
  0xfc   :  { %vm492_vm15 = vcmp.ge.f32.partialorder %v457_v24, 0.0 }
 0x101   :  { %710 = vadd.xlane.f32.xlu1 %v709_v47  ;;  %585 = vadd.xlane.f32.xlu2 %v584_v38  ;;  %v736_v47 = vsel %vm562_vm1, %v674_v39, 0.0  ;;  %v739_v38 = vsel %vm562_vm1, %v675_v40, 0.0  ;;  %v459_v49 = vpop.f32.mrf.mxu3  ;;  %v524_v40 = vmul.f32 0.01, %v457_v24 }
 0x102   :  { %734 = vadd.xlane.f32.xlu0 %v733_v22  ;;  %v460_v3 = vadd.f32 %v459_v49, %v250_v9  ;;  %v451_v49 = vadd.f32 %v1596_v43, %v235_v16 }
 0x104   :  { %v525_v25 = vmul.f32 0.01, %v460_v3  ;;  %vm493_vm14 = vcmp.ge.f32.partialorder %v460_v3, 0.0  ;;  %vm490_vm2 = vcmp.ge.f32.partialorder %v451_v49, 0.0 }
 0x106   :  { %v1668_v9 = vsel %vm493_vm14, %v460_v3, %v525_v25 }
 0x107   :  { %1947 = vst [vmem:[#allocation12_spill] sm:$0xff] %v1668_v9 }
 0x109   :  { %609 = vadd.xlane.f32.xlu1 %v608_v54  ;;  %713 = vadd.xlane.f32.xlu2 %v712_v55  ;;  %v678_v54 = vmul.f32 %v1517_v32, %v1517_v32 }
 0x10a   :  { %743 = vadd.xlane.f32.xlu0 %v742_v60 }
 0x10d   :  { %v1610_v4 = vpop.xlane.xlu0 %588  ;;  %v1632_v35 = vpop.xlane.xlu2 %564 }
 0x10f   :  { %v693_v55 = vpop.xlane.xlu1 %692 }
 0x111   :  { %719 = vadd.xlane.f32.xlu1 %v718_v23  ;;  %722 = vadd.xlane.f32.xlu2 %v721_v5  ;;  %v745_v23 = vsel %vm562_vm1, %v677_v29, 0.0  ;;  %v748_v5 = vsel %vm562_vm1, %v678_v54, 0.0  ;;  %v454_v29 = vadd.f32 %v1614_v36, %v1619_v13 }
 0x112   :  { %752 = vadd.xlane.f32.xlu0 %v751_v45  ;;  %v769_v45 = vsel %vm562_vm1, %v685_v63, 0.0 }
 0x113   :  { %vm491_vm3 = vcmp.ge.f32.partialorder %v454_v29, 0.0 }
 0x115   :  { %v1625_v19 = vpop.xlane.xlu0 %567 }
 0x119   :  { %728 = vadd.xlane.f32.xlu1 %v727_v28  ;;  %731 = vadd.xlane.f32.xlu2 %v730_v1  ;;  %v680_v28 = vmul.f32 %v1555_v6, %v1555_v6  ;;  %v681_v1 = vmul.f32 %v1570_v0, %v1570_v0 }
 0x11a   :  { %761 = vadd.xlane.f32.xlu0 %v760_v34  ;;  %v448_v34 = vadd.f32 %v1579_v18, %v1581_v41 }
 0x11b   :  { %v754_v37 = vsel %vm562_vm1, %v680_v28, 0.0  ;;  %v757_v33 = vsel %vm562_vm1, %v681_v1, 0.0 }
 0x11c   :  { %v1645_v22 = vpop.xlane.xlu2 %612  ;;  %v521_v17 = vmul.f32 0.01, %v448_v34  ;;  %vm489_vm0 = vcmp.ge.f32.partialorder %v448_v34, 0.0 }
 0x11d   :  { %v1638_v27 = vpop.xlane.xlu0 %615 }
 0x121   :  { %737 = vadd.xlane.f32.xlu1 %v736_v47  ;;  %740 = vadd.xlane.f32.xlu2 %v739_v38  ;;  %v656_v47 = vsel %vm562_vm1, %v1668_v9, 0.0  ;;  %v1674_v38 = vsel %vm492_vm15, %v457_v24, %v524_v40 }
 0x122   :  { %767 = vadd.xlane.f32.xlu0 %v766_v21  ;;  %v683_v21 = vmul.f32 %v1476_v51, %v1476_v51 }
 0x124   :  { %v1658_v20 = vpop.xlane.xlu2 %695  ;;  %v763_v3 = vsel %vm562_vm1, %v683_v21, 0.0 }
 0x125   :  { %v699_v60 = vpop.xlane.xlu0 %698 }
 0x126   :  { %v1653_v15 = vadd.f32 %v699_v60, %v693_v55  ;;  %v1687_v55 = vsel %vm489_vm0, %v448_v34, %v521_v17  ;;  %v689_v60 = vmul.f32 %v1674_v38, %v1674_v38 }
 0x127   :  { %1948 = vst [vmem:[#allocation13_spill] sm:$0xff] %v1687_v55  ;;  %v644_v63 = vsel %vm562_vm1, %v1687_v55, 0.0  ;;  %v686_v40 = vmul.f32 %v1687_v55, %v1687_v55 }
 0x128   :  { %v781_v43 = vsel %vm562_vm1, %v689_v60, 0.0 }
 0x129   :  { %746 = vadd.xlane.f32.xlu1 %v745_v23  ;;  %749 = vadd.xlane.f32.xlu2 %v748_v5  ;;  %v522_v23 = vmul.f32 0.01, %v451_v49  ;;  %v523_v5 = vmul.f32 0.01, %v454_v29  ;;  %v772_v21 = vsel %vm562_vm1, %v686_v40, 0.0 }
 0x12a   :  { %770 = vadd.xlane.f32.xlu0 %v769_v45 }
 0x12b   :  { %v1695_v45 = vsel %vm490_vm2, %v451_v49, %v522_v23  ;;  %v1697_v24 = vsel %vm491_vm3, %v454_v29, %v523_v5  ;;  %v653_v49 = vsel %vm562_vm1, %v1674_v38, 0.0 }
 0x12c   :  { %1949 = vst [vmem:[#allocation14_spill] sm:$0xff] %v1697_v24  ;;  %v647_v25 = vsel %vm562_vm1, %v1695_v45, 0.0  ;;  %v650_v28 = vsel %vm562_vm1, %v1697_v24, 0.0 }
 0x12d   :  { %v1666_v39 = vpop.xlane.xlu0 %642 }
 0x131   :  { %755 = vadd.xlane.f32.xlu1 %v754_v37  ;;  %758 = vadd.xlane.f32.xlu2 %v757_v33 }
 0x132   :  { %657 = vadd.xlane.f32.xlu0 %v656_v47 }
 0x134   :  { %v1676_v18 = vpop.xlane.xlu1 %636  ;;  %v1678_v41 = vpop.xlane.xlu2 %639 }
 0x135   :  { %v1685_v54 = vpop.xlane.xlu0 %597 }
 0x139   :  { %645 = vadd.xlane.f32.xlu1 %v644_v63  ;;  %764 = vadd.xlane.f32.xlu2 %v763_v3  ;;  %v687_v63 = vmul.f32 %v1695_v45, %v1695_v45  ;;  %v688_v3 = vmul.f32 %v1697_v24, %v1697_v24 }
 0x13a   :  { %782 = vadd.xlane.f32.xlu0 %v781_v43 }
 0x13b   :  { %v778_v23 = vsel %vm562_vm1, %v688_v3, 0.0 }
 0x13c   :  { %v592_v36 = vpop.xlane.xlu1 %591  ;;  %v595_v13 = vpop.xlane.xlu2 %594 }
 0x13d   :  { %v625_v16 = vpop.xlane.xlu0 %624 }
 0x141   :  { %648 = vadd.xlane.f32.xlu1 %v647_v25  ;;  %651 = vadd.xlane.f32.xlu2 %v650_v28  ;;  %v690_v25 = vmul.f32 %v1668_v9, %v1668_v9 }
 0x144   :  { %v571_v1 = vpop.xlane.xlu1 %570  ;;  %v574_v34 = vpop.xlane.xlu2 %573 }
 0x145   :  { %v787_v37 = vadd.f32 %v571_v1, %v1632_v35  ;;  %v788_v33 = vadd.f32 %v574_v34, %v1625_v19  ;;  %v580_v17 = vpop.xlane.xlu0 %579  ;;  %v775_v19 = vsel %vm562_vm1, %v687_v63, 0.0 }
 0x147   :  { %v792_v47 = vadd.f32 %v788_v33, %v580_v17  ;;  %v784_v33 = vsel %vm562_vm1, %v690_v25, 0.0 }
 0x149   :  { %773 = vadd.xlane.f32.xlu1 %v772_v21  ;;  %654 = vadd.xlane.f32.xlu2 %v653_v49 }
 0x14c   :  { %v619_v29 = vpop.xlane.xlu1 %618  ;;  %v622_v60 = vpop.xlane.xlu2 %621 }
 0x14d   :  { %v708_v35 = vpop.xlane.xlu0 %707 }
 0x151   :  { %776 = vadd.xlane.f32.xlu1 %v775_v19  ;;  %779 = vadd.xlane.f32.xlu2 %v778_v23 }
 0x154   :  { %v702_v5 = vpop.xlane.xlu1 %701  ;;  %v577_v43 = vpop.xlane.xlu2 %576 }
 0x155   :  { %v790_v28 = vadd.f32 %v702_v5, %v1658_v20  ;;  %v791_v1 = vadd.f32 %v787_v37, %v577_v43  ;;  %v607_v34 = vpop.xlane.xlu0 %606 }
 0x157   :  { %v794_v40 = vadd.f32 %v790_v28, %v708_v35 }
 0x159   :  { %785 = vadd.xlane.f32.xlu1 %v784_v33 }
 0x15c   :  { %v601_v17 = vpop.xlane.xlu1 %600  ;;  %v705_v21 = vpop.xlane.xlu2 %704 }
 0x15d   :  { %v793_v49 = vadd.f32 %v1653_v15, %v705_v21  ;;  %v717_v63 = vpop.xlane.xlu0 %716 }
 0x164   :  { %v628_v3 = vpop.xlane.xlu1 %627  ;;  %v604_v19 = vpop.xlane.xlu2 %603 }
 0x165   :  { %v634_v23 = vpop.xlane.xlu0 %633 }
 0x16c   :  { %v583_v24 = vpop.xlane.xlu1 %582  ;;  %v631_v55 = vpop.xlane.xlu2 %630 }
 0x16d   :  { %v795_v52 = vadd.f32 %v791_v1, %v583_v24  ;;  %v726_v25 = vpop.xlane.xlu0 %725 }
 0x16f   :  { %v799_v9 = vadd.f32 %v795_v52, %v1610_v4 }
 0x171   :  { %v803_v20 = vadd.f32 %v799_v9, %v595_v13 }
 0x173   :  { %v807_v37 = vadd.f32 %v803_v20, %v601_v17 }
 0x174   :  { %v711_v5 = vpop.xlane.xlu1 %710  ;;  %v586_v35 = vpop.xlane.xlu2 %585 }
 0x175   :  { %v811_v43 = vadd.f32 %v807_v37, %v607_v34  ;;  %v796_v28 = vadd.f32 %v792_v47, %v586_v35  ;;  %v735_v52 = vpop.xlane.xlu0 %734 }
 0x177   :  { %v815_v33 = vadd.f32 %v811_v43, %v1645_v22  ;;  %v800_v7 = vadd.f32 %v796_v28, %v592_v36 }
 0x179   :  { %v819_v15 = vadd.f32 %v815_v33, %v619_v29  ;;  %v804_v21 = vadd.f32 %v800_v7, %v1685_v54 }
 0x17b   :  { %v823_v6 = vadd.f32 %v819_v15, %v625_v16  ;;  %v808_v32 = vadd.f32 %v804_v21, %v604_v19 }
 0x17c   :  { %v610_v58 = vpop.xlane.xlu1 %609  ;;  %v714_v50 = vpop.xlane.xlu2 %713 }
 0x17d   :  { %v827_v24 = vadd.f32 %v823_v6, %v631_v55  ;;  %v812_v1 = vadd.f32 %v808_v32, %v610_v58  ;;  %v744_v20 = vpop.xlane.xlu0 %743  ;;  %v797_v58 = vadd.f32 %v793_v49, %v711_v5 }
 0x17f   :  { %v816_v4 = vadd.f32 %v812_v1, %v1638_v27  ;;  %v801_v55 = vadd.f32 %v797_v58, %v717_v63  ;;  %v831_v56 = vadd.f32 %v827_v24, %v1676_v18 }
 0x181   :  { %v820_v9 = vadd.f32 %v816_v4, %v622_v60 }
 0x183   :  { %v824_v13 = vadd.f32 %v820_v9, %v628_v3  ;;  %v798_v3 = vadd.f32 %v794_v40, %v714_v50  ;;  %v835_v40 = vadd.f32 %v831_v56, %v1666_v39 }
 0x184   :  { %v720_v34 = vpop.xlane.xlu1 %719  ;;  %v723_v17 = vpop.xlane.xlu2 %722 }
 0x185   :  { %v828_v47 = vadd.f32 %v824_v13, %v634_v23  ;;  %v753_v29 = vpop.xlane.xlu0 %752  ;;  %v805_v43 = vadd.f32 %v801_v55, %v723_v17  ;;  %v802_v28 = vadd.f32 %v798_v3, %v720_v34 }
 0x187   :  { %v806_v15 = vadd.f32 %v802_v28, %v726_v25  ;;  %v832_v25 = vadd.f32 %v828_v47, %v1678_v41 }
 0x18c   :  { %v729_v22 = vpop.xlane.xlu1 %728  ;;  %v732_v36 = vpop.xlane.xlu2 %731 }
 0x18d   :  { %v762_v19 = vpop.xlane.xlu0 %761  ;;  %v809_v23 = vadd.f32 %v805_v43, %v729_v22  ;;  %v810_v9 = vadd.f32 %v806_v15, %v732_v36 }
 0x18f   :  { %v813_v21 = vadd.f32 %v809_v23, %v735_v52 }
 0x194   :  { %v738_v37 = vpop.xlane.xlu1 %737  ;;  %v741_v7 = vpop.xlane.xlu2 %740 }
 0x195   :  { %v768_v32 = vpop.xlane.xlu0 %767  ;;  %v817_v13 = vadd.f32 %v813_v21, %v741_v7  ;;  %v814_v10 = vadd.f32 %v810_v9, %v738_v37 }
 0x197   :  { %v818_v49 = vadd.f32 %v814_v10, %v744_v20 }
 0x19c   :  { %v747_v54 = vpop.xlane.xlu1 %746  ;;  %v750_v16 = vpop.xlane.xlu2 %749 }
 0x19d   :  { %v771_v33 = vpop.xlane.xlu0 %770  ;;  %v821_v48 = vadd.f32 %v817_v13, %v747_v54  ;;  %v822_v42 = vadd.f32 %v818_v49, %v750_v16 }
 0x19f   :  { %v825_v5 = vadd.f32 %v821_v48, %v753_v29 }
 0x1a4   :  { %v756_v35 = vpop.xlane.xlu1 %755  ;;  %v759_v6 = vpop.xlane.xlu2 %758 }
 0x1a5   :  { %v658_v63 = vpop.xlane.xlu0 %657  ;;  %v829_v50 = vadd.f32 %v825_v5, %v759_v6  ;;  %v826_v17 = vadd.f32 %v822_v42, %v756_v35 }
 0x1a7   :  { %v830_v37 = vadd.f32 %v826_v17, %v762_v19  ;;  %v560_v17 = vld [vmem:[%s1922_s4] sm:$0xff] }
 0x1a9   :  { %v834_v29 = vadd.f32 %v830_v37, %v768_v32 }
 0x1ac   :  { %v646_v27 = vpop.xlane.xlu1 %645  ;;  %v765_v60 = vpop.xlane.xlu2 %764 }
 0x1ad   :  { %v833_v52 = vadd.f32 %v829_v50, %v765_v60  ;;  %v836_v36 = vadd.f32 %v832_v25, %v646_v27  ;;  %v783_v24 = vpop.xlane.xlu0 %782 }
 0x1af   :  { %v837_v55 = vadd.f32 %v833_v52, %v771_v33 }
 0x1b4   :  { %v649_v1 = vpop.xlane.xlu1 %648  ;;  %v652_v4 = vpop.xlane.xlu2 %651 }
 0x1b5   :  { %v839_v22 = vadd.f32 %v835_v40, %v649_v1  ;;  %v840_v54 = vadd.f32 %v836_v36, %v652_v4 }
 0x1b7   :  { %v844_v20 = vadd.f32 %v840_v54, %v658_v63  ;;  %v558_v63 = vld [vmem:[%s1921_s3] sm:$0xff] }
 0x1b9   :  { %v848_v35 = vmul.f32 0.00086805556, %v844_v20 }
 0x1bb   :  { %v852_v28 = vmul.f32 %v848_v35, %v848_v35 }
 0x1bc   :  { %v774_v58 = vpop.xlane.xlu1 %773  ;;  %v655_v34 = vpop.xlane.xlu2 %654 }
 0x1bd   :  { %v843_v7 = vadd.f32 %v839_v22, %v655_v34  ;;  %v838_v56 = vadd.f32 %v834_v29, %v774_v58  ;;  %v559_v22 = vld [vmem:[%s1921_s3 + $0x8] sm:$0xff] }
 0x1bf   :  { %v847_v10 = vmul.f32 0.00086805556, %v843_v7 }
 0x1c1   :  { %v851_v39 = vmul.f32 %v847_v10, %v847_v10 }
 0x1c4   :  { %v777_v18 = vpop.xlane.xlu1 %776  ;;  %v780_v6 = vpop.xlane.xlu2 %779 }
 0x1c5   :  { %v841_v48 = vadd.f32 %v837_v55, %v777_v18  ;;  %v842_v47 = vadd.f32 %v838_v56, %v780_v6  ;;  %v561_v18 = vld [vmem:[%s1922_s4 + $0x8] sm:$0xff] }
 0x1c7   :  { %v845_v16 = vadd.f32 %v841_v48, %v783_v24 }
 0x1c9   :  { %v849_v42 = vmul.f32 0.00086805556, %v845_v16 }
 0x1cb   :  { %v853_v41 = vsub.f32 %v849_v42, %v851_v39 }
 0x1cc   :  { %v786_v60 = vpop.xlane.xlu1 %785 }
 0x1cd   :  { %v855_v27 = vmax.f32 %v853_v41, 0.0  ;;  %v846_v3 = vadd.f32 %v842_v47, %v786_v60 }
 0x1cf   :  { %v857_v19 = vadd.f32 1e-05, %v855_v27  ;;  %v850_v43 = vmul.f32 0.00086805556, %v846_v3 }
 0x1d1   :  { %1110 = vrsqrt.f32 %v857_v19  ;;  %v854_v23 = vsub.f32 %v850_v43, %v852_v28  ;;  %vm865_vm5 = vweird.f32 %v857_v19 }
 0x1d3   :  { %v856_v33 = vmax.f32 %v854_v23, 0.0 }
 0x1d5   :  { %v858_v15 = vadd.f32 1e-05, %v856_v33 }
 0x1d7   :  { %v1111_v21 = vpop.eup %1110  ;;  %1112 = vrsqrt.f32 %v858_v15  ;;  %vm875_vm8 = vweird.f32 %v858_v15 }
 0x1d8   :  { %v860_v32 = vmul.f32 %v1111_v21, %v857_v19  ;;  %vm866_vm4 = vweird.f32 %v1111_v21 }
 0x1d9   :  { %vm867_vm6 = vmor %vm865_vm5, %vm866_vm4 }
 0x1da   :  { %v861_v1 = vmul.f32 %v1111_v21, %v860_v32 }
 0x1dc   :  { %v862_v4 = vmul.f32 0.5, %v861_v1 }
 0x1dd   :  { %v1113_v9 = vpop.eup %1112 }
 0x1de   :  { %v870_v13 = vmul.f32 %v1113_v9, %v858_v15  ;;  %v863_v49 = vsub.f32 1.5, %v862_v4  ;;  %vm876_vm7 = vweird.f32 %v1113_v9 }
 0x1df   :  { %vm877_vm9 = vmor %vm875_vm8, %vm876_vm7 }
 0x1e0   :  { %v871_v5 = vmul.f32 %v1113_v9, %v870_v13  ;;  %v864_v58 = vmul.f32 %v1111_v21, %v863_v49 }
 0x1e2   :  { %v872_v50 = vmul.f32 0.5, %v871_v5  ;;  %v868_v40 = vsel %vm867_vm6, %v1111_v21, %v864_v58  ;;  %v1953_v58 = vld [vmem:[#allocation8_spill] sm:$0xff] }
 0x1e3   :  { %v879_v34 = vmul.f32 %v868_v40, %v558_v63 }
 0x1e4   :  { %v873_v25 = vsub.f32 1.5, %v872_v50 }
 0x1e5   :  { %887 = vperm.xlu2 %1109, %v879_v34   ;;  %v881_v52 = vmul.f32 %v879_v34, %v847_v10  ;;  %v1954_v34 = vld [vmem:[#allocation11_spill] sm:$0xff] }
 0x1e6   :  { %v874_v36 = vmul.f32 %v1113_v9, %v873_v25 }
 0x1e7   :  { %v883_v7 = vsub.f32 %v560_v17, %v881_v52  ;;  %v1955_v52 = vld [vmem:[#allocation2_spill] sm:$0xff] }
 0x1e8   :  { %v878_v37 = vsel %vm877_vm9, %v1113_v9, %v874_v36 }
 0x1e9   :  { %899 = vperm.xlu1 %1108, %v883_v7   ;;  %v880_v54 = vmul.f32 %v878_v37, %v559_v22  ;;  %v1956_v7 = vld [vmem:[#allocation6_spill] sm:$0xff] }
 0x1eb   :  { %892 = vperm.xlu0 %1107, %v880_v54   ;;  %v882_v55 = vmul.f32 %v880_v54, %v848_v35 }
 0x1ed   :  { %v884_v48 = vsub.f32 %v561_v18, %v882_v55  ;;  %v1957_v55 = vld [vmem:[#allocation7_spill] sm:$0xff] }
 0x1f3   :  { %904 = vperm.xlu0 %1107, %v884_v48  }
 0x23f   :  { %v888_v10 = vpop.permute.xlu2 %887 }
 0x240   :  { %v895_v24 = vmul.f32 %v888_v10, %v1415_v31  ;;  %v911_v20 = vmul.f32 %v888_v10, %v1450_v2  ;;  %v918_v29 = vmul.f32 %v888_v10, %v1531_v14  ;;  %v925_v16 = vmul.f32 %v888_v10, %v1568_v62 }
 0x241   :  { %v932_v56 = vmul.f32 %v888_v10, %v1413_v30  ;;  %v939_v41 = vmul.f32 %v888_v10, %v1489_v57  ;;  %v946_v27 = vmul.f32 %v888_v10, %v1544_v53  ;;  %v953_v2 = vmul.f32 %v888_v10, %v1533_v46 }
 0x242   :  { %v960_v57 = vmul.f32 %v888_v10, %v1438_v59  ;;  %v967_v53 = vmul.f32 %v888_v10, %v1515_v12  ;;  %v974_v62 = vmul.f32 %v888_v10, %v1492_v61  ;;  %v981_v3 = vmul.f32 %v888_v10, %v1570_v0 }
 0x243   :  { %v988_v19 = vmul.f32 %v888_v10, %v1476_v51  ;;  %v995_v43 = vmul.f32 %v888_v10, %v1463_v26  ;;  %v1002_v28 = vmul.f32 %v888_v10, %v1695_v45  ;;  %v1009_v23 = vmul.f32 %v888_v10, %v1674_v38  ;;  %v1958_v10 = vld [vmem:[#allocation9_spill] sm:$0xff] }
 0x25b   :  { %v900_v6 = vpop.permute.xlu1 %899 }
 0x25c   :  { %v907_v39 = vadd.f32 %v900_v6, %v895_v24  ;;  %v913_v42 = vadd.f32 %v911_v20, %v900_v6  ;;  %v920_v35 = vadd.f32 %v918_v29, %v900_v6  ;;  %v927_v47 = vadd.f32 %v925_v16, %v900_v6  ;;  %v1959_v29 = vld [vmem:[#allocation4_spill] sm:$0xff] }
 0x25d   :  { %v1746_v60 = vpop.permute.xlu0 %892  ;;  %v934_v31 = vadd.f32 %v932_v56, %v900_v6  ;;  %v941_v30 = vadd.f32 %v939_v41, %v900_v6  ;;  %v948_v14 = vadd.f32 %v946_v27, %v900_v6  ;;  %v955_v46 = vadd.f32 %v953_v2, %v900_v6  ;;  %v1960_v56 = vld [vmem:[#allocation13_spill] sm:$0xff]  ;;  %v1962_v27 = vld [vmem:[#allocation12_spill] sm:$0xff] }
 0x25e   :  { %909 = vst.msk [vmem:[%s1923_s5] sm:$0xff] %vm562_vm1, %v907_v39  ;;  %v962_v59 = vadd.f32 %v960_v57, %v900_v6  ;;  %v969_v12 = vadd.f32 %v967_v53, %v900_v6  ;;  %v976_v61 = vadd.f32 %v974_v62, %v900_v6  ;;  %v983_v0 = vadd.f32 %v981_v3, %v900_v6 }
 0x25f   :  { %1052 = vst.msk [vmem:[%s1923_s5 + $0x10] sm:$0xff] %vm562_vm1, %v913_v42  ;;  %v990_v51 = vadd.f32 %v988_v19, %v900_v6  ;;  %v997_v26 = vadd.f32 %v995_v43, %v900_v6  ;;  %v1004_v45 = vadd.f32 %v1002_v28, %v900_v6  ;;  %v896_v15 = vmul.f32 %v1746_v60, %v1428_v44  ;;  %v1950_v44 = vld [vmem:[#allocation10_spill] sm:$0xff] }
 0x260   :  { %1054 = vst.msk [vmem:[%s1923_s5 + $0x20] sm:$0xff] %vm562_vm1, %v920_v35  ;;  %v1011_v38 = vadd.f32 %v1009_v23, %v900_v6  ;;  %v912_v21 = vmul.f32 %v1746_v60, %v1503_v8  ;;  %v919_v32 = vmul.f32 %v1746_v60, %v1505_v11  ;;  %v926_v4 = vmul.f32 %v1746_v60, %v1950_v44  ;;  %v1951_v8 = vld [vmem:[#allocation5_spill] sm:$0xff]  ;;  %v1952_v11 = vld [vmem:[#allocation3_spill] sm:$0xff]  ;;  %v1961_v35 = vld [vmem:[#allocation14_spill] sm:$0xff] }
 0x261   :  { %1056 = vst.msk [vmem:[%s1923_s5 + $0x30] sm:$0xff] %vm562_vm1, %v927_v47  ;;  %v933_v13 = vmul.f32 %v1746_v60, %v1951_v8  ;;  %v940_v5 = vmul.f32 %v1746_v60, %v1952_v11  ;;  %v947_v50 = vmul.f32 %v1746_v60, %v1953_v58  ;;  %v954_v17 = vmul.f32 %v1746_v60, %v1954_v34 }
 0x262   :  { %1058 = vst.msk [vmem:[%s1923_s5 + $0x40] sm:$0xff] %vm562_vm1, %v934_v31  ;;  %v961_v22 = vmul.f32 %v1746_v60, %v1955_v52  ;;  %v968_v37 = vmul.f32 %v1746_v60, %v1956_v7  ;;  %v975_v18 = vmul.f32 %v1746_v60, %v1957_v55  ;;  %v982_v24 = vmul.f32 %v1746_v60, %v1958_v10 }
 0x263   :  { %1060 = vst.msk [vmem:[%s1923_s5 + $0x50] sm:$0xff] %vm562_vm1, %v941_v30  ;;  %v989_v16 = vmul.f32 %v1746_v60, %v1959_v29  ;;  %v996_v39 = vmul.f32 %v1746_v60, %v1960_v56  ;;  %v1003_v41 = vmul.f32 %v1746_v60, %v1961_v35  ;;  %v1010_v31 = vmul.f32 %v1746_v60, %v1962_v27 }
 0x264   :  { %1062 = vst.msk [vmem:[%s1923_s5 + $0x60] sm:$0xff] %vm562_vm1, %v948_v14 }
 0x265   :  { %1064 = vst.msk [vmem:[%s1923_s5 + $0x70] sm:$0xff] %vm562_vm1, %v955_v46  ;;  %v905_v33 = vpop.permute.xlu0 %904 }
 0x266   :  { %1066 = vst.msk [vmem:[%s1923_s5 + $0x80] sm:$0xff] %vm562_vm1, %v962_v59  ;;  %v908_v1 = vadd.f32 %v905_v33, %v896_v15  ;;  %v914_v9 = vadd.f32 %v912_v21, %v905_v33  ;;  %v921_v49 = vadd.f32 %v919_v32, %v905_v33  ;;  %v928_v63 = vadd.f32 %v926_v4, %v905_v33 }
 0x267   :  { %1068 = vst.msk [vmem:[%s1923_s5 + $0x90] sm:$0xff] %vm562_vm1, %v969_v12  ;;  %v935_v40 = vadd.f32 %v933_v13, %v905_v33  ;;  %v942_v25 = vadd.f32 %v940_v5, %v905_v33  ;;  %v949_v36 = vadd.f32 %v947_v50, %v905_v33  ;;  %v956_v54 = vadd.f32 %v954_v17, %v905_v33 }
 0x268   :  { %1070 = vst.msk [vmem:[%s1923_s5 + $0xa0] sm:$0xff] %vm562_vm1, %v976_v61  ;;  %v963_v48 = vadd.f32 %v961_v22, %v905_v33  ;;  %v970_v20 = vadd.f32 %v968_v37, %v905_v33  ;;  %v977_v6 = vadd.f32 %v975_v18, %v905_v33  ;;  %v984_v42 = vadd.f32 %v982_v24, %v905_v33 }
 0x269   :  { %1072 = vst.msk [vmem:[%s1923_s5 + $0xb0] sm:$0xff] %vm562_vm1, %v983_v0  ;;  %v991_v47 = vadd.f32 %v989_v16, %v905_v33  ;;  %v998_v2 = vadd.f32 %v996_v39, %v905_v33  ;;  %v1005_v30 = vadd.f32 %v1003_v41, %v905_v33  ;;  %v1012_v57 = vadd.f32 %v1010_v31, %v905_v33 }
 0x26a   :  { %1074 = vst.msk [vmem:[%s1923_s5 + $0xc0] sm:$0xff] %vm562_vm1, %v990_v51 }
 0x26b   :  { %1076 = vst.msk [vmem:[%s1923_s5 + $0xd0] sm:$0xff] %vm562_vm1, %v997_v26 }
 0x26c   :  { %1078 = vst.msk [vmem:[%s1923_s5 + $0xe0] sm:$0xff] %vm562_vm1, %v1004_v45 }
 0x26d   :  { %1080 = vst.msk [vmem:[%s1923_s5 + $0xf0] sm:$0xff] %vm562_vm1, %v1011_v38 }
 0x26e   :  { %910 = vst.msk [vmem:[%s1923_s5 + $0x8] sm:$0xff] %vm562_vm1, %v908_v1 }
 0x26f   :  { %1053 = vst.msk [vmem:[%s1923_s5 + $0x18] sm:$0xff] %vm562_vm1, %v914_v9 }
 0x270   :  { %1055 = vst.msk [vmem:[%s1923_s5 + $0x28] sm:$0xff] %vm562_vm1, %v921_v49 }
 0x271   :  { %1057 = vst.msk [vmem:[%s1923_s5 + $0x38] sm:$0xff] %vm562_vm1, %v928_v63 }
 0x272   :  { %1059 = vst.msk [vmem:[%s1923_s5 + $0x48] sm:$0xff] %vm562_vm1, %v935_v40 }
 0x273   :  { %1061 = vst.msk [vmem:[%s1923_s5 + $0x58] sm:$0xff] %vm562_vm1, %v942_v25 }
 0x274   :  { %1063 = vst.msk [vmem:[%s1923_s5 + $0x68] sm:$0xff] %vm562_vm1, %v949_v36 }
 0x275   :  { %1065 = vst.msk [vmem:[%s1923_s5 + $0x78] sm:$0xff] %vm562_vm1, %v956_v54 }
 0x276   :  { %1067 = vst.msk [vmem:[%s1923_s5 + $0x88] sm:$0xff] %vm562_vm1, %v963_v48 }
 0x277   :  { %1069 = vst.msk [vmem:[%s1923_s5 + $0x98] sm:$0xff] %vm562_vm1, %v970_v20 }
 0x278   :  { %1071 = vst.msk [vmem:[%s1923_s5 + $0xa8] sm:$0xff] %vm562_vm1, %v977_v6 }
 0x279   :  { %1073 = vst.msk [vmem:[%s1923_s5 + $0xb8] sm:$0xff] %vm562_vm1, %v984_v42 }
 0x27a   :  { %1075 = vst.msk [vmem:[%s1923_s5 + $0xc8] sm:$0xff] %vm562_vm1, %v991_v47 }
 0x27b   :  { %1077 = vst.msk [vmem:[%s1923_s5 + $0xd8] sm:$0xff] %vm562_vm1, %v998_v2 }
 0x27c   :  { %1079 = vst.msk [vmem:[%s1923_s5 + $0xe8] sm:$0xff] %vm562_vm1, %v1005_v30 }
 0x27d   :  { %1081 = vst.msk [vmem:[%s1923_s5 + $0xf8] sm:$0xff] %vm562_vm1, %v1012_v57 }

// kernel: tile.18
= control target key start
LH: loop header
LB: loop body
LE: loop exit
PB: predicated region body
PF: predicated region fallthrough
CT: control target
= control target key end

     0   :  { %s22_s0 = inlined_call_operand.vmem [shape: f32[16], index: 0, kind: input, shape index: {}]   ;;  %s23_s1 = inlined_call_operand.vmem [shape: f32[4,16], index: 1, kind: output, shape index: {}]  }
   0x1   :  { %v4_v0 = vld [vmem:[%s22_s0] ss:$0 sm:$0xff] }
   0x2   :  { %5 = vst [vmem:[%s23_s1] sm:$0xf] %v4_v0 }

// kernel: tile.1
= control target key start
LH: loop header
LB: loop body
LE: loop exit
PB: predicated region body
PF: predicated region fallthrough
CT: control target
= control target key end

     0   :  { %s176_s8 = smov 127   ;;  %s177_s9 = smov 123   ;;  %vm7_vm0 = vcmask 7168   ;;  %s331_s0 = inlined_call_operand.vmem [shape: f32[4,16], index: 0, kind: input, shape index: {}]   ;;  %s332_s1 = inlined_call_operand.vmem [shape: f32[64,1], index: 1, kind: output, shape index: {}]  }
   0x1   :  { %v4_v0 = vld [vmem:[%s331_s0] sm:$0xf]  ;;  %s175_s0 = smov 125   ;;  %s178_s10 = smov 124  }
   0x2   :  { %5 = vst [vmem:[#allocation0] sm:$0xf] %v4_v0  ;;  %s179_s11 = smov 126   ;;  %s180_s12 = smov 122  }
   0x3   :  { %s181_s13 = smov 120   ;;  %s182_s14 = smov 121  }
   0x4   :  { %s183_s15 = smov 119   ;;  %s184_s16 = smov 117  }
   0x5   :  { %s185_s17 = smov 118   ;;  %s186_s18 = smov 116  }
   0x6   :  { %s187_s19 = smov 114   ;;  %s188_s20 = smov 115  }
   0x7   :  { %s189_s21 = smov 113  }
   0x9   :  { %v26_v1 = vld [vmem:[#allocation0] sm:$0xf]  }
   0xa   :  { %v10_v2 = vld [vmem:[#allocation0] sm:$0xf]   ;;  %27 = vrot.lane.b32.xlu1 %v26_v1, %s175_s0 }
   0xb   :  { %11 = vrot.lane.b32.xlu0 %v10_v2, %s176_s8  ;;  %v42_v3 = vld [vmem:[#allocation0] sm:$0xf]  }
   0xc   :  { %43 = vrot.lane.b32.xlu2 %v42_v3, %s177_s9  ;;  %v34_v4 = vld [vmem:[#allocation0] sm:$0xf]  }
   0xd   :  { %v18_v5 = vld [vmem:[#allocation0] sm:$0xf]  }
   0xe   :  { %v50_v6 = vld [vmem:[#allocation0] sm:$0xf]  }
   0xf   :  { %v66_v7 = vld [vmem:[#allocation0] sm:$0xf]  }
  0x10   :  { %v58_v8 = vld [vmem:[#allocation0] sm:$0xf]  }
  0x11   :  { %v74_v9 = vld [vmem:[#allocation0] sm:$0xf]  }
  0x12   :  { %35 = vrot.lane.b32.xlu1 %v34_v4, %s178_s10  ;;  %v90_v10 = vld [vmem:[#allocation0] sm:$0xf]  }
  0x13   :  { %19 = vrot.lane.b32.xlu0 %v18_v5, %s179_s11  ;;  %v82_v11 = vld [vmem:[#allocation0] sm:$0xf]  }
  0x14   :  { %51 = vrot.lane.b32.xlu2 %v50_v6, %s180_s12  ;;  %v98_v12 = vld [vmem:[#allocation0] sm:$0xf]  }
  0x15   :  { %v114_v13 = vld [vmem:[#allocation0] sm:$0xf]  }
  0x16   :  { %v106_v14 = vld [vmem:[#allocation0] sm:$0xf]  }
  0x17   :  { %v122_v15 = vld [vmem:[#allocation0] sm:$0xf]  }
  0x18   :  { %v6_v22 = vld [vmem:[#allocation0] sm:$0xf]  }
  0x19   :  { %8 = vst.msk [vmem:[%s332_s1] ss:$16 sm:$0x3] %vm7_vm0, %v6_v22  }
  0x1a   :  { %67 = vrot.lane.b32.xlu1 %v66_v7, %s181_s13  ;;  %9 = vst.msk [vmem:[%s332_s1] ss:$16 sm:$0xc] %vm7_vm0, %v6_v22  }
  0x1b   :  { %59 = vrot.lane.b32.xlu0 %v58_v8, %s182_s14 }
  0x1c   :  { %75 = vrot.lane.b32.xlu2 %v74_v9, %s183_s15 }
  0x22   :  { %91 = vrot.lane.b32.xlu1 %v90_v10, %s184_s16 }
  0x23   :  { %83 = vrot.lane.b32.xlu0 %v82_v11, %s185_s17 }
  0x24   :  { %99 = vrot.lane.b32.xlu2 %v98_v12, %s186_s18 }
  0x2a   :  { %115 = vrot.lane.b32.xlu1 %v114_v13, %s187_s19 }
  0x2b   :  { %107 = vrot.lane.b32.xlu0 %v106_v14, %s188_s20 }
  0x2c   :  { %123 = vrot.lane.b32.xlu2 %v122_v15, %s189_s21 }
  0x66   :  { %v44_v16 = vpop.permute.xlu2 %43  }
  0x67   :  { %138 = vst.msk [vmem:[%s332_s1 + $0x5] ss:$16 sm:$0x3] %vm7_vm0, %v44_v16  }
  0x68   :  { %139 = vst.msk [vmem:[%s332_s1 + $0x5] ss:$16 sm:$0xc] %vm7_vm0, %v44_v16  }
  0x6e   :  { %v52_v17 = vpop.permute.xlu2 %51  }
  0x6f   :  { %140 = vst.msk [vmem:[%s332_s1 + $0x6] ss:$16 sm:$0x3] %vm7_vm0, %v52_v17  }
  0x70   :  { %141 = vst.msk [vmem:[%s332_s1 + $0x6] ss:$16 sm:$0xc] %vm7_vm0, %v52_v17  }
  0x76   :  { %v76_v18 = vpop.permute.xlu2 %75  }
  0x77   :  { %146 = vst.msk [vmem:[%s332_s1 + $0x9] ss:$16 sm:$0x3] %vm7_vm0, %v76_v18  }
  0x78   :  { %147 = vst.msk [vmem:[%s332_s1 + $0x9] ss:$16 sm:$0xc] %vm7_vm0, %v76_v18  }
  0x7c   :  { %v28_v19 = vpop.permute.xlu1 %27  }
  0x7d   :  { %v12_v20 = vpop.permute.xlu0 %11   ;;  %134 = vst.msk [vmem:[%s332_s1 + $0x3] ss:$16 sm:$0x3] %vm7_vm0, %v28_v19  }
  0x7e   :  { %135 = vst.msk [vmem:[%s332_s1 + $0x3] ss:$16 sm:$0xc] %vm7_vm0, %v28_v19   ;;  %v100_v21 = vpop.permute.xlu2 %99  }
  0x7f   :  { %130 = vst.msk [vmem:[%s332_s1 + $0x1] ss:$16 sm:$0x3] %vm7_vm0, %v12_v20  }
  0x80   :  { %131 = vst.msk [vmem:[%s332_s1 + $0x1] ss:$16 sm:$0xc] %vm7_vm0, %v12_v20  }
  0x81   :  { %152 = vst.msk [vmem:[%s332_s1 + $0xc] ss:$16 sm:$0x3] %vm7_vm0, %v100_v21  }
  0x82   :  { %153 = vst.msk [vmem:[%s332_s1 + $0xc] ss:$16 sm:$0xc] %vm7_vm0, %v100_v21  }
  0x84   :  { %v36_v23 = vpop.permute.xlu1 %35  }
  0x85   :  { %v20_v24 = vpop.permute.xlu0 %19   ;;  %136 = vst.msk [vmem:[%s332_s1 + $0x4] ss:$16 sm:$0x3] %vm7_vm0, %v36_v23  }
  0x86   :  { %137 = vst.msk [vmem:[%s332_s1 + $0x4] ss:$16 sm:$0xc] %vm7_vm0, %v36_v23   ;;  %v124_v25 = vpop.permute.xlu2 %123  }
  0x87   :  { %132 = vst.msk [vmem:[%s332_s1 + $0x2] ss:$16 sm:$0x3] %vm7_vm0, %v20_v24  }
  0x88   :  { %133 = vst.msk [vmem:[%s332_s1 + $0x2] ss:$16 sm:$0xc] %vm7_vm0, %v20_v24  }
  0x89   :  { %158 = vst.msk [vmem:[%s332_s1 + $0xf] ss:$16 sm:$0x3] %vm7_vm0, %v124_v25  }
  0x8a   :  { %159 = vst.msk [vmem:[%s332_s1 + $0xf] ss:$16 sm:$0xc] %vm7_vm0, %v124_v25  }
  0x8c   :  { %v68_v26 = vpop.permute.xlu1 %67  }
  0x8d   :  { %v60_v27 = vpop.permute.xlu0 %59   ;;  %144 = vst.msk [vmem:[%s332_s1 + $0x8] ss:$16 sm:$0x3] %vm7_vm0, %v68_v26  }
  0x8e   :  { %145 = vst.msk [vmem:[%s332_s1 + $0x8] ss:$16 sm:$0xc] %vm7_vm0, %v68_v26  }
  0x8f   :  { %142 = vst.msk [vmem:[%s332_s1 + $0x7] ss:$16 sm:$0x3] %vm7_vm0, %v60_v27  }
  0x90   :  { %143 = vst.msk [vmem:[%s332_s1 + $0x7] ss:$16 sm:$0xc] %vm7_vm0, %v60_v27  }
  0x94   :  { %v92_v28 = vpop.permute.xlu1 %91  }
  0x95   :  { %v84_v29 = vpop.permute.xlu0 %83   ;;  %150 = vst.msk [vmem:[%s332_s1 + $0xb] ss:$16 sm:$0x3] %vm7_vm0, %v92_v28  }
  0x96   :  { %151 = vst.msk [vmem:[%s332_s1 + $0xb] ss:$16 sm:$0xc] %vm7_vm0, %v92_v28  }
  0x97   :  { %148 = vst.msk [vmem:[%s332_s1 + $0xa] ss:$16 sm:$0x3] %vm7_vm0, %v84_v29  }
  0x98   :  { %149 = vst.msk [vmem:[%s332_s1 + $0xa] ss:$16 sm:$0xc] %vm7_vm0, %v84_v29  }
  0x9c   :  { %v116_v30 = vpop.permute.xlu1 %115  }
  0x9d   :  { %v108_v31 = vpop.permute.xlu0 %107   ;;  %156 = vst.msk [vmem:[%s332_s1 + $0xe] ss:$16 sm:$0x3] %vm7_vm0, %v116_v30  }
  0x9e   :  { %157 = vst.msk [vmem:[%s332_s1 + $0xe] ss:$16 sm:$0xc] %vm7_vm0, %v116_v30  }
  0x9f   :  { %154 = vst.msk [vmem:[%s332_s1 + $0xd] ss:$16 sm:$0x3] %vm7_vm0, %v108_v31  }
  0xa0   :  { %155 = vst.msk [vmem:[%s332_s1 + $0xd] ss:$16 sm:$0xc] %vm7_vm0, %v108_v31  }

// kernel: decoder_forward.5
= control target key start
LH: loop header
LB: loop body
LE: loop exit
PB: predicated region body
PF: predicated region fallthrough
CT: control target
= control target key end

     0   :  { %v3392_v3 = vmov 0   ;;  %vm164_vm0 = vcmask 523264   ;;  %s5979_s0 = inlined_call_operand.vmem [shape: f32[64,1250], index: 0, kind: input, shape index: {}]   ;;  %s5980_s1 = inlined_call_operand.vmem [shape: f32[64,64], index: 1, kind: input, shape index: {}]   ;;  %s5981_s2 = inlined_call_operand.vmem [shape: f32[64,1], index: 2, kind: input, shape index: {}]   ;;  %s5982_s6 = inlined_call_operand.<no memory space> [shape: f32[1,1], index: 6, kind: input, shape index: {}]   ;;  %s5983_s3 = inlined_call_operand.vmem [shape: f32[16,1], index: 3, kind: input, shape index: {}]   ;;  %s5984_s4 = inlined_call_operand.vmem [shape: f32[16,1], index: 4, kind: input, shape index: {}]   ;;  %s5985_s5 = inlined_call_operand.vmem [shape: f32[4,16], index: 5, kind: input, shape index: {}]   ;;  %s5986_s7 = inlined_call_operand.vmem [shape: f32[4,4,1250], index: 7, kind: output, shape index: {}]  }
   0x1   :  { %v106_v0 = vld [vmem:[%s5979_s0 + $0x230] sm:$0xff]  ;;  %v107_v1 = vld [vmem:[%s5979_s0 + $0x238] sm:$0xff]  ;;  %v108_v2 = vld [vmem:[%s5979_s0 + $0x240] sm:$0xff]  ;;  %3225 = vset.pattern.permute.xlu1 %v3392_v3  ;;  %3224 = vset.pattern.permute.xlu0 %v3392_v3 }
   0x2   :  { %197 = vmatpush.msra.mxu0 %v106_v0  ;;  %238 = vmatpush.msra.mxu1 %v107_v1  ;;  %v96_v4 = vld [vmem:[%s5979_s0 + $0x1e0] sm:$0xff]  ;;  %v97_v5 = vld [vmem:[%s5979_s0 + $0x1e8] sm:$0xff]  ;;  %v98_v6 = vld [vmem:[%s5979_s0 + $0x1f0] sm:$0xff] }
   0x3   :  { %279 = vmatpush.msra.mxu2 %v108_v2  ;;  %v109_v7 = vld [vmem:[%s5979_s0 + $0x248] sm:$0xff]  ;;  %v86_v8 = vld [vmem:[%s5979_s0 + $0x190] sm:$0xff]  ;;  %v87_v9 = vld [vmem:[%s5979_s0 + $0x198] sm:$0xff]  ;;  %3226 = vset.pattern.permute.xlu2 %v3392_v3 }
   0x4   :  { %198 = vmatpush.msra.mxu0 %v96_v4  ;;  %239 = vmatpush.msra.mxu1 %v97_v5  ;;  %v88_v10 = vld [vmem:[%s5979_s0 + $0x1a0] sm:$0xff]  ;;  %v99_v11 = vld [vmem:[%s5979_s0 + $0x1f8] sm:$0xff]  ;;  %v77_v13 = vld [vmem:[%s5979_s0 + $0x148] sm:$0xff] }
   0x5   :  { %280 = vmatpush.msra.mxu2 %v98_v6  ;;  %320 = vmatpush.msra.mxu3 %v109_v7  ;;  %v76_v12 = vld [vmem:[%s5979_s0 + $0x140] sm:$0xff]  ;;  %v78_v14 = vld [vmem:[%s5979_s0 + $0x150] sm:$0xff]  ;;  %v89_v15 = vld [vmem:[%s5979_s0 + $0x1a8] sm:$0xff] }
   0x6   :  { %199 = vmatpush.msra.mxu0 %v86_v8  ;;  %240 = vmatpush.msra.mxu1 %v87_v9  ;;  %v66_v16 = vld [vmem:[%s5979_s0 + $0xf0] sm:$0xff]  ;;  %v67_v17 = vld [vmem:[%s5979_s0 + $0xf8] sm:$0xff]  ;;  %v68_v18 = vld [vmem:[%s5979_s0 + $0x100] sm:$0xff] }
   0x7   :  { %281 = vmatpush.msra.mxu2 %v88_v10  ;;  %321 = vmatpush.msra.mxu3 %v99_v11  ;;  %v79_v19 = vld [vmem:[%s5979_s0 + $0x158] sm:$0xff]  ;;  %v56_v20 = vld [vmem:[%s5979_s0 + $0xa0] sm:$0xff]  ;;  %v57_v21 = vld [vmem:[%s5979_s0 + $0xa8] sm:$0xff] }
   0x8   :  { %200 = vmatpush.msra.mxu0 %v76_v12  ;;  %241 = vmatpush.msra.mxu1 %v77_v13  ;;  %v58_v22 = vld [vmem:[%s5979_s0 + $0xb0] sm:$0xff]  ;;  %v69_v23 = vld [vmem:[%s5979_s0 + $0x108] sm:$0xff]  ;;  %v47_v25 = vld [vmem:[%s5979_s0 + $0x58] sm:$0xff] }
   0x9   :  { %282 = vmatpush.msra.mxu2 %v78_v14  ;;  %322 = vmatpush.msra.mxu3 %v89_v15  ;;  %v46_v24 = vld [vmem:[%s5979_s0 + $0x50] sm:$0xff]  ;;  %v48_v26 = vld [vmem:[%s5979_s0 + $0x60] sm:$0xff]  ;;  %v59_v27 = vld [vmem:[%s5979_s0 + $0xb8] sm:$0xff] }
   0xa   :  { %201 = vmatpush.msra.mxu0 %v66_v16  ;;  %242 = vmatpush.msra.mxu1 %v67_v17  ;;  %v36_v28 = vld [vmem:[%s5979_s0] sm:$0xff]  ;;  %v37_v29 = vld [vmem:[%s5979_s0 + $0x8] sm:$0xff]  ;;  %v38_v30 = vld [vmem:[%s5979_s0 + $0x10] sm:$0xff] }
   0xb   :  { %283 = vmatpush.msra.mxu2 %v68_v18  ;;  %323 = vmatpush.msra.mxu3 %v79_v19  ;;  %v49_v31 = vld [vmem:[%s5979_s0 + $0x68] sm:$0xff]  ;;  %v3529_v32 = vld [vmem:[%s5980_s1] sm:$0xff]  ;;  %v39_v33 = vld [vmem:[%s5979_s0 + $0x18] sm:$0xff] }
   0xc   :  { %202 = vmatpush.msra.mxu0 %v56_v20  ;;  %243 = vmatpush.msra.mxu1 %v57_v21  ;;  %v116_v34 = vld [vmem:[%s5981_s2] sm:$0xff]  ;;  %v117_v35 = vld [vmem:[%s5981_s2 + $0x8] sm:$0xff]  ;;  %v118_v37 = vld [vmem:[%s5981_s2 + $0x10] sm:$0xff] }
   0xd   :  { %284 = vmatpush.msra.mxu2 %v58_v22  ;;  %324 = vmatpush.msra.mxu3 %v69_v23  ;;  %v3551_v36 = vld [vmem:[%s5980_s1 + $0x8] sm:$0xff]  ;;  %v119_v38 = vld [vmem:[%s5981_s2 + $0x18] sm:$0xff]  ;;  %v3570_v39 = vld [vmem:[%s5980_s1 + $0x10] sm:$0xff] }
   0xe   :  { %203 = vmatpush.msra.mxu0 %v46_v24  ;;  %244 = vmatpush.msra.mxu1 %v47_v25  ;;  %v110_v40 = vld [vmem:[%s5979_s0 + $0x250] sm:$0xff]  ;;  %v111_v41 = vld [vmem:[%s5979_s0 + $0x258] sm:$0xff]  ;;  %v112_v42 = vld [vmem:[%s5979_s0 + $0x260] sm:$0xff] }
   0xf   :  { %285 = vmatpush.msra.mxu2 %v48_v26  ;;  %325 = vmatpush.msra.mxu3 %v59_v27  ;;  %v100_v43 = vld [vmem:[%s5979_s0 + $0x200] sm:$0xff]  ;;  %v101_v44 = vld [vmem:[%s5979_s0 + $0x208] sm:$0xff]  ;;  %v102_v45 = vld [vmem:[%s5979_s0 + $0x210] sm:$0xff] }
  0x10   :  { %204 = vmatpush.msra.mxu0 %v36_v28  ;;  %245 = vmatpush.msra.mxu1 %v37_v29  ;;  %v113_v46 = vld [vmem:[%s5979_s0 + $0x268] sm:$0xff]  ;;  %v90_v47 = vld [vmem:[%s5979_s0 + $0x1b0] sm:$0xff]  ;;  %v91_v48 = vld [vmem:[%s5979_s0 + $0x1b8] sm:$0xff] }
  0x11   :  { %286 = vmatpush.msra.mxu2 %v38_v30  ;;  %326 = vmatpush.msra.mxu3 %v49_v31  ;;  %v92_v49 = vld [vmem:[%s5979_s0 + $0x1c0] sm:$0xff]  ;;  %v103_v50 = vld [vmem:[%s5979_s0 + $0x218] sm:$0xff]  ;;  %v81_v53 = vld [vmem:[%s5979_s0 + $0x168] sm:$0xff] }
  0x12   :  { %3048 = vmatmul.msk.f32.vlgmr.msra.gmra.mxu0 %vm164_vm0, %v3529_v32  ;;  %3056 = vmatmul.msk.f32.vlgmr.msra.gmra.mxu1 %vm164_vm0, %v3529_v32  ;;  %v3616_v51 = vld [vmem:[%s5980_s1 + $0x18] sm:$0xff]  ;;  %v80_v52 = vld [vmem:[%s5979_s0 + $0x160] sm:$0xff]  ;;  %v82_v54 = vld [vmem:[%s5979_s0 + $0x170] sm:$0xff] }
  0x13   :  { %3064 = vmatmul.msk.f32.vlgmr.msra.gmra.mxu2 %vm164_vm0, %v3529_v32  ;;  %327 = vmatpush.msra.mxu3 %v39_v33  ;;  %v93_v55 = vld [vmem:[%s5979_s0 + $0x1c8] sm:$0xff]  ;;  %v70_v56 = vld [vmem:[%s5979_s0 + $0x110] sm:$0xff]  ;;  %v71_v57 = vld [vmem:[%s5979_s0 + $0x118] sm:$0xff] }
  0x14   :  { %3072 = vmatmul.msk.f32.vlgmr.msra.gmra.mxu3 %vm164_vm0, %v3529_v32  ;;  %126 = vperm.xlu1 %3225, %v116_v34   ;;  %v72_v58 = vld [vmem:[%s5979_s0 + $0x120] sm:$0xff]  ;;  %v83_v59 = vld [vmem:[%s5979_s0 + $0x178] sm:$0xff]  ;;  %v121_v60 = vld [vmem:[%s5981_s2 + $0x28] sm:$0xff] }
  0x15   :  { %131 = vperm.xlu0 %3224, %v117_v35   ;;  %361 = vmatpush.msrb.mxu0 %v110_v40  ;;  %v122_v61 = vld [vmem:[%s5981_s2 + $0x30] sm:$0xff]  ;;  %v60_v62 = vld [vmem:[%s5979_s0 + $0xc0] sm:$0xff]  ;;  %v61_v63 = vld [vmem:[%s5979_s0 + $0xc8] sm:$0xff] }
  0x16   :  { %402 = vmatpush.msrb.mxu1 %v111_v41  ;;  %443 = vmatpush.msrb.mxu2 %v112_v42  ;;  %v3665_v0 = vld [vmem:[%s5980_s1 + $0x20] sm:$0xff]  ;;  %v73_v1 = vld [vmem:[%s5979_s0 + $0x128] sm:$0xff]  ;;  %v62_v2 = vld [vmem:[%s5979_s0 + $0xd0] sm:$0xff] }
  0x17   :  { %362 = vmatpush.msrb.mxu0 %v100_v43  ;;  %484 = vmatpush.msrb.mxu3 %v113_v46  ;;  %v50_v3 = vld [vmem:[%s5979_s0 + $0x70] sm:$0xff]  ;;  %v51_v4 = vld [vmem:[%s5979_s0 + $0x78] sm:$0xff]  ;;  %v52_v5 = vld [vmem:[%s5979_s0 + $0x80] sm:$0xff] }
  0x18   :  { %403 = vmatpush.msrb.mxu1 %v101_v44  ;;  %444 = vmatpush.msrb.mxu2 %v102_v45  ;;  %v63_v6 = vld [vmem:[%s5979_s0 + $0xd8] sm:$0xff]  ;;  %v40_v7 = vld [vmem:[%s5979_s0 + $0x20] sm:$0xff]  ;;  %v41_v8 = vld [vmem:[%s5979_s0 + $0x28] sm:$0xff] }
  0x19   :  { %363 = vmatpush.msrb.mxu0 %v90_v47  ;;  %485 = vmatpush.msrb.mxu3 %v103_v50  ;;  %v42_v9 = vld [vmem:[%s5979_s0 + $0x30] sm:$0xff]  ;;  %v53_v10 = vld [vmem:[%s5979_s0 + $0x88] sm:$0xff]  ;;  %v120_v11 = vld [vmem:[%s5981_s2 + $0x20] sm:$0xff] }
  0x1a   :  { %3049 = vmatmul.msk.f32.gmra.mxu0 %vm164_vm0, %v3551_v36  ;;  %3057 = vmatmul.msk.f32.gmra.mxu1 %vm164_vm0, %v3551_v36  ;;  %v123_v12 = vld [vmem:[%s5981_s2 + $0x38] sm:$0xff]  ;;  %v3714_v13 = vld [vmem:[%s5980_s1 + $0x28] sm:$0xff]  ;;  %v3730_v15 = vld [vmem:[%s5980_s1 + $0x30] sm:$0xff] }
  0x1b   :  { %3065 = vmatmul.msk.f32.gmra.mxu2 %vm164_vm0, %v3551_v36  ;;  %404 = vmatpush.msrb.mxu1 %v91_v48  ;;  %v43_v14 = vld [vmem:[%s5979_s0 + $0x38] sm:$0xff]  ;;  %v114_v17 = vld [vmem:[%s5979_s0 + $0x270] sm:$0xff]  ;;  %v104_v19 = vld [vmem:[%s5979_s0 + $0x220] sm:$0xff] }
  0x1c   :  { %3073 = vmatmul.msk.f32.gmra.mxu3 %vm164_vm0, %v3551_v36  ;;  %136 = vperm.xlu1 %3225, %v118_v37   ;;  %v3743_v16 = vld [vmem:[%s5980_s1 + $0x38] sm:$0xff]  ;;  %v105_v20 = vld [vmem:[%s5979_s0 + $0x228] sm:$0xff]  ;;  %v94_v21 = vld [vmem:[%s5979_s0 + $0x1d0] sm:$0xff] }
  0x1d   :  { %141 = vperm.xlu0 %3224, %v119_v38   ;;  %445 = vmatpush.msrb.mxu2 %v92_v49  ;;  %v115_v18 = vld [vmem:[%s5979_s0 + $0x278] sm:$0xff]  ;;  %v84_v23 = vld [vmem:[%s5979_s0 + $0x180] sm:$0xff]  ;;  %v85_v24 = vld [vmem:[%s5979_s0 + $0x188] sm:$0xff] }
  0x1e   :  { %364 = vmatpush.msrb.mxu0 %v80_v52  ;;  %405 = vmatpush.msrb.mxu1 %v81_v53  ;;  %v95_v22 = vld [vmem:[%s5979_s0 + $0x1d8] sm:$0xff]  ;;  %v74_v25 = vld [vmem:[%s5979_s0 + $0x130] sm:$0xff]  ;;  %v64_v27 = vld [vmem:[%s5979_s0 + $0xe0] sm:$0xff] }
  0x1f   :  { %446 = vmatpush.msrb.mxu2 %v82_v54  ;;  %486 = vmatpush.msrb.mxu3 %v93_v55  ;;  %v75_v26 = vld [vmem:[%s5979_s0 + $0x138] sm:$0xff]  ;;  %v65_v28 = vld [vmem:[%s5979_s0 + $0xe8] sm:$0xff]  ;;  %v54_v29 = vld [vmem:[%s5979_s0 + $0x90] sm:$0xff] }
  0x20   :  { %365 = vmatpush.msrb.mxu0 %v70_v56  ;;  %406 = vmatpush.msrb.mxu1 %v71_v57  ;;  %v55_v30 = vld [vmem:[%s5979_s0 + $0x98] sm:$0xff]  ;;  %v44_v31 = vld [vmem:[%s5979_s0 + $0x40] sm:$0xff]  ;;  %v45_v33 = vld [vmem:[%s5979_s0 + $0x48] sm:$0xff] }
  0x21   :  { %447 = vmatpush.msrb.mxu2 %v72_v58  ;;  %487 = vmatpush.msrb.mxu3 %v83_v59 }
  0x22   :  { %3050 = vmatmul.msk.f32.gmra.mxu0 %vm164_vm0, %v3570_v39  ;;  %3058 = vmatmul.msk.f32.gmra.mxu1 %vm164_vm0, %v3570_v39 }
  0x23   :  { %3066 = vmatmul.msk.f32.gmra.mxu2 %vm164_vm0, %v3570_v39  ;;  %151 = vperm.xlu2 %3226, %v121_v60  }
  0x24   :  { %3074 = vmatmul.msk.f32.gmra.mxu3 %vm164_vm0, %v3570_v39  ;;  %156 = vperm.xlu1 %3225, %v122_v61  }
  0x25   :  { %366 = vmatpush.msrb.mxu0 %v60_v62  ;;  %407 = vmatpush.msrb.mxu1 %v61_v63 }
  0x26   :  { %488 = vmatpush.msrb.mxu3 %v73_v1  ;;  %448 = vmatpush.msrb.mxu2 %v62_v2 }
  0x27   :  { %367 = vmatpush.msrb.mxu0 %v50_v3  ;;  %408 = vmatpush.msrb.mxu1 %v51_v4 }
  0x28   :  { %449 = vmatpush.msrb.mxu2 %v52_v5  ;;  %489 = vmatpush.msrb.mxu3 %v63_v6 }
  0x29   :  { %368 = vmatpush.msrb.mxu0 %v40_v7  ;;  %409 = vmatpush.msrb.mxu1 %v41_v8 }
  0x2a   :  { %3051 = vmatmul.msk.f32.gmra.mxu0 %vm164_vm0, %v3616_v51  ;;  %3059 = vmatmul.msk.f32.gmra.mxu1 %vm164_vm0, %v3616_v51 }
  0x2b   :  { %3067 = vmatmul.msk.f32.gmra.mxu2 %vm164_vm0, %v3616_v51  ;;  %490 = vmatpush.msrb.mxu3 %v53_v10 }
  0x2c   :  { %3075 = vmatmul.msk.f32.gmra.mxu3 %vm164_vm0, %v3616_v51  ;;  %450 = vmatpush.msrb.mxu2 %v42_v9 }
  0x2d   :  { %146 = vperm.xlu2 %3226, %v120_v11   ;;  %161 = vperm.xlu0 %3224, %v123_v12  }
  0x2e   :  { %491 = vmatpush.msrb.mxu3 %v43_v14  ;;  %525 = vmatpush.msra.mxu0 %v114_v17 }
  0x2f   :  { %566 = vmatpush.msra.mxu1 %v115_v18 }
  0x30   :  { %526 = vmatpush.msra.mxu0 %v104_v19 }
  0x31   :  { %567 = vmatpush.msra.mxu1 %v105_v20 }
  0x32   :  { %3052 = vmatmul.msk.f32.gmra.mxu0 %vm164_vm0, %v3665_v0  ;;  %3060 = vmatmul.msk.f32.gmra.mxu1 %vm164_vm0, %v3665_v0 }
  0x33   :  { %3068 = vmatmul.msk.f32.gmra.mxu2 %vm164_vm0, %v3665_v0  ;;  %527 = vmatpush.msra.mxu0 %v94_v21 }
  0x34   :  { %3076 = vmatmul.msk.f32.gmra.mxu3 %vm164_vm0, %v3665_v0  ;;  %568 = vmatpush.msra.mxu1 %v95_v22 }
  0x35   :  { %528 = vmatpush.msra.mxu0 %v84_v23 }
  0x36   :  { %569 = vmatpush.msra.mxu1 %v85_v24 }
  0x37   :  { %529 = vmatpush.msra.mxu0 %v74_v25 }
  0x38   :  { %570 = vmatpush.msra.mxu1 %v75_v26 }
  0x39   :  { %530 = vmatpush.msra.mxu0 %v64_v27 }
  0x3a   :  { %3053 = vmatmul.msk.f32.gmra.mxu0 %vm164_vm0, %v3714_v13  ;;  %3061 = vmatmul.msk.f32.gmra.mxu1 %vm164_vm0, %v3714_v13 }
  0x3b   :  { %3069 = vmatmul.msk.f32.gmra.mxu2 %vm164_vm0, %v3714_v13  ;;  %571 = vmatpush.msra.mxu1 %v65_v28 }
  0x3c   :  { %3077 = vmatmul.msk.f32.gmra.mxu3 %vm164_vm0, %v3714_v13  ;;  %531 = vmatpush.msra.mxu0 %v54_v29 }
  0x3d   :  { %572 = vmatpush.msra.mxu1 %v55_v30 }
  0x3e   :  { %532 = vmatpush.msra.mxu0 %v44_v31 }
  0x3f   :  { %573 = vmatpush.msra.mxu1 %v45_v33 }
  0x42   :  { %3054 = vmatmul.msk.f32.gmra.mxu0 %vm164_vm0, %v3730_v15  ;;  %3062 = vmatmul.msk.f32.gmra.mxu1 %vm164_vm0, %v3730_v15 }
  0x43   :  { %3070 = vmatmul.msk.f32.gmra.mxu2 %vm164_vm0, %v3730_v15 }
  0x44   :  { %3078 = vmatmul.msk.f32.gmra.mxu3 %vm164_vm0, %v3730_v15 }
  0x4a   :  { %3055 = vmatmul.msk.f32.gmra.mxu0 %vm164_vm0, %v3743_v16  ;;  %3063 = vmatmul.msk.f32.gmra.mxu1 %vm164_vm0, %v3743_v16 }
  0x4b   :  { %3071 = vmatmul.msk.f32.gmra.mxu2 %vm164_vm0, %v3743_v16 }
  0x4c   :  { %3079 = vmatmul.msk.f32.gmra.mxu3 %vm164_vm0, %v3743_v16 }
  0x52   :  { %3080 = vmatmul.msk.f32.vlgmr.msrb.gmra.mxu0 %vm164_vm0, %v3529_v32  ;;  %3088 = vmatmul.msk.f32.vlgmr.msrb.gmra.mxu1 %vm164_vm0, %v3529_v32 }
  0x53   :  { %3096 = vmatmul.msk.f32.vlgmr.msrb.gmra.mxu2 %vm164_vm0, %v3529_v32 }
  0x54   :  { %3104 = vmatmul.msk.f32.vlgmr.msrb.gmra.mxu3 %vm164_vm0, %v3529_v32 }
  0x5a   :  { %3081 = vmatmul.msk.f32.gmra.mxu0 %vm164_vm0, %v3551_v36  ;;  %3089 = vmatmul.msk.f32.gmra.mxu1 %vm164_vm0, %v3551_v36 }
  0x5b   :  { %3097 = vmatmul.msk.f32.gmra.mxu2 %vm164_vm0, %v3551_v36 }
  0x5c   :  { %3105 = vmatmul.msk.f32.gmra.mxu3 %vm164_vm0, %v3551_v36 }
  0x62   :  { %3082 = vmatmul.msk.f32.gmra.mxu0 %vm164_vm0, %v3570_v39  ;;  %3090 = vmatmul.msk.f32.gmra.mxu1 %vm164_vm0, %v3570_v39 }
  0x63   :  { %3098 = vmatmul.msk.f32.gmra.mxu2 %vm164_vm0, %v3570_v39 }
  0x64   :  { %3106 = vmatmul.msk.f32.gmra.mxu3 %vm164_vm0, %v3570_v39 }
  0x6a   :  { %3083 = vmatmul.msk.f32.gmra.mxu0 %vm164_vm0, %v3616_v51  ;;  %3091 = vmatmul.msk.f32.gmra.mxu1 %vm164_vm0, %v3616_v51 }
  0x6b   :  { %3099 = vmatmul.msk.f32.gmra.mxu2 %vm164_vm0, %v3616_v51 }
  0x6c   :  { %3107 = vmatmul.msk.f32.gmra.mxu3 %vm164_vm0, %v3616_v51 }
  0x72   :  { %3084 = vmatmul.msk.f32.gmra.mxu0 %vm164_vm0, %v3665_v0  ;;  %3092 = vmatmul.msk.f32.gmra.mxu1 %vm164_vm0, %v3665_v0 }
  0x73   :  { %3100 = vmatmul.msk.f32.gmra.mxu2 %vm164_vm0, %v3665_v0 }
  0x74   :  { %3108 = vmatmul.msk.f32.gmra.mxu3 %vm164_vm0, %v3665_v0 }
  0x7a   :  { %3085 = vmatmul.msk.f32.gmra.mxu0 %vm164_vm0, %v3714_v13  ;;  %3093 = vmatmul.msk.f32.gmra.mxu1 %vm164_vm0, %v3714_v13 }
  0x7b   :  { %3101 = vmatmul.msk.f32.gmra.mxu2 %vm164_vm0, %v3714_v13 }
  0x7c   :  { %3109 = vmatmul.msk.f32.gmra.mxu3 %vm164_vm0, %v3714_v13 }
  0x7d   :  { %v3950_v19 = vpop.permute.xlu2 %151 }
  0x82   :  { %3086 = vmatmul.msk.f32.gmra.mxu0 %vm164_vm0, %v3730_v15  ;;  %3094 = vmatmul.msk.f32.gmra.mxu1 %vm164_vm0, %v3730_v15 }
  0x83   :  { %3102 = vmatmul.msk.f32.gmra.mxu2 %vm164_vm0, %v3730_v15 }
  0x84   :  { %3110 = vmatmul.msk.f32.gmra.mxu3 %vm164_vm0, %v3730_v15 }
  0x86   :  { %v3899_v50 = vpop.permute.xlu1 %126 }
  0x87   :  { %v3913_v56 = vpop.permute.xlu0 %131 }
  0x8a   :  { %3087 = vmatmul.msk.f32.gmra.mxu0 %vm164_vm0, %v3743_v16  ;;  %3095 = vmatmul.msk.f32.gmra.mxu1 %vm164_vm0, %v3743_v16 }
  0x8b   :  { %3103 = vmatmul.msk.f32.gmra.mxu2 %vm164_vm0, %v3743_v16 }
  0x8c   :  { %3111 = vmatmul.msk.f32.gmra.mxu3 %vm164_vm0, %v3743_v16 }
  0x8e   :  { %v3936_v9 = vpop.permute.xlu1 %136 }
  0x8f   :  { %v206_v34 = vpop.f32.mrf.mxu0  ;;  %v247_v35 = vpop.f32.mrf.mxu1 }
  0x90   :  { %v207_v54 = vadd.f32 %v206_v34, %v3899_v50  ;;  %v248_v55 = vadd.f32 %v247_v35, %v3899_v50  ;;  %v3967_v30 = vpop.permute.xlu0 %141 }
  0x92   :  { %3112 = vmatmul.msk.f32.vlgmr.msra.gmra.mxu0 %vm164_vm0, %v3529_v32  ;;  %3120 = vmatmul.msk.f32.vlgmr.msra.gmra.mxu1 %vm164_vm0, %v3529_v32  ;;  %v679_v58 = vmul.f32 0.01, %v207_v54  ;;  %vm599_vm1 = vcmp.ge.f32.partialorder %v207_v54, 0.0  ;;  %v680_v60 = vmul.f32 0.01, %v248_v55  ;;  %vm600_vm2 = vcmp.ge.f32.partialorder %v248_v55, 0.0 }
  0x94   :  { %v3924_v1 = vsel %vm599_vm1, %v207_v54, %v679_v58  ;;  %v3927_v4 = vsel %vm600_vm2, %v248_v55, %v680_v60 }
  0x95   :  { %6032 = vst [vmem:[#allocation3_spill] sm:$0xff] %v3924_v1  ;;  %v940_v10 = vmul.f32 %v3924_v1, %v3924_v1  ;;  %v941_v11 = vmul.f32 %v3927_v4, %v3927_v4  ;;  %v843_v25 = vadd.f32 %v3927_v4, %v3924_v1 }
  0x96   :  { %v288_v37 = vpop.f32.mrf.mxu2  ;;  %6033 = vst [vmem:[#allocation4_spill] sm:$0xff] %v3927_v4 }
  0x97   :  { %v209_v38 = vpop.f32.mrf.mxu0  ;;  %v250_v40 = vpop.f32.mrf.mxu1  ;;  %v289_v59 = vadd.f32 %v288_v37, %v3899_v50  ;;  %v1020_v26 = vadd.f32 %v941_v11, %v940_v10 }
  0x98   :  { %v329_v41 = vpop.f32.mrf.mxu3  ;;  %v210_v61 = vadd.f32 %v209_v38, %v3913_v56  ;;  %v251_v62 = vadd.f32 %v250_v40, %v3913_v56 }
  0x99   :  { %v681_v2 = vmul.f32 0.01, %v289_v59  ;;  %v330_v3 = vadd.f32 %v329_v41, %v3899_v50  ;;  %vm601_vm3 = vcmp.ge.f32.partialorder %v289_v59, 0.0 }
  0x9a   :  { %3113 = vmatmul.msk.f32.gmra.mxu0 %vm164_vm0, %v3551_v36  ;;  %3121 = vmatmul.msk.f32.gmra.mxu1 %vm164_vm0, %v3551_v36  ;;  %v689_v5 = vmul.f32 0.01, %v210_v61  ;;  %v690_v6 = vmul.f32 0.01, %v251_v62  ;;  %vm609_vm4 = vcmp.ge.f32.partialorder %v210_v61, 0.0  ;;  %vm610_vm5 = vcmp.ge.f32.partialorder %v251_v62, 0.0 }
  0x9b   :  { %v3942_v12 = vsel %vm601_vm3, %v289_v59, %v681_v2  ;;  %vm602_vm6 = vcmp.ge.f32.partialorder %v330_v3, 0.0 }
  0x9c   :  { %6034 = vst [vmem:[#allocation5_spill] sm:$0xff] %v3942_v12  ;;  %v3944_v14 = vsel %vm609_vm4, %v210_v61, %v689_v5  ;;  %v3946_v17 = vsel %vm610_vm5, %v251_v62, %v690_v6  ;;  %v942_v27 = vmul.f32 %v3942_v12, %v3942_v12 }
  0x9d   :  { %v950_v28 = vmul.f32 %v3944_v14, %v3944_v14  ;;  %v951_v29 = vmul.f32 %v3946_v17, %v3946_v17 }
  0x9e   :  { %v291_v42 = vpop.f32.mrf.mxu2 }
  0x9f   :  { %v212_v43 = vpop.f32.mrf.mxu0  ;;  %v253_v44 = vpop.f32.mrf.mxu1  ;;  %v292_v8 = vadd.f32 %v291_v42, %v3913_v56 }
  0xa0   :  { %v332_v32 = vpop.f32.mrf.mxu3  ;;  %v254_v18 = vadd.f32 %v253_v44, %v3936_v9  ;;  %v1021_v44 = vadd.f32 %v1020_v26, %v942_v27 }
  0xa1   :  { %v691_v21 = vmul.f32 0.01, %v292_v8  ;;  %v333_v22 = vadd.f32 %v332_v32, %v3913_v56  ;;  %vm611_vm7 = vcmp.ge.f32.partialorder %v292_v8, 0.0 }
  0xa2   :  { %3114 = vmatmul.msk.f32.gmra.mxu0 %vm164_vm0, %v3570_v39  ;;  %3122 = vmatmul.msk.f32.gmra.mxu1 %vm164_vm0, %v3570_v39  ;;  %v700_v34 = vmul.f32 0.01, %v254_v18  ;;  %vm620_vm9 = vcmp.ge.f32.partialorder %v254_v18, 0.0 }
  0xa3   :  { %v3975_v35 = vsel %vm611_vm7, %v292_v8, %v691_v21  ;;  %v692_v37 = vmul.f32 0.01, %v333_v22  ;;  %vm612_vm10 = vcmp.ge.f32.partialorder %v333_v22, 0.0 }
  0xa5   :  { %v3997_v55 = vsel %vm612_vm10, %v333_v22, %v692_v37 }
  0xa6   :  { %v3881_v47 = vpop.f32.mrf.mxu2 }
  0xa7   :  { %v3877_v45 = vpop.f32.mrf.mxu0  ;;  %v3879_v46 = vpop.f32.mrf.mxu1  ;;  %v295_v38 = vadd.f32 %v3881_v47, %v3936_v9  ;;  %v952_v47 = vmul.f32 %v3975_v35, %v3975_v35 }
  0xa8   :  { %v3887_v36 = vpop.f32.mrf.mxu3  ;;  %v216_v40 = vadd.f32 %v3877_v45, %v3967_v30  ;;  %v257_v41 = vadd.f32 %v3879_v46, %v3967_v30  ;;  %v3995_v45 = vsel %vm620_vm9, %v254_v18, %v700_v34  ;;  %v1032_v46 = vadd.f32 %v951_v29, %v950_v28 }
  0xa9   :  { %6037 = vst [vmem:[#allocation8_spill] sm:$0xff] %v3995_v45  ;;  %v701_v58 = vmul.f32 0.01, %v295_v38  ;;  %v336_v59 = vadd.f32 %v3887_v36, %v3936_v9  ;;  %vm621_vm11 = vcmp.ge.f32.partialorder %v295_v38, 0.0  ;;  %v961_v8 = vmul.f32 %v3995_v45, %v3995_v45  ;;  %v4012_v36 = vpop.permute.xlu2 %146 }
  0xaa   :  { %3115 = vmatmul.msk.f32.gmra.mxu0 %vm164_vm0, %v3616_v51  ;;  %3123 = vmatmul.msk.f32.gmra.mxu1 %vm164_vm0, %v3616_v51  ;;  %v709_v2 = vmul.f32 0.01, %v216_v40  ;;  %vm629_vm12 = vcmp.ge.f32.partialorder %v216_v40, 0.0  ;;  %vm630_vm13 = vcmp.ge.f32.partialorder %v257_v41, 0.0  ;;  %v1033_v10 = vadd.f32 %v1032_v46, %v952_v47 }
  0xab   :  { %vm622_vm14 = vcmp.ge.f32.partialorder %v336_v59, 0.0  ;;  %v702_v18 = vmul.f32 0.01, %v336_v59 }
  0xac   :  { %v4022_v22 = vsel %vm629_vm12, %v216_v40, %v709_v2 }
  0xad   :  { %6039 = vst [vmem:[#allocation10_spill] sm:$0xff] %v4022_v22  ;;  %v970_v40 = vmul.f32 %v4022_v22, %v4022_v22 }
  0xae   :  { %v3893_v39 = vpop.f32.mrf.mxu2 }
  0xaf   :  { %v3889_v48 = vpop.f32.mrf.mxu0  ;;  %v3891_v49 = vpop.f32.mrf.mxu1  ;;  %v298_v21 = vadd.f32 %v3893_v39, %v3967_v30 }
  0xb0   :  { %v3905_v51 = vpop.f32.mrf.mxu3  ;;  %v219_v26 = vadd.f32 %v3889_v48, %v4012_v36  ;;  %v260_v27 = vadd.f32 %v3891_v49, %v4012_v36 }
  0xb1   :  { %vm631_vm15 = vcmp.ge.f32.partialorder %v298_v21, 0.0 }
  0xb2   :  { %3116 = vmatmul.msk.f32.gmra.mxu0 %vm164_vm0, %v3665_v0  ;;  %3124 = vmatmul.msk.f32.gmra.mxu1 %vm164_vm0, %v3665_v0  ;;  %v719_v47 = vmul.f32 0.01, %v219_v26  ;;  %v720_v46 = vmul.f32 0.01, %v260_v27  ;;  %vm640_vm1 = vcmp.ge.f32.partialorder %v260_v27, 0.0 }
  0xb6   :  { %v3915_v57 = vpop.f32.mrf.mxu2 }
  0xb7   :  { %v3901_v52 = vpop.f32.mrf.mxu0  ;;  %v3903_v53 = vpop.f32.mrf.mxu1  ;;  %v301_v48 = vadd.f32 %v3915_v57, %v4012_v36  ;;  %v339_v57 = vadd.f32 %v3905_v51, %v3967_v30 }
  0xb8   :  { %v3929_v7 = vpop.f32.mrf.mxu3 }
  0xb9   :  { %vm641_vm2 = vcmp.ge.f32.partialorder %v301_v48, 0.0  ;;  %vm632_vm3 = vcmp.ge.f32.partialorder %v339_v57, 0.0 }
  0xba   :  { %3117 = vmatmul.msk.f32.gmra.mxu0 %vm164_vm0, %v3714_v13  ;;  %3125 = vmatmul.msk.f32.gmra.mxu1 %vm164_vm0, %v3714_v13  ;;  %v682_v13 = vmul.f32 0.01, %v330_v3 }
  0xbc   :  { %v3969_v31 = vsel %vm602_vm6, %v330_v3, %v682_v13  ;;  %v710_v3 = vmul.f32 0.01, %v257_v41  ;;  %v953_v13 = vmul.f32 %v3997_v55, %v3997_v55 }
  0xbd   :  { %6035 = vst [vmem:[#allocation6_spill] sm:$0xff] %v3969_v31  ;;  %v943_v32 = vmul.f32 %v3969_v31, %v3969_v31 }
  0xbe   :  { %v3952_v20 = vpop.f32.mrf.mxu2  ;;  %v4038_v39 = vadd.f32 %v1033_v10, %v953_v13  ;;  %v4080_v13 = vsel %vm640_vm1, %v260_v27, %v720_v46 }
  0xbf   :  { %v3920_v63 = vpop.f32.mrf.mxu0  ;;  %v3922_v0 = vpop.f32.mrf.mxu1  ;;  %v4033_v29 = vadd.f32 %v1021_v44, %v943_v32  ;;  %v711_v32 = vmul.f32 0.01, %v298_v21  ;;  %6044 = vst [vmem:[#allocation15_spill] sm:$0xff] %v4080_v13  ;;  %v981_v27 = vmul.f32 %v4080_v13, %v4080_v13 }
  0xc0   :  { %v3983_v42 = vpop.f32.mrf.mxu3 }
  0xc2   :  { %3118 = vmatmul.msk.f32.gmra.mxu0 %vm164_vm0, %v3730_v15  ;;  %3126 = vmatmul.msk.f32.gmra.mxu1 %vm164_vm0, %v3730_v15  ;;  %v213_v15 = vadd.f32 %v212_v43, %v3936_v9  ;;  %v844_v43 = vadd.f32 %v843_v25, %v3942_v12  ;;  %v4024_v25 = vsel %vm630_vm13, %v257_v41, %v710_v3  ;;  %v721_v3 = vmul.f32 0.01, %v301_v48 }
  0xc3   :  { %6040 = vst [vmem:[#allocation11_spill] sm:$0xff] %v4024_v25  ;;  %v971_v41 = vmul.f32 %v4024_v25, %v4024_v25  ;;  %v880_v2 = vadd.f32 %v4024_v25, %v4022_v22 }
  0xc4   :  { %vm619_vm8 = vcmp.ge.f32.partialorder %v213_v15, 0.0  ;;  %v699_v33 = vmul.f32 0.01, %v213_v15  ;;  %v4031_v28 = vadd.f32 %v844_v43, %v3969_v31  ;;  %v4052_v43 = vsel %vm622_vm14, %v336_v59, %v702_v18 }
  0xc5   :  { %6041 = vst [vmem:[#allocation12_spill] sm:$0xff] %v4052_v43  ;;  %v263_v59 = vadd.f32 %v3903_v53, %v3950_v19  ;;  %v1056_v10 = vadd.f32 %v971_v41, %v970_v40  ;;  %v4076_v53 = vsel %vm631_vm15, %v298_v21, %v711_v32  ;;  %v712_v18 = vmul.f32 0.01, %v339_v57  ;;  %v4086_v41 = vpop.permute.xlu1 %156 }
  0xc6   :  { %v3993_v54 = vsel %vm619_vm8, %v213_v15, %v699_v33  ;;  %v4006_v5 = vpop.f32.mrf.mxu2  ;;  %v4018_v15 = vsel %vm621_vm11, %v295_v38, %v701_v58  ;;  %v222_v58 = vadd.f32 %v3901_v52, %v3950_v19  ;;  %v963_v52 = vmul.f32 %v4052_v43, %v4052_v43  ;;  %6042 = vst [vmem:[#allocation13_spill] sm:$0xff] %v4076_v53 }
  0xc7   :  { %v3955_v23 = vpop.f32.mrf.mxu0  ;;  %v3957_v24 = vpop.f32.mrf.mxu1  ;;  %6036 = vst [vmem:[#allocation7_spill] sm:$0xff] %v3993_v54  ;;  %v960_v6 = vmul.f32 %v3993_v54, %v3993_v54  ;;  %v868_v11 = vadd.f32 %v3995_v45, %v3993_v54  ;;  %v962_v38 = vmul.f32 %v4018_v15, %v4018_v15  ;;  %vm650_vm5 = vcmp.ge.f32.partialorder %v263_v59, 0.0 }
  0xc8   :  { %6038 = vst [vmem:[#allocation9_spill] sm:$0xff] %v4018_v15  ;;  %v4045_v49 = vpop.f32.mrf.mxu3  ;;  %vm649_vm4 = vcmp.ge.f32.partialorder %v222_v58, 0.0  ;;  %v304_v40 = vadd.f32 %v3952_v20, %v3950_v19  ;;  %v972_v21 = vmul.f32 %v4076_v53, %v4076_v53  ;;  %v881_v20 = vadd.f32 %v880_v2, %v4076_v53 }
  0xc9   :  { %v1044_v33 = vadd.f32 %v961_v8, %v960_v6  ;;  %v869_v37 = vadd.f32 %v868_v11, %v4018_v15  ;;  %v342_v6 = vadd.f32 %v3929_v7, %v4012_v36  ;;  %v729_v7 = vmul.f32 0.01, %v222_v58 }
  0xca   :  { %3119 = vmatmul.msk.f32.gmra.mxu0 %vm164_vm0, %v3743_v16  ;;  %3127 = vmatmul.msk.f32.gmra.mxu1 %vm164_vm0, %v3743_v16  ;;  %v856_v16 = vadd.f32 %v3946_v17, %v3944_v14  ;;  %vm639_vm0 = vcmp.ge.f32.partialorder %v219_v26, 0.0  ;;  %v1057_v53 = vadd.f32 %v1056_v10, %v972_v21  ;;  %vm651_vm7 = vcmp.ge.f32.partialorder %v304_v40, 0.0 }
  0xcb   :  { %v4071_v51 = vadd.f32 %v869_v37, %v4052_v43  ;;  %v4078_v11 = vsel %vm639_vm0, %v219_v26, %v719_v47  ;;  %v722_v37 = vmul.f32 0.01, %v342_v6  ;;  %vm642_vm6 = vcmp.ge.f32.partialorder %v342_v6, 0.0 }
  0xcc   :  { %v857_v62 = vadd.f32 %v856_v16, %v3975_v35  ;;  %6043 = vst [vmem:[#allocation14_spill] sm:$0xff] %v4078_v11  ;;  %v980_v26 = vmul.f32 %v4078_v11, %v4078_v11  ;;  %v892_v46 = vadd.f32 %v4080_v13, %v4078_v11  ;;  %v4111_v45 = vsel %vm649_vm4, %v222_v58, %v729_v7  ;;  %v4133_v7 = vpop.permute.xlu0 %161 }
  0xcd   :  { %6047 = vst [vmem:[#allocation18_spill] sm:$0xff] %v4111_v45  ;;  %v4118_v2 = vsel %vm642_vm6, %v342_v6, %v722_v37  ;;  %v307_v58 = vadd.f32 %v4006_v5, %v4086_v41  ;;  %v990_v6 = vmul.f32 %v4111_v45, %v4111_v45 }
  0xce   :  { %v4036_v34 = vadd.f32 %v857_v62, %v3997_v55  ;;  %v1045_v62 = vadd.f32 %v1044_v33, %v962_v38  ;;  %v4068_v8 = vpop.f32.mrf.mxu2  ;;  %v730_v33 = vmul.f32 0.01, %v263_v59  ;;  %v4082_v38 = vsel %vm641_vm2, %v301_v48, %v721_v3  ;;  %6049 = vst [vmem:[#allocation20_spill] sm:$0xff] %v4118_v2 }
  0xcf   :  { %v4001_v60 = vpop.f32.mrf.mxu0  ;;  %v4003_v61 = vpop.f32.mrf.mxu1  ;;  %6045 = vst [vmem:[#allocation16_spill] sm:$0xff] %v4082_v38  ;;  %v4104_v3 = vsel %vm632_vm3, %v339_v57, %v712_v18  ;;  %v982_v15 = vmul.f32 %v4082_v38, %v4082_v38  ;;  %v266_v57 = vadd.f32 %v3922_v0, %v4086_v41  ;;  %v345_v18 = vadd.f32 %v3983_v42, %v3950_v19 }
  0xd0   :  { %v4098_v47 = vadd.f32 %v1045_v62, %v963_v52  ;;  %6046 = vst [vmem:[#allocation17_spill] sm:$0xff] %v4104_v3  ;;  %v4106_v43 = vpop.f32.mrf.mxu3  ;;  %v4114_v54 = vsel %vm650_vm5, %v263_v59, %v730_v33  ;;  %v225_v62 = vadd.f32 %v3920_v63, %v4086_v41  ;;  %v731_v52 = vmul.f32 0.01, %v304_v40 }
  0xd1   :  { %6048 = vst [vmem:[#allocation19_spill] sm:$0xff] %v4114_v54  ;;  %v1068_v25 = vadd.f32 %v981_v27, %v980_v26  ;;  %v973_v59 = vmul.f32 %v4104_v3, %v4104_v3  ;;  %v893_v63 = vadd.f32 %v892_v46, %v4082_v38  ;;  %v991_v0 = vmul.f32 %v4114_v54, %v4114_v54 }
  0xd2   :  { %v983_v33 = vmul.f32 %v4118_v2, %v4118_v2  ;;  %vm659_vm8 = vcmp.ge.f32.partialorder %v225_v62, 0.0  ;;  %v739_v5 = vmul.f32 0.01, %v225_v62  ;;  %v4139_v37 = vsel %vm651_vm7, %v304_v40, %v731_v52 }
  0xd3   :  { %v1069_v10 = vadd.f32 %v1068_v25, %v982_v15  ;;  %6050 = vst [vmem:[#allocation21_spill] sm:$0xff] %v4139_v37  ;;  %vm660_vm9 = vcmp.ge.f32.partialorder %v266_v57, 0.0  ;;  %v740_v21 = vmul.f32 0.01, %v266_v57  ;;  %v732_v26 = vmul.f32 0.01, %v345_v18 }
  0xd4   :  { %vm652_vm10 = vcmp.ge.f32.partialorder %v345_v18, 0.0  ;;  %v741_v27 = vmul.f32 0.01, %v307_v58  ;;  %v228_v46 = vadd.f32 %v3955_v23, %v4133_v7  ;;  %v269_v38 = vadd.f32 %v3957_v24, %v4133_v7 }
  0xd5   :  { %v4150_v25 = vadd.f32 %v881_v20, %v4104_v3  ;;  %v4152_v40 = vadd.f32 %v1057_v53, %v973_v59  ;;  %vm661_vm11 = vcmp.ge.f32.partialorder %v307_v58, 0.0  ;;  %v348_v52 = vadd.f32 %v4045_v49, %v4086_v41 }
  0xd6   :  { %v4135_v42 = vpop.f32.mrf.mxu2  ;;  %v904_v13 = vadd.f32 %v4114_v54, %v4111_v45  ;;  %v1080_v23 = vadd.f32 %v991_v0, %v990_v6  ;;  %v4159_v11 = vadd.f32 %v893_v63, %v4118_v2  ;;  %v4161_v24 = vadd.f32 %v1069_v10, %v983_v33 }
  0xd7   :  { %v4054_v44 = vpop.f32.mrf.mxu0  ;;  %v4056_v16 = vpop.f32.mrf.mxu1  ;;  %v992_v31 = vmul.f32 %v4139_v37, %v4139_v37  ;;  %v4166_v20 = vsel %vm659_vm8, %v225_v62, %v739_v5  ;;  %v4169_v53 = vsel %vm660_vm9, %v266_v57, %v740_v21  ;;  %v4172_v49 = vsel %vm652_vm10, %v345_v18, %v732_v26 }
  0xd8   :  { %6051 = vst [vmem:[#allocation22_spill] sm:$0xff] %v4166_v20  ;;  %v493_v59 = vpop.f32.mrf.mxu3  ;;  %v4174_v3 = vsel %vm661_vm11, %v307_v58, %v741_v27  ;;  %v749_v6 = vmul.f32 0.01, %v228_v46  ;;  %v750_v63 = vmul.f32 0.01, %v269_v38  ;;  %v371_v0 = vadd.f32 %v4001_v60, %v3899_v50 }
  0xd9   :  { %6052 = vst [vmem:[#allocation23_spill] sm:$0xff] %v4169_v53  ;;  %vm669_vm12 = vcmp.ge.f32.partialorder %v228_v46, 0.0  ;;  %vm670_vm13 = vcmp.ge.f32.partialorder %v269_v38, 0.0  ;;  %v742_v10 = vmul.f32 0.01, %v348_v52  ;;  %v310_v62 = vadd.f32 %v4068_v8, %v4133_v7 }
  0xda   :  { %6053 = vst [vmem:[#allocation24_spill] sm:$0xff] %v4172_v49  ;;  %v905_v57 = vadd.f32 %v904_v13, %v4139_v37  ;;  %v1000_v18 = vmul.f32 %v4166_v20, %v4166_v20  ;;  %v1001_v58 = vmul.f32 %v4169_v53, %v4169_v53  ;;  %vm662_vm14 = vcmp.ge.f32.partialorder %v348_v52, 0.0 }
  0xdb   :  { %6054 = vst [vmem:[#allocation25_spill] sm:$0xff] %v4174_v3  ;;  %v1081_v33 = vadd.f32 %v1080_v23, %v992_v31  ;;  %v916_v5 = vadd.f32 %v4169_v53, %v4166_v20  ;;  %v993_v60 = vmul.f32 %v4172_v49, %v4172_v49  ;;  %v1002_v21 = vmul.f32 %v4174_v3, %v4174_v3 }
  0xdc   :  { %v4191_v26 = vsel %vm669_vm12, %v228_v46, %v749_v6  ;;  %v4193_v13 = vsel %vm670_vm13, %v269_v38, %v750_v63  ;;  %v683_v27 = vmul.f32 0.01, %v371_v0  ;;  %v412_v2 = vadd.f32 %v4003_v61, %v3899_v50 }
  0xdd   :  { %6055 = vst [vmem:[#allocation26_spill] sm:$0xff] %v4191_v26  ;;  %v4201_v23 = vsel %vm662_vm14, %v348_v52, %v742_v10  ;;  %v751_v53 = vmul.f32 0.01, %v310_v62  ;;  %v351_v20 = vadd.f32 %v4106_v43, %v4133_v7  ;;  %vm603_vm15 = vcmp.ge.f32.partialorder %v371_v0, 0.0 }
  0xde   :  { %v455_v8 = vpop.f32.mrf.mxu2  ;;  %6056 = vst [vmem:[#allocation27_spill] sm:$0xff] %v4193_v13  ;;  %v1092_v12 = vadd.f32 %v1001_v58, %v1000_v18  ;;  %v4206_v46 = vadd.f32 %v905_v57, %v4172_v49  ;;  %vm671_vm0 = vcmp.ge.f32.partialorder %v310_v62, 0.0  ;;  %v374_v38 = vadd.f32 %v4054_v44, %v3913_v56 }
  0xdf   :  { %v4094_v32 = vpop.f32.mrf.mxu0  ;;  %v4096_v48 = vpop.f32.mrf.mxu1  ;;  %6057 = vst [vmem:[#allocation28_spill] sm:$0xff] %v4201_v23  ;;  %v4210_v61 = vadd.f32 %v1081_v33, %v993_v60  ;;  %v917_v6 = vadd.f32 %v916_v5, %v4174_v3  ;;  %v1010_v52 = vmul.f32 %v4191_v26, %v4191_v26  ;;  %v1011_v63 = vmul.f32 %v4193_v13, %v4193_v13 }
  0xe0   :  { %v1093_v43 = vadd.f32 %v1092_v12, %v1002_v21  ;;  %v1003_v10 = vmul.f32 %v4201_v23, %v4201_v23  ;;  %v4219_v57 = vsel %vm603_vm15, %v371_v0, %v683_v27  ;;  %v684_v18 = vmul.f32 0.01, %v412_v2  ;;  %v496_v5 = vpop.f32.mrf.mxu3 }
  0xe1   :  { %6058 = vst [vmem:[#allocation29_spill] sm:$0xff] %v4219_v57  ;;  %v4221_v58 = vsel %vm671_vm0, %v310_v62, %v751_v53  ;;  %v752_v44 = vmul.f32 0.01, %v351_v20  ;;  %vm604_vm1 = vcmp.ge.f32.partialorder %v412_v2, 0.0  ;;  %v453_v33 = vadd.f32 %v4135_v42, %v3899_v50 }
  0xe2   :  { %6059 = vst [vmem:[#allocation30_spill] sm:$0xff] %v4221_v58  ;;  %v928_v60 = vadd.f32 %v4193_v13, %v4191_v26  ;;  %vm672_vm2 = vcmp.ge.f32.partialorder %v351_v20, 0.0  ;;  %v693_v49 = vmul.f32 0.01, %v374_v38  ;;  %v415_v12 = vadd.f32 %v4056_v16, %v3913_v56 }
  0xe3   :  { %v1104_v21 = vadd.f32 %v1011_v63, %v1010_v52  ;;  %v4230_v0 = vadd.f32 %v917_v6, %v4201_v23  ;;  %v944_v53 = vmul.f32 %v4219_v57, %v4219_v57  ;;  %vm613_vm3 = vcmp.ge.f32.partialorder %v374_v38, 0.0 }
  0xe4   :  { %v929_v62 = vadd.f32 %v928_v60, %v4221_v58  ;;  %v1012_v42 = vmul.f32 %v4221_v58, %v4221_v58  ;;  %v846_v27 = vadd.f32 %v4031_v28, %v4219_v57  ;;  %v4239_v3 = vsel %vm604_vm1, %v412_v2, %v684_v18 }
  0xe5   :  { %6060 = vst [vmem:[#allocation31_spill] sm:$0xff] %v4239_v3  ;;  %v4245_v6 = vadd.f32 %v1093_v43, %v1003_v10  ;;  %v4247_v52 = vsel %vm672_vm2, %v351_v20, %v752_v44  ;;  %v685_v63 = vmul.f32 0.01, %v453_v33  ;;  %v494_v23 = vadd.f32 %v493_v59, %v3899_v50 }
  0xe6   :  { %6061 = vst [vmem:[#allocation32_spill] sm:$0xff] %v4247_v52  ;;  %vm605_vm4 = vcmp.ge.f32.partialorder %v453_v33, 0.0  ;;  %v4250_v60 = vsel %vm613_vm3, %v374_v38, %v693_v49  ;;  %v694_v58 = vmul.f32 0.01, %v415_v12  ;;  %v377_v28 = vadd.f32 %v4094_v32, %v3936_v9  ;;  %v458_v2 = vpop.f32.mrf.mxu2 }
  0xe7   :  { %v4145_v22 = vpop.f32.mrf.mxu0  ;;  %v4147_v15 = vpop.f32.mrf.mxu1  ;;  %6062 = vst [vmem:[#allocation33_spill] sm:$0xff] %v4250_v60  ;;  %v1023_v18 = vadd.f32 %v4033_v29, %v944_v53  ;;  %v945_v57 = vmul.f32 %v4239_v3, %v4239_v3  ;;  %vm614_vm5 = vcmp.ge.f32.partialorder %v415_v12, 0.0  ;;  %v456_v20 = vadd.f32 %v455_v8, %v3913_v56 }
  0xe8   :  { %v4258_v43 = vadd.f32 %v1104_v21, %v1012_v42  ;;  %v4261_v59 = vadd.f32 %v929_v62, %v4247_v52  ;;  %v4265_v49 = vmul.f32 %v4247_v52, %v4247_v52  ;;  %v847_v32 = vadd.f32 %v846_v27, %v4239_v3 }
  0xe9   :  { %v4268_v38 = vsel %vm605_vm4, %v453_v33, %v685_v63  ;;  %v954_v29 = vmul.f32 %v4250_v60, %v4250_v60  ;;  %vm606_vm6 = vcmp.ge.f32.partialorder %v494_v23, 0.0  ;;  %v686_v10 = vmul.f32 0.01, %v494_v23  ;;  %v499_v33 = vpop.f32.mrf.mxu3 }
  0xea   :  { %6063 = vst [vmem:[#allocation34_spill] sm:$0xff] %v4268_v38  ;;  %v4272_v44 = vsel %vm614_vm5, %v415_v12, %v694_v58  ;;  %v703_v8 = vmul.f32 0.01, %v377_v28  ;;  %v418_v21 = vadd.f32 %v4096_v48, %v3936_v9  ;;  %v497_v53 = vadd.f32 %v496_v5, %v3913_v56 }
  0xeb   :  { %6064 = vst [vmem:[#allocation35_spill] sm:$0xff] %v4272_v44  ;;  %v1024_v62 = vadd.f32 %v1023_v18, %v945_v57  ;;  %v695_v42 = vmul.f32 0.01, %v456_v20  ;;  %vm623_vm7 = vcmp.ge.f32.partialorder %v377_v28, 0.0  ;;  %v459_v27 = vadd.f32 %v458_v2, %v3936_v9 }
  0xec   :  { %v848_v63 = vadd.f32 %v847_v32, %v4268_v38  ;;  %v946_v52 = vmul.f32 %v4268_v38, %v4268_v38  ;;  %vm615_vm8 = vcmp.ge.f32.partialorder %v456_v20, 0.0  ;;  %v380_v58 = vadd.f32 %v4145_v22, %v3967_v30 }
  0xed   :  { %v859_v57 = vadd.f32 %v4036_v34, %v4250_v60  ;;  %v1035_v5 = vadd.f32 %v4038_v39, %v954_v29  ;;  %v955_v2 = vmul.f32 %v4272_v44, %v4272_v44  ;;  %v4293_v18 = vsel %vm606_vm6, %v494_v23, %v686_v10 }
  0xee   :  { %6065 = vst [vmem:[#allocation36_spill] sm:$0xff] %v4293_v18  ;;  %v4295_v32 = vsel %vm623_vm7, %v377_v28, %v703_v8  ;;  %vm624_vm9 = vcmp.ge.f32.partialorder %v418_v21, 0.0  ;;  %v704_v38 = vmul.f32 0.01, %v418_v21  ;;  %v696_v22 = vmul.f32 0.01, %v497_v53  ;;  %v461_v10 = vpop.f32.mrf.mxu2 }
  0xef   :  { %v4197_v37 = vpop.f32.mrf.mxu0  ;;  %v4199_v31 = vpop.f32.mrf.mxu1  ;;  %6066 = vst [vmem:[#allocation37_spill] sm:$0xff] %v4295_v32  ;;  %v4297_v3 = vsel %vm615_vm8, %v456_v20, %v695_v42  ;;  %vm616_vm10 = vcmp.ge.f32.partialorder %v497_v53, 0.0  ;;  %v705_v1 = vmul.f32 0.01, %v459_v27  ;;  %v421_v34 = vadd.f32 %v4147_v15, %v3967_v30 }
  0xf0   :  { %v947_v39 = vmul.f32 %v4293_v18, %v4293_v18  ;;  %vm625_vm11 = vcmp.ge.f32.partialorder %v459_v27, 0.0  ;;  %v713_v29 = vmul.f32 0.01, %v380_v58  ;;  %v500_v23 = vadd.f32 %v499_v33, %v3936_v9 }
  0xf1   :  { %v860_v28 = vadd.f32 %v859_v57, %v4272_v44  ;;  %v964_v8 = vmul.f32 %v4295_v32, %v4295_v32  ;;  %vm633_vm12 = vcmp.ge.f32.partialorder %v380_v58, 0.0  ;;  %v1025_v20 = vadd.f32 %v1024_v62, %v946_v52 }
  0xf2   :  { %v956_v42 = vmul.f32 %v4297_v3, %v4297_v3  ;;  %v871_v15 = vadd.f32 %v4071_v51, %v4295_v32  ;;  %v4312_v13 = vsel %vm624_vm9, %v418_v21, %v704_v38  ;;  %v4314_v26 = vsel %vm616_vm10, %v497_v53, %v696_v22  ;;  %v502_v53 = vpop.f32.mrf.mxu3 }
  0xf3   :  { %6067 = vst [vmem:[#allocation38_spill] sm:$0xff] %v4312_v13  ;;  %v1036_v33 = vadd.f32 %v1035_v5, %v955_v2  ;;  %v4316_v60 = vsel %vm625_vm11, %v459_v27, %v705_v1  ;;  %v714_v57 = vmul.f32 0.01, %v421_v34  ;;  %v462_v44 = vadd.f32 %v461_v10, %v3967_v30 }
  0xf4   :  { %v861_v54 = vadd.f32 %v860_v28, %v4297_v3  ;;  %v4320_v52 = vsel %vm633_vm12, %v380_v58, %v713_v29  ;;  %vm634_vm13 = vcmp.ge.f32.partialorder %v421_v34, 0.0  ;;  %v706_v62 = vmul.f32 0.01, %v500_v23 }
  0xf5   :  { %6068 = vst [vmem:[#allocation39_spill] sm:$0xff] %v4320_v52  ;;  %v1047_v38 = vadd.f32 %v4098_v47, %v964_v8  ;;  %v965_v21 = vmul.f32 %v4312_v13, %v4312_v13  ;;  %v957_v1 = vmul.f32 %v4314_v26, %v4314_v26  ;;  %vm626_vm14 = vcmp.ge.f32.partialorder %v500_v23, 0.0 }
  0xf6   :  { %v872_v27 = vadd.f32 %v871_v15, %v4312_v13  ;;  %v966_v58 = vmul.f32 %v4316_v60, %v4316_v60  ;;  %v383_v5 = vadd.f32 %v4197_v37, %v4012_v36  ;;  %v1037_v2 = vadd.f32 %v1036_v33, %v956_v42 }
  0xf7   :  { %v4241_v4 = vpop.f32.mrf.mxu0  ;;  %v4243_v16 = vpop.f32.mrf.mxu1  ;;  %v883_v47 = vadd.f32 %v4150_v25, %v4320_v52  ;;  %v974_v22 = vmul.f32 %v4320_v52, %v4320_v52  ;;  %v4340_v29 = vsel %vm634_vm13, %v421_v34, %v714_v57  ;;  %v715_v10 = vmul.f32 0.01, %v462_v44 }
  0xf8   :  { %6069 = vst [vmem:[#allocation40_spill] sm:$0xff] %v4340_v29  ;;  %v4342_v28 = vsel %vm626_vm14, %v500_v23, %v706_v62  ;;  %vm635_vm15 = vcmp.ge.f32.partialorder %v462_v44, 0.0  ;;  %v424_v8 = vadd.f32 %v4199_v31, %v4012_v36  ;;  %v503_v15 = vadd.f32 %v502_v53, %v3967_v30 }
  0xf9   :  { %v1048_v13 = vadd.f32 %v1047_v38, %v965_v21  ;;  %v849_v37 = vadd.f32 %v848_v63, %v4293_v18  ;;  %v4349_v42 = vadd.f32 %v861_v54, %v4314_v26  ;;  %v4351_v25 = vadd.f32 %v1025_v20, %v947_v39 }
  0xfa   :  { %v873_v34 = vadd.f32 %v872_v27, %v4316_v60  ;;  %v975_v23 = vmul.f32 %v4340_v29, %v4340_v29  ;;  %v723_v33 = vmul.f32 0.01, %v383_v5  ;;  %v4356_v57 = vadd.f32 %v1037_v2, %v957_v1 }
  0xfb   :  { %v967_v31 = vmul.f32 %v4342_v28, %v4342_v28  ;;  %v4360_v62 = vsel %vm635_vm15, %v462_v44, %v715_v10  ;;  %vm643_vm0 = vcmp.ge.f32.partialorder %v383_v5, 0.0  ;;  %v1049_v63 = vadd.f32 %v1048_v13, %v966_v58  ;;  %v464_v10 = vpop.f32.mrf.mxu2 }
  0xfc   :  { %v1059_v54 = vadd.f32 %v4152_v40, %v974_v22  ;;  %v884_v39 = vadd.f32 %v883_v47, %v4340_v29  ;;  %v724_v20 = vmul.f32 0.01, %v424_v8  ;;  %v716_v38 = vmul.f32 0.01, %v503_v15 }
  0xfd   :  { %vm644_vm1 = vcmp.ge.f32.partialorder %v424_v8, 0.0  ;;  %vm636_vm2 = vcmp.ge.f32.partialorder %v503_v15, 0.0  ;;  %v4367_v44 = vsel %vm643_vm0, %v383_v5, %v723_v33  ;;  %vm851_vm3 = vcmask 801792  }
  0xfe   :  { %v885_v2 = vadd.f32 %v884_v39, %v4360_v62  ;;  %v4370_v40 = vadd.f32 %v873_v34, %v4342_v28  ;;  %v976_v47 = vmul.f32 %v4360_v62, %v4360_v62  ;;  %v4374_v22 = vsel %vm644_vm1, %v424_v8, %v724_v20 }
  0xff   :  { %v4283_v12 = vpop.f32.mrf.mxu0  ;;  %v4285_v48 = vpop.f32.mrf.mxu1  ;;  %6070 = vst [vmem:[#allocation41_spill] sm:$0xff] %v4374_v22  ;;  %v1060_v5 = vadd.f32 %v1059_v54, %v975_v23  ;;  %v465_v33 = vadd.f32 %v464_v10, %v4012_v36  ;;  %v386_v32 = vadd.f32 %v4241_v4, %v3950_v19  ;;  %v895_v23 = vadd.f32 %v4159_v11, %v4367_v44 }
 0x100   :  { %v505_v54 = vpop.f32.mrf.mxu3  ;;  %v427_v4 = vadd.f32 %v4243_v16, %v3950_v19 }
 0x101   :  { %v1061_v11 = vadd.f32 %v1060_v5, %v976_v47  ;;  %v725_v10 = vmul.f32 0.01, %v465_v33  ;;  %vm645_vm6 = vcmp.ge.f32.partialorder %v465_v33, 0.0  ;;  %v733_v52 = vmul.f32 0.01, %v386_v32 }
 0x102   :  { %v506_v16 = vadd.f32 %v505_v54, %v4012_v36  ;;  %v896_v47 = vadd.f32 %v895_v23, %v4374_v22  ;;  %vm653_vm9 = vcmp.ge.f32.partialorder %v386_v32, 0.0  ;;  %v734_v5 = vmul.f32 0.01, %v427_v4 }
 0x103   :  { %vm654_vm10 = vcmp.ge.f32.partialorder %v427_v4, 0.0 }
 0x104   :  { %vm646_vm11 = vcmp.ge.f32.partialorder %v506_v16, 0.0 }
 0x107   :  { %v4322_v45 = vpop.f32.mrf.mxu0  ;;  %v4324_v51 = vpop.f32.mrf.mxu1 }
 0x10f   :  { %v534_v21 = vpop.f32.mrf.mxu0  ;;  %v575_v53 = vpop.f32.mrf.mxu1 }
 0x110   :  { %v535_v1 = vadd.f32 %v534_v21, %v3899_v50  ;;  %v576_v27 = vadd.f32 %v575_v53, %v3899_v50  ;;  %v4376_v21 = vsel %vm636_vm2, %v503_v15, %v716_v38  ;;  %v4378_v50 = vadd.f32 %v1049_v63, %v967_v31 }
 0x111   :  { %v984_v53 = vmul.f32 %v4367_v44, %v4367_v44  ;;  %v985_v31 = vmul.f32 %v4374_v22, %v4374_v22  ;;  %v977_v63 = vmul.f32 %v4376_v21, %v4376_v21  ;;  %v4399_v20 = vadd.f32 %v885_v2, %v4376_v21 }
 0x112   :  { %vm607_vm4 = vcmp.ge.f32.partialorder %v535_v1, 0.0  ;;  %v687_v13 = vmul.f32 0.01, %v535_v1  ;;  %vm608_vm5 = vcmp.ge.f32.partialorder %v576_v27, 0.0  ;;  %v688_v58 = vmul.f32 0.01, %v576_v27 }
 0x113   :  { %v1071_v2 = vadd.f32 %v4161_v24, %v984_v53  ;;  %v4439_v22 = vsel %vm654_vm10, %v427_v4, %v734_v5  ;;  %v508_v5 = vpop.f32.mrf.mxu3 }
 0x114   :  { %v4381_v39 = vsel %vm607_vm4, %v535_v1, %v687_v13  ;;  %v4383_v34 = vsel %vm608_vm5, %v576_v27, %v688_v58  ;;  %v995_v4 = vmul.f32 %v4439_v22, %v4439_v22 }
 0x115   :  { %6071 = vst [vmem:[#allocation42_spill] sm:$0xff] %v4381_v39  ;;  %v850_v8 = vadd.f32 %v849_v37, %v4381_v39  ;;  %v852_v15 = vsel %vm851_vm3, %v4383_v34, 0.0  ;;  %v948_v27 = vmul.f32 %v4381_v39, %v4381_v39  ;;  %v949_v29 = vmul.f32 %v4383_v34, %v4383_v34  ;;  %v467_v39 = vpop.f32.mrf.mxu2 }
 0x116   :  { %6072 = vst [vmem:[#allocation43_spill] sm:$0xff] %v4383_v34 }
 0x117   :  { %v537_v37 = vpop.f32.mrf.mxu0  ;;  %v578_v38 = vpop.f32.mrf.mxu1  ;;  %v853_v1 = vadd.f32 %v852_v15, %v850_v8  ;;  %v1028_v53 = vsel %vm851_vm3, %v949_v29, 0.0 }
 0x118   :  { %v538_v13 = vadd.f32 %v537_v37, %v3913_v56  ;;  %v579_v58 = vadd.f32 %v578_v38, %v3913_v56  ;;  %v1027_v56 = vadd.f32 %v4351_v25, %v948_v27  ;;  %v4413_v37 = vsel %vm645_vm6, %v465_v33, %v725_v10 }
 0x119   :  { %854 = vadd.xlane.f32.xlu1 %v853_v1  ;;  %v4428_v33 = vsel %vm653_vm9, %v386_v32, %v733_v52  ;;  %v726_v27 = vmul.f32 0.01, %v506_v16  ;;  %v986_v34 = vmul.f32 %v4413_v37, %v4413_v37 }
 0x11a   :  { %vm617_vm7 = vcmp.ge.f32.partialorder %v538_v13, 0.0  ;;  %v697_v8 = vmul.f32 0.01, %v538_v13  ;;  %vm618_vm8 = vcmp.ge.f32.partialorder %v579_v58, 0.0  ;;  %v698_v15 = vmul.f32 0.01, %v579_v58 }
 0x11b   :  { %v994_v18 = vmul.f32 %v4428_v33, %v4428_v33 }
 0x11c   :  { %v4415_v38 = vsel %vm617_vm7, %v538_v13, %v697_v8  ;;  %v4417_v24 = vsel %vm618_vm8, %v579_v58, %v698_v15  ;;  %v1029_v58 = vadd.f32 %v1028_v53, %v1027_v56  ;;  %v897_v15 = vadd.f32 %v896_v47, %v4413_v37 }
 0x11d   :  { %v863_v54 = vadd.f32 %v4349_v42, %v4415_v38  ;;  %v864_v1 = vsel %vm851_vm3, %v4417_v24, 0.0  ;;  %v958_v23 = vmul.f32 %v4415_v38, %v4415_v38  ;;  %v959_v25 = vmul.f32 %v4417_v24, %v4417_v24 }
 0x11e   :  { %v1072_v53 = vadd.f32 %v1071_v2, %v985_v31  ;;  %v1083_v31 = vadd.f32 %v4210_v61, %v994_v18  ;;  %v389_v2 = vadd.f32 %v4283_v12, %v4086_v41  ;;  %v509_v12 = vadd.f32 %v508_v5, %v3950_v19 }
 0x11f   :  { %v540_v10 = vpop.f32.mrf.mxu0  ;;  %v581_v13 = vpop.f32.mrf.mxu1  ;;  %v865_v29 = vadd.f32 %v864_v1, %v863_v54  ;;  %v1039_v42 = vadd.f32 %v4356_v57, %v958_v23  ;;  %v1040_v8 = vsel %vm851_vm3, %v959_v25, 0.0  ;;  %v4442_v54 = vsel %vm646_vm11, %v506_v16, %v726_v27 }
 0x120   :  { %v541_v32 = vadd.f32 %v540_v10, %v3936_v9  ;;  %v582_v52 = vadd.f32 %v581_v13, %v3936_v9  ;;  %v468_v1 = vadd.f32 %v467_v39, %v3950_v19  ;;  %v1062_v9 = vadd.f32 %v1061_v11, %v977_v63 }
 0x121   :  { %866 = vadd.xlane.f32.xlu2 %v865_v29  ;;  %1030 = vadd.xlane.f32.xlu1 %v1029_v58  ;;  %v1041_v57 = vadd.f32 %v1040_v8, %v1039_v42  ;;  %v907_v23 = vadd.f32 %v4206_v46, %v4428_v33  ;;  %v4462_v46 = vmul.f32 %v4442_v54, %v4442_v54  ;;  %vm663_vm15 = vcmp.ge.f32.partialorder %v389_v2, 0.0 }
 0x122   :  { %vm627_vm12 = vcmp.ge.f32.partialorder %v541_v32, 0.0  ;;  %v707_v56 = vmul.f32 0.01, %v541_v32  ;;  %vm628_vm13 = vcmp.ge.f32.partialorder %v582_v52, 0.0  ;;  %v708_v47 = vmul.f32 0.01, %v582_v52 }
 0x123   :  { %1042 = vadd.xlane.f32.xlu0 %v1041_v57  ;;  %v430_v11 = vadd.f32 %v4285_v48, %v4086_v41  ;;  %v4467_v16 = vadd.f32 %v897_v15, %v4442_v54  ;;  %v4469_v61 = vadd.f32 %v1072_v53, %v986_v34  ;;  %v735_v18 = vmul.f32 0.01, %v468_v1  ;;  %v470_v53 = vpop.f32.mrf.mxu2 }
 0x124   :  { %v4449_v25 = vsel %vm627_vm12, %v541_v32, %v707_v56  ;;  %v4451_v10 = vsel %vm628_vm13, %v582_v52, %v708_v47  ;;  %vm655_vm14 = vcmp.ge.f32.partialorder %v468_v1, 0.0  ;;  %v908_v34 = vadd.f32 %v907_v23, %v4439_v22 }
 0x125   :  { %6073 = vst [vmem:[#allocation44_spill] sm:$0xff] %v4449_v25  ;;  %v875_v39 = vadd.f32 %v4370_v40, %v4449_v25  ;;  %v876_v63 = vsel %vm851_vm3, %v4451_v10, 0.0  ;;  %v968_v29 = vmul.f32 %v4449_v25, %v4449_v25  ;;  %v969_v48 = vmul.f32 %v4451_v10, %v4451_v10 }
 0x126   :  { %6074 = vst [vmem:[#allocation45_spill] sm:$0xff] %v4451_v10  ;;  %v1084_v8 = vadd.f32 %v1083_v31, %v995_v4  ;;  %v743_v15 = vmul.f32 0.01, %v389_v2  ;;  %v4479_v57 = vsel %vm655_vm14, %v468_v1, %v735_v18  ;;  %v744_v56 = vmul.f32 0.01, %v430_v11 }
 0x127   :  { %v543_v27 = vpop.f32.mrf.mxu0  ;;  %v584_v40 = vpop.f32.mrf.mxu1  ;;  %v877_v13 = vadd.f32 %v876_v63, %v875_v39  ;;  %vm656_vm2 = vcmp.ge.f32.partialorder %v509_v12, 0.0  ;;  %v1051_v47 = vadd.f32 %v4378_v50, %v968_v29  ;;  %v1052_v23 = vsel %vm851_vm3, %v969_v48, 0.0 }
 0x128   :  { %v544_v58 = vadd.f32 %v543_v27, %v3967_v30  ;;  %v585_v42 = vadd.f32 %v584_v40, %v3967_v30  ;;  %v736_v30 = vmul.f32 0.01, %v509_v12  ;;  %v909_v63 = vadd.f32 %v908_v34, %v4479_v57 }
 0x129   :  { %878 = vadd.xlane.f32.xlu2 %v877_v13  ;;  %v996_v18 = vmul.f32 %v4479_v57, %v4479_v57  ;;  %v4499_v27 = vsel %vm663_vm15, %v389_v2, %v743_v15  ;;  %vm664_vm4 = vcmp.ge.f32.partialorder %v430_v11, 0.0  ;;  %v1053_v29 = vadd.f32 %v1052_v23, %v1051_v47 }
 0x12a   :  { %vm637_vm0 = vcmp.ge.f32.partialorder %v544_v58, 0.0  ;;  %v717_v32 = vmul.f32 0.01, %v544_v58  ;;  %vm638_vm1 = vcmp.ge.f32.partialorder %v585_v42, 0.0  ;;  %v718_v52 = vmul.f32 0.01, %v585_v42 }
 0x12b   :  { %v4503_v48 = vsel %vm656_vm2, %v509_v12, %v736_v30  ;;  %v919_v2 = vadd.f32 %v4230_v0, %v4499_v27  ;;  %v4510_v15 = vsel %vm664_vm4, %v430_v11, %v744_v56  ;;  %v1004_v30 = vmul.f32 %v4499_v27, %v4499_v27 }
 0x12c   :  { %v4482_v5 = vsel %vm637_vm0, %v544_v58, %v717_v32  ;;  %v4484_v39 = vsel %vm638_vm1, %v585_v42, %v718_v52  ;;  %v471_v32 = vadd.f32 %v470_v53, %v4086_v41  ;;  %v997_v53 = vmul.f32 %v4503_v48, %v4503_v48 }
 0x12d   :  { %6075 = vst [vmem:[#allocation46_spill] sm:$0xff] %v4482_v5  ;;  %v887_v4 = vadd.f32 %v4399_v20, %v4482_v5  ;;  %v888_v31 = vsel %vm851_vm3, %v4484_v39, 0.0  ;;  %v978_v1 = vmul.f32 %v4482_v5, %v4482_v5  ;;  %v979_v50 = vmul.f32 %v4484_v39, %v4484_v39 }
 0x12e   :  { %6076 = vst [vmem:[#allocation47_spill] sm:$0xff] %v4484_v39  ;;  %v1085_v0 = vadd.f32 %v1084_v8, %v996_v18  ;;  %v745_v11 = vmul.f32 0.01, %v471_v32  ;;  %v433_v56 = vadd.f32 %v4324_v51, %v4133_v7  ;;  %vm665_vm7 = vcmp.ge.f32.partialorder %v471_v32, 0.0  ;;  %v473_v8 = vpop.f32.mrf.mxu2 }
 0x12f   :  { %v546_v40 = vpop.f32.mrf.mxu0  ;;  %v587_v20 = vpop.f32.mrf.mxu1  ;;  %v889_v13 = vadd.f32 %v888_v31, %v887_v4  ;;  %v1063_v58 = vadd.f32 %v1062_v9, %v978_v1  ;;  %v1064_v42 = vsel %vm851_vm3, %v979_v50, 0.0  ;;  %v1005_v51 = vmul.f32 %v4510_v15, %v4510_v15 }
 0x130   :  { %v547_v34 = vadd.f32 %v546_v40, %v4012_v36  ;;  %v588_v52 = vadd.f32 %v587_v20, %v4012_v36  ;;  %v511_v9 = vpop.f32.mrf.mxu3  ;;  %v392_v36 = vadd.f32 %v4322_v45, %v4133_v7  ;;  %v4531_v45 = vadd.f32 %v4258_v43, %v4265_v49 }
 0x131   :  { %890 = vadd.xlane.f32.xlu0 %v889_v13  ;;  %1054 = vadd.xlane.f32.xlu2 %v1053_v29  ;;  %v1065_v47 = vadd.f32 %v1064_v42, %v1063_v58  ;;  %v512_v1 = vadd.f32 %v511_v9, %v4086_v41  ;;  %v910_v18 = vadd.f32 %v909_v63, %v4503_v48  ;;  %v754_v63 = vmul.f32 0.01, %v433_v56 }
 0x132   :  { %vm647_vm5 = vcmp.ge.f32.partialorder %v547_v34, 0.0  ;;  %v727_v23 = vmul.f32 0.01, %v547_v34  ;;  %vm648_vm6 = vcmp.ge.f32.partialorder %v588_v52, 0.0  ;;  %v728_v12 = vmul.f32 0.01, %v588_v52 }
 0x133   :  { %1066 = vadd.xlane.f32.xlu1 %v1065_v47  ;;  %v1074_v20 = vadd.f32 %v4469_v61, %v4462_v46  ;;  %v1095_v13 = vadd.f32 %v4245_v6, %v1004_v30  ;;  %v753_v43 = vmul.f32 0.01, %v392_v36  ;;  %vm673_vm8 = vcmp.ge.f32.partialorder %v392_v36, 0.0 }
 0x134   :  { %v4520_v4 = vsel %vm647_vm5, %v547_v34, %v727_v23  ;;  %v4522_v31 = vsel %vm648_vm6, %v588_v52, %v728_v12  ;;  %v1086_v34 = vadd.f32 %v1085_v0, %v997_v53  ;;  %v4540_v52 = vsel %vm665_vm7, %v471_v32, %v745_v11 }
 0x135   :  { %v899_v50 = vadd.f32 %v4467_v16, %v4520_v4  ;;  %v900_v40 = vsel %vm851_vm3, %v4522_v31, 0.0  ;;  %v920_v16 = vadd.f32 %v919_v2, %v4510_v15  ;;  %v746_v9 = vmul.f32 0.01, %v512_v1 }
 0x136   :  { %v474_v46 = vadd.f32 %v473_v8, %v4133_v7  ;;  %v1096_v2 = vadd.f32 %v1095_v13, %v1005_v51  ;;  %vm674_vm11 = vcmp.ge.f32.partialorder %v433_v56, 0.0  ;;  %vm666_vm12 = vcmp.ge.f32.partialorder %v512_v1, 0.0 }
 0x137   :  { %v549_v29 = vpop.f32.mrf.mxu0  ;;  %v590_v58 = vpop.f32.mrf.mxu1  ;;  %v901_v42 = vadd.f32 %v900_v40, %v899_v50  ;;  %v921_v23 = vadd.f32 %v920_v16, %v4540_v52  ;;  %v1006_v32 = vmul.f32 %v4540_v52, %v4540_v52  ;;  %v4548_v12 = vsel %vm673_vm8, %v392_v36, %v753_v43 }
 0x138   :  { %v550_v49 = vadd.f32 %v549_v29, %v3950_v19  ;;  %v591_v47 = vadd.f32 %v590_v58, %v3950_v19  ;;  %v514_v53 = vpop.f32.mrf.mxu3  ;;  %v4561_v51 = vsel %vm674_vm11, %v433_v56, %v754_v63  ;;  %v4563_v36 = vsel %vm666_vm12, %v512_v1, %v746_v9 }
 0x139   :  { %902 = vadd.xlane.f32.xlu2 %v901_v42  ;;  %vm675_vm13 = vcmp.ge.f32.partialorder %v474_v46, 0.0  ;;  %v755_v8 = vmul.f32 0.01, %v474_v46  ;;  %v988_v42 = vmul.f32 %v4520_v4, %v4520_v4  ;;  %v515_v43 = vadd.f32 %v514_v53, %v4133_v7 }
 0x13a   :  { %vm657_vm9 = vcmp.ge.f32.partialorder %v550_v49, 0.0  ;;  %v737_v6 = vmul.f32 0.01, %v550_v49  ;;  %vm658_vm10 = vcmp.ge.f32.partialorder %v591_v47, 0.0  ;;  %v738_v61 = vmul.f32 0.01, %v591_v47 }
 0x13b   :  { %v989_v1 = vmul.f32 %v4522_v31, %v4522_v31  ;;  %v1007_v63 = vmul.f32 %v4563_v36, %v4563_v36  ;;  %v1075_v53 = vadd.f32 %v1074_v20, %v988_v42  ;;  %vm676_vm0 = vcmp.ge.f32.partialorder %v515_v43, 0.0 }
 0x13c   :  { %v4550_v19 = vsel %vm657_vm9, %v550_v49, %v737_v6  ;;  %v4552_v30 = vsel %vm658_vm10, %v591_v47, %v738_v61  ;;  %v931_v47 = vadd.f32 %v4261_v59, %v4548_v12  ;;  %v1097_v59 = vadd.f32 %v1096_v2, %v1006_v32 }
 0x13d   :  { %v911_v0 = vadd.f32 %v910_v18, %v4550_v19  ;;  %v912_v11 = vsel %vm851_vm3, %v4552_v30, 0.0  ;;  %v998_v50 = vmul.f32 %v4550_v19, %v4550_v19  ;;  %v999_v40 = vmul.f32 %v4552_v30, %v4552_v30 }
 0x13e   :  { %vm1234_vm9 = vcmask 130048  }
 0x13f   :  { %v552_v13 = vpop.f32.mrf.mxu0  ;;  %v593_v16 = vpop.f32.mrf.mxu1  ;;  %v913_v29 = vadd.f32 %v912_v11, %v911_v0  ;;  %v1087_v58 = vadd.f32 %v1086_v34, %v998_v50  ;;  %v1088_v18 = vsel %vm851_vm3, %v999_v40, 0.0  ;;  %v1014_v34 = vmul.f32 %v4548_v12, %v4548_v12 }
 0x140   :  { %v553_v49 = vadd.f32 %v552_v13, %v4086_v41  ;;  %v594_v56 = vadd.f32 %v593_v16, %v4086_v41  ;;  %v4580_v41 = vsel %vm675_vm13, %v474_v46, %v755_v8  ;;  %v922_v0 = vadd.f32 %v921_v23, %v4563_v36 }
 0x141   :  { %914 = vadd.xlane.f32.xlu2 %v913_v29  ;;  %v1089_v9 = vadd.f32 %v1088_v18, %v1087_v58  ;;  %v756_v11 = vmul.f32 0.01, %v515_v43  ;;  %v1076_v40 = vsel %vm851_vm3, %v989_v1, 0.0  ;;  %v932_v16 = vadd.f32 %v931_v47, %v4561_v51 }
 0x142   :  { %vm667_vm14 = vcmp.ge.f32.partialorder %v553_v49, 0.0  ;;  %v747_v6 = vmul.f32 0.01, %v553_v49  ;;  %vm668_vm15 = vcmp.ge.f32.partialorder %v594_v56, 0.0  ;;  %v748_v61 = vmul.f32 0.01, %v594_v56 }
 0x143   :  { %1090 = vadd.xlane.f32.xlu0 %v1089_v9  ;;  %v1107_v20 = vadd.f32 %v4531_v45, %v1014_v34  ;;  %v933_v23 = vadd.f32 %v932_v16, %v4580_v41  ;;  %v1077_v8 = vadd.f32 %v1076_v40, %v1075_v53  ;;  %v4596_v42 = vsel %vm676_vm0, %v515_v43, %v756_v11 }
 0x144   :  { %v4583_v50 = vsel %vm667_vm14, %v553_v49, %v747_v6  ;;  %v4586_v13 = vsel %vm668_vm15, %v594_v56, %v748_v61  ;;  %v1015_v45 = vmul.f32 %v4561_v51, %v4561_v51  ;;  %v1016_v47 = vmul.f32 %v4580_v41, %v4580_v41 }
 0x145   :  { %v923_v29 = vadd.f32 %v922_v0, %v4583_v50  ;;  %v924_v46 = vsel %vm851_vm3, %v4586_v13, 0.0  ;;  %v1008_v18 = vmul.f32 %v4583_v50, %v4583_v50  ;;  %v1009_v1 = vmul.f32 %v4586_v13, %v4586_v13 }
 0x146   :  { %v1098_v34 = vadd.f32 %v1097_v59, %v1007_v63  ;;  %v1108_v6 = vadd.f32 %v1107_v20, %v1015_v45  ;;  %v934_v61 = vadd.f32 %v933_v23, %v4596_v42  ;;  %v1017_v40 = vmul.f32 %v4596_v42, %v4596_v42 }
 0x147   :  { %v555_v2 = vpop.f32.mrf.mxu0  ;;  %v596_v32 = vpop.f32.mrf.mxu1  ;;  %v925_v58 = vadd.f32 %v924_v46, %v923_v29  ;;  %v1100_v11 = vsel %vm851_vm3, %v1009_v1, 0.0  ;;  %vm1643_vm13 = vcmask 1043456  }
 0x148   :  { %v556_v49 = vadd.f32 %v555_v2, %v4133_v7  ;;  %v597_v56 = vadd.f32 %v596_v32, %v4133_v7  ;;  %v1099_v7 = vadd.f32 %v1098_v34, %v1008_v18  ;;  %v1109_v59 = vadd.f32 %v1108_v6, %v1016_v47 }
 0x149   :  { %1078 = vadd.xlane.f32.xlu2 %v1077_v8  ;;  %926 = vadd.xlane.f32.xlu1 %v925_v58 }
 0x14a   :  { %vm677_vm1 = vcmp.ge.f32.partialorder %v556_v49, 0.0  ;;  %v757_v9 = vmul.f32 0.01, %v556_v49  ;;  %vm678_vm2 = vcmp.ge.f32.partialorder %v597_v56, 0.0  ;;  %v758_v43 = vmul.f32 0.01, %v597_v56 }
 0x14b   :  { %v1101_v46 = vadd.f32 %v1100_v11, %v1099_v7  ;;  %v1110_v2 = vadd.f32 %v1109_v59, %v1017_v40 }
 0x14c   :  { %v4607_v53 = vsel %vm677_vm1, %v556_v49, %v757_v9  ;;  %v4609_v0 = vsel %vm678_vm2, %v597_v56, %v758_v43 }
 0x14d   :  { %v935_v16 = vadd.f32 %v934_v61, %v4607_v53  ;;  %v936_v63 = vsel %vm851_vm3, %v4609_v0, 0.0  ;;  %v1018_v20 = vmul.f32 %v4607_v53, %v4607_v53  ;;  %v1019_v23 = vmul.f32 %v4609_v0, %v4609_v0 }
 0x14f   :  { %v937_v29 = vadd.f32 %v936_v63, %v935_v16  ;;  %v1111_v32 = vadd.f32 %v1110_v2, %v1018_v20  ;;  %v1112_v8 = vsel %vm851_vm3, %v1019_v23, 0.0 }
 0x151   :  { %938 = vadd.xlane.f32.xlu0 %v937_v29  ;;  %1102 = vadd.xlane.f32.xlu1 %v1101_v46  ;;  %v1113_v58 = vadd.f32 %v1112_v8, %v1111_v32 }
 0x159   :  { %1114 = vadd.xlane.f32.xlu0 %v1113_v58 }
 0x18c   :  { %v855_v56 = vpop.xlane.xlu1 %854 }
 0x194   :  { %v867_v18 = vpop.xlane.xlu2 %866  ;;  %v1031_v45 = vpop.xlane.xlu1 %1030 }
 0x196   :  { %v1043_v47 = vpop.xlane.xlu0 %1042 }
 0x19c   :  { %v879_v49 = vpop.xlane.xlu2 %878 }
 0x19d   :  { %v1116_v61 = vadd.f32 %v879_v49, %v855_v56  ;;  %v12_v49 = vstv %s5982_s6 }
 0x19e   :  { %13 = vst [vmem:[#allocation2] sm:$0x1] %v12_v49 }
 0x1a4   :  { %v1055_v1 = vpop.xlane.xlu2 %1054  ;;  %v891_v9 = vpop.xlane.xlu0 %890 }
 0x1a5   :  { %v1118_v59 = vadd.f32 %v1055_v1, %v1031_v45  ;;  %v1117_v29 = vadd.f32 %v891_v9, %v867_v18 }
 0x1a6   :  { %v1067_v43 = vpop.xlane.xlu1 %1066 }
 0x1a7   :  { %v1119_v39 = vadd.f32 %v1067_v43, %v1043_v47 }
 0x1ac   :  { %v903_v34 = vpop.xlane.xlu2 %902 }
 0x1ad   :  { %v1120_v16 = vadd.f32 %v1116_v61, %v903_v34 }
 0x1b4   :  { %v915_v6 = vpop.xlane.xlu2 %914 }
 0x1b5   :  { %v1121_v32 = vadd.f32 %v1117_v29, %v915_v6 }
 0x1b6   :  { %v1091_v7 = vpop.xlane.xlu0 %1090 }
 0x1b7   :  { %v1123_v56 = vadd.f32 %v1119_v39, %v1091_v7 }
 0x1bc   :  { %v927_v11 = vpop.xlane.xlu1 %926  ;;  %v1079_v63 = vpop.xlane.xlu2 %1078 }
 0x1bd   :  { %v1124_v40 = vadd.f32 %v1120_v16, %v927_v11  ;;  %v1122_v46 = vadd.f32 %v1118_v59, %v1079_v63 }
 0x1bf   :  { %v1128_v20 = vmul.f32 0.0002, %v1124_v40 }
 0x1c1   :  { %v1132_v58 = vmul.f32 %v1128_v20, %v1128_v20 }
 0x1c4   :  { %v939_v23 = vpop.xlane.xlu0 %938  ;;  %v1103_v2 = vpop.xlane.xlu1 %1102 }
 0x1c5   :  { %v1126_v8 = vadd.f32 %v1122_v46, %v1103_v2  ;;  %v1125_v10 = vadd.f32 %v1121_v32, %v939_v23 }
 0x1c7   :  { %v1130_v25 = vmul.f32 0.0002, %v1126_v8  ;;  %v1129_v34 = vmul.f32 0.0002, %v1125_v10 }
 0x1c9   :  { %v1134_v5 = vsub.f32 %v1130_v25, %v1132_v58  ;;  %v1133_v9 = vmul.f32 %v1129_v34, %v1129_v34  ;;  %v840_v58 = vld [vmem:[%s5983_s3 + $0x8] sm:$0xff] }
 0x1cb   :  { %v1136_v61 = vmax.f32 %v1134_v5, 0.0  ;;  %v839_v5 = vld [vmem:[%s5983_s3] sm:$0xff] }
 0x1cc   :  { %v1115_v18 = vpop.xlane.xlu0 %1114 }
 0x1cd   :  { %v1138_v1 = vadd.f32 1e-05, %v1136_v61  ;;  %v1127_v45 = vadd.f32 %v1123_v56, %v1115_v18  ;;  %v841_v56 = vld [vmem:[%s5984_s4] sm:$0xff] }
 0x1cf   :  { %3228 = vrsqrt.f32 %v1138_v1  ;;  %v1131_v6 = vmul.f32 0.0002, %v1127_v45  ;;  %vm1146_vm4 = vweird.f32 %v1138_v1  ;;  %v842_v45 = vld [vmem:[%s5984_s4 + $0x8] sm:$0xff] }
 0x1d1   :  { %v1135_v11 = vsub.f32 %v1131_v6, %v1133_v9  ;;  %v3227_v6 = vld [vmem:[#allocation2] ss:$0 sm:$0xff] }
 0x1d3   :  { %v1137_v16 = vmax.f32 %v1135_v11, 0.0 }
 0x1d5   :  { %v3229_v40 = vpop.eup %3228  ;;  %v1139_v63 = vadd.f32 1e-05, %v1137_v16 }
 0x1d6   :  { %v1141_v47 = vmul.f32 %v3229_v40, %v1138_v1  ;;  %vm1147_vm3 = vweird.f32 %v3229_v40 }
 0x1d7   :  { %3230 = vrsqrt.f32 %v1139_v63  ;;  %vm1148_vm5 = vmor %vm1146_vm4, %vm1147_vm3  ;;  %vm1156_vm7 = vweird.f32 %v1139_v63 }
 0x1d8   :  { %v1142_v25 = vmul.f32 %v3229_v40, %v1141_v47 }
 0x1da   :  { %v1143_v43 = vmul.f32 0.5, %v1142_v25 }
 0x1dc   :  { %v1144_v59 = vsub.f32 1.5, %v1143_v43 }
 0x1dd   :  { %v3231_v39 = vpop.eup %3230 }
 0x1de   :  { %v1151_v10 = vmul.f32 %v3231_v39, %v1139_v63  ;;  %v1145_v7 = vmul.f32 %v3229_v40, %v1144_v59  ;;  %vm1157_vm6 = vweird.f32 %v3231_v39  ;;  %v6077_v59 = vld [vmem:[#allocation18_spill] sm:$0xff] }
 0x1df   :  { %vm1158_vm8 = vmor %vm1156_vm7, %vm1157_vm6 }
 0x1e0   :  { %v1152_v29 = vmul.f32 %v3231_v39, %v1151_v10  ;;  %v1149_v46 = vsel %vm1148_vm5, %v3229_v40, %v1145_v7  ;;  %v6078_v10 = vld [vmem:[#allocation19_spill] sm:$0xff] }
 0x1e1   :  { %v1160_v23 = vmul.f32 %v1149_v46, %v839_v5  ;;  %v6079_v5 = vld [vmem:[#allocation33_spill] sm:$0xff] }
 0x1e2   :  { %v1153_v2 = vmul.f32 0.5, %v1152_v29 }
 0x1e3   :  { %1170 = vperm.xlu0 %3224, %v1160_v23   ;;  %v1162_v8 = vmul.f32 %v1160_v23, %v1128_v20  ;;  %v6081_v23 = vld [vmem:[#allocation26_spill] sm:$0xff] }
 0x1e4   :  { %v1154_v32 = vsub.f32 1.5, %v1153_v2  ;;  %v6082_v2 = vld [vmem:[#allocation27_spill] sm:$0xff] }
 0x1e5   :  { %v1164_v1 = vsub.f32 %v841_v56, %v1162_v8  ;;  %v6083_v8 = vld [vmem:[#allocation3_spill] sm:$0xff] }
 0x1e6   :  { %v1155_v49 = vmul.f32 %v3231_v39, %v1154_v32 }
 0x1e8   :  { %v1159_v61 = vsel %vm1158_vm8, %v3231_v39, %v1155_v49 }
 0x1e9   :  { %v1161_v18 = vmul.f32 %v1159_v61, %v840_v58  ;;  %v6084_v58 = vld [vmem:[#allocation4_spill] sm:$0xff] }
 0x1eb   :  { %1175 = vperm.xlu2 %3226, %v1161_v18   ;;  %1200 = vperm.xlu0 %3224, %v1164_v1   ;;  %v1163_v20 = vmul.f32 %v1161_v18, %v1129_v34 }
 0x1ed   :  { %v1165_v9 = vsub.f32 %v842_v45, %v1163_v20 }
 0x1ef   :  { %1205 = vperm.xlu1 %3225, %v1165_v9  }
 0x1f3   :  { %1231 = vperm.xlu2 %3226, %v3227_v6  }
 0x245   :  { %v4639_v16 = vpop.permute.xlu2 %1175 }
 0x246   :  { %v1188_v40 = vmul.f32 %v4639_v16, %v3944_v14  ;;  %v1189_v63 = vmul.f32 %v4639_v16, %v3946_v17  ;;  %v1677_v47 = vmul.f32 %v4639_v16, %v4360_v62  ;;  %v1678_v34 = vmul.f32 %v4639_v16, %v4376_v21  ;;  %v6080_v62 = vld [vmem:[#allocation35_spill] sm:$0xff] }
 0x247   :  { %v1190_v25 = vmul.f32 %v4639_v16, %v3975_v35  ;;  %v1191_v43 = vmul.f32 %v4639_v16, %v3997_v55  ;;  %v2132_v39 = vmul.f32 %v4639_v16, %v6077_v59  ;;  %v2133_v14 = vmul.f32 %v4639_v16, %v6078_v10  ;;  %v6087_v59 = vld [vmem:[#allocation14_spill] sm:$0xff] }
 0x248   :  { %v4659_v17 = vmul.f32 %v4639_v16, %v6079_v5  ;;  %v4663_v7 = vmul.f32 %v4639_v16, %v6080_v62  ;;  %v4667_v35 = vmul.f32 %v4639_v16, %v4428_v33  ;;  %v4671_v55 = vmul.f32 %v4639_v16, %v4439_v22  ;;  %v6088_v5 = vld [vmem:[#allocation15_spill] sm:$0xff] }
 0x249   :  { %v4675_v21 = vmul.f32 %v4639_v16, %v4297_v3  ;;  %v4679_v29 = vmul.f32 %v4639_v16, %v4314_v26  ;;  %v4683_v46 = vmul.f32 %v4639_v16, %v4550_v19  ;;  %v4687_v33 = vmul.f32 %v4639_v16, %v4552_v30 }
 0x24a   :  { %v4691_v22 = vmul.f32 %v4639_v16, %v4415_v38  ;;  %v4695_v3 = vmul.f32 %v4639_v16, %v4417_v24  ;;  %v4699_v26 = vmul.f32 %v4639_v16, %v4479_v57  ;;  %v4703_v19 = vmul.f32 %v4639_v16, %v4503_v48 }
 0x24b   :  { %v4707_v30 = vmul.f32 %v4639_v16, %v6081_v23  ;;  %v4711_v38 = vmul.f32 %v4639_v16, %v6082_v2  ;;  %v4723_v48 = vmul.f32 %v4639_v16, %v4548_v12  ;;  %v4727_v56 = vmul.f32 %v4639_v16, %v4561_v51  ;;  %v6089_v23 = vld [vmem:[#allocation29_spill] sm:$0xff] }
 0x24c   :  { %v4739_v12 = vmul.f32 %v4639_v16, %v4607_v53  ;;  %v4743_v51 = vmul.f32 %v4639_v16, %v4609_v0  ;;  %v4754_v0 = vld [vmem:[%s5985_s5] sm:$0xf] }
 0x255   :  { %v4637_v11 = vpop.permute.xlu0 %1170 }
 0x256   :  { %v1178_v57 = vmul.f32 %v4637_v11, %v6083_v8  ;;  %v1179_v49 = vmul.f32 %v4637_v11, %v6084_v58  ;;  %v1667_v20 = vmul.f32 %v4637_v11, %v4316_v60  ;;  %v1668_v9 = vmul.f32 %v4637_v11, %v4342_v28  ;;  %v6090_v58 = vld [vmem:[#allocation31_spill] sm:$0xff] }
 0x257   :  { %v2122_v10 = vmul.f32 %v4637_v11, %v6087_v59  ;;  %v2123_v62 = vmul.f32 %v4637_v11, %v6088_v5  ;;  %v1182_v2 = vmul.f32 %v4637_v11, %v6089_v23 }
 0x25d   :  { %v4713_v32 = vpop.permute.xlu0 %1200 }
 0x25e   :  { %v1208_v6 = vadd.f32 %v4713_v32, %v1178_v57  ;;  %v1687_v28 = vadd.f32 %v1667_v20, %v4713_v32  ;;  %v1688_v53 = vadd.f32 %v1668_v9, %v4713_v32  ;;  %v6093_v9 = vld [vmem:[#allocation36_spill] sm:$0xff] }
 0x261   :  { %v4715_v24 = vpop.permute.xlu1 %1205 }
 0x262   :  { %v1218_v61 = vadd.f32 %v4715_v24, %v1188_v40  ;;  %v1219_v18 = vadd.f32 %v4715_v24, %v1189_v63  ;;  %v1697_v1 = vadd.f32 %v1677_v47, %v4715_v24  ;;  %v1698_v45 = vadd.f32 %v1678_v34, %v4715_v24  ;;  %v6085_v63 = vld [vmem:[#allocation5_spill] sm:$0xff]  ;;  %v6086_v47 = vld [vmem:[#allocation6_spill] sm:$0xff] }
 0x263   :  { %v1209_v40 = vadd.f32 %v4713_v32, %v1179_v49  ;;  %v1180_v60 = vmul.f32 %v4637_v11, %v6085_v63  ;;  %v1181_v34 = vmul.f32 %v4637_v11, %v6086_v47  ;;  %v1220_v8 = vadd.f32 %v4715_v24, %v1190_v25 }
 0x264   :  { %1252 = vmatpush.msra.mxu2 %v1218_v61  ;;  %1272 = vmatpush.msra.mxu3 %v1219_v18  ;;  %v1221_v57 = vadd.f32 %v4715_v24, %v1191_v43  ;;  %v1183_v49 = vmul.f32 %v4637_v11, %v6090_v58  ;;  %v2126_v61 = vmul.f32 %v4637_v11, %v4367_v44  ;;  %v6091_v18 = vld [vmem:[#allocation41_spill] sm:$0xff]  ;;  %v6095_v58 = vld [vmem:[#allocation23_spill] sm:$0xff] }
 0x265   :  { %1835 = vmatpush.msrb.mxu0 %v1697_v1  ;;  %1855 = vmatpush.msrb.mxu1 %v1698_v45  ;;  %v2127_v1 = vmul.f32 %v4637_v11, %v6091_v18  ;;  %v6092_v45 = vld [vmem:[#allocation34_spill] sm:$0xff]  ;;  %v2152_v43 = vadd.f32 %v2132_v39, %v4715_v24  ;;  %v2153_v20 = vadd.f32 %v2133_v14, %v4715_v24 }
 0x266   :  { %1253 = vmatpush.msra.mxu2 %v1208_v6  ;;  %1273 = vmatpush.msra.mxu3 %v1209_v40  ;;  %v1184_v25 = vmul.f32 %v4637_v11, %v6092_v45  ;;  %v1185_v6 = vmul.f32 %v4637_v11, %v6093_v9  ;;  %v1210_v44 = vadd.f32 %v4713_v32, %v1180_v60 }
 0x267   :  { %1836 = vmatpush.msrb.mxu0 %v1687_v28  ;;  %1856 = vmatpush.msrb.mxu1 %v1688_v53  ;;  %v1211_v40 = vadd.f32 %v4713_v32, %v1181_v34  ;;  %v2130_v63 = vmul.f32 %v4637_v11, %v4520_v4  ;;  %v2142_v39 = vadd.f32 %v2122_v10, %v4713_v32 }
 0x268   :  { %3128 = vmatmul.msk.f32.vlgmr.msra.gmra.mxu2 %vm1234_vm9, %v4754_v0  ;;  %3129 = vmatmul.msk.f32.vlgmr.msra.gmra.mxu3 %vm1234_vm9, %v4754_v0  ;;  %v2143_v14 = vadd.f32 %v2123_v62, %v4713_v32  ;;  %v2131_v28 = vmul.f32 %v4637_v11, %v4522_v31  ;;  %v1222_v53 = vadd.f32 %v4715_v24, %v4659_v17 }
 0x269   :  { %1292 = vmatpush.msrb.mxu2 %v1220_v8  ;;  %1312 = vmatpush.msrb.mxu3 %v1221_v57  ;;  %v1223_v60 = vadd.f32 %v4715_v24, %v4663_v7  ;;  %v1212_v47 = vadd.f32 %v4713_v32, %v1182_v2  ;;  %v2156_v4 = vadd.f32 %v4667_v35, %v4715_v24 }
 0x26a   :  { %3154 = vmatmul.msk.f32.vlgmr.msrb.gmra.mxu0 %vm1234_vm9, %v4754_v0  ;;  %3155 = vmatmul.msk.f32.vlgmr.msrb.gmra.mxu1 %vm1234_vm9, %v4754_v0  ;;  %v2157_v34 = vadd.f32 %v4671_v55, %v4715_v24  ;;  %v1213_v31 = vadd.f32 %v4713_v32, %v1183_v49  ;;  %v2146_v59 = vadd.f32 %v2126_v61, %v4713_v32 }
 0x26b   :  { %2176 = vmatpush.msra.mxu0 %v2152_v43  ;;  %2196 = vmatpush.msra.mxu1 %v2153_v20  ;;  %v2147_v17 = vadd.f32 %v2127_v1, %v4713_v32  ;;  %v1214_v7 = vadd.f32 %v4713_v32, %v1184_v25  ;;  %v1215_v10 = vadd.f32 %v4713_v32, %v1185_v6 }
 0x26c   :  { %1293 = vmatpush.msrb.mxu2 %v1210_v44  ;;  %1313 = vmatpush.msrb.mxu3 %v1211_v40  ;;  %v2150_v5 = vadd.f32 %v2130_v63, %v4713_v32  ;;  %v2151_v35 = vadd.f32 %v2131_v28, %v4713_v32  ;;  %v1224_v55 = vadd.f32 %v4715_v24, %v4675_v21  ;;  %v6098_v40 = vld [vmem:[#allocation42_spill] sm:$0xff] }
 0x26d   :  { %2177 = vmatpush.msra.mxu0 %v2142_v39  ;;  %2197 = vmatpush.msra.mxu1 %v2143_v14  ;;  %v1225_v62 = vadd.f32 %v4715_v24, %v4679_v29  ;;  %v2160_v23 = vadd.f32 %v4683_v46, %v4715_v24  ;;  %v2161_v2 = vadd.f32 %v4687_v33, %v4715_v24  ;;  %v6099_v39 = vld [vmem:[#allocation43_spill] sm:$0xff]  ;;  %v6100_v14 = vld [vmem:[#allocation25_spill] sm:$0xff] }
 0x26e   :  { %1332 = vmatpush.msra.mxu2 %v1222_v53  ;;  %1352 = vmatpush.msra.mxu3 %v1223_v60  ;;  %v4820_v8 = vadd.f32 %v4699_v26, %v4715_v24  ;;  %v4824_v57 = vadd.f32 %v4703_v19, %v4715_v24  ;;  %v2128_v21 = vmul.f32 %v4637_v11, %v4413_v37  ;;  %v6094_v26 = vld [vmem:[#allocation22_spill] sm:$0xff]  ;;  %v6101_v60 = vld [vmem:[#allocation28_spill] sm:$0xff] }
 0x26f   :  { %2256 = vmatpush.msrb.mxu0 %v2156_v4  ;;  %2276 = vmatpush.msrb.mxu1 %v2157_v34  ;;  %v2129_v29 = vmul.f32 %v4637_v11, %v4442_v54  ;;  %v4836_v46 = vadd.f32 %v4707_v30, %v4715_v24  ;;  %v4840_v33 = vadd.f32 %v4711_v38, %v4715_v24 }
 0x270   :  { %1333 = vmatpush.msra.mxu2 %v1212_v47  ;;  %1353 = vmatpush.msra.mxu3 %v1213_v31  ;;  %v2583_v19 = vmul.f32 %v4637_v11, %v6094_v26  ;;  %v2584_v49 = vmul.f32 %v4637_v11, %v6095_v58  ;;  %v4851_v37 = vadd.f32 %v2128_v21, %v4713_v32 }
 0x271   :  { %2257 = vmatpush.msrb.mxu0 %v2146_v59  ;;  %2277 = vmatpush.msrb.mxu1 %v2147_v17  ;;  %v4854_v54 = vadd.f32 %v2129_v29, %v4713_v32  ;;  %v4858_v30 = vadd.f32 %v4723_v48, %v4715_v24  ;;  %v4868_v18 = vadd.f32 %v4727_v56, %v4715_v24  ;;  %v6102_v17 = vld [vmem:[#allocation10_spill] sm:$0xff]  ;;  %v6105_v29 = vld [vmem:[#allocation8_spill] sm:$0xff] }
 0x272   :  { %3130 = vmatmul.msk.f32.vlgmr.msrb.gmra.mxu2 %vm1234_vm9, %v4754_v0  ;;  %3131 = vmatmul.msk.f32.vlgmr.msrb.gmra.mxu3 %vm1234_vm9, %v4754_v0  ;;  %v4861_v38 = vadd.f32 %v2583_v19, %v4713_v32  ;;  %v4864_v61 = vadd.f32 %v2584_v49, %v4713_v32  ;;  %v2587_v1 = vmul.f32 %v4637_v11, %v4499_v27  ;;  %v6096_v27 = vld [vmem:[#allocation30_spill] sm:$0xff] }
 0x273   :  { %1372 = vmatpush.msrb.mxu2 %v1224_v55  ;;  %1392 = vmatpush.msrb.mxu3 %v1225_v62  ;;  %v2588_v48 = vmul.f32 %v4637_v11, %v4510_v15  ;;  %v4876_v45 = vadd.f32 %v4739_v12, %v4715_v24  ;;  %v4880_v25 = vadd.f32 %v4743_v51, %v4715_v24  ;;  %v6097_v15 = vld [vmem:[#allocation32_spill] sm:$0xff] }
 0x274   :  { %3173 = vmatmul.msk.f32.vlgmr.msra.gmra.mxu0 %vm1234_vm9, %v4754_v0  ;;  %3174 = vmatmul.msk.f32.vlgmr.msra.gmra.mxu1 %vm1234_vm9, %v4754_v0  ;;  %v2591_v56 = vmul.f32 %v4637_v11, %v4583_v50  ;;  %v2592_v43 = vmul.f32 %v4637_v11, %v4586_v13  ;;  %v2595_v20 = vmul.f32 %v4639_v16, %v6096_v27 }
 0x275   :  { %2336 = vmatpush.msra.mxu0 %v2160_v23  ;;  %2356 = vmatpush.msra.mxu1 %v2161_v2  ;;  %v2596_v9 = vmul.f32 %v4639_v16, %v6097_v15  ;;  %v4891_v12 = vadd.f32 %v2587_v1, %v4713_v32  ;;  %v4894_v6 = vadd.f32 %v2588_v48, %v4713_v32  ;;  %v6104_v2 = vld [vmem:[#allocation7_spill] sm:$0xff] }
 0x276   :  { %1373 = vmatpush.msrb.mxu2 %v1214_v7  ;;  %1393 = vmatpush.msrb.mxu3 %v1215_v10  ;;  %v1226_v51 = vadd.f32 %v4715_v24, %v4691_v22  ;;  %v1227_v50 = vadd.f32 %v4715_v24, %v4695_v3  ;;  %v4901_v13 = vadd.f32 %v2591_v56, %v4713_v32  ;;  %v6103_v10 = vld [vmem:[#allocation11_spill] sm:$0xff] }
 0x277   :  { %2337 = vmatpush.msra.mxu0 %v2150_v5  ;;  %2357 = vmatpush.msra.mxu1 %v2151_v35  ;;  %v4904_v44 = vadd.f32 %v2592_v43, %v4713_v32  ;;  %v1186_v63 = vmul.f32 %v4637_v11, %v6098_v40  ;;  %v1187_v22 = vmul.f32 %v4637_v11, %v6099_v39  ;;  %v6107_v43 = vld [vmem:[#allocation17_spill] sm:$0xff] }
 0x278   :  { %v2585_v3 = vmul.f32 %v4637_v11, %v6100_v14  ;;  %v2615_v28 = vadd.f32 %v2595_v20, %v4715_v24  ;;  %v2616_v53 = vadd.f32 %v2596_v9, %v4715_v24  ;;  %v2586_v47 = vmul.f32 %v4637_v11, %v6101_v60  ;;  %v6108_v9 = vld [vmem:[#allocation9_spill] sm:$0xff] }
 0x279   :  { %v1216_v4 = vadd.f32 %v4713_v32, %v1186_v63  ;;  %v1217_v34 = vadd.f32 %v4713_v32, %v1187_v22  ;;  %v1671_v7 = vmul.f32 %v4639_v16, %v6102_v17  ;;  %v1672_v5 = vmul.f32 %v4639_v16, %v6103_v10  ;;  %v6110_v22 = vld [vmem:[#allocation39_spill] sm:$0xff] }
 0x27a   :  { %3132 = vmatmul.msk.f32.vlgmr.msra.gmra.mxu2 %vm1234_vm9, %v4754_v0  ;;  %3133 = vmatmul.msk.f32.vlgmr.msra.gmra.mxu3 %vm1234_vm9, %v4754_v0  ;;  %v2605_v31 = vadd.f32 %v2585_v3, %v4713_v32  ;;  %v2606_v59 = vadd.f32 %v2586_v47, %v4713_v32  ;;  %v2599_v62 = vmul.f32 %v4639_v16, %v4580_v41  ;;  %v6111_v3 = vld [vmem:[#allocation40_spill] sm:$0xff]  ;;  %v6112_v47 = vld [vmem:[#allocation37_spill] sm:$0xff] }
 0x27b   :  { %1412 = vmatpush.msra.mxu2 %v1226_v51  ;;  %1432 = vmatpush.msra.mxu3 %v1227_v50  ;;  %v1691_v35 = vadd.f32 %v1671_v7, %v4715_v24  ;;  %v1692_v55 = vadd.f32 %v1672_v5, %v4715_v24  ;;  %v2600_v23 = vmul.f32 %v4639_v16, %v4596_v42  ;;  %v6109_v50 = vld [vmem:[#allocation12_spill] sm:$0xff]  ;;  %v6114_v7 = vld [vmem:[#allocation46_spill] sm:$0xff]  ;;  %v6115_v5 = vld [vmem:[#allocation47_spill] sm:$0xff] }
 0x27c   :  { %3177 = vmatmul.msk.f32.vlgmr.msrb.gmra.mxu0 %vm1234_vm9, %v4754_v0  ;;  %3178 = vmatmul.msk.f32.vlgmr.msrb.gmra.mxu1 %vm1234_vm9, %v4754_v0  ;;  %v1661_v21 = vmul.f32 %v4637_v11, %v6104_v2  ;;  %v1662_v26 = vmul.f32 %v4637_v11, %v6105_v29  ;;  %v2589_v19 = vmul.f32 %v4637_v11, %v4540_v52 }
 0x27d   :  { %2677 = vmatpush.msrb.mxu0 %v2615_v28  ;;  %2697 = vmatpush.msrb.mxu1 %v2616_v53  ;;  %v2619_v41 = vadd.f32 %v2599_v62, %v4715_v24  ;;  %v2620_v42 = vadd.f32 %v2600_v23, %v4715_v24  ;;  %v2590_v58 = vmul.f32 %v4637_v11, %v4563_v36  ;;  %v6106_v36 = vld [vmem:[#allocation13_spill] sm:$0xff]  ;;  %v6116_v23 = vld [vmem:[#allocation44_spill] sm:$0xff] }
 0x27e   :  { %1413 = vmatpush.msra.mxu2 %v1216_v4  ;;  %1433 = vmatpush.msra.mxu3 %v1217_v34  ;;  %v1681_v49 = vadd.f32 %v1661_v21, %v4713_v32  ;;  %v1682_v1 = vadd.f32 %v1662_v26, %v4713_v32  ;;  %v2609_v52 = vadd.f32 %v2589_v19, %v4713_v32  ;;  %v6113_v34 = vld [vmem:[#allocation38_spill] sm:$0xff]  ;;  %v6117_v21 = vld [vmem:[#allocation45_spill] sm:$0xff] }
 0x27f   :  { %2678 = vmatpush.msrb.mxu0 %v2605_v31  ;;  %2698 = vmatpush.msrb.mxu1 %v2606_v59  ;;  %v2610_v48 = vadd.f32 %v2590_v58, %v4713_v32  ;;  %v1673_v56 = vmul.f32 %v4639_v16, %v6106_v36  ;;  %v1674_v27 = vmul.f32 %v4639_v16, %v6107_v43  ;;  %v6119_v58 = vld [vmem:[#allocation24_spill] sm:$0xff] }
 0x280   :  { %v1663_v51 = vmul.f32 %v4637_v11, %v6108_v9  ;;  %v1664_v40 = vmul.f32 %v4637_v11, %v6109_v50  ;;  %v1675_v14 = vmul.f32 %v4639_v16, %v6110_v22  ;;  %v1676_v28 = vmul.f32 %v4639_v16, %v6111_v3 }
 0x281   :  { %v1693_v20 = vadd.f32 %v1673_v56, %v4715_v24  ;;  %v1694_v15 = vadd.f32 %v1674_v27, %v4715_v24  ;;  %v1665_v4 = vmul.f32 %v4637_v11, %v6112_v47  ;;  %v1666_v31 = vmul.f32 %v4637_v11, %v6113_v34  ;;  %v6121_v56 = vld [vmem:[#allocation20_spill] sm:$0xff] }
 0x282   :  { %3134 = vmatmul.msk.f32.vlgmr.msrb.gmra.mxu2 %vm1234_vm9, %v4754_v0  ;;  %3135 = vmatmul.msk.f32.vlgmr.msrb.gmra.mxu3 %vm1234_vm9, %v4754_v0  ;;  %v1683_v63 = vadd.f32 %v1663_v51, %v4713_v32  ;;  %v1684_v39 = vadd.f32 %v1664_v40, %v4713_v32  ;;  %v1695_v53 = vadd.f32 %v1675_v14, %v4715_v24 }
 0x283   :  { %1715 = vmatpush.msrb.mxu2 %v1691_v35  ;;  %1735 = vmatpush.msrb.mxu3 %v1692_v55  ;;  %v1696_v60 = vadd.f32 %v1676_v28, %v4715_v24  ;;  %v1685_v59 = vadd.f32 %v1665_v4, %v4713_v32  ;;  %v1686_v17 = vadd.f32 %v1666_v31, %v4713_v32 }
 0x284   :  { %3181 = vmatmul.msk.f32.vlgmr.msra.gmra.mxu0 %vm1234_vm9, %v4754_v0  ;;  %3182 = vmatmul.msk.f32.vlgmr.msra.gmra.mxu1 %vm1234_vm9, %v4754_v0  ;;  %v1679_v10 = vmul.f32 %v4639_v16, %v6114_v7  ;;  %v1680_v35 = vmul.f32 %v4639_v16, %v6115_v5  ;;  %v1669_v2 = vmul.f32 %v4637_v11, %v6116_v23 }
 0x285   :  { %2757 = vmatpush.msra.mxu0 %v2619_v41  ;;  %2777 = vmatpush.msra.mxu1 %v2620_v42  ;;  %v1670_v29 = vmul.f32 %v4637_v11, %v6117_v21  ;;  %v6118_v41 = vld [vmem:[#allocation21_spill] sm:$0xff]  ;;  %v2125_v43 = vmul.f32 %v4637_v11, %v6121_v56 }
 0x286   :  { %1716 = vmatpush.msrb.mxu2 %v1681_v49  ;;  %1736 = vmatpush.msrb.mxu3 %v1682_v1  ;;  %v1699_v55 = vadd.f32 %v1679_v10, %v4715_v24  ;;  %v1700_v62 = vadd.f32 %v1680_v35, %v4715_v24  ;;  %v1689_v26 = vadd.f32 %v1669_v2, %v4713_v32 }
 0x287   :  { %2758 = vmatpush.msra.mxu0 %v2609_v52  ;;  %2778 = vmatpush.msra.mxu1 %v2610_v48  ;;  %v1690_v19 = vadd.f32 %v1670_v29, %v4713_v32  ;;  %v2134_v42 = vmul.f32 %v4639_v16, %v6118_v41  ;;  %v2135_v49 = vmul.f32 %v4639_v16, %v6119_v58  ;;  %v6120_v48 = vld [vmem:[#allocation16_spill] sm:$0xff] }
 0x288   :  { %v2124_v36 = vmul.f32 %v4637_v11, %v6120_v48  ;;  %v2145_v27 = vadd.f32 %v2125_v43, %v4713_v32  ;;  %v5072_v11 = vpop.permute.xlu2 %1231 }
 0x289   :  { %v2154_v1 = vadd.f32 %v2134_v42, %v4715_v24  ;;  %v2155_v52 = vadd.f32 %v2135_v49, %v4715_v24 }
 0x28a   :  { %3136 = vmatmul.msk.f32.vlgmr.msra.gmra.mxu2 %vm1234_vm9, %v4754_v0  ;;  %3137 = vmatmul.msk.f32.vlgmr.msra.gmra.mxu3 %vm1234_vm9, %v4754_v0  ;;  %v2144_v16 = vadd.f32 %v2124_v36, %v4713_v32 }
 0x28b   :  { %1755 = vmatpush.msra.mxu2 %v1693_v20  ;;  %1775 = vmatpush.msra.mxu3 %v1694_v15 }
 0x28c   :  { %3200 = vmatmul.msk.f32.vlgmr.msrb.gmra.mxu0 %vm1234_vm9, %v4754_v0  ;;  %3201 = vmatmul.msk.f32.vlgmr.msrb.gmra.mxu1 %vm1234_vm9, %v4754_v0 }
 0x28d   :  { %1756 = vmatpush.msra.mxu2 %v1683_v63  ;;  %1776 = vmatpush.msra.mxu3 %v1684_v39 }
 0x292   :  { %3148 = vmatmul.msk.f32.vlgmr.msrb.gmra.mxu2 %vm1234_vm9, %v4754_v0  ;;  %3149 = vmatmul.msk.f32.vlgmr.msrb.gmra.mxu3 %vm1234_vm9, %v4754_v0 }
 0x293   :  { %1795 = vmatpush.msrb.mxu2 %v1695_v53  ;;  %1815 = vmatpush.msrb.mxu3 %v1696_v60 }
 0x294   :  { %3204 = vmatmul.msk.f32.vlgmr.msra.gmra.mxu0 %vm1234_vm9, %v4754_v0  ;;  %3205 = vmatmul.msk.f32.vlgmr.msra.gmra.mxu1 %vm1234_vm9, %v4754_v0 }
 0x295   :  { %1796 = vmatpush.msrb.mxu2 %v1685_v59  ;;  %1816 = vmatpush.msrb.mxu3 %v1686_v17 }
 0x29a   :  { %3150 = vmatmul.msk.f32.vlgmr.msra.gmra.mxu2 %vm1234_vm9, %v4754_v0  ;;  %3151 = vmatmul.msk.f32.vlgmr.msra.gmra.mxu3 %vm1234_vm9, %v4754_v0 }
 0x29b   :  { %1875 = vmatpush.msra.mxu2 %v1699_v55  ;;  %1895 = vmatpush.msra.mxu3 %v1700_v62 }
 0x29d   :  { %1876 = vmatpush.msra.mxu2 %v1689_v26  ;;  %1896 = vmatpush.msra.mxu3 %v1690_v19 }
 0x2a2   :  { %3152 = vmatmul.msk.f32.vlgmr.msrb.gmra.mxu2 %vm1234_vm9, %v4754_v0  ;;  %3153 = vmatmul.msk.f32.vlgmr.msrb.gmra.mxu3 %vm1234_vm9, %v4754_v0 }
 0x2a3   :  { %2216 = vmatpush.msrb.mxu2 %v2154_v1  ;;  %2236 = vmatpush.msrb.mxu3 %v2155_v52 }
 0x2a5   :  { %2217 = vmatpush.msrb.mxu2 %v2144_v16  ;;  %2237 = vmatpush.msrb.mxu3 %v2145_v27 }
 0x2aa   :  { %3156 = vmatmul.msk.f32.vlgmr.msra.gmra.mxu2 %vm1234_vm9, %v4754_v0  ;;  %3157 = vmatmul.msk.f32.vlgmr.msra.gmra.mxu3 %vm1234_vm9, %v4754_v0 }
 0x2ab   :  { %2296 = vmatpush.msra.mxu2 %v4820_v8  ;;  %2316 = vmatpush.msra.mxu3 %v4824_v57 }
 0x2ad   :  { %2297 = vmatpush.msra.mxu2 %v4851_v37  ;;  %2317 = vmatpush.msra.mxu3 %v4854_v54 }
 0x2b2   :  { %3175 = vmatmul.msk.f32.vlgmr.msrb.gmra.mxu2 %vm1234_vm9, %v4754_v0  ;;  %3176 = vmatmul.msk.f32.vlgmr.msrb.gmra.mxu3 %vm1234_vm9, %v4754_v0 }
 0x2b3   :  { %2637 = vmatpush.msrb.mxu2 %v4836_v46  ;;  %2657 = vmatpush.msrb.mxu3 %v4840_v33 }
 0x2b5   :  { %2638 = vmatpush.msrb.mxu2 %v4861_v38  ;;  %2658 = vmatpush.msrb.mxu3 %v4864_v61 }
 0x2ba   :  { %3179 = vmatmul.msk.f32.vlgmr.msra.gmra.mxu2 %vm1234_vm9, %v4754_v0  ;;  %3180 = vmatmul.msk.f32.vlgmr.msra.gmra.mxu3 %vm1234_vm9, %v4754_v0 }
 0x2bb   :  { %2717 = vmatpush.msra.mxu2 %v4858_v30  ;;  %2737 = vmatpush.msra.mxu3 %v4868_v18 }
 0x2bd   :  { %2718 = vmatpush.msra.mxu2 %v4891_v12  ;;  %2738 = vmatpush.msra.mxu3 %v4894_v6 }
 0x2c2   :  { %3198 = vmatmul.msk.f32.vlgmr.msrb.gmra.mxu2 %vm1234_vm9, %v4754_v0  ;;  %3199 = vmatmul.msk.f32.vlgmr.msrb.gmra.mxu3 %vm1234_vm9, %v4754_v0 }
 0x2c3   :  { %2797 = vmatpush.msrb.mxu2 %v4876_v45  ;;  %2817 = vmatpush.msrb.mxu3 %v4880_v25 }
 0x2c5   :  { %2798 = vmatpush.msrb.mxu2 %v4901_v13  ;;  %2818 = vmatpush.msrb.mxu3 %v4904_v44 }
 0x2ca   :  { %3202 = vmatmul.msk.f32.vlgmr.msra.gmra.mxu2 %vm1234_vm9, %v4754_v0  ;;  %3203 = vmatmul.msk.f32.vlgmr.msra.gmra.mxu3 %vm1234_vm9, %v4754_v0 }
 0x2d2   :  { %3206 = vmatmul.msk.f32.vlgmr.msrb.gmra.mxu2 %vm1234_vm9, %v4754_v0  ;;  %3207 = vmatmul.msk.f32.vlgmr.msrb.gmra.mxu3 %vm1234_vm9, %v4754_v0 }
 0x2e7   :  { %v1838_v32 = vpop.f32.mrf.mxu0  ;;  %v1858_v24 = vpop.f32.mrf.mxu1 }
 0x2e8   :  { %v1839_v8 = vadd.f32 %v1838_v32, %v5072_v11  ;;  %v1859_v57 = vadd.f32 %v1858_v24, %v5072_v11 }
 0x2ea   :  { %v3164_v46 = vmul.f32 -1.442695, %v1839_v8  ;;  %v3165_v33 = vmul.f32 -1.442695, %v1859_v57 }
 0x2eb   :  { %v1255_v37 = vpop.f32.mrf.mxu2  ;;  %v1275_v54 = vpop.f32.mrf.mxu3 }
 0x2ec   :  { %3232 = vpow2.f32 %v3164_v46  ;;  %v1256_v30 = vadd.f32 %v1255_v37, %v5072_v11  ;;  %v1276_v38 = vadd.f32 %v1275_v54, %v5072_v11 }
 0x2ed   :  { %3234 = vpow2.f32 %v3165_v33 }
 0x2ee   :  { %v3138_v61 = vmul.f32 -1.442695, %v1256_v30  ;;  %v3139_v0 = vmul.f32 -1.442695, %v1276_v38 }
 0x2f0   :  { %3236 = vpow2.f32 %v3138_v61 }
 0x2f1   :  { %3238 = vpow2.f32 %v3139_v0  ;;  %v2179_v18 = vpop.f32.mrf.mxu0  ;;  %v2199_v45 = vpop.f32.mrf.mxu1 }
 0x2f2   :  { %v3233_v25 = vpop.eup %3232  ;;  %v2180_v12 = vadd.f32 %v2179_v18, %v5072_v11  ;;  %v2200_v6 = vadd.f32 %v2199_v45, %v5072_v11 }
 0x2f3   :  { %v3235_v13 = vpop.eup %3234  ;;  %v1937_v44 = vadd.f32 1.0, %v3233_v25 }
 0x2f4   :  { %v5080_v20 = vadd.f32 1.0, %v3235_v13  ;;  %v3183_v15 = vmul.f32 -1.442695, %v2180_v12  ;;  %v3184_v9 = vmul.f32 -1.442695, %v2200_v6 }
 0x2f5   :  { %3240 = vrcp.f32 %v1937_v44  ;;  %v2042_v63 = vand.u32 2147483648, %v1937_v44  ;;  %v1295_v22 = vpop.f32.mrf.mxu2  ;;  %v2040_v53 = vand.u32 2147483647, %v1937_v44  ;;  %vm2036_vm10 = vweird.f32 %v1937_v44  ;;  %v1315_v42 = vpop.f32.mrf.mxu3 }
 0x2f6   :  { %v3237_v51 = vpop.eup %3236  ;;  %3242 = vrcp.f32 %v5080_v20  ;;  %v2055_v14 = vand.u32 2147483647, %v5080_v20  ;;  %v2057_v3 = vand.u32 2147483648, %v5080_v20  ;;  %v1296_v60 = vadd.f32 %v1295_v22, %v5072_v11 }
 0x2f7   :  { %v3239_v50 = vpop.eup %3238  ;;  %v5083_v40 = vadd.f32 1.0, %v3237_v51  ;;  %3244 = vpow2.f32 %v3183_v15  ;;  %v5095_v34 = vor.u32 1.1754944e-38, %v2042_v63  ;;  %vm2051_vm11 = vweird.f32 %v5080_v20 }
 0x2f8   :  { %v5085_v39 = vadd.f32 1.0, %v3239_v50  ;;  %3246 = vpow2.f32 %v3184_v9  ;;  %vm5099_vm12 = vcmp.eq.f32.partialorder %v2055_v14, 8.507059e+37  ;;  %v2058_v7 = vor.u32 1.1754944e-38, %v2057_v3 }
 0x2f9   :  { %3248 = vrcp.f32 %v5083_v40  ;;  %v1487_v10 = vand.u32 2147483647, %v5083_v40  ;;  %v3140_v5 = vmul.f32 -1.442695, %v1296_v60  ;;  %vm1483_vm14 = vweird.f32 %v5083_v40  ;;  %v2259_v37 = vpop.f32.mrf.mxu0  ;;  %v2279_v0 = vpop.f32.mrf.mxu1 }
 0x2fa   :  { %3250 = vrcp.f32 %v5085_v39  ;;  %v1489_v62 = vand.u32 2147483648, %v5083_v40  ;;  %v1502_v23 = vand.u32 2147483647, %v5085_v39  ;;  %vm5111_vm15 = vcmp.eq.f32.partialorder %v2040_v53, 8.507059e+37 }
 0x2fb   :  { %v5091_v28 = vpop.eup %3240  ;;  %v1504_v19 = vand.u32 2147483648, %v5085_v39  ;;  %3252 = vpow2.f32 %v3140_v5  ;;  %vm1498_vm2 = vweird.f32 %v5085_v39  ;;  %vm5126_vm3 = vcmp.eq.f32.partialorder %v1487_v10, 8.507059e+37 }
 0x2fc   :  { %v3243_v47 = vpop.eup %3242  ;;  %v2032_v4 = vmul.f32 %v5091_v28, %v1937_v44  ;;  %vm2037_vm0 = vweird.f32 %v5091_v28  ;;  %v1316_v16 = vadd.f32 %v1315_v42, %v5072_v11  ;;  %v1490_v24 = vor.u32 1.1754944e-38, %v1489_v62 }
 0x2fd   :  { %v3245_v31 = vpop.eup %3244  ;;  %v2047_v59 = vmul.f32 %v3243_v47, %v5080_v20  ;;  %vm2052_vm1 = vweird.f32 %v3243_v47  ;;  %vm5132_vm4 = vmor %vm2036_vm10, %vm2037_vm0  ;;  %vm5141_vm7 = vcmp.eq.f32.partialorder %v1502_v23, 8.507059e+37  ;;  %v1505_v33 = vor.u32 1.1754944e-38, %v1504_v19  ;;  %v1335_v13 = vpop.f32.mrf.mxu2 }
 0x2fe   :  { %v3247_v35 = vpop.eup %3246  ;;  %v2033_v55 = vsub.f32 1.0, %v2032_v4  ;;  %v5107_v2 = vadd.f32 1.0, %v3245_v31  ;;  %vm2053_vm5 = vmor %vm2051_vm11, %vm2052_vm1  ;;  %v3141_v6 = vmul.f32 -1.442695, %v1316_v16  ;;  %v2260_v51 = vadd.f32 %v2259_v37, %v5072_v11 }
 0x2ff   :  { %v5109_v21 = vpop.eup %3248  ;;  %v2048_v26 = vsub.f32 1.0, %v2047_v59  ;;  %v5116_v41 = vadd.f32 1.0, %v3247_v35  ;;  %v1336_v53 = vadd.f32 %v1335_v13, %v5072_v11 }
 0x300   :  { %v3251_v58 = vpop.eup %3250  ;;  %v2034_v49 = vmul.f32 %v5091_v28, %v2033_v55  ;;  %v1479_v1 = vmul.f32 %v5109_v21, %v5083_v40  ;;  %3254 = vrcp.f32 %v5107_v2  ;;  %vm1484_vm6 = vweird.f32 %v5109_v21 }
 0x301   :  { %v2049_v52 = vmul.f32 %v3243_v47, %v2048_v26  ;;  %v1494_v48 = vmul.f32 %v3251_v58, %v5085_v39  ;;  %3256 = vrcp.f32 %v5116_v41  ;;  %v3253_v54 = vpop.eup %3252  ;;  %vm1499_vm8 = vweird.f32 %v3251_v58  ;;  %vm5159_vm9 = vmor %vm1483_vm14, %vm1484_vm6  ;;  %v2339_v19 = vpop.f32.mrf.mxu0 }
 0x302   :  { %v2035_v36 = vadd.f32 %v5091_v28, %v2034_v49  ;;  %v1480_v56 = vsub.f32 1.0, %v1479_v1  ;;  %v5153_v12 = vadd.f32 1.0, %v3253_v54  ;;  %vm1500_vm10 = vmor %vm1498_vm2, %vm1499_vm8  ;;  %v2280_v40 = vadd.f32 %v2279_v0, %v5072_v11 }
 0x303   :  { %v2050_v32 = vadd.f32 %v3243_v47, %v2049_v52  ;;  %v1495_v8 = vsub.f32 1.0, %v1494_v48  ;;  %v2413_v39 = vand.u32 2147483648, %v5107_v2  ;;  %v2426_v4 = vand.u32 2147483647, %v5116_v41 }
 0x304   :  { %v1481_v57 = vmul.f32 %v5109_v21, %v1480_v56  ;;  %v2039_v30 = vsel %vm5132_vm4, %v5091_v28, %v2035_v36  ;;  %3258 = vrcp.f32 %v5153_v12  ;;  %v2428_v17 = vand.u32 2147483648, %v5116_v41 }
 0x305   :  { %v2054_v38 = vsel %vm2053_vm5, %v3243_v47, %v2050_v32  ;;  %v1496_v61 = vmul.f32 %v3251_v58, %v1495_v8  ;;  %v2044_v50 = vsel %vm5111_vm15, %v5095_v34, %v2039_v30  ;;  %3260 = vpow2.f32 %v3141_v6  ;;  %v2359_v32 = vpop.f32.mrf.mxu1 }
 0x306   :  { %v5148_v18 = vpop.eup %3254  ;;  %v2059_v45 = vsel %vm5099_vm12, %v2058_v7, %v2054_v38  ;;  %v1482_v25 = vadd.f32 %v5109_v21, %v1481_v57  ;;  %v1355_v7 = vpop.f32.mrf.mxu3  ;;  %v3187_v5 = vmul.f32 -1.442695, %v2260_v51  ;;  %v3188_v35 = vmul.f32 -1.442695, %v2280_v40 }
 0x307   :  { %v2104_v44 = vrot.slane %v2059_v45, 4  ;;  %v1497_v15 = vadd.f32 %v3251_v58, %v1496_v61  ;;  %v2403_v9 = vmul.f32 %v5148_v18, %v5107_v2  ;;  %v3257_v22 = vpop.eup %3256  ;;  %vm2408_vm11 = vweird.f32 %v5148_v18  ;;  %v1375_v38 = vpop.f32.mrf.mxu2 }
 0x308   :  { %v1486_v63 = vsel %vm5159_vm9, %v5109_v21, %v1482_v25  ;;  %v2418_v47 = vmul.f32 %v3257_v22, %v5116_v41  ;;  %vm2423_vm12 = vweird.f32 %v3257_v22  ;;  %3262 = vpow2.f32 %v3187_v5 }
 0x309   :  { %v2109_v14 = vsel %vm1643_vm13, %v2044_v50, %v2104_v44  ;;  %v1501_v3 = vsel %vm1500_vm10, %v3251_v58, %v1497_v15  ;;  %v2404_v28 = vsub.f32 1.0, %v2403_v9  ;;  %v1491_v34 = vsel %vm5126_vm3, %v1490_v24, %v1486_v63  ;;  %v2680_v63 = vpop.f32.mrf.mxu0 }
 0x30a   :  { %3171 = vst [vmem:[%s5986_s7 + $0x40] sm:$0xff] %v2109_v14  ;;  %v1506_v60 = vsel %vm5141_vm7, %v1505_v33, %v1501_v3  ;;  %v2419_v10 = vsub.f32 1.0, %v2418_v47  ;;  %v5194_v23 = vpop.eup %3258  ;;  %v3142_v29 = vmul.f32 -1.442695, %v1336_v53  ;;  %v1356_v26 = vadd.f32 %v1355_v7, %v5072_v11 }
 0x30b   :  { %v1638_v31 = vrot.slane %v1506_v60, 4  ;;  %v2405_v59 = vmul.f32 %v5148_v18, %v2404_v28  ;;  %vm2407_vm14 = vweird.f32 %v5107_v2  ;;  %v2411_v42 = vand.u32 2147483647, %v5107_v2  ;;  %v3261_v2 = vpop.eup %3260 }
 0x30c   :  { %v2420_v21 = vmul.f32 %v3257_v22, %v2419_v10  ;;  %v1509_v58 = vmul.f32 %v5194_v23, %v5153_v12  ;;  %3264 = vpow2.f32 %v3188_v35  ;;  %vm5204_vm15 = vmor %vm2407_vm14, %vm2408_vm11  ;;  %vm2422_vm0 = vweird.f32 %v5116_v41 }
 0x30d   :  { %v1644_v55 = vsel %vm1643_vm13, %v1491_v34, %v1638_v31  ;;  %v2406_v62 = vadd.f32 %v5148_v18, %v2405_v59  ;;  %3266 = vpow2.f32 %v3142_v29  ;;  %v3143_v52 = vmul.f32 -1.442695, %v1356_v26  ;;  %vm2424_vm1 = vmor %vm2422_vm0, %vm2423_vm12 }
 0x30e   :  { %1654 = vst [vmem:[%s5986_s7] sm:$0xff] %v1644_v55  ;;  %v2421_v1 = vadd.f32 %v3257_v22, %v2420_v21  ;;  %v2429_v48 = vor.u32 1.1754944e-38, %v2428_v17  ;;  %v1510_v36 = vsub.f32 1.0, %v1509_v58  ;;  %v2340_v56 = vadd.f32 %v2339_v19, %v5072_v11  ;;  %v3263_v46 = vpop.eup %3262  ;;  %v1395_v15 = vpop.f32.mrf.mxu3 }
 0x30f   :  { %v2410_v43 = vsel %vm5204_vm15, %v5148_v18, %v2406_v62  ;;  %v2414_v16 = vor.u32 1.1754944e-38, %v2413_v39  ;;  %vm2427_vm2 = vcmp.eq.f32.partialorder %v2426_v4, 8.507059e+37  ;;  %v5215_v8 = vadd.f32 1.0, %v3261_v2 }
 0x310   :  { %v2425_v27 = vsel %vm2424_vm1, %v3257_v22, %v2421_v1  ;;  %v1511_v41 = vmul.f32 %v5194_v23, %v1510_v36  ;;  %v3191_v57 = vmul.f32 -1.442695, %v2340_v56  ;;  %vm2412_vm3 = vcmp.eq.f32.partialorder %v2411_v42, 8.507059e+37 }
 0x311   :  { %v2430_v24 = vsel %vm2427_vm2, %v2429_v48, %v2425_v27  ;;  %3268 = vpow2.f32 %v3143_v52  ;;  %v2415_v54 = vsel %vm2412_vm3, %v2414_v16, %v2410_v43  ;;  %vm1514_vm4 = vweird.f32 %v5194_v23  ;;  %v5289_v43 = vpop.f32.mrf.mxu2 }
 0x312   :  { %v2562_v33 = vrot.slane %v2430_v24, 4  ;;  %v3265_v37 = vpop.eup %3264  ;;  %3270 = vrcp.f32 %v5215_v8  ;;  %v2360_v30 = vadd.f32 %v2359_v32, %v5072_v11  ;;  %v1512_v18 = vadd.f32 %v5194_v23, %v1511_v41 }
 0x313   :  { %v3267_v61 = vpop.eup %3266  ;;  %v5222_v45 = vadd.f32 1.0, %v3263_v46  ;;  %v5224_v25 = vadd.f32 1.0, %v3265_v37  ;;  %v1517_v6 = vand.u32 2147483647, %v5153_v12  ;;  %v1519_v13 = vand.u32 2147483648, %v5153_v12 }
 0x314   :  { %v2567_v0 = vsel %vm1643_vm13, %v2415_v54, %v2562_v33  ;;  %v5231_v44 = vadd.f32 1.0, %v3267_v61  ;;  %3272 = vpow2.f32 %v3191_v57  ;;  %vm1513_vm5 = vweird.f32 %v5153_v12 }
 0x315   :  { %3193 = vst [vmem:[%s5986_s7 + $0x50] sm:$0xff] %v2567_v0  ;;  %3274 = vrcp.f32 %v5222_v45  ;;  %v1376_v20 = vadd.f32 %v1375_v38, %v5072_v11  ;;  %vm5238_vm6 = vmor %vm1513_vm5, %vm1514_vm4  ;;  %v1532_v51 = vand.u32 2147483647, %v5215_v8  ;;  %v3192_v50 = vmul.f32 -1.442695, %v2360_v30 }
 0x316   :  { %3276 = vrcp.f32 %v5224_v25  ;;  %v1516_v12 = vsel %vm5238_vm6, %v5194_v23, %v1512_v18  ;;  %vm1518_vm7 = vcmp.eq.f32.partialorder %v1517_v6, 8.507059e+37  ;;  %v1520_v14 = vor.u32 1.1754944e-38, %v1519_v13  ;;  %v1435_v9 = vpop.f32.mrf.mxu3 }
 0x317   :  { %v3269_v40 = vpop.eup %3268  ;;  %3278 = vrcp.f32 %v5231_v44  ;;  %v1534_v3 = vand.u32 2147483648, %v5215_v8  ;;  %v1396_v28 = vadd.f32 %v1395_v15, %v5072_v11  ;;  %vm1528_vm8 = vweird.f32 %v5215_v8 }
 0x318   :  { %v3271_v22 = vpop.eup %3270  ;;  %v3144_v60 = vmul.f32 -1.442695, %v1376_v20  ;;  %v5253_v39 = vadd.f32 %v2680_v63, %v5072_v11  ;;  %v1521_v4 = vsel %vm1518_vm7, %v1520_v14, %v1516_v12  ;;  %vm5255_vm9 = vcmp.eq.f32.partialorder %v1532_v51, 8.507059e+37 }
 0x319   :  { %v1524_v53 = vmul.f32 %v3271_v22, %v5215_v8  ;;  %v5259_v31 = vadd.f32 1.0, %v3269_v40  ;;  %3280 = vpow2.f32 %v3192_v50  ;;  %v2471_v7 = vand.u32 2147483647, %v5222_v45  ;;  %v2700_v40 = vpop.f32.mrf.mxu1 }
 0x31a   :  { %v3273_v47 = vpop.eup %3272  ;;  %v2473_v10 = vand.u32 2147483648, %v5222_v45  ;;  %v1535_v55 = vor.u32 1.1754944e-38, %v1534_v3  ;;  %vm2467_vm10 = vweird.f32 %v5222_v45  ;;  %vm1529_vm11 = vweird.f32 %v3271_v22 }
 0x31b   :  { %v5261_v59 = vpop.eup %3274  ;;  %v1525_v17 = vsub.f32 1.0, %v1524_v53  ;;  %v5265_v5 = vadd.f32 1.0, %v3273_v47  ;;  %3282 = vrcp.f32 %v5259_v31  ;;  %vm2482_vm12 = vweird.f32 %v5224_v25  ;;  %vm1530_vm15 = vmor %vm1528_vm8, %vm1529_vm11 }
 0x31c   :  { %v3277_v35 = vpop.eup %3276  ;;  %v2463_v62 = vmul.f32 %v5261_v59, %v5222_v45  ;;  %v2486_v19 = vand.u32 2147483647, %v5224_v25  ;;  %v2488_v42 = vand.u32 2147483648, %v5224_v25  ;;  %vm5279_vm14 = vcmp.eq.f32.partialorder %v2471_v7, 8.507059e+37 }
 0x31d   :  { %v5271_v23 = vpop.eup %3278  ;;  %v1526_v21 = vmul.f32 %v3271_v22, %v1525_v17  ;;  %v2478_v29 = vmul.f32 %v3277_v35, %v5224_v25  ;;  %v2474_v52 = vor.u32 1.1754944e-38, %v2473_v10  ;;  %3284 = vrcp.f32 %v5265_v5  ;;  %v1718_v17 = vpop.f32.mrf.mxu2 }
 0x31e   :  { %v2464_v26 = vsub.f32 1.0, %v2463_v62  ;;  %v1539_v58 = vmul.f32 %v5271_v23, %v5231_v44  ;;  %vm2468_vm0 = vweird.f32 %v5261_v59  ;;  %vm1543_vm1 = vweird.f32 %v5231_v44 }
 0x31f   :  { %v1527_v49 = vadd.f32 %v3271_v22, %v1526_v21  ;;  %v2479_v48 = vsub.f32 1.0, %v2478_v29  ;;  %v3281_v36 = vpop.eup %3280  ;;  %3286 = vpow2.f32 %v3144_v60  ;;  %vm2483_vm2 = vweird.f32 %v3277_v35  ;;  %vm5304_vm4 = vmor %vm2467_vm10, %vm2468_vm0 }
 0x320   :  { %v2465_v56 = vmul.f32 %v5261_v59, %v2464_v26  ;;  %v1540_v2 = vsub.f32 1.0, %v1539_v58  ;;  %v1547_v32 = vand.u32 2147483647, %v5231_v44  ;;  %vm5295_vm3 = vcmp.eq.f32.partialorder %v2486_v19, 8.507059e+37  ;;  %vm2484_vm5 = vmor %vm2482_vm12, %vm2483_vm2 }
 0x321   :  { %v1531_v16 = vsel %vm1530_vm15, %v3271_v22, %v1527_v49  ;;  %v2480_v27 = vmul.f32 %v3277_v35, %v2479_v48  ;;  %v3283_v24 = vpop.eup %3282  ;;  %v5309_v38 = vadd.f32 1.0, %v3281_v36  ;;  %v2489_v61 = vor.u32 1.1754944e-38, %v2488_v42 }
 0x322   :  { %v1536_v41 = vsel %vm5255_vm9, %v1535_v55, %v1531_v16  ;;  %v2466_v8 = vadd.f32 %v5261_v59, %v2465_v56  ;;  %v1541_v46 = vmul.f32 %v5271_v23, %v1540_v2  ;;  %v1554_v30 = vmul.f32 %v3283_v24, %v5259_v31  ;;  %v5370_v56 = vpop.f32.mrf.mxu3 }
 0x323   :  { %v1639_v33 = vrot.slane %v1536_v41, 4  ;;  %v2481_v54 = vadd.f32 %v3277_v35, %v2480_v27  ;;  %vm1544_vm6 = vweird.f32 %v5271_v23  ;;  %v1562_v0 = vand.u32 2147483647, %v5259_v31  ;;  %v5315_v6 = vpop.eup %3284 }
 0x324   :  { %v3145_v18 = vmul.f32 -1.442695, %v1396_v28  ;;  %v2470_v13 = vsel %vm5304_vm4, %v5261_v59, %v2466_v8  ;;  %v1555_v15 = vsub.f32 1.0, %v1554_v30  ;;  %vm1559_vm7 = vweird.f32 %v3283_v24  ;;  %vm5340_vm9 = vmor %vm1543_vm1, %vm1544_vm6 }
 0x325   :  { %v1645_v45 = vsel %vm1643_vm13, %v1521_v4, %v1639_v33  ;;  %v2485_v20 = vsel %vm2484_vm5, %v3277_v35, %v2481_v54  ;;  %v3287_v51 = vpop.eup %3286  ;;  %v1564_v50 = vand.u32 2147483648, %v5259_v31  ;;  %v2523_v63 = vmul.f32 %v5315_v6, %v5265_v5 }
 0x326   :  { %1655 = vst [vmem:[%s5986_s7 + $0x8] sm:$0xff] %v1645_v45  ;;  %v2490_v25 = vsel %vm5295_vm3, %v2489_v61, %v2485_v20  ;;  %v1542_v22 = vadd.f32 %v5271_v23, %v1541_v46  ;;  %v1556_v14 = vmul.f32 %v3283_v24, %v1555_v15  ;;  %3288 = vrcp.f32 %v5309_v38  ;;  %v5402_v15 = vpop.f32.mrf.mxu2 }
 0x327   :  { %v2564_v12 = vrot.slane %v2490_v25, 4  ;;  %v2475_v3 = vsel %vm5279_vm14, %v2474_v52, %v2470_v13  ;;  %v1549_v28 = vand.u32 2147483648, %v5231_v44  ;;  %vm1558_vm8 = vweird.f32 %v5259_v31 }
 0x328   :  { %v2524_v53 = vsub.f32 1.0, %v2523_v63  ;;  %v1557_v4 = vadd.f32 %v3283_v24, %v1556_v14  ;;  %v5344_v34 = vadd.f32 1.0, %v3287_v51  ;;  %3290 = vpow2.f32 %v3145_v18  ;;  %vm1560_vm10 = vmor %vm1558_vm8, %vm1559_vm7 }
 0x329   :  { %v2569_v60 = vsel %vm1643_vm13, %v2475_v3, %v2564_v12  ;;  %vm1563_vm11 = vcmp.eq.f32.partialorder %v1562_v0, 8.507059e+37  ;;  %v1565_v31 = vor.u32 1.1754944e-38, %v1564_v50  ;;  %v2533_v59 = vand.u32 2147483648, %v5265_v5 }
 0x32a   :  { %3195 = vst [vmem:[%s5986_s7 + $0x60] sm:$0xff] %v2569_v60  ;;  %v3210_v44 = vmul.f32 -1.442695, %v5253_v39  ;;  %v1546_v7 = vsel %vm5340_vm9, %v5271_v23, %v1542_v22  ;;  %v1561_v10 = vsel %vm1560_vm10, %v3283_v24, %v1557_v4  ;;  %v2531_v35 = vand.u32 2147483647, %v5265_v5  ;;  %v2780_v24 = vpop.f32.mrf.mxu1 }
 0x32b   :  { %3292 = vrcp.f32 %v5344_v34  ;;  %vm1548_vm12 = vcmp.eq.f32.partialorder %v1547_v32, 8.507059e+37  ;;  %v1550_v55 = vor.u32 1.1754944e-38, %v1549_v28  ;;  %v1566_v62 = vsel %vm1563_vm11, %v1565_v31, %v1561_v10  ;;  %v2760_v32 = vpop.f32.mrf.mxu0 }
 0x32c   :  { %3294 = vpow2.f32 %v3210_v44  ;;  %v3289_v21 = vpop.eup %3288  ;;  %v1640_v29 = vrot.slane %v1566_v62, 4  ;;  %v2525_v26 = vmul.f32 %v5315_v6, %v2524_v53  ;;  %vm1658_vm14 = vcmask 801796  }
 0x32d   :  { %v2701_v39 = vadd.f32 %v2700_v40, %v5072_v11  ;;  %v1416_v19 = vadd.f32 %v5289_v43, %v5072_v11  ;;  %v1551_v23 = vsel %vm1548_vm12, %v1550_v55, %v1546_v7  ;;  %vm2527_vm15 = vweird.f32 %v5265_v5  ;;  %vm5420_vm7 = vmor %vm1658_vm14, %vm1643_vm13 }
 0x32e   :  { %v2534_v42 = vor.u32 1.1754944e-38, %v2533_v59  ;;  %v2538_v58 = vmul.f32 %v3289_v21, %v5309_v38  ;;  %v3291_v49 = vpop.eup %3290  ;;  %v1646_v1 = vsel %vm1643_vm13, %v1551_v23, %v1640_v29  ;;  %vm2528_vm0 = vweird.f32 %v5315_v6  ;;  %v5434_v59 = vpop.f32.mrf.mxu3 }
 0x32f   :  { %vm5365_vm1 = vcmp.eq.f32.partialorder %v2531_v35, 8.507059e+37  ;;  %v2546_v48 = vand.u32 2147483647, %v5309_v38  ;;  %v3211_v36 = vmul.f32 -1.442695, %v2701_v39  ;;  %1656 = vst [vmem:[%s5986_s7 + $0x10] sm:$0xff] %v1646_v1  ;;  %v1436_v27 = vadd.f32 %v1435_v9, %v5072_v11  ;;  %vm5398_vm5 = vmor %vm2527_vm15, %vm2528_vm0 }
 0x330   :  { %v2539_v2 = vsub.f32 1.0, %v2538_v58  ;;  %v5375_v43 = vadd.f32 1.0, %v3291_v49  ;;  %v3146_v16 = vmul.f32 -1.442695, %v1416_v19  ;;  %v2526_v8 = vadd.f32 %v5315_v6, %v2525_v26 }
 0x331   :  { %v5378_v41 = vpop.eup %3292  ;;  %vm2542_vm2 = vweird.f32 %v5309_v38  ;;  %v2548_v57 = vand.u32 2147483648, %v5309_v38  ;;  %3296 = vpow2.f32 %v3211_v36  ;;  %vm2543_vm3 = vweird.f32 %v3289_v21  ;;  %v5472_v36 = vpop.f32.mrf.mxu2 }
 0x332   :  { %v3295_v46 = vpop.eup %3294  ;;  %v2540_v33 = vmul.f32 %v3289_v21, %v2539_v2  ;;  %v1569_v37 = vmul.f32 %v5378_v41, %v5344_v34  ;;  %3298 = vrcp.f32 %v5375_v43  ;;  %vm5386_vm4 = vcmp.eq.f32.partialorder %v2546_v48, 8.507059e+37  ;;  %vm2544_vm6 = vmor %vm2542_vm2, %vm2543_vm3 }
 0x333   :  { %v5390_v30 = vadd.f32 1.0, %v3295_v46  ;;  %v2761_v61 = vadd.f32 %v2760_v32, %v5072_v11  ;;  %v2781_v0 = vadd.f32 %v2780_v24, %v5072_v11  ;;  %3300 = vpow2.f32 %v3146_v16 }
 0x334   :  { %v2541_v45 = vadd.f32 %v3289_v21, %v2540_v33  ;;  %v1570_v13 = vsub.f32 1.0, %v1569_v37  ;;  %v3147_v20 = vmul.f32 -1.442695, %v1436_v27  ;;  %v2530_v9 = vsel %vm5398_vm5, %v5315_v6, %v2526_v8 }
 0x335   :  { %v2549_v51 = vor.u32 1.1754944e-38, %v2548_v57  ;;  %v1577_v5 = vand.u32 2147483647, %v5344_v34  ;;  %3302 = vrcp.f32 %v5390_v30  ;;  %v1579_v63 = vand.u32 2147483648, %v5344_v34 }
 0x336   :  { %v2545_v25 = vsel %vm2544_vm6, %v3289_v21, %v2541_v45  ;;  %v1571_v50 = vmul.f32 %v5378_v41, %v1570_v13  ;;  %v1719_v40 = vadd.f32 %v1718_v17, %v5072_v11  ;;  %3304 = vpow2.f32 %v3147_v20  ;;  %v5494_v45 = vpop.f32.mrf.mxu3 }
 0x337   :  { %v3297_v12 = vpop.eup %3296  ;;  %v2550_v22 = vsel %vm5386_vm4, %v2549_v51, %v2545_v25  ;;  %v3214_v6 = vmul.f32 -1.442695, %v2761_v61  ;;  %v3215_v38 = vmul.f32 -1.442695, %v2781_v0  ;;  %v2535_v3 = vsel %vm5365_vm1, %v2534_v42, %v2530_v9 }
 0x338   :  { %v3299_v14 = vpop.eup %3298  ;;  %v2566_v53 = vrot.slane %v2550_v22, 4  ;;  %vm1573_vm8 = vweird.f32 %v5344_v34  ;;  %v1592_v60 = vand.u32 2147483647, %v5375_v43  ;;  %vm1574_vm9 = vweird.f32 %v5378_v41 }
 0x339   :  { %vm5427_vm10 = vcmp.eq.f32.partialorder %v1577_v5, 8.507059e+37  ;;  %v1584_v4 = vmul.f32 %v3299_v14, %v5375_v43  ;;  %v5432_v31 = vadd.f32 1.0, %v3297_v12  ;;  %3306 = vpow2.f32 %v3214_v6  ;;  %v3301_v44 = vpop.eup %3300  ;;  %vm5460_vm14 = vmor %vm1573_vm8, %vm1574_vm9 }
 0x33a   :  { %v2571_v17 = vsel %vm1643_vm13, %v2535_v3, %v2566_v53  ;;  %v1572_v7 = vadd.f32 %v5378_v41, %v1571_v50  ;;  %3308 = vpow2.f32 %v3215_v38  ;;  %v3158_v10 = vmul.f32 -1.442695, %v1719_v40 }
 0x33b   :  { %v5438_v35 = vpop.eup %3302  ;;  %3197 = vst.msk [vmem:[%s5986_s7 + $0x70] sm:$0xff] %vm5420_vm7, %v2571_v17  ;;  %v1580_v55 = vor.u32 1.1754944e-38, %v1579_v63  ;;  %v1585_v62 = vsub.f32 1.0, %v1584_v4  ;;  %3310 = vrcp.f32 %v5432_v31  ;;  %v1739_v21 = vadd.f32 %v5370_v56, %v5072_v11  ;;  %v5531_v17 = vpop.f32.mrf.mxu2 }
 0x33c   :  { %vm1588_vm11 = vweird.f32 %v5375_v43  ;;  %vm5449_vm12 = vcmp.eq.f32.partialorder %v1592_v60, 8.507059e+37  ;;  %v1594_v26 = vand.u32 2147483648, %v5375_v43  ;;  %v2894_v39 = vmul.f32 %v5438_v35, %v5390_v30  ;;  %v3305_v19 = vpop.eup %3304 }
 0x33d   :  { %v1586_v42 = vmul.f32 %v3299_v14, %v1585_v62  ;;  %vm1589_vm15 = vweird.f32 %v3299_v14  ;;  %v2904_v58 = vand.u32 2147483648, %v5390_v30  ;;  %v5465_v49 = vadd.f32 1.0, %v3301_v44 }
 0x33e   :  { %v1576_v1 = vsel %vm5460_vm14, %v5378_v41, %v1572_v7  ;;  %v2895_v52 = vsub.f32 1.0, %v2894_v39  ;;  %v5470_v48 = vadd.f32 1.0, %v3305_v19  ;;  %3312 = vpow2.f32 %v3158_v10  ;;  %vm1590_vm0 = vmor %vm1588_vm11, %vm1589_vm15 }
 0x33f   :  { %v3307_v34 = vpop.eup %3306  ;;  %v1587_v56 = vadd.f32 %v3299_v14, %v1586_v42  ;;  %v2917_v2 = vand.u32 2147483647, %v5432_v31  ;;  %v2919_v16 = vand.u32 2147483648, %v5432_v31  ;;  %3314 = vrcp.f32 %v5465_v49 }
 0x340   :  { %v3309_v27 = vpop.eup %3308  ;;  %v1595_v32 = vor.u32 1.1754944e-38, %v1594_v26  ;;  %vm2898_vm1 = vweird.f32 %v5390_v30  ;;  %v2902_v24 = vand.u32 2147483647, %v5390_v30  ;;  %3316 = vrcp.f32 %v5470_v48 }
 0x341   :  { %v3311_v41 = vpop.eup %3310  ;;  %v1591_v8 = vsel %vm1590_vm0, %v3299_v14, %v1587_v56  ;;  %v2896_v57 = vmul.f32 %v5438_v35, %v2895_v52  ;;  %v2905_v46 = vor.u32 1.1754944e-38, %v2904_v58  ;;  %v3159_v33 = vmul.f32 -1.442695, %v1739_v21 }
 0x342   :  { %v1581_v37 = vsel %vm5427_vm10, %v1580_v55, %v1576_v1  ;;  %v1596_v43 = vsel %vm5449_vm12, %v1595_v32, %v1591_v8  ;;  %v2909_v54 = vmul.f32 %v3311_v41, %v5432_v31  ;;  %vm2913_vm2 = vweird.f32 %v5432_v31 }
 0x343   :  { %v1641_v61 = vrot.slane %v1596_v43, 4  ;;  %vm2899_vm3 = vweird.f32 %v5438_v35  ;;  %vm5490_vm4 = vcmp.eq.f32.partialorder %v2917_v2, 8.507059e+37  ;;  %v2920_v18 = vor.u32 1.1754944e-38, %v2919_v16  ;;  %v5566_v2 = vpop.f32.mrf.mxu3 }
 0x344   :  { %v3313_v13 = vpop.eup %3312  ;;  %vm5496_vm5 = vcmp.eq.f32.partialorder %v2902_v24, 8.507059e+37  ;;  %v2910_v9 = vsub.f32 1.0, %v2909_v54  ;;  %v1607_v51 = vand.u32 2147483647, %v5465_v49  ;;  %v5501_v5 = vadd.f32 1.0, %v3307_v34  ;;  %vm5525_vm9 = vmor %vm2898_vm1, %vm2899_vm3 }
 0x345   :  { %v5503_v25 = vadd.f32 1.0, %v3309_v27  ;;  %v5505_v50 = vpop.eup %3314  ;;  %v1647_v63 = vsel %vm1643_vm13, %v1581_v37, %v1641_v61  ;;  %v2897_v40 = vadd.f32 %v5438_v35, %v2896_v57  ;;  %v1609_v12 = vand.u32 2147483648, %v5465_v49 }
 0x346   :  { %3318 = vpow2.f32 %v3159_v33  ;;  %v3317_v22 = vpop.eup %3316  ;;  %1657 = vst [vmem:[%s5986_s7 + $0x18] sm:$0xff] %v1647_v63  ;;  %v2911_v6 = vmul.f32 %v3311_v41, %v2910_v9  ;;  %vm2914_vm6 = vweird.f32 %v3311_v41  ;;  %v1599_v38 = vmul.f32 %v5505_v50, %v5465_v49  ;;  %v2219_v9 = vpop.f32.mrf.mxu2 }
 0x347   :  { %3320 = vrcp.f32 %v5501_v5  ;;  %vm1603_vm8 = vweird.f32 %v5465_v49  ;;  %v1614_v14 = vmul.f32 %v3317_v22, %v5470_v48  ;;  %v1622_v3 = vand.u32 2147483647, %v5470_v48  ;;  %vm2915_vm10 = vmor %vm2913_vm2, %vm2914_vm6 }
 0x348   :  { %v5519_v53 = vadd.f32 1.0, %v3313_v13  ;;  %v2912_v47 = vadd.f32 %v3311_v41, %v2911_v6  ;;  %v1600_v4 = vsub.f32 1.0, %v1599_v38  ;;  %v1624_v44 = vand.u32 2147483648, %v5470_v48 }
 0x349   :  { %3322 = vrcp.f32 %v5503_v25  ;;  %vm5535_vm11 = vcmp.eq.f32.partialorder %v1607_v51, 8.507059e+37  ;;  %v1610_v30 = vor.u32 1.1754944e-38, %v1609_v12  ;;  %v1615_v10 = vsub.f32 1.0, %v1614_v14 }
 0x34a   :  { %vm1618_vm12 = vweird.f32 %v5470_v48  ;;  %v2901_v55 = vsel %vm5525_vm9, %v5438_v35, %v2897_v40  ;;  %v2916_v62 = vsel %vm2915_vm10, %v3311_v41, %v2912_v47  ;;  %v1601_v21 = vmul.f32 %v5505_v50, %v1600_v4 }
 0x34b   :  { %vm1604_vm14 = vweird.f32 %v5505_v50  ;;  %v2921_v31 = vsel %vm5490_vm4, %v2920_v18, %v2916_v62  ;;  %v1616_v26 = vmul.f32 %v3317_v22, %v1615_v10  ;;  %vm1619_vm15 = vweird.f32 %v3317_v22 }
 0x34c   :  { %v3319_v29 = vpop.eup %3318  ;;  %3324 = vrcp.f32 %v5519_v53  ;;  %v3024_v19 = vrot.slane %v2921_v31, 4  ;;  %v1602_v23 = vadd.f32 %v5505_v50, %v1601_v21  ;;  %vm5551_vm0 = vcmp.eq.f32.partialorder %v1622_v3, 8.507059e+37  ;;  %vm5559_vm1 = vmor %vm1603_vm8, %vm1604_vm14 }
 0x34d   :  { %v5548_v39 = vpop.eup %3320  ;;  %v1625_v42 = vor.u32 1.1754944e-38, %v1624_v44  ;;  %v2906_v58 = vsel %vm5496_vm5, %v2905_v46, %v2901_v55  ;;  %v1617_v52 = vadd.f32 %v3317_v22, %v1616_v26  ;;  %v2962_v56 = vand.u32 2147483647, %v5501_v5  ;;  %vm1620_vm2 = vmor %vm1618_vm12, %vm1619_vm15  ;;  %v2239_v55 = vpop.f32.mrf.mxu3 }
 0x34e   :  { %v2954_v34 = vmul.f32 %v5548_v39, %v5501_v5  ;;  %v3029_v27 = vsel %vm1643_vm13, %v2906_v58, %v3024_v19  ;;  %vm2958_vm3 = vweird.f32 %v5501_v5  ;;  %v2964_v49 = vand.u32 2147483648, %v5501_v5  ;;  %v2299_v1 = vpop.f32.mrf.mxu2 }
 0x34f   :  { %v3323_v16 = vpop.eup %3322  ;;  %v5574_v32 = vadd.f32 1.0, %v3319_v29  ;;  %3219 = vst [vmem:[%s5986_s7 + $0x80] sm:$0xff] %v3029_v27  ;;  %v1606_v24 = vsel %vm5559_vm1, %v5505_v50, %v1602_v23  ;;  %v1621_v41 = vsel %vm1620_vm2, %v3317_v22, %v1617_v52  ;;  %vm2973_vm4 = vweird.f32 %v5503_v25 }
 0x350   :  { %v2955_v8 = vsub.f32 1.0, %v2954_v34  ;;  %v2969_v57 = vmul.f32 %v3323_v16, %v5503_v25  ;;  %v1626_v48 = vsel %vm5551_vm0, %v1625_v42, %v1621_v41  ;;  %v2977_v46 = vand.u32 2147483647, %v5503_v25 }
 0x351   :  { %v2979_v33 = vand.u32 2147483648, %v5503_v25  ;;  %v1642_v43 = vrot.slane %v1626_v48, 4  ;;  %vm5591_vm5 = vcmp.eq.f32.partialorder %v2962_v56, 8.507059e+37  ;;  %3326 = vrcp.f32 %v5574_v32 }
 0x352   :  { %v5588_v37 = vpop.eup %3324  ;;  %v2956_v54 = vmul.f32 %v5548_v39, %v2955_v8  ;;  %v2970_v0 = vsub.f32 1.0, %v2969_v57  ;;  %v1611_v18 = vsel %vm5535_vm11, %v1610_v30, %v1606_v24  ;;  %vm2959_vm6 = vweird.f32 %v5548_v39 }
 0x353   :  { %v2965_v13 = vor.u32 1.1754944e-38, %v2964_v49  ;;  %v1942_v20 = vmul.f32 %v5588_v37, %v5519_v53  ;;  %v1648_v51 = vsel %vm1643_vm13, %v1611_v18, %v1642_v43  ;;  %vm2974_vm8 = vweird.f32 %v3323_v16  ;;  %vm5618_vm10 = vmor %vm2958_vm3, %vm2959_vm6 }
 0x354   :  { %v2957_v50 = vadd.f32 %v5548_v39, %v2956_v54  ;;  %v2971_v63 = vmul.f32 %v3323_v16, %v2970_v0  ;;  %1660 = vst.msk [vmem:[%s5986_s7 + $0x20] sm:$0xff] %vm5420_vm7, %v1648_v51  ;;  %vm5608_vm9 = vcmp.eq.f32.partialorder %v2977_v46, 8.507059e+37  ;;  %v1759_v22 = vadd.f32 %v5402_v15, %v5072_v11  ;;  %vm2975_vm11 = vmor %vm2973_vm4, %vm2974_vm8 }
 0x355   :  { %v1943_v12 = vsub.f32 1.0, %v1942_v20  ;;  %v1779_v6 = vadd.f32 %v5434_v59, %v5072_v11  ;;  %v2980_v3 = vor.u32 1.1754944e-38, %v2979_v33  ;;  %v1952_v60 = vand.u32 2147483648, %v5519_v53  ;;  %v2319_v61 = vpop.f32.mrf.mxu3 }
 0x356   :  { %v2972_v14 = vadd.f32 %v3323_v16, %v2971_v63  ;;  %v1799_v47 = vadd.f32 %v5472_v36, %v5072_v11  ;;  %v2961_v15 = vsel %vm5618_vm10, %v5548_v39, %v2957_v50  ;;  %v3160_v5 = vmul.f32 -1.442695, %v1759_v22 }
 0x357   :  { %v1944_v59 = vmul.f32 %v5588_v37, %v1943_v12  ;;  %v3161_v4 = vmul.f32 -1.442695, %v1779_v6  ;;  %v3327_v44 = vpop.eup %3326  ;;  %v1819_v10 = vadd.f32 %v5494_v45, %v5072_v11  ;;  %v1879_v36 = vadd.f32 %v5531_v17, %v5072_v11  ;;  %v2640_v6 = vpop.f32.mrf.mxu2 }
 0x358   :  { %v2976_v7 = vsel %vm2975_vm11, %v3323_v16, %v2972_v14  ;;  %v3162_v30 = vmul.f32 -1.442695, %v1799_v47  ;;  %vm1947_vm12 = vweird.f32 %v5588_v37  ;;  %v1957_v25 = vmul.f32 %v3327_v44, %v5574_v32 }
 0x359   :  { %v2981_v62 = vsel %vm5608_vm9, %v2980_v3, %v2976_v7  ;;  %v1965_v21 = vand.u32 2147483647, %v5574_v32  ;;  %3328 = vpow2.f32 %v3160_v5  ;;  %v3163_v31 = vmul.f32 -1.442695, %v1819_v10 }
 0x35a   :  { %v3026_v29 = vrot.slane %v2981_v62, 4  ;;  %v3166_v26 = vmul.f32 -1.442695, %v1879_v36  ;;  %v2966_v45 = vsel %vm5591_vm5, %v2965_v13, %v2961_v15  ;;  %v1958_v39 = vsub.f32 1.0, %v1957_v25 }
 0x35b   :  { %3330 = vpow2.f32 %v3161_v4  ;;  %v1899_v17 = vadd.f32 %v5566_v2, %v5072_v11  ;;  %v1945_v23 = vadd.f32 %v5588_v37, %v1944_v59  ;;  %v1967_v35 = vand.u32 2147483648, %v5574_v32 }
 0x35c   :  { %v3031_v19 = vsel %vm1643_vm13, %v2966_v45, %v3026_v29  ;;  %3332 = vpow2.f32 %v3162_v30  ;;  %v1959_v42 = vmul.f32 %v3327_v44, %v1958_v39  ;;  %vm1962_vm14 = vweird.f32 %v3327_v44 }
 0x35d   :  { %3221 = vst [vmem:[%s5986_s7 + $0x90] sm:$0xff] %v3031_v19  ;;  %3334 = vpow2.f32 %v3163_v31  ;;  %v2220_v58 = vadd.f32 %v2219_v9, %v5072_v11  ;;  %vm1946_vm15 = vweird.f32 %v5519_v53  ;;  %v3167_v52 = vmul.f32 -1.442695, %v1899_v17 }
 0x35e   :  { %3336 = vpow2.f32 %v3166_v26  ;;  %v2240_v34 = vadd.f32 %v2239_v55, %v5072_v11  ;;  %vm5655_vm0 = vmor %vm1946_vm15, %vm1947_vm12  ;;  %v1950_v2 = vand.u32 2147483647, %v5519_v53  ;;  %v1960_v16 = vadd.f32 %v3327_v44, %v1959_v42 }
 0x35f   :  { %vm1961_vm1 = vweird.f32 %v5574_v32  ;;  %v3329_v27 = vpop.eup %3328  ;;  %v1949_v49 = vsel %vm5655_vm0, %v5588_v37, %v1945_v23  ;;  %v1953_v24 = vor.u32 1.1754944e-38, %v1952_v60  ;;  %vm1966_vm3 = vcmp.eq.f32.partialorder %v1965_v21, 8.507059e+37  ;;  %v5723_v23 = vpop.f32.mrf.mxu3 }
 0x360   :  { %vm1963_vm2 = vmor %vm1961_vm1, %vm1962_vm14  ;;  %v1968_v41 = vor.u32 1.1754944e-38, %v1967_v35  ;;  %v5665_v48 = vadd.f32 1.0, %v3329_v27  ;;  %v3185_v46 = vmul.f32 -1.442695, %v2220_v58  ;;  %v2300_v53 = vadd.f32 %v2299_v1, %v5072_v11 }
 0x361   :  { %v3331_v8 = vpop.eup %3330  ;;  %v1964_v57 = vsel %vm1963_vm2, %v3327_v44, %v1960_v16  ;;  %3338 = vpow2.f32 %v3167_v52  ;;  %v3186_v54 = vmul.f32 -1.442695, %v2240_v34  ;;  %vm1951_vm4 = vcmp.eq.f32.partialorder %v1950_v2, 8.507059e+37 }
 0x362   :  { %v3333_v33 = vpop.eup %3332  ;;  %v1969_v43 = vsel %vm1966_vm3, %v1968_v41, %v1964_v57  ;;  %v5668_v32 = vadd.f32 1.0, %v3331_v8  ;;  %3340 = vrcp.f32 %v5665_v48  ;;  %v1954_v13 = vsel %vm1951_vm4, %v1953_v24, %v1949_v49 }
 0x363   :  { %v3335_v37 = vpop.eup %3334  ;;  %v2101_v0 = vrot.slane %v1969_v43, 4  ;;  %v5673_v9 = vadd.f32 1.0, %v3333_v33  ;;  %v2320_v51 = vadd.f32 %v2319_v61, %v5072_v11  ;;  %v3189_v40 = vmul.f32 -1.442695, %v2300_v53 }
 0x364   :  { %v3337_v18 = vpop.eup %3336  ;;  %3342 = vrcp.f32 %v5668_v32  ;;  %v5679_v50 = vadd.f32 1.0, %v3335_v37  ;;  %v1982_v12 = vand.u32 2147483648, %v5665_v48  ;;  %v1995_v22 = vand.u32 2147483647, %v5668_v32 }
 0x365   :  { %v2106_v20 = vsel %vm1643_vm13, %v1954_v13, %v2101_v0  ;;  %3344 = vpow2.f32 %v3185_v46  ;;  %v5681_v63 = vadd.f32 1.0, %v3337_v18  ;;  %v1997_v14 = vand.u32 2147483648, %v5668_v32 }
 0x366   :  { %3168 = vst [vmem:[%s5986_s7 + $0x28] sm:$0xff] %v2106_v20  ;;  %3346 = vpow2.f32 %v3186_v54  ;;  %v1980_v60 = vand.u32 2147483647, %v5665_v48  ;;  %v5692_v47 = vmul.f32 -1.442695, %v2320_v51  ;;  %vm1976_vm5 = vweird.f32 %v5665_v48 }
 0x367   :  { %3348 = vrcp.f32 %v5673_v9  ;;  %v3339_v38 = vpop.eup %3338  ;;  %v5698_v5 = vadd.f32 %v2640_v6, %v5072_v11  ;;  %v1983_v44 = vor.u32 1.1754944e-38, %v1982_v12  ;;  %vm1991_vm6 = vweird.f32 %v5668_v32  ;;  %v2720_v6 = vpop.f32.mrf.mxu2 }
 0x368   :  { %3350 = vrcp.f32 %v5679_v50  ;;  %v5688_v3 = vpop.eup %3340  ;;  %vm5702_vm8 = vcmp.eq.f32.partialorder %v1995_v22, 8.507059e+37  ;;  %v1998_v55 = vor.u32 1.1754944e-38, %v1997_v14  ;;  %vm2006_vm9 = vweird.f32 %v5673_v9 }
 0x369   :  { %3352 = vrcp.f32 %v5681_v63  ;;  %v1972_v59 = vmul.f32 %v5688_v3, %v5665_v48  ;;  %v5707_v62 = vadd.f32 1.0, %v3339_v38  ;;  %vm5711_vm10 = vcmp.eq.f32.partialorder %v1980_v60, 8.507059e+37 }
 0x36a   :  { %v3343_v15 = vpop.eup %3342  ;;  %3354 = vpow2.f32 %v3189_v40  ;;  %v2010_v31 = vand.u32 2147483647, %v5673_v9  ;;  %v2012_v26 = vand.u32 2147483648, %v5673_v9  ;;  %vm2021_vm11 = vweird.f32 %v5679_v50 }
 0x36b   :  { %v3345_v4 = vpop.eup %3344  ;;  %v1987_v7 = vmul.f32 %v3343_v15, %v5668_v32  ;;  %v1973_v36 = vsub.f32 1.0, %v1972_v59  ;;  %vm1977_vm12 = vweird.f32 %v5688_v3  ;;  %v2025_v19 = vand.u32 2147483647, %v5679_v50 }
 0x36c   :  { %v3347_v10 = vpop.eup %3346  ;;  %vm1992_vm14 = vweird.f32 %v3343_v15  ;;  %3356 = vrcp.f32 %v5707_v62  ;;  %v2027_v56 = vand.u32 2147483648, %v5679_v50  ;;  %vm5735_vm15 = vmor %vm1976_vm5, %vm1977_vm12  ;;  %vm5739_vm0 = vcmp.eq.f32.partialorder %v2010_v31, 8.507059e+37 }
 0x36d   :  { %v5709_v25 = vpop.eup %3348  ;;  %v1988_v29 = vsub.f32 1.0, %v1987_v7  ;;  %v1974_v39 = vmul.f32 %v5688_v3, %v1973_v36  ;;  %v2013_v24 = vor.u32 1.1754944e-38, %v2012_v26  ;;  %v5743_v8 = vadd.f32 1.0, %v3345_v4  ;;  %vm1993_vm1 = vmor %vm1991_vm6, %vm1992_vm14  ;;  %v2740_v4 = vpop.f32.mrf.mxu3 }
 0x36e   :  { %v3351_v45 = vpop.eup %3350  ;;  %v2002_v17 = vmul.f32 %v5709_v25, %v5673_v9  ;;  %vm2007_vm2 = vweird.f32 %v5709_v25  ;;  %vm5749_vm3 = vcmp.eq.f32.partialorder %v2025_v19, 8.507059e+37  ;;  %v2028_v61 = vor.u32 1.1754944e-38, %v2027_v56 }
 0x36f   :  { %v5725_v35 = vpop.eup %3352  ;;  %v1989_v42 = vmul.f32 %v3343_v15, %v1988_v29  ;;  %v2017_v58 = vmul.f32 %v3351_v45, %v5679_v50  ;;  %v1975_v52 = vadd.f32 %v5688_v3, %v1974_v39  ;;  %vm2022_vm4 = vweird.f32 %v3351_v45  ;;  %vm5762_vm5 = vmor %vm2006_vm9, %vm2007_vm2 }
 0x370   :  { %v3355_v1 = vpop.eup %3354  ;;  %v2003_v34 = vsub.f32 1.0, %v2002_v17  ;;  %v2062_v2 = vmul.f32 %v5725_v35, %v5681_v63  ;;  %3358 = vrcp.f32 %v5743_v8  ;;  %v5767_v51 = vadd.f32 1.0, %v3347_v10  ;;  %vm2023_vm6 = vmor %vm2021_vm11, %vm2022_vm4 }
 0x371   :  { %v1990_v27 = vadd.f32 %v3343_v15, %v1989_v42  ;;  %v2018_v41 = vsub.f32 1.0, %v2017_v58  ;;  %v1979_v53 = vsel %vm5735_vm15, %v5688_v3, %v1975_v52  ;;  %v2070_v12 = vand.u32 2147483647, %v5681_v63 }
 0x372   :  { %v2004_v57 = vmul.f32 %v5709_v25, %v2003_v34  ;;  %v2063_v46 = vsub.f32 1.0, %v2062_v2  ;;  %v3357_v0 = vpop.eup %3356  ;;  %v1984_v40 = vsel %vm5711_vm10, %v1983_v44, %v1979_v53  ;;  %v2072_v22 = vand.u32 2147483648, %v5681_v63 }
 0x373   :  { %v1994_v33 = vsel %vm1993_vm1, %v3343_v15, %v1990_v27  ;;  %v2019_v43 = vmul.f32 %v3351_v45, %v2018_v41  ;;  %v2077_v9 = vmul.f32 %v3357_v0, %v5707_v62  ;;  %v5780_v60 = vadd.f32 1.0, %v3355_v1 }
 0x374   :  { %v1999_v32 = vsel %vm5702_vm8, %v1998_v55, %v1994_v33  ;;  %v2005_v54 = vadd.f32 %v5709_v25, %v2004_v57  ;;  %v2064_v37 = vmul.f32 %v5725_v35, %v2063_v46  ;;  %vm2067_vm8 = vweird.f32 %v5725_v35 }
 0x375   :  { %v2102_v18 = vrot.slane %v1999_v32, 4  ;;  %v2020_v20 = vadd.f32 %v3351_v45, %v2019_v43  ;;  %v2078_v59 = vsub.f32 1.0, %v2077_v9  ;;  %v2085_v7 = vand.u32 2147483647, %v5707_v62  ;;  %v2820_v53 = vpop.f32.mrf.mxu3 }
 0x376   :  { %v2009_v14 = vsel %vm5762_vm5, %v5709_v25, %v2005_v54  ;;  %v2065_v15 = vadd.f32 %v5725_v35, %v2064_v37  ;;  %v2087_v30 = vand.u32 2147483648, %v5707_v62  ;;  %3360 = vrcp.f32 %v5767_v51  ;;  %v5795_v55 = vpop.eup %3358 }
 0x377   :  { %v2107_v38 = vsel %vm1643_vm13, %v1984_v40, %v2102_v18  ;;  %v2024_v3 = vsel %vm2023_vm6, %v3351_v45, %v2020_v20  ;;  %v2014_v10 = vsel %vm5739_vm0, %v2013_v24, %v2009_v14  ;;  %vm2066_vm9 = vweird.f32 %v5681_v63 }
 0x378   :  { %3169 = vst [vmem:[%s5986_s7 + $0x30] sm:$0xff] %v2107_v38  ;;  %v2029_v50 = vsel %vm5749_vm3, %v2028_v61, %v2024_v3  ;;  %v2079_v36 = vmul.f32 %v3357_v0, %v2078_v59  ;;  %vm2082_vm10 = vweird.f32 %v3357_v0  ;;  %vm5798_vm11 = vmor %vm2066_vm9, %vm2067_vm8  ;;  %vm5802_vm12 = vcmp.eq.f32.partialorder %v2070_v12, 8.507059e+37 }
 0x379   :  { %v2103_v44 = vrot.slane %v2029_v50, 4  ;;  %v2073_v31 = vor.u32 1.1754944e-38, %v2072_v22  ;;  %3362 = vrcp.f32 %v5780_v60  ;;  %v2069_v63 = vsel %vm5798_vm11, %v5725_v35, %v2065_v15 }
 0x37a   :  { %v2080_v26 = vadd.f32 %v3357_v0, %v2079_v36  ;;  %vm2081_vm14 = vweird.f32 %v5707_v62  ;;  %v2433_v45 = vmul.f32 %v5795_v55, %v5743_v8  ;;  %vm2086_vm0 = vcmp.eq.f32.partialorder %v2085_v7, 8.507059e+37 }
 0x37b   :  { %v2108_v25 = vsel %vm1643_vm13, %v2014_v10, %v2103_v44  ;;  %vm2083_vm15 = vmor %vm2081_vm14, %vm2082_vm10  ;;  %v2088_v39 = vor.u32 1.1754944e-38, %v2087_v30  ;;  %vm2437_vm1 = vweird.f32 %v5743_v8  ;;  %3364 = vpow2.f32 %v5692_v47 }
 0x37c   :  { %3170 = vst [vmem:[%s5986_s7 + $0x38] sm:$0xff] %v2108_v25  ;;  %v2084_v17 = vsel %vm2083_vm15, %v3357_v0, %v2080_v26  ;;  %v2434_v19 = vsub.f32 1.0, %v2433_v45  ;;  %v3208_v42 = vmul.f32 -1.442695, %v5698_v5  ;;  %v2661_v35 = vadd.f32 %v5723_v23, %v5072_v11  ;;  %v3361_v58 = vpop.eup %3360  ;;  %v2800_v5 = vpop.f32.mrf.mxu2 }
 0x37d   :  { %v2074_v62 = vsel %vm5802_vm12, %v2073_v31, %v2069_v63  ;;  %v2089_v1 = vsel %vm2086_vm0, %v2088_v39, %v2084_v17  ;;  %v2443_v52 = vand.u32 2147483648, %v5743_v8  ;;  %v2721_v34 = vadd.f32 %v2720_v6, %v5072_v11 }
 0x37e   :  { %v2105_v56 = vrot.slane %v2089_v1, 4  ;;  %v2435_v2 = vmul.f32 %v5795_v55, %v2434_v19  ;;  %v2448_v47 = vmul.f32 %v3361_v58, %v5767_v51  ;;  %v2456_v16 = vand.u32 2147483647, %v5767_v51 }
 0x37f   :  { %v5828_v27 = vpop.eup %3362  ;;  %3366 = vpow2.f32 %v3208_v42  ;;  %v3209_v23 = vmul.f32 -1.442695, %v2661_v35  ;;  %v3212_v49 = vmul.f32 -1.442695, %v2721_v34  ;;  %v2741_v24 = vadd.f32 %v2740_v4, %v5072_v11 }
 0x380   :  { %v2110_v41 = vsel %vm1643_vm13, %v2074_v62, %v2105_v56  ;;  %v2449_v57 = vsub.f32 1.0, %v2448_v47  ;;  %v2458_v48 = vand.u32 2147483648, %v5767_v51  ;;  %v2493_v46 = vmul.f32 %v5828_v27, %v5780_v60 }
 0x381   :  { %v3365_v33 = vpop.eup %3364  ;;  %3172 = vst.msk [vmem:[%s5986_s7 + $0x48] sm:$0xff] %vm5420_vm7, %v2110_v41  ;;  %vm2438_vm2 = vweird.f32 %v5795_v55  ;;  %3368 = vpow2.f32 %v3209_v23  ;;  %v3213_v43 = vmul.f32 -1.442695, %v2741_v24  ;;  %v2801_v32 = vadd.f32 %v2800_v5, %v5072_v11 }
 0x382   :  { %v2436_v54 = vadd.f32 %v5795_v55, %v2435_v2  ;;  %v2450_v61 = vmul.f32 %v3361_v58, %v2449_v57  ;;  %vm2453_vm3 = vweird.f32 %v3361_v58  ;;  %v5843_v37 = vadd.f32 1.0, %v3365_v33  ;;  %vm5848_vm4 = vmor %vm2437_vm1, %vm2438_vm2 }
 0x383   :  { %v2494_v0 = vsub.f32 1.0, %v2493_v46  ;;  %3370 = vpow2.f32 %v3212_v49  ;;  %v3216_v18 = vmul.f32 -1.442695, %v2801_v32  ;;  %v2821_v13 = vadd.f32 %v2820_v53, %v5072_v11 }
 0x384   :  { %v2441_v40 = vand.u32 2147483647, %v5743_v8  ;;  %v2451_v12 = vadd.f32 %v3361_v58, %v2450_v61  ;;  %vm2452_vm5 = vweird.f32 %v5767_v51  ;;  %3372 = vrcp.f32 %v5843_v37 }
 0x385   :  { %v3367_v22 = vpop.eup %3366  ;;  %v2444_v9 = vor.u32 1.1754944e-38, %v2443_v52  ;;  %vm2454_vm6 = vmor %vm2452_vm5, %vm2453_vm3  ;;  %v2459_v6 = vor.u32 1.1754944e-38, %v2458_v48  ;;  %3374 = vpow2.f32 %v3213_v43  ;;  %v2440_v11 = vsel %vm5848_vm4, %v5795_v55, %v2436_v54 }
 0x386   :  { %v2455_v38 = vsel %vm2454_vm6, %v3361_v58, %v2451_v12  ;;  %vm2457_vm8 = vcmp.eq.f32.partialorder %v2456_v16, 8.507059e+37  ;;  %v5858_v14 = vadd.f32 1.0, %v3367_v22  ;;  %v2495_v50 = vmul.f32 %v5828_v27, %v2494_v0 }
 0x387   :  { %v3369_v3 = vpop.eup %3368  ;;  %v2460_v8 = vsel %vm2457_vm8, %v2459_v6, %v2455_v38  ;;  %3376 = vpow2.f32 %v3216_v18  ;;  %v3217_v51 = vmul.f32 -1.442695, %v2821_v13  ;;  %vm2442_vm9 = vcmp.eq.f32.partialorder %v2441_v40, 8.507059e+37 }
 0x388   :  { %v2563_v15 = vrot.slane %v2460_v8, 4  ;;  %3378 = vrcp.f32 %v5858_v14  ;;  %v2445_v4 = vsel %vm2442_vm9, %v2444_v9, %v2440_v11  ;;  %v5862_v44 = vadd.f32 1.0, %v3369_v3 }
 0x389   :  { %v3371_v59 = vpop.eup %3370  ;;  %v2496_v55 = vadd.f32 %v5828_v27, %v2495_v50  ;;  %vm2498_vm10 = vweird.f32 %v5828_v27  ;;  %3380 = vpow2.f32 %v3217_v51  ;;  %v2501_v21 = vand.u32 2147483647, %v5780_v60 }
 0x38a   :  { %v3373_v7 = vpop.eup %3372  ;;  %v2568_v30 = vsel %vm1643_vm13, %v2445_v4, %v2563_v15  ;;  %v5865_v10 = vadd.f32 1.0, %v3371_v59  ;;  %v2503_v29 = vand.u32 2147483648, %v5780_v60  ;;  %3382 = vrcp.f32 %v5862_v44 }
 0x38b   :  { %v3375_v36 = vpop.eup %3374  ;;  %3194 = vst [vmem:[%s5986_s7 + $0x58] sm:$0xff] %v2568_v30  ;;  %v2508_v25 = vmul.f32 %v3373_v7, %v5843_v37  ;;  %vm2497_vm11 = vweird.f32 %v5780_v60  ;;  %v2516_v26 = vand.u32 2147483647, %v5843_v37  ;;  %v2518_v17 = vand.u32 2147483648, %v5843_v37 }
 0x38c   :  { %3384 = vrcp.f32 %v5865_v10  ;;  %vm5881_vm12 = vmor %vm2497_vm11, %vm2498_vm10  ;;  %v5886_v19 = vadd.f32 1.0, %v3375_v36  ;;  %vm2513_vm14 = vweird.f32 %v3373_v7  ;;  %vm2502_vm15 = vcmp.eq.f32.partialorder %v2501_v21, 8.507059e+37 }
 0x38d   :  { %v3377_v31 = vpop.eup %3376  ;;  %v2509_v63 = vsub.f32 1.0, %v2508_v25  ;;  %v2500_v42 = vsel %vm5881_vm12, %v5828_v27, %v2496_v55  ;;  %v2504_v58 = vor.u32 1.1754944e-38, %v2503_v29  ;;  %vm2512_vm0 = vweird.f32 %v5843_v37 }
 0x38e   :  { %v5879_v45 = vpop.eup %3378  ;;  %3386 = vrcp.f32 %v5886_v19  ;;  %vm2517_vm1 = vcmp.eq.f32.partialorder %v2516_v26, 8.507059e+37  ;;  %v5895_v34 = vadd.f32 1.0, %v3377_v31  ;;  %vm2514_vm2 = vmor %vm2512_vm0, %vm2513_vm14  ;;  %v2519_v47 = vor.u32 1.1754944e-38, %v2518_v17 }
 0x38f   :  { %v2510_v60 = vmul.f32 %v3373_v7, %v2509_v63  ;;  %v2864_v35 = vmul.f32 %v5879_v45, %v5858_v14  ;;  %v3381_v62 = vpop.eup %3380  ;;  %v2505_v2 = vsel %vm2502_vm15, %v2504_v58, %v2500_v42  ;;  %vm2868_vm3 = vweird.f32 %v5858_v14 }
 0x390   :  { %v3383_v56 = vpop.eup %3382  ;;  %v2872_v16 = vand.u32 2147483647, %v5858_v14  ;;  %v2874_v49 = vand.u32 2147483648, %v5858_v14  ;;  %v2887_v57 = vand.u32 2147483647, %v5862_v44  ;;  %v2889_v48 = vand.u32 2147483648, %v5862_v44 }
 0x391   :  { %v2511_v1 = vadd.f32 %v3373_v7, %v2510_v60  ;;  %v2865_v52 = vsub.f32 1.0, %v2864_v35  ;;  %v2879_v24 = vmul.f32 %v3383_v56, %v5862_v44  ;;  %3388 = vrcp.f32 %v5895_v34 }
 0x392   :  { %v5899_v5 = vpop.eup %3384  ;;  %v5909_v43 = vadd.f32 1.0, %v3381_v62  ;;  %vm2869_vm4 = vweird.f32 %v5879_v45  ;;  %vm5913_vm5 = vcmp.eq.f32.partialorder %v2872_v16, 8.507059e+37  ;;  %vm2884_vm6 = vweird.f32 %v3383_v56 }
 0x393   :  { %v2515_v27 = vsel %vm2514_vm2, %v3373_v7, %v2511_v1  ;;  %v2866_v23 = vmul.f32 %v5879_v45, %v2865_v52  ;;  %v2924_v46 = vmul.f32 %v5899_v5, %v5865_v10  ;;  %v2880_v33 = vsub.f32 1.0, %v2879_v24  ;;  %vm5930_vm10 = vmor %vm2868_vm3, %vm2869_vm4 }
 0x394   :  { %v2520_v41 = vsel %vm2517_vm1, %v2519_v47, %v2515_v27  ;;  %v3387_v32 = vpop.eup %3386  ;;  %v2875_v20 = vor.u32 1.1754944e-38, %v2874_v49  ;;  %vm2883_vm8 = vweird.f32 %v5862_v44  ;;  %vm5923_vm9 = vcmp.eq.f32.partialorder %v2887_v57, 8.507059e+37 }
 0x395   :  { %v2565_v53 = vrot.slane %v2520_v41, 4  ;;  %v2867_v54 = vadd.f32 %v5879_v45, %v2866_v23  ;;  %v2925_v37 = vsub.f32 1.0, %v2924_v46  ;;  %v2881_v18 = vmul.f32 %v3383_v56, %v2880_v33  ;;  %vm2885_vm11 = vmor %vm2883_vm8, %vm2884_vm6 }
 0x396   :  { %v2939_v13 = vmul.f32 %v3387_v32, %v5886_v19  ;;  %v2890_v6 = vor.u32 1.1754944e-38, %v2889_v48  ;;  %3390 = vrcp.f32 %v5909_v43  ;;  %vm2929_vm12 = vweird.f32 %v5899_v5 }
 0x397   :  { %v2570_v0 = vsel %vm1643_vm13, %v2505_v2, %v2565_v53  ;;  %v2926_v12 = vmul.f32 %v5899_v5, %v2925_v37  ;;  %v2882_v9 = vadd.f32 %v3383_v56, %v2881_v18  ;;  %v2871_v38 = vsel %vm5930_vm10, %v5879_v45, %v2867_v54  ;;  %v3389_v8 = vpop.eup %3388 }
 0x398   :  { %3196 = vst [vmem:[%s5986_s7 + $0x68] sm:$0xff] %v2570_v0  ;;  %v2940_v11 = vsub.f32 1.0, %v2939_v13  ;;  %v2947_v3 = vand.u32 2147483647, %v5886_v19  ;;  %v2949_v14 = vand.u32 2147483648, %v5886_v19  ;;  %vm2944_vm14 = vweird.f32 %v3387_v32 }
 0x399   :  { %v2886_v50 = vsel %vm2885_vm11, %v3383_v56, %v2882_v9  ;;  %v2927_v51 = vadd.f32 %v5899_v5, %v2926_v12  ;;  %vm2928_vm15 = vweird.f32 %v5865_v10  ;;  %v2934_v4 = vand.u32 2147483648, %v5865_v10 }
 0x39a   :  { %v2941_v15 = vmul.f32 %v3387_v32, %v2940_v11  ;;  %v2891_v59 = vsel %vm5923_vm9, %v2890_v6, %v2886_v50  ;;  %v2984_v44 = vmul.f32 %v3389_v8, %v5895_v34  ;;  %vm5947_vm0 = vmor %vm2928_vm15, %vm2929_vm12  ;;  %v2932_v36 = vand.u32 2147483647, %v5865_v10 }
 0x39b   :  { %v3023_v7 = vrot.slane %v2891_v59, 4  ;;  %vm2943_vm1 = vweird.f32 %v5886_v19  ;;  %v2876_v25 = vsel %vm5913_vm5, %v2875_v20, %v2871_v38  ;;  %v2950_v21 = vor.u32 1.1754944e-38, %v2949_v14 }
 0x39c   :  { %v2942_v55 = vadd.f32 %v3387_v32, %v2941_v15  ;;  %vm2945_vm2 = vmor %vm2943_vm1, %vm2944_vm14  ;;  %v2985_v29 = vsub.f32 1.0, %v2984_v44  ;;  %v3391_v31 = vpop.eup %3390  ;;  %v2931_v26 = vsel %vm5947_vm0, %v5899_v5, %v2927_v51  ;;  %vm2948_vm3 = vcmp.eq.f32.partialorder %v2947_v3, 8.507059e+37 }
 0x39d   :  { %v3028_v63 = vsel %vm1643_vm13, %v2876_v25, %v3023_v7  ;;  %v2935_v10 = vor.u32 1.1754944e-38, %v2934_v4  ;;  %v2999_v19 = vmul.f32 %v3391_v31, %v5909_v43  ;;  %vm2933_vm4 = vcmp.eq.f32.partialorder %v2932_v36, 8.507059e+37 }
 0x39e   :  { %v2946_v45 = vsel %vm2945_vm2, %v3387_v32, %v2942_v55  ;;  %3218 = vst [vmem:[%s5986_s7 + $0x78] sm:$0xff] %v3028_v63  ;;  %v2986_v17 = vmul.f32 %v3389_v8, %v2985_v29  ;;  %vm2989_vm5 = vweird.f32 %v3389_v8  ;;  %v3009_v62 = vand.u32 2147483648, %v5909_v43 }
 0x39f   :  { %v2951_v39 = vsel %vm2948_vm3, %v2950_v21, %v2946_v45  ;;  %v2936_v60 = vsel %vm2933_vm4, %v2935_v10, %v2931_v26  ;;  %v3000_v35 = vsub.f32 1.0, %v2999_v19  ;;  %vm3004_vm6 = vweird.f32 %v3391_v31 }
 0x3a0   :  { %v3025_v42 = vrot.slane %v2951_v39, 4  ;;  %v2987_v1 = vadd.f32 %v3389_v8, %v2986_v17  ;;  %v3007_v56 = vand.u32 2147483647, %v5909_v43  ;;  %vm2988_vm8 = vweird.f32 %v5895_v34 }
 0x3a1   :  { %v3001_v52 = vmul.f32 %v3391_v31, %v3000_v35  ;;  %v2994_v2 = vand.u32 2147483648, %v5895_v34  ;;  %vm2990_vm9 = vmor %vm2988_vm8, %vm2989_vm5  ;;  %v2992_v47 = vand.u32 2147483647, %v5895_v34  ;;  %vm3003_vm10 = vweird.f32 %v5909_v43 }
 0x3a2   :  { %v3030_v58 = vsel %vm1643_vm13, %v2936_v60, %v3025_v42  ;;  %vm3005_vm11 = vmor %vm3003_vm10, %vm3004_vm6  ;;  %v3010_v5 = vor.u32 1.1754944e-38, %v3009_v62  ;;  %v2991_v27 = vsel %vm2990_vm9, %v3389_v8, %v2987_v1  ;;  %vm3008_vm12 = vcmp.eq.f32.partialorder %v3007_v56, 8.507059e+37 }
 0x3a3   :  { %3220 = vst [vmem:[%s5986_s7 + $0x88] sm:$0xff] %v3030_v58  ;;  %v3002_v16 = vadd.f32 %v3391_v31, %v3001_v52  ;;  %v2995_v49 = vor.u32 1.1754944e-38, %v2994_v2  ;;  %vm2993_vm14 = vcmp.eq.f32.partialorder %v2992_v47, 8.507059e+37 }
 0x3a5   :  { %v3006_v23 = vsel %vm3005_vm11, %v3391_v31, %v3002_v16  ;;  %v2996_v57 = vsel %vm2993_vm14, %v2995_v49, %v2991_v27 }
 0x3a6   :  { %v3011_v24 = vsel %vm3008_vm12, %v3010_v5, %v3006_v23 }
 0x3a7   :  { %v3027_v41 = vrot.slane %v3011_v24, 4 }
 0x3a9   :  { %v3032_v48 = vsel %vm1643_vm13, %v2996_v57, %v3027_v41 }
 0x3aa   :  { %3222 = vst.msk [vmem:[%s5986_s7 + $0x98] sm:$0xff] %vm5420_vm7, %v3032_v48 }

</bundles_post_ra>
